<compile_context>
chip_gen: v5e
topology: v5e:2x2
jax: 0.10.0
libtpu: 0.0.40
codegen_flags: <defaults>
</compile_context>

<pallas_src>
import jax
import jax.numpy as jnp
from jax.experimental import pallas as pl
from jax.experimental.pallas import tpu as pltpu

# Keep reference and kernel matmul numerics aligned (true-f32 passes).
jax.config.update("jax_default_matmul_precision", "highest")

# ---------------- model hyper-parameters (small, consistent with the module) --
VOC_P = 32
DIM_P = 24
VOC_S = 4
DIM_S = 8
DIM_SRC = DIM_P + DIM_S          # 32  (embed dim E of the attention)
DIM_TARGET = 16
DIM_HIDDEN = 32
MAX_LENGTH = 8
NUM_HEADS = 4
HEAD_DIM = DIM_SRC // NUM_HEADS  # 8

B, W, L = 2, 4, MAX_LENGTH       # batch, words-per-sample, syllables-per-word
BW = B * W

BN_EPS = 1e-5
NEG_INF = -1e30                  # finite "-inf" so fully-masked rows stay NaN-free
LANE = 128                       # lane width used for the packed parameter slabs


# ------------------------------- Pallas kernel --------------------------------
def pron_attention_kernel(x_ref, pos_ref, mask2_ref, w_ref, b_ref, out_ref):
    bw, l, e = x_ref.shape
    h, dh = NUM_HEADS, HEAD_DIM
    hid, tgt = DIM_HIDDEN, DIM_TARGET

    # ---- static views into the two packed parameter slabs (no extra DMAs) ----
    # Weight slab: each matrix sits at a 128-lane-aligned block offset.
    wqkv = w_ref[:, 0:3 * e]                       # (E, 3E)   in-proj (transposed)
    wo = w_ref[:, LANE:LANE + e]                   # (E, E)    out-proj (transposed)
    w1 = w_ref[:, 2 * LANE:2 * LANE + hid]         # (E, H)    fc1 (transposed)
    w2 = w_ref[:, 3 * LANE:3 * LANE + tgt]         # (H, T)    fc2 (transposed)
    # Bias / affine slab: one row per parameter, lanes start at 0.
    bqkv = b_ref[0:1, 0:3 * e]                     # (1, 3E)
    bo = b_ref[1:2, 0:e]                           # (1, E)
    g1 = b_ref[2:3, 0:e]                           # (1, E)  BN1 gamma
    be1 = b_ref[3:4, 0:e]                          # (1, E)  BN1 beta
    b1 = b_ref[4:5, 0:hid]                         # (1, H)
    b2 = b_ref[5:6, 0:tgt]                         # (1, T)
    alpha = b_ref[6:7, 0:1]                        # (1, 1)  PReLU alpha

    mask2 = mask2_ref[...]                         # (bw, l) {0,1}
    mask3 = mask2[:, :, None]                      # broadcast in-kernel

    # positional embedding + zero out padded syllables
    x = (x_ref[...] + pos_ref[...][None, :, :]) * mask3        # (bw, l, e)
    x2 = x.reshape(bw * l, e)                                   # (64, 32)

    # ---- nn.MultiheadAttention(E, num_heads, batch_first=True) --------------
    # Fused QKV: ONE (bw*l, E) x (E, 3E) matmul, then static lane views per head.
    qkv = jnp.dot(x2, wqkv, preferred_element_type=jnp.float32) + bqkv   # (64, 96)
    qkv = qkv.reshape(bw, l, 3 * e)

    scale = 1.0 / (dh ** 0.5)
    key_mask = mask2[:, None, :] > 0.0                          # (bw, 1, l)

    # Per-head attention (statically unrolled, batch dim = bw only) with the
    # out-projection folded per head into one (bw*l, E) accumulator
    # (== the 'bhld,hde->ble' contraction, without materializing ctx4 / concat).
    y2 = jnp.zeros((bw * l, e), jnp.float32)
    for hi in range(h):
        q = qkv[:, :, hi * dh:(hi + 1) * dh] * scale            # (bw, l, dh)
        k = qkv[:, :, e + hi * dh:e + (hi + 1) * dh]
        v = qkv[:, :, 2 * e + hi * dh:2 * e + (hi + 1) * dh]
        s = jnp.einsum('bld,bmd->blm', q, k,
                       preferred_element_type=jnp.float32)      # (bw, l, l)
        s = jnp.where(key_mask, s, jnp.float32(NEG_INF))        # key_padding_mask
        s = s - jnp.max(s, axis=-1, keepdims=True)
        es = jnp.exp(s)
        p = es * pl.reciprocal(jnp.sum(es, axis=-1, keepdims=True), approx=True)
        ctx = jnp.einsum('blm,bmd->bld', p, v,
                         preferred_element_type=jnp.float32)    # (bw, l, dh)
        y2 = y2 + jnp.dot(ctx.reshape(bw * l, dh),
                          wo[hi * dh:(hi + 1) * dh, :],
                          preferred_element_type=jnp.float32)   # (bw*l, e)
    y = y2.reshape(bw, l, e) + bo[None, :, :]                   # (bw, l, e)

    # ---- residual + mask, masked mean pool over syllables --------------------
    x = x + y * mask3
    lengths = jnp.sum(mask2, axis=1, keepdims=True)             # (bw, 1)
    word_mask = (lengths > 0.0).astype(jnp.float32)             # (bw, 1)
    inv_len = 1.0 / jnp.maximum(lengths, 1.0)                   # exact (feeds BN stats)
    pooled = jnp.sum(x, axis=1) * inv_len                       # (bw, e)

    # ---- BatchNorm1d(dim_src)  (training-mode batch stats over valid words) --
    nvalid = jnp.maximum(jnp.sum(word_mask), 1.0)
    inv_n = 1.0 / nvalid
    mean1 = jnp.sum(pooled * word_mask, axis=0, keepdims=True) * inv_n
    var1 = jnp.sum(jnp.square(pooled - mean1) * word_mask, axis=0,
                   keepdims=True) * inv_n
    h1 = (pooled - mean1) * jax.lax.rsqrt(var1 + BN_EPS)
    h1 = h1 * g1 + be1

    # ---- fc1 -> PReLU -> fc2 --------------------------------------------------
    h1 = jnp.dot(h1, w1, preferred_element_type=jnp.float32) + b1       # (bw, H)
    h1 = jnp.where(h1 >= 0.0, h1, alpha * h1)                           # PReLU
    h2 = jnp.dot(h1, w2, preferred_element_type=jnp.float32) + b2       # (bw, T)

    # ---- BatchNorm1d(dim_target, affine=False) --------------------------------
    mean2 = jnp.sum(h2 * word_mask, axis=0, keepdims=True) * inv_n
    var2 = jnp.sum(jnp.square(h2 - mean2) * word_mask, axis=0,
                   keepdims=True) * inv_n
    h2 = (h2 - mean2) * jax.lax.rsqrt(var2 + BN_EPS)

    # ---- emulate res.index_copy_(0, indices, x) into zeros --------------------
    out_ref[...] = h2 * word_mask


# ------------------------------- JAX glue / wrapper ----------------------------
def init_params(key):
    ks = jax.random.split(key, 12)
    p = {}
    p['emb_p'] = 0.1 * jax.random.normal(ks[0], (VOC_P, DIM_P), jnp.float32)
    p['emb_s'] = 0.1 * jax.random.normal(ks[1], (VOC_S, DIM_S), jnp.float32)
    p['pos_emb'] = 0.1 * jax.random.normal(ks[2], (MAX_LENGTH, DIM_SRC), jnp.float32)
    # MultiheadAttention: in_proj (3E, E) / out_proj (E, E) -- stored transposed.
    p['wqkv_t'] = 0.1 * jax.random.normal(ks[3], (DIM_SRC, 3 * DIM_SRC), jnp.float32)
    p['bqkv'] = 0.01 * jax.random.normal(ks[4], (1, 3 * DIM_SRC), jnp.float32)
    p['wo_t'] = 0.1 * jax.random.normal(ks[5], (DIM_SRC, DIM_SRC), jnp.float32)
    p['bo'] = 0.01 * jax.random.normal(ks[6], (1, DIM_SRC), jnp.float32)
    # BatchNorm1d(dim_src): affine params at PyTorch init values.
    p['bn1_gamma'] = jnp.ones((1, DIM_SRC), jnp.float32)
    p['bn1_beta'] = jnp.zeros((1, DIM_SRC), jnp.float32)
    # fc1 / fc2 (stored transposed) + PReLU alpha (default 0.25).
    p['w1_t'] = 0.1 * jax.random.normal(ks[7], (DIM_SRC, DIM_HIDDEN), jnp.float32)
    p['b1'] = 0.01 * jax.random.normal(ks[8], (1, DIM_HIDDEN), jnp.float32)
    p['alpha'] = jnp.full((1, 1), 0.25, jnp.float32)
    p['w2_t'] = 0.1 * jax.random.normal(ks[9], (DIM_HIDDEN, DIM_TARGET), jnp.float32)
    p['b2'] = 0.01 * jax.random.normal(ks[10], (1, DIM_TARGET), jnp.float32)
    return p


def _pad_lanes(a, lanes=LANE):
    a2 = a.reshape(a.shape[0], -1)
    return jnp.pad(a2, ((0, 0), (0, lanes - a2.shape[1])))


@jax.jit
def pronunciation_attention_forward(pronunciation, stress, attention_mask, params):
    b, w, l = attention_mask.shape
    bw = b * w
    e = DIM_SRC

    pron_f = pronunciation.reshape(bw, l)
    stress_f = stress.reshape(bw, l)
    mask2 = attention_mask.reshape(bw, l).astype(jnp.float32)

    # Embedding lookups (data-dependent gather) stay in plain JAX glue.
    p_emb = params['emb_p'][pron_f]                      # (BW, L, dim_p)
    s_emb = params['emb_s'][stress_f]                    # (BW, L, dim_s)
    x = jnp.concatenate([p_emb, s_emb], axis=-1)         # (BW, L, E)
    pos = params['pos_emb'][:l]                          # (L, E)

    # ---- pack parameters into two 128-lane-padded slabs (2 DMAs, not 11) ----
    # All four weight matrices share 32 rows (E == DIM_HIDDEN == 32).
    assert DIM_HIDDEN == DIM_SRC
    w_slab = jnp.concatenate([_pad_lanes(params['wqkv_t']),   # lanes   0: 96
                              _pad_lanes(params['wo_t']),     # lanes 128:160
                              _pad_lanes(params['w1_t']),     # lanes 256:288
                              _pad_lanes(params['w2_t'])],    # lanes 384:400
                             axis=1)                          # (32, 512)
    b_slab = jnp.concatenate([_pad_lanes(params['bqkv']),
                              _pad_lanes(params['bo']),
                              _pad_lanes(params['bn1_gamma']),
                              _pad_lanes(params['bn1_beta']),
                              _pad_lanes(params['b1']),
                              _pad_lanes(params['b2']),
                              _pad_lanes(params['alpha']),
                              jnp.zeros((1, LANE), jnp.float32)],
                             axis=0)                          # (8, 128)

    args = (x, pos, mask2, w_slab, b_slab)

    n = bw * l
    flops = (2 * n * e * 3 * e                                     # fused QKV
             + NUM_HEADS * (2 * bw * l * l * HEAD_DIM * 2          # scores + ctx
                            + 2 * n * HEAD_DIM * e)                # out projection
             + 2 * bw * e * DIM_HIDDEN                             # fc1
             + 2 * bw * DIM_HIDDEN * DIM_TARGET                    # fc2
             + 20 * bw * l * e)                                    # elementwise slack
    transcendentals = NUM_HEADS * bw * l * l + 2 * (e + DIM_TARGET) + 64
    bytes_accessed = (sum(a.size * a.dtype.itemsize for a in args)
                      + bw * DIM_TARGET * 4)
    cost = pl.CostEstimate(flops=int(flops), transcendentals=int(transcendentals),
                           bytes_accessed=int(bytes_accessed))

    vmem = pl.BlockSpec(memory_space=pltpu.MemorySpace.VMEM)

    # Gridless, fully VMEM-resident call: the two BatchNorms couple all words.
    # When BW is production-sized: add a parallel BW grid axis + two-pass BN,
    # pad DIM_TARGET to 128 lanes for a lane-dense store, and size tiles
    # against v7x's 64 MiB VMEM via pltpu.CompilerParams(vmem_limit_bytes=...).
    out2d = pl.pallas_call(
        pron_attention_kernel,
        out_shape=jax.ShapeDtypeStruct((bw, DIM_TARGET), jnp.float32),
        in_specs=[vmem] * 5,
        out_specs=vmem,
        cost_estimate=cost,
    )(*args)

    return out2d.reshape(b, w, DIM_TARGET)


# ---------------------------- pure-JAX reference (for checking) ----------------
def reference_forward(pronunciation, stress, attention_mask, params):
    b, w, l = attention_mask.shape
    bw = b * w
    mask2 = attention_mask.reshape(bw, l).astype(jnp.float32)
    p_emb = params['emb_p'][pronunciation.reshape(bw, l)]
    s_emb = params['emb_s'][stress.reshape(bw, l)]
    x = jnp.concatenate([p_emb, s_emb], axis=-1)
    x = (x + params['pos_emb'][:l][None]) * mask2[:, :, None]

    e = DIM_SRC
    dh = e // NUM_HEADS
    qkv = x.reshape(bw * l, e) @ params['wqkv_t'] + params['bqkv']
    q = qkv[:, :e].reshape(bw, l, e)
    k = qkv[:, e:2 * e].reshape(bw, l, e)
    v = qkv[:, 2 * e:].reshape(bw, l, e)
    heads = []
    for hi in range(NUM_HEADS):
        qh = q[..., hi * dh:(hi + 1) * dh] / (dh ** 0.5)
        kh = k[..., hi * dh:(hi + 1) * dh]
        vh = v[..., hi * dh:(hi + 1) * dh]
        s = jnp.einsum('bld,bmd->blm', qh, kh)
        s = jnp.where(mask2[:, None, :] > 0, s, NEG_INF)
        p = jax.nn.softmax(s, axis=-1)
        heads.append(jnp.einsum('blm,bmd->bld', p, vh))
    attn = jnp.concatenate(heads, axis=-1)
    y = (attn.reshape(bw * l, e) @ params['wo_t'] + params['bo']).reshape(bw, l, e)

    x = x + y * mask2[:, :, None]
    lengths = jnp.sum(mask2, axis=1, keepdims=True)
    word_mask = (lengths > 0).astype(jnp.float32)
    pooled = jnp.sum(x, axis=1) / jnp.maximum(lengths, 1.0)

    n = jnp.maximum(jnp.sum(word_mask), 1.0)
    m1 = jnp.sum(pooled * word_mask, 0, keepdims=True) / n
    v1 = jnp.sum(jnp.square(pooled - m1) * word_mask, 0, keepdims=True) / n
    h1 = (pooled - m1) / jnp.sqrt(v1 + BN_EPS) * params['bn1_gamma'] + params['bn1_beta']
    h1 = h1 @ params['w1_t'] + params['b1']
    h1 = jnp.where(h1 >= 0, h1, params['alpha'] * h1)
    h2 = h1 @ params['w2_t'] + params['b2']
    m2 = jnp.sum(h2 * word_mask, 0, keepdims=True) / n
    v2 = jnp.sum(jnp.square(h2 - m2) * word_mask, 0, keepdims=True) / n
    h2 = (h2 - m2) / jnp.sqrt(v2 + BN_EPS)
    return (h2 * word_mask).reshape(b, w, DIM_TARGET)


# ------------------------------------- main ------------------------------------
if __name__ == "__main__":
    key = jax.random.PRNGKey(0)
    k_par, k_p, k_s = jax.random.split(key, 3)
    params = init_params(k_par)

    pronunciation = jax.random.randint(k_p, (B, W, L), 0, VOC_P, dtype=jnp.int32)
    stress = jax.random.randint(k_s, (B, W, L), 0, VOC_S, dtype=jnp.int32)
    # per-word syllable counts (includes an empty word to exercise word_mask path)
    word_lengths = jnp.array([[3, 8, 5, 0], [2, 6, 1, 4]], dtype=jnp.int32)
    attention_mask = jnp.arange(L)[None, None, :] < word_lengths[:, :, None]  # (B,W,L) bool

    out = pronunciation_attention_forward(pronunciation, stress, attention_mask, params)
    out = jax.block_until_ready(out)

    ref = reference_forward(pronunciation, stress, attention_mask, params)
    assert out.shape == (B, W, DIM_TARGET)
    assert bool(jnp.all(jnp.isfinite(out)))
    assert bool(jnp.allclose(out, ref, atol=2e-3, rtol=2e-3))

    print("KERNEL_OK")
</pallas_src>

<mosaic_0001>
module attributes {stable_mosaic.version = 11 : i64} {
  func.func @pron_attention_kernel(%arg0: memref<8x8x32xf32, #tpu.memory_space<vmem>>, %arg1: memref<8x32xf32, #tpu.memory_space<vmem>>, %arg2: memref<8x8xf32, #tpu.memory_space<vmem>>, %arg3: memref<32x512xf32, #tpu.memory_space<vmem>>, %arg4: memref<8x128xf32, #tpu.memory_space<vmem>>, %arg5: memref<8x16xf32, #tpu.memory_space<vmem>>) attributes {dimension_semantics = [], scalar_prefetch = 0 : i64, scratch_operands = 0 : i64, tpu.core_type = #tpu.core_type<tc>} {
    %c0 = arith.constant 0 : index
    %c0_0 = arith.constant 0 : index
    %0 = vector.load %arg3[%c0, %c0_0] : memref<32x512xf32, #tpu.memory_space<vmem>>, vector<32x96xf32>
    %c0_1 = arith.constant 0 : index
    %c128 = arith.constant 128 : index
    %1 = vector.load %arg3[%c0_1, %c128] : memref<32x512xf32, #tpu.memory_space<vmem>>, vector<32x32xf32>
    %c0_2 = arith.constant 0 : index
    %c256 = arith.constant 256 : index
    %2 = vector.load %arg3[%c0_2, %c256] : memref<32x512xf32, #tpu.memory_space<vmem>>, vector<32x32xf32>
    %c0_3 = arith.constant 0 : index
    %c384 = arith.constant 384 : index
    %3 = vector.load %arg3[%c0_3, %c384] : memref<32x512xf32, #tpu.memory_space<vmem>>, vector<32x16xf32>
    %c0_4 = arith.constant 0 : index
    %c0_5 = arith.constant 0 : index
    %4 = vector.load %arg4[%c0_4, %c0_5] : memref<8x128xf32, #tpu.memory_space<vmem>>, vector<1x96xf32>
    %c1 = arith.constant 1 : index
    %c0_6 = arith.constant 0 : index
    %5 = vector.load %arg4[%c1, %c0_6] : memref<8x128xf32, #tpu.memory_space<vmem>>, vector<1x32xf32>
    %c2 = arith.constant 2 : index
    %c0_7 = arith.constant 0 : index
    %6 = vector.load %arg4[%c2, %c0_7] : memref<8x128xf32, #tpu.memory_space<vmem>>, vector<1x32xf32>
    %c3 = arith.constant 3 : index
    %c0_8 = arith.constant 0 : index
    %7 = vector.load %arg4[%c3, %c0_8] : memref<8x128xf32, #tpu.memory_space<vmem>>, vector<1x32xf32>
    %c4 = arith.constant 4 : index
    %c0_9 = arith.constant 0 : index
    %8 = vector.load %arg4[%c4, %c0_9] : memref<8x128xf32, #tpu.memory_space<vmem>>, vector<1x32xf32>
    %c5 = arith.constant 5 : index
    %c0_10 = arith.constant 0 : index
    %9 = vector.load %arg4[%c5, %c0_10] : memref<8x128xf32, #tpu.memory_space<vmem>>, vector<1x16xf32>
    %c6 = arith.constant 6 : index
    %c0_11 = arith.constant 0 : index
    %10 = vector.load %arg4[%c6, %c0_11] : memref<8x128xf32, #tpu.memory_space<vmem>>, vector<1x1xf32>
    %c0_12 = arith.constant 0 : index
    %c0_13 = arith.constant 0 : index
    %11 = vector.load %arg2[%c0_12, %c0_13] : memref<8x8xf32, #tpu.memory_space<vmem>>, vector<8x8xf32>
    %12 = vector.shape_cast %11 : vector<8x8xf32> to vector<8x8x1xf32>
    %c0_14 = arith.constant 0 : index
    %c0_15 = arith.constant 0 : index
    %c0_16 = arith.constant 0 : index
    %13 = vector.load %arg0[%c0_14, %c0_15, %c0_16] : memref<8x8x32xf32, #tpu.memory_space<vmem>>, vector<8x8x32xf32>
    %c0_17 = arith.constant 0 : index
    %c0_18 = arith.constant 0 : index
    %14 = vector.load %arg1[%c0_17, %c0_18] : memref<8x32xf32, #tpu.memory_space<vmem>>, vector<8x32xf32>
    %15 = vector.shape_cast %14 : vector<8x32xf32> to vector<1x8x32xf32>
    %16 = vector.broadcast %15 : vector<1x8x32xf32> to vector<8x8x32xf32>
    %17 = arith.addf %13, %16 : vector<8x8x32xf32>
    %18 = vector.broadcast %12 : vector<8x8x1xf32> to vector<8x8x32xf32>
    %19 = arith.mulf %17, %18 : vector<8x8x32xf32>
    %20 = vector.shape_cast %19 : vector<8x8x32xf32> to vector<64x32xf32>
    %cst = arith.constant dense<0.000000e+00> : vector<64x96xf32>
    %21 = tpu.matmul %20, %0, %cst {dimension_numbers = #tpu.dot_dimension_numbers<[1], [0], [0], [1], [0, 0, 1, 1], [], []>, precision = #tpu.contract_precision<fp32>} : vector<64x32xf32>, vector<32x96xf32>, vector<64x96xf32> -> vector<64x96xf32>
    %22 = vector.broadcast %4 : vector<1x96xf32> to vector<64x96xf32>
    %23 = arith.addf %21, %22 : vector<64x96xf32>
    %24 = vector.shape_cast %23 : vector<64x96xf32> to vector<8x8x96xf32>
    %25 = vector.shape_cast %11 : vector<8x8xf32> to vector<8x1x8xf32>
    %cst_19 = arith.constant 0.000000e+00 : f32
    %26 = vector.broadcast %cst_19 : f32 to vector<8x1x8xf32>
    %27 = arith.cmpf ogt, %25, %26 : vector<8x1x8xf32>
    %cst_20 = arith.constant 0.000000e+00 : f32
    %28 = vector.broadcast %cst_20 : f32 to vector<64x32xf32>
    %29 = vector.extract_strided_slice %24 {offsets = [0, 0, 0], sizes = [8, 8, 8], strides = [1, 1, 1]} : vector<8x8x96xf32> to vector<8x8x8xf32>
    %cst_21 = arith.constant 0.353553385 : f32
    %30 = vector.broadcast %cst_21 : f32 to vector<8x8x8xf32>
    %31 = arith.mulf %29, %30 : vector<8x8x8xf32>
    %32 = vector.extract_strided_slice %24 {offsets = [0, 0, 32], sizes = [8, 8, 8], strides = [1, 1, 1]} : vector<8x8x96xf32> to vector<8x8x8xf32>
    %33 = vector.extract_strided_slice %24 {offsets = [0, 0, 64], sizes = [8, 8, 8], strides = [1, 1, 1]} : vector<8x8x96xf32> to vector<8x8x8xf32>
    "tpu.trace_start"() <{level = 10 : i32, message = "bld,bmd->blm"}> : () -> ()
    %cst_22 = arith.constant dense<0.000000e+00> : vector<8x8x8xf32>
    %34 = tpu.matmul %31, %32, %cst_22 {dimension_numbers = #tpu.dot_dimension_numbers<[2], [2], [1], [1], [0, 0, 0, 1, 1, 1], [0], [0]>, precision = #tpu.contract_precision<fp32>} : vector<8x8x8xf32>, vector<8x8x8xf32>, vector<8x8x8xf32> -> vector<8x8x8xf32>
    %cst_23 = arith.constant -1.000000e+30 : f32
    "tpu.trace_stop"() : () -> ()
    %35 = vector.shape_cast %27 : vector<8x1x8xi1> to vector<8x1x8xi1>
    %36 = vector.broadcast %35 : vector<8x1x8xi1> to vector<8x8x8xi1>
    %37 = vector.broadcast %cst_23 : f32 to vector<8x8x8xf32>
    %38 = arith.select %36, %34, %37 : vector<8x8x8xi1>, vector<8x8x8xf32>
    %cst_24 = arith.constant dense<0xFF800000> : vector<8x8xf32>
    %39 = vector.multi_reduction <maximumf>, %38, %cst_24 [2] : vector<8x8x8xf32> to vector<8x8xf32>
    %40 = vector.shape_cast %39 : vector<8x8xf32> to vector<8x8x1xf32>
    %41 = vector.broadcast %40 : vector<8x8x1xf32> to vector<8x8x8xf32>
    %42 = arith.subf %38, %41 : vector<8x8x8xf32>
    %43 = math.exp %42 : vector<8x8x8xf32>
    %cst_25 = arith.constant dense<0.000000e+00> : vector<8x8xf32>
    %44 = vector.multi_reduction <add>, %43, %cst_25 [2] : vector<8x8x8xf32> to vector<8x8xf32>
    %45 = vector.shape_cast %44 : vector<8x8xf32> to vector<8x8x1xf32>
    %46 = tpu.reciprocal %45 {approx = true} : vector<8x8x1xf32> -> vector<8x8x1xf32>
    %47 = vector.broadcast %46 : vector<8x8x1xf32> to vector<8x8x8xf32>
    %48 = arith.mulf %43, %47 : vector<8x8x8xf32>
    "tpu.trace_start"() <{level = 10 : i32, message = "blm,bmd->bld"}> : () -> ()
    %cst_26 = arith.constant dense<0.000000e+00> : vector<8x8x8xf32>
    %49 = tpu.matmul %48, %33, %cst_26 {dimension_numbers = #tpu.dot_dimension_numbers<[2], [1], [1], [2], [0, 0, 0, 1, 1, 2], [0], [0]>, precision = #tpu.contract_precision<fp32>} : vector<8x8x8xf32>, vector<8x8x8xf32>, vector<8x8x8xf32> -> vector<8x8x8xf32>
    "tpu.trace_stop"() : () -> ()
    %50 = vector.shape_cast %49 : vector<8x8x8xf32> to vector<64x8xf32>
    %51 = vector.extract_strided_slice %1 {offsets = [0, 0], sizes = [8, 32], strides = [1, 1]} : vector<32x32xf32> to vector<8x32xf32>
    %cst_27 = arith.constant dense<0.000000e+00> : vector<64x32xf32>
    %52 = tpu.matmul %50, %51, %cst_27 {dimension_numbers = #tpu.dot_dimension_numbers<[1], [0], [0], [1], [0, 0, 1, 1], [], []>, precision = #tpu.contract_precision<fp32>} : vector<64x8xf32>, vector<8x32xf32>, vector<64x32xf32> -> vector<64x32xf32>
    %53 = arith.addf %28, %52 : vector<64x32xf32>
    %54 = vector.extract_strided_slice %24 {offsets = [0, 0, 8], sizes = [8, 8, 8], strides = [1, 1, 1]} : vector<8x8x96xf32> to vector<8x8x8xf32>
    %cst_28 = arith.constant 0.353553385 : f32
    %55 = vector.broadcast %cst_28 : f32 to vector<8x8x8xf32>
    %56 = arith.mulf %54, %55 : vector<8x8x8xf32>
    %57 = vector.extract_strided_slice %24 {offsets = [0, 0, 40], sizes = [8, 8, 8], strides = [1, 1, 1]} : vector<8x8x96xf32> to vector<8x8x8xf32>
    %58 = vector.extract_strided_slice %24 {offsets = [0, 0, 72], sizes = [8, 8, 8], strides = [1, 1, 1]} : vector<8x8x96xf32> to vector<8x8x8xf32>
    "tpu.trace_start"() <{level = 10 : i32, message = "bld,bmd->blm"}> : () -> ()
    %cst_29 = arith.constant dense<0.000000e+00> : vector<8x8x8xf32>
    %59 = tpu.matmul %56, %57, %cst_29 {dimension_numbers = #tpu.dot_dimension_numbers<[2], [2], [1], [1], [0, 0, 0, 1, 1, 1], [0], [0]>, precision = #tpu.contract_precision<fp32>} : vector<8x8x8xf32>, vector<8x8x8xf32>, vector<8x8x8xf32> -> vector<8x8x8xf32>
    %cst_30 = arith.constant -1.000000e+30 : f32
    "tpu.trace_stop"() : () -> ()
    %60 = vector.shape_cast %27 : vector<8x1x8xi1> to vector<8x1x8xi1>
    %61 = vector.broadcast %60 : vector<8x1x8xi1> to vector<8x8x8xi1>
    %62 = vector.broadcast %cst_30 : f32 to vector<8x8x8xf32>
    %63 = arith.select %61, %59, %62 : vector<8x8x8xi1>, vector<8x8x8xf32>
    %cst_31 = arith.constant dense<0xFF800000> : vector<8x8xf32>
    %64 = vector.multi_reduction <maximumf>, %63, %cst_31 [2] : vector<8x8x8xf32> to vector<8x8xf32>
    %65 = vector.shape_cast %64 : vector<8x8xf32> to vector<8x8x1xf32>
    %66 = vector.broadcast %65 : vector<8x8x1xf32> to vector<8x8x8xf32>
    %67 = arith.subf %63, %66 : vector<8x8x8xf32>
    %68 = math.exp %67 : vector<8x8x8xf32>
    %cst_32 = arith.constant dense<0.000000e+00> : vector<8x8xf32>
    %69 = vector.multi_reduction <add>, %68, %cst_32 [2] : vector<8x8x8xf32> to vector<8x8xf32>
    %70 = vector.shape_cast %69 : vector<8x8xf32> to vector<8x8x1xf32>
    %71 = tpu.reciprocal %70 {approx = true} : vector<8x8x1xf32> -> vector<8x8x1xf32>
    %72 = vector.broadcast %71 : vector<8x8x1xf32> to vector<8x8x8xf32>
    %73 = arith.mulf %68, %72 : vector<8x8x8xf32>
    "tpu.trace_start"() <{level = 10 : i32, message = "blm,bmd->bld"}> : () -> ()
    %cst_33 = arith.constant dense<0.000000e+00> : vector<8x8x8xf32>
    %74 = tpu.matmul %73, %58, %cst_33 {dimension_numbers = #tpu.dot_dimension_numbers<[2], [1], [1], [2], [0, 0, 0, 1, 1, 2], [0], [0]>, precision = #tpu.contract_precision<fp32>} : vector<8x8x8xf32>, vector<8x8x8xf32>, vector<8x8x8xf32> -> vector<8x8x8xf32>
    "tpu.trace_stop"() : () -> ()
    %75 = vector.shape_cast %74 : vector<8x8x8xf32> to vector<64x8xf32>
    %76 = vector.extract_strided_slice %1 {offsets = [8, 0], sizes = [8, 32], strides = [1, 1]} : vector<32x32xf32> to vector<8x32xf32>
    %cst_34 = arith.constant dense<0.000000e+00> : vector<64x32xf32>
    %77 = tpu.matmul %75, %76, %cst_34 {dimension_numbers = #tpu.dot_dimension_numbers<[1], [0], [0], [1], [0, 0, 1, 1], [], []>, precision = #tpu.contract_precision<fp32>} : vector<64x8xf32>, vector<8x32xf32>, vector<64x32xf32> -> vector<64x32xf32>
    %78 = arith.addf %53, %77 : vector<64x32xf32>
    %79 = vector.extract_strided_slice %24 {offsets = [0, 0, 16], sizes = [8, 8, 8], strides = [1, 1, 1]} : vector<8x8x96xf32> to vector<8x8x8xf32>
    %cst_35 = arith.constant 0.353553385 : f32
    %80 = vector.broadcast %cst_35 : f32 to vector<8x8x8xf32>
    %81 = arith.mulf %79, %80 : vector<8x8x8xf32>
    %82 = vector.extract_strided_slice %24 {offsets = [0, 0, 48], sizes = [8, 8, 8], strides = [1, 1, 1]} : vector<8x8x96xf32> to vector<8x8x8xf32>
    %83 = vector.extract_strided_slice %24 {offsets = [0, 0, 80], sizes = [8, 8, 8], strides = [1, 1, 1]} : vector<8x8x96xf32> to vector<8x8x8xf32>
    "tpu.trace_start"() <{level = 10 : i32, message = "bld,bmd->blm"}> : () -> ()
    %cst_36 = arith.constant dense<0.000000e+00> : vector<8x8x8xf32>
    %84 = tpu.matmul %81, %82, %cst_36 {dimension_numbers = #tpu.dot_dimension_numbers<[2], [2], [1], [1], [0, 0, 0, 1, 1, 1], [0], [0]>, precision = #tpu.contract_precision<fp32>} : vector<8x8x8xf32>, vector<8x8x8xf32>, vector<8x8x8xf32> -> vector<8x8x8xf32>
    %cst_37 = arith.constant -1.000000e+30 : f32
    "tpu.trace_stop"() : () -> ()
    %85 = vector.shape_cast %27 : vector<8x1x8xi1> to vector<8x1x8xi1>
    %86 = vector.broadcast %85 : vector<8x1x8xi1> to vector<8x8x8xi1>
    %87 = vector.broadcast %cst_37 : f32 to vector<8x8x8xf32>
    %88 = arith.select %86, %84, %87 : vector<8x8x8xi1>, vector<8x8x8xf32>
    %cst_38 = arith.constant dense<0xFF800000> : vector<8x8xf32>
    %89 = vector.multi_reduction <maximumf>, %88, %cst_38 [2] : vector<8x8x8xf32> to vector<8x8xf32>
    %90 = vector.shape_cast %89 : vector<8x8xf32> to vector<8x8x1xf32>
    %91 = vector.broadcast %90 : vector<8x8x1xf32> to vector<8x8x8xf32>
    %92 = arith.subf %88, %91 : vector<8x8x8xf32>
    %93 = math.exp %92 : vector<8x8x8xf32>
    %cst_39 = arith.constant dense<0.000000e+00> : vector<8x8xf32>
    %94 = vector.multi_reduction <add>, %93, %cst_39 [2] : vector<8x8x8xf32> to vector<8x8xf32>
    %95 = vector.shape_cast %94 : vector<8x8xf32> to vector<8x8x1xf32>
    %96 = tpu.reciprocal %95 {approx = true} : vector<8x8x1xf32> -> vector<8x8x1xf32>
    %97 = vector.broadcast %96 : vector<8x8x1xf32> to vector<8x8x8xf32>
    %98 = arith.mulf %93, %97 : vector<8x8x8xf32>
    "tpu.trace_start"() <{level = 10 : i32, message = "blm,bmd->bld"}> : () -> ()
    %cst_40 = arith.constant dense<0.000000e+00> : vector<8x8x8xf32>
    %99 = tpu.matmul %98, %83, %cst_40 {dimension_numbers = #tpu.dot_dimension_numbers<[2], [1], [1], [2], [0, 0, 0, 1, 1, 2], [0], [0]>, precision = #tpu.contract_precision<fp32>} : vector<8x8x8xf32>, vector<8x8x8xf32>, vector<8x8x8xf32> -> vector<8x8x8xf32>
    "tpu.trace_stop"() : () -> ()
    %100 = vector.shape_cast %99 : vector<8x8x8xf32> to vector<64x8xf32>
    %101 = vector.extract_strided_slice %1 {offsets = [16, 0], sizes = [8, 32], strides = [1, 1]} : vector<32x32xf32> to vector<8x32xf32>
    %cst_41 = arith.constant dense<0.000000e+00> : vector<64x32xf32>
    %102 = tpu.matmul %100, %101, %cst_41 {dimension_numbers = #tpu.dot_dimension_numbers<[1], [0], [0], [1], [0, 0, 1, 1], [], []>, precision = #tpu.contract_precision<fp32>} : vector<64x8xf32>, vector<8x32xf32>, vector<64x32xf32> -> vector<64x32xf32>
    %103 = arith.addf %78, %102 : vector<64x32xf32>
    %104 = vector.extract_strided_slice %24 {offsets = [0, 0, 24], sizes = [8, 8, 8], strides = [1, 1, 1]} : vector<8x8x96xf32> to vector<8x8x8xf32>
    %cst_42 = arith.constant 0.353553385 : f32
    %105 = vector.broadcast %cst_42 : f32 to vector<8x8x8xf32>
    %106 = arith.mulf %104, %105 : vector<8x8x8xf32>
    %107 = vector.extract_strided_slice %24 {offsets = [0, 0, 56], sizes = [8, 8, 8], strides = [1, 1, 1]} : vector<8x8x96xf32> to vector<8x8x8xf32>
    %108 = vector.extract_strided_slice %24 {offsets = [0, 0, 88], sizes = [8, 8, 8], strides = [1, 1, 1]} : vector<8x8x96xf32> to vector<8x8x8xf32>
    "tpu.trace_start"() <{level = 10 : i32, message = "bld,bmd->blm"}> : () -> ()
    %cst_43 = arith.constant dense<0.000000e+00> : vector<8x8x8xf32>
    %109 = tpu.matmul %106, %107, %cst_43 {dimension_numbers = #tpu.dot_dimension_numbers<[2], [2], [1], [1], [0, 0, 0, 1, 1, 1], [0], [0]>, precision = #tpu.contract_precision<fp32>} : vector<8x8x8xf32>, vector<8x8x8xf32>, vector<8x8x8xf32> -> vector<8x8x8xf32>
    %cst_44 = arith.constant -1.000000e+30 : f32
    "tpu.trace_stop"() : () -> ()
    %110 = vector.shape_cast %27 : vector<8x1x8xi1> to vector<8x1x8xi1>
    %111 = vector.broadcast %110 : vector<8x1x8xi1> to vector<8x8x8xi1>
    %112 = vector.broadcast %cst_44 : f32 to vector<8x8x8xf32>
    %113 = arith.select %111, %109, %112 : vector<8x8x8xi1>, vector<8x8x8xf32>
    %cst_45 = arith.constant dense<0xFF800000> : vector<8x8xf32>
    %114 = vector.multi_reduction <maximumf>, %113, %cst_45 [2] : vector<8x8x8xf32> to vector<8x8xf32>
    %115 = vector.shape_cast %114 : vector<8x8xf32> to vector<8x8x1xf32>
    %116 = vector.broadcast %115 : vector<8x8x1xf32> to vector<8x8x8xf32>
    %117 = arith.subf %113, %116 : vector<8x8x8xf32>
    %118 = math.exp %117 : vector<8x8x8xf32>
    %cst_46 = arith.constant dense<0.000000e+00> : vector<8x8xf32>
    %119 = vector.multi_reduction <add>, %118, %cst_46 [2] : vector<8x8x8xf32> to vector<8x8xf32>
    %120 = vector.shape_cast %119 : vector<8x8xf32> to vector<8x8x1xf32>
    %121 = tpu.reciprocal %120 {approx = true} : vector<8x8x1xf32> -> vector<8x8x1xf32>
    %122 = vector.broadcast %121 : vector<8x8x1xf32> to vector<8x8x8xf32>
    %123 = arith.mulf %118, %122 : vector<8x8x8xf32>
    "tpu.trace_start"() <{level = 10 : i32, message = "blm,bmd->bld"}> : () -> ()
    %cst_47 = arith.constant dense<0.000000e+00> : vector<8x8x8xf32>
    %124 = tpu.matmul %123, %108, %cst_47 {dimension_numbers = #tpu.dot_dimension_numbers<[2], [1], [1], [2], [0, 0, 0, 1, 1, 2], [0], [0]>, precision = #tpu.contract_precision<fp32>} : vector<8x8x8xf32>, vector<8x8x8xf32>, vector<8x8x8xf32> -> vector<8x8x8xf32>
    "tpu.trace_stop"() : () -> ()
    %125 = vector.shape_cast %124 : vector<8x8x8xf32> to vector<64x8xf32>
    %126 = vector.extract_strided_slice %1 {offsets = [24, 0], sizes = [8, 32], strides = [1, 1]} : vector<32x32xf32> to vector<8x32xf32>
    %cst_48 = arith.constant dense<0.000000e+00> : vector<64x32xf32>
    %127 = tpu.matmul %125, %126, %cst_48 {dimension_numbers = #tpu.dot_dimension_numbers<[1], [0], [0], [1], [0, 0, 1, 1], [], []>, precision = #tpu.contract_precision<fp32>} : vector<64x8xf32>, vector<8x32xf32>, vector<64x32xf32> -> vector<64x32xf32>
    %128 = arith.addf %103, %127 : vector<64x32xf32>
    %129 = vector.shape_cast %128 : vector<64x32xf32> to vector<8x8x32xf32>
    %130 = vector.shape_cast %5 : vector<1x32xf32> to vector<1x1x32xf32>
    %131 = vector.broadcast %130 : vector<1x1x32xf32> to vector<8x8x32xf32>
    %132 = arith.addf %129, %131 : vector<8x8x32xf32>
    %133 = vector.broadcast %12 : vector<8x8x1xf32> to vector<8x8x32xf32>
    %134 = arith.mulf %132, %133 : vector<8x8x32xf32>
    %135 = arith.addf %19, %134 : vector<8x8x32xf32>
    %cst_49 = arith.constant dense<0.000000e+00> : vector<8xf32>
    %136 = vector.multi_reduction <add>, %11, %cst_49 [1] : vector<8x8xf32> to vector<8xf32>
    %137 = vector.shape_cast %136 : vector<8xf32> to vector<8x1xf32>
    %cst_50 = arith.constant 0.000000e+00 : f32
    %138 = vector.broadcast %cst_50 : f32 to vector<8x1xf32>
    %139 = arith.cmpf ogt, %137, %138 : vector<8x1xf32>
    %140 = arith.extui %139 : vector<8x1xi1> to vector<8x1xi32>
    %141 = arith.sitofp %140 : vector<8x1xi32> to vector<8x1xf32>
    %cst_51 = arith.constant 1.000000e+00 : f32
    %142 = vector.broadcast %cst_51 : f32 to vector<8x1xf32>
    %143 = arith.maximumf %137, %142 : vector<8x1xf32>
    %cst_52 = arith.constant 1.000000e+00 : f32
    %144 = vector.broadcast %cst_52 : f32 to vector<8x1xf32>
    %145 = arith.divf %144, %143 : vector<8x1xf32>
    %cst_53 = arith.constant dense<0.000000e+00> : vector<8x32xf32>
    %146 = vector.multi_reduction <add>, %135, %cst_53 [1] : vector<8x8x32xf32> to vector<8x32xf32>
    %147 = vector.broadcast %145 : vector<8x1xf32> to vector<8x32xf32>
    %148 = arith.mulf %146, %147 : vector<8x32xf32>
    %149 = vector.shape_cast %141 : vector<8x1xf32> to vector<1x8x1xf32>
    %cst_54 = arith.constant dense<0.000000e+00> : vector<1xf32>
    %150 = vector.multi_reduction <add>, %149, %cst_54 [1, 2] : vector<1x8x1xf32> to vector<1xf32>
    %151 = vector.shape_cast %150 : vector<1xf32> to vector<1x1x1xf32>
    %152 = vector.extract %151[0, 0, 0] : f32 from vector<1x1x1xf32>
    %cst_55 = arith.constant 1.000000e+00 : f32
    %153 = arith.maximumf %152, %cst_55 : f32
    %cst_56 = arith.constant 1.000000e+00 : f32
    %154 = arith.divf %cst_56, %153 : f32
    %155 = vector.broadcast %141 : vector<8x1xf32> to vector<8x32xf32>
    %156 = arith.mulf %148, %155 : vector<8x32xf32>
    %cst_57 = arith.constant dense<0.000000e+00> : vector<32xf32>
    %157 = vector.multi_reduction <add>, %156, %cst_57 [0] : vector<8x32xf32> to vector<32xf32>
    %158 = vector.shape_cast %157 : vector<32xf32> to vector<1x32xf32>
    %159 = vector.broadcast %154 : f32 to vector<1x32xf32>
    %160 = arith.mulf %158, %159 : vector<1x32xf32>
    %161 = vector.broadcast %160 : vector<1x32xf32> to vector<8x32xf32>
    %162 = arith.subf %148, %161 : vector<8x32xf32>
    %163 = arith.mulf %162, %162 : vector<8x32xf32>
    %164 = vector.broadcast %141 : vector<8x1xf32> to vector<8x32xf32>
    %165 = arith.mulf %163, %164 : vector<8x32xf32>
    %cst_58 = arith.constant dense<0.000000e+00> : vector<32xf32>
    %166 = vector.multi_reduction <add>, %165, %cst_58 [0] : vector<8x32xf32> to vector<32xf32>
    %167 = vector.shape_cast %166 : vector<32xf32> to vector<1x32xf32>
    %168 = vector.broadcast %154 : f32 to vector<1x32xf32>
    %169 = arith.mulf %167, %168 : vector<1x32xf32>
    %170 = vector.broadcast %160 : vector<1x32xf32> to vector<8x32xf32>
    %171 = arith.subf %148, %170 : vector<8x32xf32>
    %cst_59 = arith.constant 9.99999974E-6 : f32
    %172 = vector.broadcast %cst_59 : f32 to vector<1x32xf32>
    %173 = arith.addf %169, %172 : vector<1x32xf32>
    %174 = math.rsqrt %173 : vector<1x32xf32>
    %175 = vector.broadcast %174 : vector<1x32xf32> to vector<8x32xf32>
    %176 = arith.mulf %171, %175 : vector<8x32xf32>
    %177 = vector.broadcast %6 : vector<1x32xf32> to vector<8x32xf32>
    %178 = arith.mulf %176, %177 : vector<8x32xf32>
    %179 = vector.broadcast %7 : vector<1x32xf32> to vector<8x32xf32>
    %180 = arith.addf %178, %179 : vector<8x32xf32>
    %cst_60 = arith.constant dense<0.000000e+00> : vector<8x32xf32>
    %181 = tpu.matmul %180, %2, %cst_60 {dimension_numbers = #tpu.dot_dimension_numbers<[1], [0], [0], [1], [0, 0, 1, 1], [], []>, precision = #tpu.contract_precision<fp32>} : vector<8x32xf32>, vector<32x32xf32>, vector<8x32xf32> -> vector<8x32xf32>
    %182 = vector.broadcast %8 : vector<1x32xf32> to vector<8x32xf32>
    %183 = arith.addf %181, %182 : vector<8x32xf32>
    %cst_61 = arith.constant 0.000000e+00 : f32
    %184 = vector.broadcast %cst_61 : f32 to vector<8x32xf32>
    %185 = arith.cmpf oge, %183, %184 : vector<8x32xf32>
    %186 = vector.broadcast %10 : vector<1x1xf32> to vector<8x32xf32>
    %187 = arith.mulf %186, %183 : vector<8x32xf32>
    %188 = arith.select %185, %183, %187 : vector<8x32xi1>, vector<8x32xf32>
    %cst_62 = arith.constant dense<0.000000e+00> : vector<8x16xf32>
    %189 = tpu.matmul %188, %3, %cst_62 {dimension_numbers = #tpu.dot_dimension_numbers<[1], [0], [0], [1], [0, 0, 1, 1], [], []>, precision = #tpu.contract_precision<fp32>} : vector<8x32xf32>, vector<32x16xf32>, vector<8x16xf32> -> vector<8x16xf32>
    %190 = vector.broadcast %9 : vector<1x16xf32> to vector<8x16xf32>
    %191 = arith.addf %189, %190 : vector<8x16xf32>
    %192 = vector.broadcast %141 : vector<8x1xf32> to vector<8x16xf32>
    %193 = arith.mulf %191, %192 : vector<8x16xf32>
    %cst_63 = arith.constant dense<0.000000e+00> : vector<16xf32>
    %194 = vector.multi_reduction <add>, %193, %cst_63 [0] : vector<8x16xf32> to vector<16xf32>
    %195 = vector.shape_cast %194 : vector<16xf32> to vector<1x16xf32>
    %196 = vector.broadcast %154 : f32 to vector<1x16xf32>
    %197 = arith.mulf %195, %196 : vector<1x16xf32>
    %198 = vector.broadcast %197 : vector<1x16xf32> to vector<8x16xf32>
    %199 = arith.subf %191, %198 : vector<8x16xf32>
    %200 = arith.mulf %199, %199 : vector<8x16xf32>
    %201 = vector.broadcast %141 : vector<8x1xf32> to vector<8x16xf32>
    %202 = arith.mulf %200, %201 : vector<8x16xf32>
    %cst_64 = arith.constant dense<0.000000e+00> : vector<16xf32>
    %203 = vector.multi_reduction <add>, %202, %cst_64 [0] : vector<8x16xf32> to vector<16xf32>
    %204 = vector.shape_cast %203 : vector<16xf32> to vector<1x16xf32>
    %205 = vector.broadcast %154 : f32 to vector<1x16xf32>
    %206 = arith.mulf %204, %205 : vector<1x16xf32>
    %207 = vector.broadcast %197 : vector<1x16xf32> to vector<8x16xf32>
    %208 = arith.subf %191, %207 : vector<8x16xf32>
    %cst_65 = arith.constant 9.99999974E-6 : f32
    %209 = vector.broadcast %cst_65 : f32 to vector<1x16xf32>
    %210 = arith.addf %206, %209 : vector<1x16xf32>
    %211 = math.rsqrt %210 : vector<1x16xf32>
    %212 = vector.broadcast %211 : vector<1x16xf32> to vector<8x16xf32>
    %213 = arith.mulf %208, %212 : vector<8x16xf32>
    %214 = vector.broadcast %141 : vector<8x1xf32> to vector<8x16xf32>
    %215 = arith.mulf %213, %214 : vector<8x16xf32>
    %c0_66 = arith.constant 0 : index
    %c0_67 = arith.constant 0 : index
    %216 = vector.load %arg5[%c0_66, %c0_67] : memref<8x16xf32, #tpu.memory_space<vmem>>, vector<8x16xf32>
    tpu.vector_store %arg5[%c0_66, %c0_67], %215 {strides = array<i32>} : memref<8x16xf32, #tpu.memory_space<vmem>>, vector<8x16xf32>,
    return
  }
}

</mosaic_0001>

<bundles_post_ra>
// kernel: pronunciation_attention_forward.1
= control target key start
LH: loop header
LB: loop body
LE: loop exit
PB: predicated region body
PF: predicated region fallthrough
CT: control target
= control target key end

     0   :  { %v46_v0 = vlaneseq  ;;  %s16011_s0 = inlined_call_operand.vmem [shape: f32[8,8,32], index: 0, kind: input, shape index: {}]   ;;  %s16012_s1 = inlined_call_operand.vmem [shape: f32[8,32], index: 1, kind: input, shape index: {}]   ;;  %s16013_s2 = inlined_call_operand.vmem [shape: f32[8,8], index: 2, kind: input, shape index: {}]   ;;  %s16014_s3 = inlined_call_operand.vmem [shape: f32[32,512], index: 3, kind: input, shape index: {}]   ;;  %s16015_s4 = inlined_call_operand.vmem [shape: f32[8,128], index: 4, kind: input, shape index: {}]   ;;  %s16016_s5 = inlined_call_operand.hbm [shape: f32[8,16], index: 5, kind: output, shape index: {}]  }
   0x2   :  { %v47_v1 = vshrl.u32 %v46_v0, 7 }
   0x4   :  { %13150 = vset.pattern.permute.xlu1 %v47_v1  ;;  %13149 = vset.pattern.permute.xlu0 %v47_v1 }
   0x5   :  { %10 = vsyncpa [#allocation3], 0  ;;  %13151 = vset.pattern.permute.xlu2 %v47_v1  ;;  %v44_v2 = vld [vmem:[%s16013_s2] sm:$0xff]  ;;  %v108_v37 = vld [vmem:[%s16011_s0 + $0x38] sm:$0xff]  ;;  %vm127_vm0 = vcmask 261120   ;;  %s13322_s21 = smov 96  }
   0x6   :  { %v59_v3 = vperm.slane %v44_v2, 2  ;;  %v45_v4 = vperm.slane %v44_v2, 0  ;;  %v73_v5 = vperm.slane %v44_v2, 4  ;;  %v66_v6 = vperm.slane %v44_v2, 3  ;;  %v24_v11 = vld [vmem:[%s16014_s3 + $0x60] sm:$0xff]  ;;  %v103_v49 = vld [vmem:[%s16011_s0 + $0x10] sm:$0xff] }
   0x7   :  { %v52_v7 = vperm.slane %v44_v2, 1  ;;  %v94_v8 = vperm.slane %v44_v2, 7  ;;  %v87_v9 = vperm.slane %v44_v2, 6  ;;  %v80_v10 = vperm.slane %v44_v2, 5  ;;  %v23_v13 = vld [vmem:[%s16014_s3 + $0x40] sm:$0xff]  ;;  %v102_v54 = vld [vmem:[%s16011_s0 + $0x8] sm:$0xff] }
   0x8   :  { %v164_v12 = vand.u32 4294901760, %v24_v11  ;;  %v166_v14 = vand.u32 4294901760, %v23_v13  ;;  %v22_v16 = vld [vmem:[%s16014_s3 + $0x20] sm:$0xff]  ;;  %v104_v59 = vld [vmem:[%s16011_s0 + $0x18] sm:$0xff]  ;;  %s13323_s22 = smov 64   ;;  %vm588_vm1 = vcmask 64512  }
   0x9   :  { %v168_v18 = vand.u32 4294901760, %v22_v16  ;;  %v21_v20 = vld [vmem:[%s16014_s3] sm:$0xff]  ;;  %s13325_s25 = smov 88   ;;  %s13326_s26 = smov 120  }
   0xa   :  { %13120 = vmatpush.msra.mxu2 %v164_v12  ;;  %v250_v15 = vsub.f32 %v24_v11, %v164_v12  ;;  %165 = vmatpush.msra.mxu0 %v164_v12  ;;  %v256_v19 = vsub.f32 %v23_v13, %v166_v14  ;;  %v170_v21 = vand.u32 4294901760, %v21_v20  ;;  %v13387_v36 = vld [vmem:[%s16012_s1] sm:$0xff]  ;;  %s13327_s27 = smov 56   ;;  %s13328_s28 = smov 112  }
   0xb   :  { %v262_v24 = vsub.f32 %v22_v16, %v168_v18  ;;  %v117_v38 = vadd.f32 %v13387_v36, %v108_v37  ;;  %v101_v45 = vld [vmem:[%s16011_s0] sm:$0xff]  ;;  %v112_v51 = vadd.f32 %v13387_v36, %v103_v49  ;;  %v111_v58 = vadd.f32 %v13387_v36, %v102_v54  ;;  %s13329_s29 = smov 80   ;;  %s13330_s8 = smov 48  }
   0xc   :  { %64 = vperm.xlu1 %13150, %v59_v3   ;;  %50 = vperm.xlu0 %13149, %v45_v4   ;;  %v251_v17 = vand.u32 4294901760, %v250_v15  ;;  %v257_v23 = vand.u32 4294901760, %v256_v19  ;;  %v268_v28 = vsub.f32 %v21_v20, %v170_v21  ;;  %v110_v47 = vadd.f32 %v13387_v36, %v101_v45  ;;  %v106_v20 = vld [vmem:[%s16011_s0 + $0x28] sm:$0xff]  ;;  %s13331_s9 = smov 72   ;;  %s13332_s10 = smov 104  }
   0xd   :  { %78 = vperm.xlu2 %13151, %v73_v5   ;;  %13121 = vmatpush.msra.mxu2 %v166_v14  ;;  %v263_v27 = vand.u32 4294901760, %v262_v24  ;;  %v113_v0 = vadd.f32 %v13387_v36, %v104_v59  ;;  %s13333_s13 = smov 40   ;;  %s13335_s18 = smov 1.0  }
   0xe   :  { %167 = vmatpush.msra.mxu0 %v166_v14  ;;  %v252_v22 = vsub.f32 %v250_v15, %v251_v17  ;;  %v258_v26 = vsub.f32 %v256_v19, %v257_v23  ;;  %v269_v31 = vand.u32 4294901760, %v268_v28  ;;  %s13110_s23 = sshll.u32 %s16016_s5, 4  ;;  %s13111_s23 = int_to_ptr.hbm [resolvable:$true] %s13110_s23 }
   0xf   :  { %13122 = vmatpush.msra.mxu2 %v168_v18  ;;  %v264_v30 = vsub.f32 %v262_v24, %v263_v27 }
  0x10   :  { %169 = vmatpush.msra.mxu0 %v168_v18  ;;  %v253_v25 = vand.u32 4294901760, %v252_v22  ;;  %v259_v29 = vand.u32 4294901760, %v258_v26  ;;  %v270_v33 = vsub.f32 %v268_v28, %v269_v31 }
  0x11   :  { %13123 = vmatpush.msra.mxu2 %v170_v21  ;;  %v265_v32 = vand.u32 4294901760, %v264_v30  ;;  %v107_v30 = vld [vmem:[%s16011_s0 + $0x30] sm:$0xff] }
  0x12   :  { %171 = vmatpush.msra.mxu0 %v170_v21  ;;  %13124 = vmatpush.msra.mxu3 %v253_v25  ;;  %v271_v34 = vand.u32 4294901760, %v270_v33  ;;  %v116_v33 = vadd.f32 %v13387_v36, %v107_v30 }
  0x13   :  { %320 = vmatpush.msrb.mxu2 %v250_v15  ;;  %254 = vmatpush.msra.mxu1 %v253_v25 }
  0x14   :  { %71 = vperm.xlu1 %13150, %v66_v6   ;;  %57 = vperm.xlu0 %13149, %v52_v7  }
  0x15   :  { %99 = vperm.xlu2 %13151, %v94_v8   ;;  %455 = vmatpush.msrb.mxu0 %v251_v17 }
  0x16   :  { %323 = vmatpush.msrb.mxu2 %v256_v19  ;;  %13125 = vmatpush.msra.mxu3 %v259_v29 }
  0x17   :  { %459 = vmatpush.msrb.mxu0 %v257_v23  ;;  %260 = vmatpush.msra.mxu1 %v259_v29 }
  0x18   :  { %326 = vmatpush.msrb.mxu2 %v262_v24  ;;  %13126 = vmatpush.msra.mxu3 %v265_v32  ;;  %v115_v24 = vadd.f32 %v13387_v36, %v106_v20 }
  0x19   :  { %463 = vmatpush.msrb.mxu0 %v263_v27  ;;  %266 = vmatpush.msra.mxu1 %v265_v32 }
  0x1a   :  { %329 = vmatpush.msrb.mxu2 %v268_v28  ;;  %13127 = vmatpush.msra.mxu3 %v271_v34 }
  0x1b   :  { %467 = vmatpush.msrb.mxu0 %v269_v31  ;;  %272 = vmatpush.msra.mxu1 %v271_v34 }
  0x1c   :  { %92 = vperm.xlu1 %13150, %v87_v9   ;;  %85 = vperm.xlu0 %13149, %v80_v10   ;;  %v105_v9 = vld [vmem:[%s16011_s0 + $0x20] sm:$0xff] }
  0x1d   :  { %384 = vmatpush.msrb.mxu3 %v164_v12  ;;  %514 = vmatpush.msrb.mxu1 %v164_v12  ;;  %v114_v13 = vadd.f32 %v13387_v36, %v105_v9 }
  0x1f   :  { %386 = vmatpush.msrb.mxu3 %v166_v14  ;;  %516 = vmatpush.msrb.mxu1 %v166_v14 }
  0x21   :  { %388 = vmatpush.msrb.mxu3 %v168_v18  ;;  %518 = vmatpush.msrb.mxu1 %v168_v18 }
  0x23   :  { %390 = vmatpush.msrb.mxu3 %v170_v21  ;;  %520 = vmatpush.msrb.mxu1 %v170_v21 }
  0x67   :  { %v13382_v35 = vpop.permute.xlu2 %78 }
  0x68   :  { %16047 = vst [vmem:[#allocation5_spill] sm:$0xff] %v13382_v35  ;;  %v13472_v19 = vmul.f32 %v114_v13, %v13382_v35 }
  0x6a   :  { %16058 = vst [vmem:[#allocation16_spill] sm:$0xff] %v13472_v19  ;;  %v141_v23 = vsel %vm127_vm0, %v13472_v19, 0 }
  0x6b   :  { %v204_v26 = vand.u32 4294901760, %v141_v23 }
  0x6d   :  { %v205_v32 = vsub.f32 %v141_v23, %v204_v26 }
  0x6f   :  { %v13393_v39 = vpop.permute.xlu2 %99  ;;  %v206_v45 = vand.u32 4294901760, %v205_v32 }
  0x70   :  { %16048 = vst [vmem:[#allocation6_spill] sm:$0xff] %v13393_v39  ;;  %v13396_v40 = vmul.f32 %v117_v38, %v13393_v39 }
  0x72   :  { %16049 = vst [vmem:[#allocation7_spill] sm:$0xff] %v13396_v40  ;;  %v150_v41 = vsel %vm127_vm0, %v13396_v40, 0 }
  0x73   :  { %v13400_v42 = vand.u32 4294901760, %v150_v41 }
  0x75   :  { %v13403_v43 = vsub.f32 %v150_v41, %v13400_v42  ;;  %302 = vmatmul.f32.vlgmr.msra.gmra.mxu3 %v13400_v42 }
  0x77   :  { %v230_v44 = vand.u32 4294901760, %v13403_v43 }
  0x79   :  { %v231_v46 = vsub.f32 %v13403_v43, %v230_v44 }
  0x7b   :  { %v232_v48 = vand.u32 4294901760, %v231_v46 }
  0x7d   :  { %233 = vmatmul.f32.vlgmr.msra.gmra.mxu2 %v232_v48 }
  0x7e   :  { %v13417_v50 = vpop.permute.xlu0 %50  ;;  %v13423_v53 = vpop.permute.xlu1 %64 }
  0x7f   :  { %16050 = vst [vmem:[#allocation8_spill] sm:$0xff] %v13417_v50  ;;  %v13421_v52 = vmul.f32 %v110_v47, %v13417_v50  ;;  %v13433_v57 = vmul.f32 %v112_v51, %v13423_v53  ;;  %v207_v47 = vsub.f32 %v205_v32, %v206_v45 }
  0x80   :  { %16052 = vst [vmem:[#allocation10_spill] sm:$0xff] %v13423_v53 }
  0x81   :  { %16051 = vst [vmem:[#allocation9_spill] sm:$0xff] %v13421_v52  ;;  %v129_v55 = vsel %vm127_vm0, %v13421_v52, 0  ;;  %v135_v63 = vsel %vm127_vm0, %v13433_v57, 0  ;;  %v208_v51 = vand.u32 4294901760, %v207_v47 }
  0x82   :  { %v13430_v56 = vand.u32 4294901760, %v129_v55  ;;  %16053 = vst [vmem:[#allocation11_spill] sm:$0xff] %v13433_v57  ;;  %v13451_v4 = vand.u32 4294901760, %v135_v63 }
  0x84   :  { %274 = vmatmul.f32.vlgmr.msra.gmra.mxu1 %v13430_v56  ;;  %v173_v60 = vsub.f32 %v129_v55, %v13430_v56  ;;  %v189_v12 = vsub.f32 %v135_v63, %v13451_v4 }
  0x86   :  { %v13441_v61 = vpop.permute.xlu0 %57  ;;  %332 = vmatmul.f32.vlgmr.msrb.gmra.mxu2 %v173_v60  ;;  %v174_v62 = vand.u32 4294901760, %v173_v60  ;;  %v13453_v5 = vpop.permute.xlu1 %71  ;;  %v190_v18 = vand.u32 4294901760, %v189_v12 }
  0x87   :  { %16054 = vst [vmem:[#allocation12_spill] sm:$0xff] %v13441_v61  ;;  %v13447_v1 = vmul.f32 %v111_v58, %v13441_v61  ;;  %v13458_v8 = vmul.f32 %v113_v0, %v13453_v5 }
  0x88   :  { %394 = vmatmul.f32.vlgmr.msrb.gmra.mxu3 %v174_v62  ;;  %v175_v2 = vsub.f32 %v173_v60, %v174_v62  ;;  %16056 = vst [vmem:[#allocation14_spill] sm:$0xff] %v13453_v5  ;;  %v191_v21 = vsub.f32 %v189_v12, %v190_v18 }
  0x89   :  { %16055 = vst [vmem:[#allocation13_spill] sm:$0xff] %v13447_v1  ;;  %v132_v3 = vsel %vm127_vm0, %v13447_v1, 0  ;;  %v138_v14 = vsel %vm127_vm0, %v13458_v8, 0 }
  0x8a   :  { %v13455_v6 = vand.u32 4294901760, %v132_v3  ;;  %v176_v7 = vand.u32 4294901760, %v175_v2  ;;  %16057 = vst [vmem:[#allocation15_spill] sm:$0xff] %v13458_v8  ;;  %v13469_v16 = vand.u32 4294901760, %v138_v14  ;;  %v192_v27 = vand.u32 4294901760, %v191_v21 }
  0x8c   :  { %177 = vmatmul.f32.vlgmr.msra.gmra.mxu0 %v176_v7  ;;  %278 = vmatmul.f32.gmra.mxu1 %v13455_v6  ;;  %v181_v10 = vsub.f32 %v132_v3, %v13455_v6  ;;  %v197_v22 = vsub.f32 %v138_v14, %v13469_v16 }
  0x8e   :  { %337 = vmatmul.f32.gmra.mxu2 %v181_v10  ;;  %v182_v11 = vand.u32 4294901760, %v181_v10  ;;  %v13482_v25 = vpop.permute.xlu0 %85  ;;  %v198_v28 = vand.u32 4294901760, %v197_v22  ;;  %v13494_v37 = vpop.permute.xlu1 %92 }
  0x8f   :  { %16059 = vst [vmem:[#allocation17_spill] sm:$0xff] %v13482_v25  ;;  %v13485_v29 = vmul.f32 %v115_v24, %v13482_v25  ;;  %v13497_v46 = vmul.f32 %v116_v33, %v13494_v37 }
  0x90   :  { %400 = vmatmul.f32.gmra.mxu3 %v182_v11  ;;  %v183_v15 = vsub.f32 %v181_v10, %v182_v11  ;;  %v199_v31 = vsub.f32 %v197_v22, %v198_v28  ;;  %16061 = vst [vmem:[#allocation19_spill] sm:$0xff] %v13494_v37 }
  0x91   :  { %16060 = vst [vmem:[#allocation18_spill] sm:$0xff] %v13485_v29  ;;  %v144_v34 = vsel %vm127_vm0, %v13485_v29, 0  ;;  %v147_v36 = vsel %vm127_vm0, %v13497_v46, 0 }
  0x92   :  { %v184_v17 = vand.u32 4294901760, %v183_v15  ;;  %v212_v38 = vand.u32 4294901760, %v144_v34  ;;  %v200_v41 = vand.u32 4294901760, %v199_v31  ;;  %16062 = vst [vmem:[#allocation20_spill] sm:$0xff] %v13497_v46  ;;  %v220_v49 = vand.u32 4294901760, %v147_v36 }
  0x94   :  { %185 = vmatmul.f32.gmra.mxu0 %v184_v17  ;;  %282 = vmatmul.f32.gmra.mxu1 %v13451_v4  ;;  %v213_v48 = vsub.f32 %v144_v34, %v212_v38  ;;  %v221_v58 = vsub.f32 %v147_v36, %v220_v49 }
  0x96   :  { %342 = vmatmul.f32.gmra.mxu2 %v189_v12  ;;  %v214_v54 = vand.u32 4294901760, %v213_v48  ;;  %v222_v60 = vand.u32 4294901760, %v221_v58 }
  0x98   :  { %406 = vmatmul.f32.gmra.mxu3 %v190_v18  ;;  %v215_v55 = vsub.f32 %v213_v48, %v214_v54  ;;  %v223_v62 = vsub.f32 %v221_v58, %v222_v60 }
  0x9a   :  { %v216_v59 = vand.u32 4294901760, %v215_v55  ;;  %v224_v63 = vand.u32 4294901760, %v223_v62 }
  0x9c   :  { %193 = vmatmul.f32.gmra.mxu0 %v192_v27  ;;  %286 = vmatmul.f32.gmra.mxu1 %v13469_v16 }
  0x9e   :  { %347 = vmatmul.f32.gmra.mxu2 %v197_v22 }
  0xa0   :  { %412 = vmatmul.f32.gmra.mxu3 %v198_v28 }
  0xa4   :  { %201 = vmatmul.f32.gmra.mxu0 %v200_v41  ;;  %290 = vmatmul.f32.gmra.mxu1 %v204_v26 }
  0xa6   :  { %352 = vmatmul.f32.gmra.mxu2 %v205_v32 }
  0xa8   :  { %418 = vmatmul.f32.gmra.mxu3 %v206_v45 }
  0xac   :  { %209 = vmatmul.f32.gmra.mxu0 %v208_v51  ;;  %294 = vmatmul.f32.gmra.mxu1 %v212_v38 }
  0xae   :  { %357 = vmatmul.f32.gmra.mxu2 %v213_v48 }
  0xb0   :  { %424 = vmatmul.f32.gmra.mxu3 %v214_v54 }
  0xb4   :  { %217 = vmatmul.f32.gmra.mxu0 %v216_v59  ;;  %298 = vmatmul.f32.gmra.mxu1 %v220_v49 }
  0xb6   :  { %362 = vmatmul.f32.gmra.mxu2 %v221_v58 }
  0xb8   :  { %430 = vmatmul.f32.gmra.mxu3 %v222_v60 }
  0xbc   :  { %225 = vmatmul.f32.gmra.mxu0 %v224_v63  ;;  %522 = vmatmul.f32.vlgmr.msrb.gmra.mxu1 %v13430_v56 }
  0xbe   :  { %367 = vmatmul.f32.gmra.mxu2 %v13403_v43 }
  0xc0   :  { %436 = vmatmul.f32.gmra.mxu3 %v230_v44 }
  0xc4   :  { %469 = vmatmul.f32.vlgmr.msrb.gmra.mxu0 %v13430_v56  ;;  %526 = vmatmul.f32.gmra.mxu1 %v13455_v6 }
  0xcc   :  { %473 = vmatmul.f32.gmra.mxu0 %v13455_v6  ;;  %530 = vmatmul.f32.gmra.mxu1 %v13451_v4 }
  0xd4   :  { %477 = vmatmul.f32.gmra.mxu0 %v13451_v4  ;;  %534 = vmatmul.f32.gmra.mxu1 %v13469_v16 }
  0xdc   :  { %481 = vmatmul.f32.gmra.mxu0 %v13469_v16  ;;  %538 = vmatmul.f32.gmra.mxu1 %v204_v26 }
  0xe4   :  { %485 = vmatmul.f32.gmra.mxu0 %v204_v26  ;;  %542 = vmatmul.f32.gmra.mxu1 %v212_v38 }
  0xec   :  { %489 = vmatmul.f32.gmra.mxu0 %v212_v38  ;;  %546 = vmatmul.f32.gmra.mxu1 %v220_v49 }
  0xf4   :  { %493 = vmatmul.f32.gmra.mxu0 %v220_v49  ;;  %550 = vmatmul.f32.gmra.mxu1 %v13400_v42 }
  0xf8   :  { %v13516_v10 = vpop.f32.mrf.mxu3 }
  0xfc   :  { %497 = vmatmul.f32.gmra.mxu0 %v13400_v42  ;;  %v13521_v42 = vld [vmem:[%s16015_s4] ss:$0 sm:$0xff] }
 0x100   :  { %v13514_v6 = vpop.f32.mrf.mxu2 }
 0x101   :  { %v275_v43 = vpop.f32.mrf.mxu1 }
 0x109   :  { %v178_v44 = vpop.f32.mrf.mxu0  ;;  %v279_v56 = vpop.f32.mrf.mxu1 }
 0x10a   :  { %v333_v13 = vpop.f32.mrf.mxu2  ;;  %v179_v17 = vadd.f32 %v13521_v42, %v178_v44 }
 0x10b   :  { %v395_v14 = vpop.f32.mrf.mxu3 }
 0x10c   :  { %v276_v20 = vadd.f32 %v275_v43, %v179_v17 }
 0x10e   :  { %v334_v24 = vadd.f32 %v333_v13, %v276_v20 }
 0x110   :  { %v396_v28 = vadd.f32 %v395_v14, %v334_v24 }
 0x111   :  { %v186_v0 = vpop.f32.mrf.mxu0  ;;  %v283_v2 = vpop.f32.mrf.mxu1 }
 0x112   :  { %v338_v18 = vpop.f32.mrf.mxu2  ;;  %v187_v26 = vadd.f32 %v13521_v42, %v186_v0 }
 0x113   :  { %v401_v21 = vpop.f32.mrf.mxu3 }
 0x114   :  { %v280_v30 = vadd.f32 %v279_v56, %v187_v26 }
 0x116   :  { %v339_v38 = vadd.f32 %v338_v18, %v280_v30 }
 0x118   :  { %v402_v47 = vadd.f32 %v401_v21, %v339_v38 }
 0x119   :  { %v194_v3 = vpop.f32.mrf.mxu0  ;;  %v287_v4 = vpop.f32.mrf.mxu1 }
 0x11a   :  { %v343_v27 = vpop.f32.mrf.mxu2  ;;  %v195_v41 = vadd.f32 %v13521_v42, %v194_v3 }
 0x11b   :  { %v407_v34 = vpop.f32.mrf.mxu3 }
 0x11c   :  { %v284_v48 = vadd.f32 %v283_v2, %v195_v41 }
 0x11e   :  { %v344_v55 = vadd.f32 %v343_v27, %v284_v48 }
 0x120   :  { %v408_v62 = vadd.f32 %v407_v34, %v344_v55 }
 0x121   :  { %v202_v7 = vpop.f32.mrf.mxu0  ;;  %v291_v9 = vpop.f32.mrf.mxu1 }
 0x122   :  { %v348_v36 = vpop.f32.mrf.mxu2  ;;  %v203_v58 = vadd.f32 %v13521_v42, %v202_v7 }
 0x123   :  { %v413_v60 = vpop.f32.mrf.mxu3 }
 0x124   :  { %v288_v63 = vadd.f32 %v287_v4, %v203_v58 }
 0x126   :  { %v349_v2 = vadd.f32 %v348_v36, %v288_v63 }
 0x128   :  { %v414_v14 = vadd.f32 %v413_v60, %v349_v2 }
 0x129   :  { %v210_v11 = vpop.f32.mrf.mxu0  ;;  %v295_v12 = vpop.f32.mrf.mxu1 }
 0x12a   :  { %v353_v44 = vpop.f32.mrf.mxu2  ;;  %v211_v3 = vadd.f32 %v13521_v42, %v210_v11 }
 0x12b   :  { %v419_v7 = vpop.f32.mrf.mxu3 }
 0x12c   :  { %v292_v17 = vadd.f32 %v291_v9, %v211_v3 }
 0x12e   :  { %v354_v21 = vadd.f32 %v353_v44, %v292_v17 }
 0x130   :  { %v420_v11 = vadd.f32 %v419_v7, %v354_v21 }
 0x131   :  { %v218_v15 = vpop.f32.mrf.mxu0  ;;  %v13523_v16 = vpop.f32.mrf.mxu1 }
 0x132   :  { %v219_v4 = vadd.f32 %v13521_v42, %v218_v15 }
 0x134   :  { %v296_v27 = vadd.f32 %v295_v12, %v219_v4 }
 0x139   :  { %v226_v22 = vpop.f32.mrf.mxu0  ;;  %v523_v23 = vpop.f32.mrf.mxu1 }
 0x13a   :  { %v227_v9 = vadd.f32 %v13521_v42, %v226_v22 }
 0x13c   :  { %v300_v41 = vadd.f32 %v13523_v16, %v227_v9 }
 0x141   :  { %v470_v31 = vpop.f32.mrf.mxu0  ;;  %v527_v32 = vpop.f32.mrf.mxu1 }
 0x142   :  { %v471_v33 = vadd.f32 %v470_v31, %v396_v28  ;;  %v425_v28 = vpop.f32.mrf.mxu3 }
 0x144   :  { %v13528_v45 = vadd.f32 %v523_v23, %v471_v33  ;;  %v358_v23 = vpop.f32.mrf.mxu2 }
 0x146   :  { %586 = vrot.lane.b32.xlu2 %v13528_v45, %s13322_s21 }
 0x149   :  { %v474_v49 = vpop.f32.mrf.mxu0  ;;  %v531_v51 = vpop.f32.mrf.mxu1 }
 0x14a   :  { %v475_v54 = vadd.f32 %v474_v49, %v402_v47  ;;  %v431_v36 = vpop.f32.mrf.mxu3 }
 0x14c   :  { %v13533_v59 = vadd.f32 %v527_v32, %v475_v54  ;;  %v359_v32 = vadd.f32 %v358_v23, %v296_v27  ;;  %v363_v34 = vpop.f32.mrf.mxu2 }
 0x14d   :  { %v364_v12 = vadd.f32 %v363_v34, %v300_v41 }
 0x14e   :  { %741 = vrot.lane.b32.xlu0 %v13533_v59, %s13322_s21  ;;  %v426_v38 = vadd.f32 %v425_v28, %v359_v32  ;;  %v13577_v28 = vmul.f32 0.35355338, %v13533_v59 }
 0x14f   :  { %v432_v22 = vadd.f32 %v431_v36, %v364_v12 }
 0x151   :  { %v478_v43 = vpop.f32.mrf.mxu0  ;;  %v535_v0 = vpop.f32.mrf.mxu1 }
 0x152   :  { %v479_v56 = vadd.f32 %v478_v43, %v408_v62  ;;  %v437_v43 = vpop.f32.mrf.mxu3 }
 0x154   :  { %v13538_v13 = vadd.f32 %v531_v51, %v479_v56  ;;  %v235_v51 = vadd.f32 %v13521_v42, %v13514_v6  ;;  %v368_v54 = vpop.f32.mrf.mxu2 }
 0x156   :  { %895 = vrot.lane.b32.xlu1 %v13538_v13, %s13322_s21  ;;  %v304_v60 = vadd.f32 %v13516_v10, %v235_v51  ;;  %v13571_v10 = vmul.f32 0.35355338, %v13528_v45  ;;  %v13586_v51 = vmul.f32 0.35355338, %v13538_v13 }
 0x158   :  { %v369_v16 = vadd.f32 %v368_v54, %v304_v60  ;;  %v590_v2 = vsel %vm588_vm1, %v13571_v10, 0 }
 0x159   :  { %v482_v18 = vpop.f32.mrf.mxu0  ;;  %v539_v26 = vpop.f32.mrf.mxu1  ;;  %v611_v3 = vand.u32 4294901760, %v590_v2 }
 0x15a   :  { %v483_v20 = vadd.f32 %v482_v18, %v414_v14  ;;  %v438_v44 = vadd.f32 %v437_v43, %v369_v16  ;;  %v898_v43 = vsel %vm588_vm1, %v13586_v51, 0 }
 0x15b   :  { %v612_v7 = vsub.f32 %v590_v2, %v611_v3  ;;  %v919_v2 = vand.u32 4294901760, %v898_v43 }
 0x15c   :  { %v13543_v24 = vadd.f32 %v535_v0, %v483_v20 }
 0x15d   :  { %v613_v14 = vand.u32 4294901760, %v612_v7 }
 0x15e   :  { %1049 = vrot.lane.b32.xlu2 %v13543_v24, %s13322_s21 }
 0x15f   :  { %v614_v20 = vsub.f32 %v612_v7, %v613_v14 }
 0x161   :  { %v486_v30 = vpop.f32.mrf.mxu0  ;;  %v543_v15 = vpop.f32.mrf.mxu1  ;;  %v615_v23 = vand.u32 4294901760, %v614_v20 }
 0x162   :  { %v487_v31 = vadd.f32 %v486_v30, %v420_v11  ;;  %v744_v30 = vsel %vm588_vm1, %v13577_v28, 0 }
 0x164   :  { %v13548_v33 = vadd.f32 %v539_v26, %v487_v31  ;;  %v13581_v31 = vand.u32 4294901760, %v744_v30 }
 0x166   :  { %1203 = vrot.lane.b32.xlu0 %v13548_v33, %s13322_s21  ;;  %v766_v32 = vsub.f32 %v744_v30, %v13581_v31 }
 0x168   :  { %v767_v9 = vand.u32 4294901760, %v766_v32 }
 0x169   :  { %v490_v47 = vpop.f32.mrf.mxu0  ;;  %v547_v55 = vpop.f32.mrf.mxu1 }
 0x16a   :  { %v491_v48 = vadd.f32 %v490_v47, %v426_v38  ;;  %v768_v38 = vsub.f32 %v766_v32, %v767_v9 }
 0x16c   :  { %v13553_v49 = vadd.f32 %v543_v15, %v491_v48  ;;  %v769_v36 = vand.u32 4294901760, %v768_v38 }
 0x16e   :  { %1357 = vrot.lane.b32.xlu1 %v13553_v49, %s13322_s21 }
 0x171   :  { %v494_v58 = vpop.f32.mrf.mxu0  ;;  %v551_v42 = vpop.f32.mrf.mxu1 }
 0x172   :  { %v495_v62 = vadd.f32 %v494_v58, %v432_v22  ;;  %v13590_v58 = vmul.f32 0.35355338, %v13543_v24 }
 0x174   :  { %v13560_v63 = vadd.f32 %v547_v55, %v495_v62 }
 0x176   :  { %1511 = vrot.lane.b32.xlu2 %v13560_v63, %s13322_s21 }
 0x179   :  { %v498_v56 = vpop.f32.mrf.mxu0 }
 0x17a   :  { %v499_v6 = vadd.f32 %v498_v56, %v438_v44  ;;  %v13598_v56 = vmul.f32 0.35355338, %v13548_v33 }
 0x17c   :  { %v13564_v0 = vadd.f32 %v551_v42, %v499_v6  ;;  %v1052_v42 = vsel %vm588_vm1, %v13590_v58, 0 }
 0x17e   :  { %1665 = vrot.lane.b32.xlu0 %v13564_v0, %s13322_s21  ;;  %1938 = vrot.lane.b32.xlu2 %v13528_v45, %s13323_s22 }
 0x1a0   :  { %v587_v17 = vpop.permute.xlu2 %586 }
 0x1a1   :  { %v592_v18 = vsel %vm588_vm1, %v587_v17, 0 }
 0x1a2   :  { %v609_v21 = vand.u32 4294901760, %v592_v18 }
 0x1a4   :  { %v636_v4 = vsub.f32 %v592_v18, %v609_v21  ;;  %610 = vmatpush.xpose.msra.mxu2 %v609_v21  ;;  %v13609_v18 = vsub.f32 %v898_v43, %v919_v2 }
 0x1a6   :  { %v637_v26 = vand.u32 4294901760, %v636_v4 }
 0x1a7   :  { %616 = vmatmul.f32.vlgmr.msra.gmra.mxu2 %v615_v23  ;;  %v921_v23 = vand.u32 4294901760, %v13609_v18 }
 0x1a8   :  { %663 = vmatpush.xpose.msrb.mxu2 %v636_v4  ;;  %v638_v11 = vsub.f32 %v636_v4, %v637_v26 }
 0x1aa   :  { %v639_v27 = vand.u32 4294901760, %v638_v11 }
 0x1ac   :  { %712 = vmatpush.xpose.msra.mxu2 %v637_v26  ;;  %640 = vmatpush.xpose.msra.mxu3 %v639_v27 }
 0x1af   :  { %642 = vmatmul.f32.vlgmr.msra.gmra.mxu3 %v611_v3  ;;  %666 = vmatmul.f32.vlgmr.msrb.gmra.mxu2 %v612_v7  ;;  %v13604_v7 = vand.u32 4294901760, %v1052_v42 }
 0x1b0   :  { %686 = vmatpush.xpose.msrb.mxu3 %v609_v21 }
 0x1b1   :  { %v1074_v4 = vsub.f32 %v1052_v42, %v13604_v7 }
 0x1b3   :  { %v1075_v27 = vand.u32 4294901760, %v1074_v4 }
 0x1b4   :  { %734 = vmatpush.xpose.msra.mxu3 %v609_v21 }
 0x1b7   :  { %690 = vmatmul.f32.vlgmr.msrb.gmra.mxu3 %v613_v14  ;;  %714 = vmatmul.f32.vlgmr.msra.gmra.mxu2 %v611_v3  ;;  %v1206_v14 = vsel %vm588_vm1, %v13598_v56, 0 }
 0x1b8   :  { %v1050_v48 = vpop.permute.xlu2 %1049  ;;  %v13611_v21 = vand.u32 4294901760, %v1206_v14 }
 0x1b9   :  { %v1054_v22 = vsel %vm588_vm1, %v1050_v48, 0 }
 0x1ba   :  { %v13595_v44 = vand.u32 4294901760, %v1054_v22  ;;  %v13616_v11 = vsub.f32 %v1206_v14, %v13611_v21  ;;  %v13638_v14 = vmul.f32 0.35355338, %v13560_v63 }
 0x1bc   :  { %v1098_v17 = vsub.f32 %v1054_v22, %v13595_v44 }
 0x1bf   :  { %736 = vmatmul.f32.vlgmr.msra.gmra.mxu3 %v611_v3 }
 0x1c0   :  { %v742_v34 = vpop.permute.xlu0 %741 }
 0x1c1   :  { %v746_v15 = vsel %vm588_vm1, %v742_v34, 0  ;;  %v922_v34 = vsub.f32 %v13609_v18, %v921_v23 }
 0x1c2   :  { %v763_v41 = vand.u32 4294901760, %v746_v15 }
 0x1c3   :  { %v923_v48 = vand.u32 4294901760, %v922_v34 }
 0x1c4   :  { %v790_v47 = vsub.f32 %v746_v15, %v763_v41  ;;  %764 = vmatpush.xpose.msrb.mxu2 %v763_v41 }
 0x1c6   :  { %v791_v12 = vand.u32 4294901760, %v790_v47 }
 0x1c7   :  { %770 = vmatmul.f32.vlgmr.msrb.gmra.mxu2 %v769_v36  ;;  %v1099_v36 = vand.u32 4294901760, %v1098_v17 }
 0x1c8   :  { %817 = vmatpush.xpose.msra.mxu2 %v790_v47  ;;  %v792_v54 = vsub.f32 %v790_v47, %v791_v12  ;;  %v896_v55 = vpop.permute.xlu1 %895 }
 0x1c9   :  { %v900_v60 = vsel %vm588_vm1, %v896_v55, 0  ;;  %v1100_v43 = vsub.f32 %v1098_v17, %v1099_v36 }
 0x1ca   :  { %v793_v62 = vand.u32 4294901760, %v792_v54  ;;  %v917_v16 = vand.u32 4294901760, %v900_v60 }
 0x1cc   :  { %866 = vmatpush.xpose.msrb.mxu2 %v791_v12  ;;  %v944_v6 = vsub.f32 %v900_v60, %v917_v16  ;;  %794 = vmatpush.xpose.msrb.mxu3 %v793_v62 }
 0x1cd   :  { %1042 = vmatpush.xpose.msra.mxu1 %v917_v16 }
 0x1ce   :  { %v945_v3 = vand.u32 4294901760, %v944_v6 }
 0x1cf   :  { %796 = vmatmul.f32.vlgmr.msrb.gmra.mxu3 %v13581_v31  ;;  %820 = vmatmul.f32.vlgmr.msra.gmra.mxu2 %v766_v32 }
 0x1d0   :  { %840 = vmatpush.xpose.msra.mxu3 %v763_v41  ;;  %918 = vmatpush.xpose.msra.mxu2 %v917_v16  ;;  %v946_v20 = vsub.f32 %v944_v6, %v945_v3  ;;  %v1512_v15 = vpop.permute.xlu2 %1511 }
 0x1d1   :  { %1148 = vmatpush.xpose.msrb.mxu1 %v13595_v44  ;;  %1020 = vmatpush.xpose.msra.mxu0 %v945_v3 }
 0x1d2   :  { %1044 = vmatmul.f32.vlgmr.msra.gmra.mxu1 %v919_v2  ;;  %v947_v26 = vand.u32 4294901760, %v946_v20 }
 0x1d4   :  { %888 = vmatpush.xpose.msrb.mxu3 %v763_v41  ;;  %1022 = vmatmul.f32.vlgmr.msra.gmra.mxu0 %v919_v2  ;;  %v1229_v41 = vand.u32 4294901760, %v13616_v11 }
 0x1d5   :  { %1125 = vmatpush.xpose.msrb.mxu0 %v1098_v17  ;;  %v13647_v17 = vmul.f32 0.35355338, %v13553_v49 }
 0x1d6   :  { %v1230_v22 = vsub.f32 %v13616_v11, %v1229_v41 }
 0x1d7   :  { %844 = vmatmul.f32.vlgmr.msra.gmra.mxu3 %v767_v9  ;;  %868 = vmatmul.f32.vlgmr.msrb.gmra.mxu2 %v13581_v31  ;;  %v1516_v9 = vsel %vm588_vm1, %v1512_v15, 0 }
 0x1d8   :  { %948 = vmatpush.xpose.msra.mxu3 %v947_v26  ;;  %971 = vmatpush.xpose.msrb.mxu2 %v944_v6  ;;  %v1204_v30 = vpop.permute.xlu0 %1203  ;;  %v13631_v54 = vand.u32 4294901760, %v1516_v9  ;;  %v1231_v3 = vand.u32 4294901760, %v1230_v22  ;;  %v1514_v26 = vsel %vm588_vm1, %v13638_v14, 0 }
 0x1d9   :  { %v1208_v32 = vsel %vm588_vm1, %v1204_v30, 0  ;;  %v1535_v34 = vand.u32 4294901760, %v1514_v26 }
 0x1da   :  { %1152 = vmatmul.f32.vlgmr.msrb.gmra.mxu1 %v1075_v27  ;;  %v13621_v38 = vand.u32 4294901760, %v1208_v32 }
 0x1dc   :  { %v1252_v47 = vsub.f32 %v1208_v32, %v13621_v38  ;;  %1128 = vmatmul.f32.vlgmr.msrb.gmra.mxu0 %v1074_v4  ;;  %v1076_v32 = vsub.f32 %v1074_v4, %v1075_v27 }
 0x1dd   :  { %1226 = vmatpush.xpose.msra.mxu0 %v13621_v38 }
 0x1de   :  { %v1253_v12 = vand.u32 4294901760, %v1252_v47  ;;  %v1077_v15 = vand.u32 4294901760, %v1076_v32 }
 0x1df   :  { %890 = vmatmul.f32.vlgmr.msrb.gmra.mxu3 %v13581_v31  ;;  %924 = vmatmul.f32.vlgmr.msra.gmra.mxu2 %v923_v48  ;;  %v13641_v31 = vsub.f32 %v1516_v9, %v13631_v54  ;;  %v13661_v48 = vsub.f32 %v1514_v26, %v1535_v34  ;;  %v13679_v26 = vmul.f32 0.35355338, %v13564_v0 }
 0x1e0   :  { %v1254_v55 = vsub.f32 %v1252_v47, %v1253_v12  ;;  %994 = vmatpush.xpose.msrb.mxu3 %v917_v16  ;;  %1072 = vmatpush.xpose.msra.mxu2 %v13595_v44  ;;  %v1358_v60 = vpop.permute.xlu1 %1357  ;;  %v1101_v16 = vand.u32 4294901760, %v1100_v43 }
 0x1e1   :  { %v1362_v62 = vsel %vm588_vm1, %v1358_v60, 0  ;;  %1328 = vmatpush.xpose.msrb.mxu0 %v1253_v12  ;;  %v1561_v30 = vand.u32 4294901760, %v13641_v31  ;;  %v1537_v12 = vand.u32 4294901760, %v13661_v48 }
 0x1e2   :  { %v1255_v6 = vand.u32 4294901760, %v1254_v55  ;;  %v13635_v42 = vand.u32 4294901760, %v1362_v62  ;;  %v1939_v55 = vpop.permute.xlu2 %1938 }
 0x1e4   :  { %v1406_v20 = vsub.f32 %v1362_v62, %v13635_v42  ;;  %1232 = vmatmul.f32.vlgmr.msra.gmra.mxu0 %v1231_v3  ;;  %1256 = vmatpush.xpose.msra.mxu1 %v1255_v6 }
 0x1e6   :  { %1433 = vmatpush.xpose.msra.mxu0 %v1406_v20  ;;  %v1407_v60 = vand.u32 4294901760, %v1406_v20 }
 0x1e7   :  { %950 = vmatmul.f32.vlgmr.msra.gmra.mxu3 %v919_v2  ;;  %974 = vmatmul.f32.vlgmr.msrb.gmra.mxu2 %v13609_v18  ;;  %v1360_v2 = vsel %vm588_vm1, %v13647_v17, 0  ;;  %v1562_v18 = vsub.f32 %v13641_v31, %v1561_v30 }
 0x1e8   :  { %1350 = vmatpush.xpose.msrb.mxu1 %v13621_v38  ;;  %1102 = vmatpush.xpose.msra.mxu3 %v1101_v16  ;;  %v13659_v9 = vand.u32 4294901760, %v1360_v2  ;;  %v1408_v62 = vsub.f32 %v1406_v20, %v1407_v60 }
 0x1e9   :  { %1174 = vmatpush.xpose.msrb.mxu2 %v1099_v36  ;;  %1258 = vmatmul.f32.vlgmr.msra.gmra.mxu1 %v13611_v21  ;;  %v1563_v4 = vand.u32 4294901760, %v1562_v18 }
 0x1ea   :  { %v1382_v36 = vsub.f32 %v1360_v2, %v13659_v9  ;;  %v1409_v16 = vand.u32 4294901760, %v1408_v62 }
 0x1ec   :  { %1456 = vmatpush.xpose.msra.mxu1 %v13635_v42  ;;  %1330 = vmatmul.f32.vlgmr.msrb.gmra.mxu0 %v13611_v21 }
 0x1ed   :  { %1534 = vmatpush.xpose.msrb.mxu0 %v13631_v54 }
 0x1ef   :  { %998 = vmatmul.f32.vlgmr.msrb.gmra.mxu3 %v921_v23  ;;  %1078 = vmatmul.f32.vlgmr.msra.gmra.mxu2 %v1077_v15 }
 0x1f0   :  { %1196 = vmatpush.xpose.msrb.mxu3 %v13595_v44  ;;  %1279 = vmatpush.xpose.msra.mxu2 %v1252_v47  ;;  %v1666_v27 = vpop.permute.xlu0 %1665  ;;  %v1538_v44 = vsub.f32 %v13661_v48, %v1537_v12  ;;  %v1959_v47 = vand.u32 4294901760, %v1939_v55 }
 0x1f1   :  { %1352 = vmatmul.f32.vlgmr.msrb.gmra.mxu1 %v13611_v21  ;;  %v1670_v22 = vsel %vm588_vm1, %v1666_v27, 0  ;;  %v1383_v21 = vand.u32 4294901760, %v1382_v36 }
 0x1f2   :  { %1564 = vmatpush.xpose.msrb.mxu1 %v1563_v4  ;;  %v1687_v23 = vand.u32 4294901760, %v1670_v22  ;;  %v1539_v43 = vand.u32 4294901760, %v1538_v44  ;;  %v1986_v3 = vsub.f32 %v1939_v55, %v1959_v47  ;;  %v13324_v55 = vmov 0  }
 0x1f3   :  { %v1384_v20 = vsub.f32 %v1382_v36, %v1383_v21 }
 0x1f4   :  { %1436 = vmatmul.f32.vlgmr.msra.gmra.mxu0 %v1382_v36  ;;  %v1714_v6 = vsub.f32 %v1670_v22, %v1687_v23  ;;  %v13697_v22 = vld [vmem:[%s16013_s2] sm:$0xff] }
 0x1f5   :  { %1636 = vmatpush.xpose.msra.mxu0 %v1561_v30  ;;  %v1668_v30 = vsel %vm588_vm1, %v13679_v26, 0  ;;  %v1385_v2 = vand.u32 4294901760, %v1384_v20  ;;  %vm569_vm2 = vcmp.gt.f32.partialorder %v13697_v22, 0.0 }
 0x1f6   :  { %v1689_v18 = vand.u32 4294901760, %v1668_v30  ;;  %v1715_v4 = vand.u32 4294901760, %v1714_v6 }
 0x1f7   :  { %1104 = vmatmul.f32.vlgmr.msra.gmra.mxu3 %v13604_v7  ;;  %1176 = vmatmul.f32.vlgmr.msrb.gmra.mxu2 %v13604_v7 }
 0x1f8   :  { %1302 = vmatpush.xpose.msra.mxu3 %v13621_v38  ;;  %1380 = vmatpush.xpose.msrb.mxu2 %v13635_v42  ;;  %v1987_v38 = vand.u32 4294901760, %v1986_v3  ;;  %v1690_v15 = vsub.f32 %v1668_v30, %v1689_v18 }
 0x1f9   :  { %1460 = vmatmul.f32.vlgmr.msra.gmra.mxu1 %v1383_v21 }
 0x1fa   :  { %1658 = vmatpush.xpose.msra.mxu1 %v13631_v54  ;;  %v1988_v32 = vsub.f32 %v1986_v3, %v1987_v38  ;;  %v1691_v27 = vand.u32 4294901760, %v1690_v15 }
 0x1fc   :  { %1540 = vmatmul.f32.vlgmr.msrb.gmra.mxu0 %v1539_v43  ;;  %v16063_v43 = vmov 0 }
 0x1fd   :  { %1741 = vmatpush.xpose.msrb.mxu0 %v1714_v6 }
 0x1ff   :  { %1198 = vmatmul.f32.vlgmr.msrb.gmra.mxu3 %v13604_v7  ;;  %1282 = vmatmul.f32.vlgmr.msra.gmra.mxu2 %v13616_v11  ;;  %v1989_v7 = vand.u32 4294901760, %v1988_v32  ;;  %v1716_v11 = vsub.f32 %v1714_v6, %v1715_v4  ;;  %v555_v32 = vrot.slane %v13697_v22, 1 }
 0x200   :  { %1410 = vmatpush.xpose.msrb.mxu3 %v1409_v16  ;;  %1482 = vmatpush.xpose.msra.mxu2 %v1407_v60  ;;  %v1818_v60 = vsel %vm569_vm2, 1, %v13324_v55 }
 0x201   :  { %1566 = vmatmul.f32.vlgmr.msrb.gmra.mxu1 %v1535_v34  ;;  %vm570_vm4 = vcmp.gt.f32.partialorder %v555_v32, 0.0 }
 0x202   :  { %1764 = vmatpush.xpose.msrb.mxu1 %v1687_v23 }
 0x204   :  { %1638 = vmatmul.f32.vlgmr.msra.gmra.mxu0 %v1535_v34 }
 0x205   :  { %1960 = vmatpush.msra.mxu0 %v1959_v47 }
 0x207   :  { %1306 = vmatmul.f32.vlgmr.msra.gmra.mxu3 %v1229_v41  ;;  %1386 = vmatmul.f32.vlgmr.msrb.gmra.mxu2 %v1385_v2  ;;  %v1717_v41 = vand.u32 4294901760, %v1716_v11 }
 0x208   :  { %1504 = vmatpush.xpose.msra.mxu3 %v13635_v42  ;;  %1587 = vmatpush.xpose.msrb.mxu2 %v13641_v31  ;;  %v1692_v42 = vsub.f32 %v1690_v15, %v1691_v27 }
 0x209   :  { %1660 = vmatmul.f32.vlgmr.msra.gmra.mxu1 %v1535_v34 }
 0x20a   :  { %1990 = vmatpush.msra.mxu1 %v1989_v7  ;;  %v1693_v31 = vand.u32 4294901760, %v1692_v42 }
 0x20c   :  { %1744 = vmatmul.f32.vlgmr.msrb.gmra.mxu0 %v1690_v15 }
 0x20d   :  { %2062 = vmatpush.msrb.mxu0 %v1987_v38 }
 0x20f   :  { %1412 = vmatmul.f32.vlgmr.msrb.gmra.mxu3 %v13659_v9  ;;  %1484 = vmatmul.f32.vlgmr.msra.gmra.mxu2 %v13659_v9 }
 0x210   :  { %1610 = vmatpush.xpose.msrb.mxu3 %v13631_v54  ;;  %1688 = vmatpush.xpose.msra.mxu2 %v1687_v23 }
 0x211   :  { %1768 = vmatmul.f32.vlgmr.msrb.gmra.mxu1 %v1691_v27 }
 0x212   :  { %2084 = vmatpush.msrb.mxu1 %v1959_v47 }
 0x217   :  { %1506 = vmatmul.f32.vlgmr.msra.gmra.mxu3 %v13659_v9  ;;  %1590 = vmatmul.f32.vlgmr.msrb.gmra.mxu2 %v13661_v48 }
 0x218   :  { %1718 = vmatpush.xpose.msra.mxu3 %v1717_v41  ;;  %1790 = vmatpush.xpose.msrb.mxu2 %v1715_v4  ;;  %v1819_v4 = vsel %vm570_vm4, 1, %v13324_v55 }
 0x219   :  { %v1827_v11 = vperm.slane %v1819_v4, 0 }
 0x21b   :  { %vm13713_vm5 = vcmp.eq.s32.totalorder %v1827_v11, 1 }
 0x21f   :  { %1614 = vmatmul.f32.vlgmr.msrb.gmra.mxu3 %v1537_v12  ;;  %1694 = vmatmul.f32.vlgmr.msra.gmra.mxu2 %v1693_v31 }
 0x220   :  { %1812 = vmatpush.xpose.msrb.mxu3 %v1687_v23  ;;  %2013 = vmatpush.msra.mxu2 %v1986_v3  ;;  %v1826_v23 = vperm.slane %v1818_v60, 0 }
 0x222   :  { %vm13701_vm3 = vcmp.eq.s32.totalorder %v1826_v23, 1 }
 0x223   :  { %v16064_v43 = vsel %vm13701_vm3, 4294967295, %v16063_v43 }
 0x224   :  { %16065 = vst [vmem:[#allocation21_spill] sm:$0xff] %v16064_v43 }
 0x227   :  { %1720 = vmatmul.f32.vlgmr.msra.gmra.mxu3 %v1689_v18  ;;  %1792 = vmatmul.f32.vlgmr.msrb.gmra.mxu2 %v1689_v18 }
 0x228   :  { %2036 = vmatpush.msra.mxu3 %v1959_v47 }
 0x22a   :  { %v617_v54 = vpop.f32.mrf.mxu2 }
 0x22f   :  { %1814 = vmatmul.f32.vlgmr.msrb.gmra.mxu3 %v1689_v18 }
 0x232   :  { %v643_v34 = vpop.f32.mrf.mxu3  ;;  %v667_v36 = vpop.f32.mrf.mxu2 }
 0x233   :  { %v644_v9 = vadd.f32 %v643_v34, %v617_v54  ;;  %v16066_v54 = vmov 0 }
 0x234   :  { %v16067_v54 = vsel %vm13713_vm5, 4294967295, %v16066_v54 }
 0x235   :  { %v668_v12 = vadd.f32 %v667_v36, %v644_v9  ;;  %16068 = vst [vmem:[#allocation22_spill] sm:$0xff] %v16067_v54 }
 0x23a   :  { %v691_v48 = vpop.f32.mrf.mxu3  ;;  %v715_v21 = vpop.f32.mrf.mxu2 }
 0x23b   :  { %v692_v44 = vadd.f32 %v691_v48, %v668_v12  ;;  %v556_v12 = vrot.slane %v13697_v22, 2 }
 0x23d   :  { %v716_v47 = vadd.f32 %v715_v21, %v692_v44  ;;  %vm571_vm6 = vcmp.gt.f32.partialorder %v556_v12, 0.0 }
 0x242   :  { %v737_v62 = vpop.f32.mrf.mxu3 }
 0x243   :  { %v738_v6 = vadd.f32 %v737_v62, %v716_v47  ;;  %v1820_v62 = vsel %vm571_vm6, 1, %v13324_v55 }
 0x245   :  { %v13707_v3 = vsel %vm13701_vm3, %v738_v6, -1e+30 }
 0x246   :  { %v1850_v16 = vsel %vm588_vm1, %v13707_v3, -inf }
 0x247   :  { %1851 = vmax.xlane.f32.xlu1 %v1850_v16 }
 0x24a   :  { %v771_v38 = vpop.f32.mrf.mxu2 }
 0x24f   :  { %v1045_v60 = vpop.f32.mrf.mxu1 }
 0x251   :  { %v1023_v36 = vpop.f32.mrf.mxu0 }
 0x252   :  { %v797_v20 = vpop.f32.mrf.mxu3  ;;  %v821_v30 = vpop.f32.mrf.mxu2 }
 0x253   :  { %v798_v2 = vadd.f32 %v797_v20, %v771_v38  ;;  %v1828_v20 = vperm.slane %v1820_v62, 0 }
 0x255   :  { %v822_v15 = vadd.f32 %v821_v30, %v798_v2  ;;  %vm13725_vm7 = vcmp.eq.s32.totalorder %v1828_v20, 1 }
 0x257   :  { %v1153_v32 = vpop.f32.mrf.mxu1 }
 0x259   :  { %v1129_v47 = vpop.f32.mrf.mxu0 }
 0x25a   :  { %v845_v18 = vpop.f32.mrf.mxu3  ;;  %v869_v7 = vpop.f32.mrf.mxu2 }
 0x25b   :  { %v846_v27 = vadd.f32 %v845_v18, %v822_v15  ;;  %v16069_v18 = vmov 0 }
 0x25c   :  { %v16070_v18 = vsel %vm13725_vm7, 4294967295, %v16069_v18 }
 0x25d   :  { %v870_v41 = vadd.f32 %v869_v7, %v846_v27  ;;  %16071 = vst [vmem:[#allocation23_spill] sm:$0xff] %v16070_v18 }
 0x261   :  { %v1233_v15 = vpop.f32.mrf.mxu0 }
 0x262   :  { %v891_v42 = vpop.f32.mrf.mxu3  ;;  %v925_v31 = vpop.f32.mrf.mxu2 }
 0x263   :  { %v892_v34 = vadd.f32 %v891_v42, %v870_v41 }
 0x265   :  { %v13719_v9 = vsel %vm13713_vm5, %v892_v34, -1e+30 }
 0x266   :  { %v1853_v48 = vsel %vm588_vm1, %v13719_v9, -inf  ;;  %v1259_v42 = vpop.f32.mrf.mxu1 }
 0x267   :  { %1854 = vmax.xlane.f32.xlu2 %v1853_v48 }
 0x269   :  { %v1331_v48 = vpop.f32.mrf.mxu0 }
 0x26a   :  { %v951_v44 = vpop.f32.mrf.mxu3  ;;  %v975_v23 = vpop.f32.mrf.mxu2 }
 0x26b   :  { %v952_v21 = vadd.f32 %v951_v44, %v925_v31  ;;  %v558_v31 = vrot.slane %v13697_v22, 4 }
 0x26d   :  { %v976_v6 = vadd.f32 %v975_v23, %v952_v21  ;;  %vm573_vm8 = vcmp.gt.f32.partialorder %v558_v31, 0.0 }
 0x26e   :  { %v1353_v12 = vpop.f32.mrf.mxu1  ;;  %v1822_v44 = vsel %vm573_vm8, 1, %v13324_v55 }
 0x272   :  { %v999_v16 = vpop.f32.mrf.mxu3  ;;  %v1079_v38 = vpop.f32.mrf.mxu2 }
 0x273   :  { %v1000_v30 = vadd.f32 %v999_v16, %v976_v6  ;;  %v1830_v6 = vperm.slane %v1822_v44, 0 }
 0x275   :  { %v1024_v2 = vadd.f32 %v1023_v36, %v1000_v30  ;;  %v1437_v30 = vpop.f32.mrf.mxu0  ;;  %vm13739_vm9 = vcmp.eq.s32.totalorder %v1830_v6, 1 }
 0x277   :  { %v1046_v7 = vadd.f32 %v1045_v60, %v1024_v2  ;;  %v1260_v60 = vadd.f32 %v1259_v42, %v1233_v15  ;;  %v16072_v2 = vmov 0 }
 0x278   :  { %v16073_v2 = vsel %vm13739_vm9, 4294967295, %v16072_v2 }
 0x279   :  { %v13731_v4 = vsel %vm13725_vm7, %v1046_v7, -1e+30  ;;  %16074 = vst [vmem:[#allocation24_spill] sm:$0xff] %v16073_v2 }
 0x27a   :  { %v1105_v27 = vpop.f32.mrf.mxu3  ;;  %v1177_v11 = vpop.f32.mrf.mxu2  ;;  %v1856_v41 = vsel %vm588_vm1, %v13731_v4, -inf }
 0x27b   :  { %1857 = vmax.xlane.f32.xlu0 %v1856_v41  ;;  %v1461_v41 = vpop.f32.mrf.mxu1  ;;  %v1106_v31 = vadd.f32 %v1105_v27, %v1079_v38 }
 0x27d   :  { %v1130_v44 = vadd.f32 %v1129_v47, %v1106_v31 }
 0x27f   :  { %2242 = vrot.lane.b32.xlu2 %v13538_v13, %s13323_s22 }
 0x282   :  { %v1199_v34 = vpop.f32.mrf.mxu3  ;;  %v1283_v36 = vpop.f32.mrf.mxu2 }
 0x283   :  { %v1284_v23 = vadd.f32 %v1283_v36, %v1260_v60  ;;  %v557_v60 = vrot.slane %v13697_v22, 3  ;;  %v1567_v6 = vpop.f32.mrf.mxu1 }
 0x285   :  { %vm572_vm10 = vcmp.gt.f32.partialorder %v557_v60, 0.0 }
 0x286   :  { %v1821_v27 = vsel %vm572_vm10, 1, %v13324_v55 }
 0x28a   :  { %v1307_v21 = vpop.f32.mrf.mxu3  ;;  %v1387_v62 = vpop.f32.mrf.mxu2 }
 0x28b   :  { %v1308_v16 = vadd.f32 %v1307_v21, %v1284_v23  ;;  %v1541_v23 = vpop.f32.mrf.mxu0  ;;  %v1154_v21 = vadd.f32 %v1153_v32, %v1130_v44  ;;  %v1661_v29 = vpop.f32.mrf.mxu1 }
 0x28c   :  { %v1568_v40 = vadd.f32 %v1567_v6, %v1541_v23  ;;  %v561_v23 = vrot.slane %v13697_v22, 7 }
 0x28d   :  { %v1332_v20 = vadd.f32 %v1331_v48, %v1308_v16  ;;  %v1178_v16 = vadd.f32 %v1177_v11, %v1154_v21  ;;  %v559_v21 = vrot.slane %v13697_v22, 5 }
 0x28e   :  { %vm576_vm14 = vcmp.gt.f32.partialorder %v561_v23, 0.0 }
 0x28f   :  { %2090 = vrot.lane.b32.xlu0 %v13533_v59, %s13323_s22  ;;  %v1354_v7 = vadd.f32 %v1353_v12, %v1332_v20  ;;  %v560_v12 = vrot.slane %v13697_v22, 6  ;;  %vm574_vm15 = vcmp.gt.f32.partialorder %v559_v21, 0.0 }
 0x291   :  { %v13747_v15 = vsel %vm13739_vm9, %v1354_v7, -1e+30  ;;  %vm575_vm11 = vcmp.gt.f32.partialorder %v560_v12, 0.0  ;;  %v1829_v7 = vperm.slane %v1821_v27, 0  ;;  %v1825_v27 = vsel %vm576_vm14, 1, %v13324_v55 }
 0x292   :  { %v1413_v42 = vpop.f32.mrf.mxu3  ;;  %v1485_v36 = vpop.f32.mrf.mxu2  ;;  %v1862_v48 = vsel %vm588_vm1, %v13747_v15, -inf  ;;  %v1824_v39 = vsel %vm575_vm11, 1, %v13324_v55  ;;  %vm12541_vm14 = vcmask 1042434  }
 0x293   :  { %1863 = vmax.xlane.f32.xlu1 %v1862_v48  ;;  %v1200_v48 = vadd.f32 %v1199_v34, %v1178_v16  ;;  %v1414_v46 = vadd.f32 %v1413_v42, %v1387_v62  ;;  %vm13755_vm12 = vcmp.eq.s32.totalorder %v1829_v7, 1  ;;  %v1639_v32 = vpop.f32.mrf.mxu0  ;;  %v1832_v60 = vperm.slane %v1824_v39, 0 }
 0x294   :  { %v1823_v16 = vsel %vm574_vm15, 1, %v13324_v55  ;;  %vm12544_vm15 = vcmask 1043459  }
 0x295   :  { %v13761_v11 = vsel %vm13755_vm12, %v1200_v48, -1e+30  ;;  %v1438_v34 = vadd.f32 %v1437_v30, %v1414_v46  ;;  %vm13765_vm13 = vcmp.eq.s32.totalorder %v1832_v60, 1  ;;  %v1769_v48 = vpop.f32.mrf.mxu1 }
 0x296   :  { %v1859_v39 = vsel %vm588_vm1, %v13761_v11, -inf }
 0x297   :  { %v1462_v12 = vadd.f32 %v1461_v41, %v1438_v34  ;;  %v1831_v41 = vperm.slane %v1823_v16, 0 }
 0x299   :  { %vm13783_vm4 = vcmp.eq.s32.totalorder %v1831_v41, 1 }
 0x29a   :  { %v1507_v38 = vpop.f32.mrf.mxu3  ;;  %v1591_v20 = vpop.f32.mrf.mxu2 }
 0x29b   :  { %v1592_v37 = vadd.f32 %v1591_v20, %v1568_v40  ;;  %v1745_v20 = vpop.f32.mrf.mxu0 }
 0x2a2   :  { %v1615_v31 = vpop.f32.mrf.mxu3  ;;  %v1695_v40 = vpop.f32.mrf.mxu2 }
 0x2a3   :  { %v1616_v44 = vadd.f32 %v1615_v31, %v1592_v37 }
 0x2a5   :  { %v1640_v62 = vadd.f32 %v1639_v32, %v1616_v44  ;;  %v1833_v32 = vperm.slane %v1825_v27, 0 }
 0x2a7   :  { %v1662_v37 = vadd.f32 %v1661_v29, %v1640_v62  ;;  %v1486_v29 = vadd.f32 %v1485_v36, %v1462_v12  ;;  %vm13779_vm2 = vcmp.eq.s32.totalorder %v1833_v32, 1 }
 0x2a8   :  { %1860 = vmax.xlane.f32.xlu2 %v1859_v39 }
 0x2a9   :  { %v13773_v6 = vsel %vm13765_vm13, %v1662_v37, -1e+30  ;;  %v1508_v44 = vadd.f32 %v1507_v38, %v1486_v29 }
 0x2aa   :  { %v1721_v22 = vpop.f32.mrf.mxu3  ;;  %v1868_v46 = vsel %vm588_vm1, %v13773_v6, -inf  ;;  %v1793_v60 = vpop.f32.mrf.mxu2 }
 0x2ab   :  { %v1722_v30 = vadd.f32 %v1721_v22, %v1695_v40  ;;  %1869 = vmax.xlane.f32.xlu1 %v1868_v46  ;;  %v1847_v40 = vsel %vm13783_vm4, %v1508_v44, -1e+30 }
 0x2ac   :  { %v1865_v38 = vsel %vm588_vm1, %v1847_v40, -inf }
 0x2ad   :  { %v1746_v7 = vadd.f32 %v1745_v20, %v1722_v30 }
 0x2af   :  { %v1770_v31 = vadd.f32 %v1769_v48, %v1746_v7 }
 0x2b1   :  { %v1794_v23 = vadd.f32 %v1793_v60, %v1770_v31 }
 0x2b2   :  { %v1815_v21 = vpop.f32.mrf.mxu3 }
 0x2b3   :  { %v1816_v55 = vadd.f32 %v1815_v21, %v1794_v23 }
 0x2b5   :  { %v1849_v36 = vsel %vm13779_vm2, %v1816_v55, -1e+30 }
 0x2b6   :  { %v1871_v39 = vsel %vm588_vm1, %v1849_v36, -inf }
 0x2b7   :  { %1872 = vmax.xlane.f32.xlu1 %v1871_v39 }
 0x2b9   :  { %1866 = vmax.xlane.f32.xlu0 %v1865_v38 }
 0x2ba   :  { %v1852_v37 = vpop.xlane.xlu1 %1851 }
 0x2bb   :  { %v1874_v12 = vsub.f32 %v13707_v3, %v1852_v37 }
 0x2bd   :  { %v1882_v22 = vmul.f32 1.442695, %v1874_v12 }
 0x2bf   :  { %13158 = vpow2.f32 %v1882_v22 }
 0x2c5   :  { %v13794_v46 = vpop.eup %13158 }
 0x2c6   :  { %v1898_v30 = vsel %vm588_vm1, %v13794_v46, 0.0 }
 0x2c7   :  { %1899 = vadd.xlane.f32.xlu2 %v1898_v30 }
 0x2da   :  { %v1855_v27 = vpop.xlane.xlu2 %1854 }
 0x2db   :  { %v1875_v16 = vsub.f32 %v13719_v9, %v1855_v27 }
 0x2dd   :  { %v1884_v20 = vmul.f32 1.442695, %v1875_v16 }
 0x2df   :  { %13160 = vpow2.f32 %v1884_v20  ;;  %2698 = vrot.lane.b32.xlu2 %v13553_v49, %s13323_s22 }
 0x2e2   :  { %v2243_v22 = vpop.permute.xlu2 %2242 }
 0x2e5   :  { %v13801_v29 = vpop.eup %13160 }
 0x2e6   :  { %v1901_v3 = vsel %vm588_vm1, %v13801_v29, 0.0 }
 0x2e7   :  { %1902 = vadd.xlane.f32.xlu1 %v1901_v3 }
 0x2ee   :  { %v1858_v7 = vpop.xlane.xlu0 %1857 }
 0x2ef   :  { %v1876_v48 = vsub.f32 %v13731_v4, %v1858_v7 }
 0x2f1   :  { %v1886_v32 = vmul.f32 1.442695, %v1876_v48 }
 0x2f3   :  { %13162 = vpow2.f32 %v1886_v32 }
 0x2f9   :  { %v13806_v41 = vpop.eup %13162 }
 0x2fa   :  { %v1904_v9 = vsel %vm588_vm1, %v13806_v41, 0.0 }
 0x2fb   :  { %1905 = vadd.xlane.f32.xlu1 %v1904_v9 }
 0x301   :  { %v2091_v31 = vpop.permute.xlu0 %2090 }
 0x302   :  { %v13810_v60 = vand.u32 4294901760, %v2091_v31 }
 0x304   :  { %v13813_v44 = vsub.f32 %v2091_v31, %v13810_v60  ;;  %2112 = vmatpush.msrb.mxu2 %v13810_v60 }
 0x306   :  { %v2139_v23 = vand.u32 4294901760, %v13813_v44  ;;  %v1864_v21 = vpop.xlane.xlu1 %1863 }
 0x307   :  { %v1878_v4 = vsub.f32 %v13747_v15, %v1864_v21 }
 0x308   :  { %v2140_v55 = vsub.f32 %v13813_v44, %v2139_v23 }
 0x309   :  { %v1890_v39 = vmul.f32 1.442695, %v1878_v4 }
 0x30a   :  { %v2141_v38 = vand.u32 4294901760, %v2140_v55  ;;  %v2263_v55 = vand.u32 4294901760, %v2243_v22 }
 0x30b   :  { %13164 = vpow2.f32 %v1890_v39 }
 0x30c   :  { %2142 = vmatpush.msrb.mxu3 %v2141_v38  ;;  %v2290_v38 = vsub.f32 %v2243_v22, %v2263_v55 }
 0x311   :  { %v13819_v37 = vpop.eup %13164 }
 0x312   :  { %v1910_v12 = vsel %vm588_vm1, %v13819_v37, 0.0 }
 0x313   :  { %1911 = vadd.xlane.f32.xlu2 %v1910_v12 }
 0x314   :  { %2394 = vrot.lane.b32.xlu1 %v13543_v24, %s13323_s22 }
 0x31b   :  { %v1861_v30 = vpop.xlane.xlu2 %1860 }
 0x31c   :  { %v1877_v27 = vsub.f32 %v13761_v11, %v1861_v30 }
 0x31e   :  { %v1888_v15 = vmul.f32 1.442695, %v1877_v27  ;;  %v1870_v3 = vpop.xlane.xlu1 %1869 }
 0x320   :  { %13166 = vpow2.f32 %v1888_v15 }
 0x326   :  { %v13826_v16 = vpop.eup %13166 }
 0x327   :  { %v1907_v20 = vsel %vm588_vm1, %v13826_v16, 0.0 }
 0x328   :  { %1908 = vadd.xlane.f32.xlu0 %v1907_v20  ;;  %v2291_v20 = vand.u32 4294901760, %v2290_v38 }
 0x32a   :  { %v1873_v9 = vpop.xlane.xlu1 %1872  ;;  %v2292_v22 = vsub.f32 %v2290_v38, %v2291_v20 }
 0x32b   :  { %2850 = vrot.lane.b32.xlu2 %v13560_v63, %s13323_s22  ;;  %v1881_v11 = vsub.f32 %v1849_v36, %v1873_v9 }
 0x32c   :  { %v1867_v7 = vpop.xlane.xlu0 %1866  ;;  %v2293_v9 = vand.u32 4294901760, %v2292_v22 }
 0x32d   :  { %v1879_v48 = vsub.f32 %v1847_v40, %v1867_v7  ;;  %v1896_v31 = vmul.f32 1.442695, %v1881_v11 }
 0x32f   :  { %v1892_v32 = vmul.f32 1.442695, %v1879_v48 }
 0x331   :  { %13168 = vpow2.f32 %v1892_v32 }
 0x333   :  { %3156 = vrot.lane.b32.xlu2 %v13528_v45, %s13325_s25 }
 0x337   :  { %v13834_v21 = vpop.eup %13168 }
 0x338   :  { %v1913_v40 = vsel %vm588_vm1, %v13834_v21, 0.0 }
 0x33a   :  { %v1900_v4 = vpop.xlane.xlu2 %1899 }
 0x33b   :  { %13170 = vrcp.f32 %v1900_v4  ;;  %3154 = vrot.lane.b32.xlu2 %v13571_v10, %s13326_s26 }
 0x33c   :  { %13172 = vpow2.f32 %v1896_v31  ;;  %2546 = vrot.lane.b32.xlu0 %v13548_v33, %s13323_s22 }
 0x33e   :  { %1914 = vadd.xlane.f32.xlu1 %v1913_v40 }
 0x341   :  { %v13171_v36 = vpop.eup %13170 }
 0x342   :  { %v13842_v39 = vpop.eup %13172  ;;  %v1930_v12 = vmul.f32 %v13171_v36, %v13794_v46 }
 0x343   :  { %3310 = vrot.lane.b32.xlu2 %v13533_v59, %s13325_s25  ;;  %v1919_v27 = vsel %vm588_vm1, %v13842_v39, 0.0 }
 0x344   :  { %v1942_v30 = vsel %vm588_vm1, %v1930_v12, 0 }
 0x345   :  { %v1961_v15 = vand.u32 4294901760, %v1942_v30 }
 0x346   :  { %1920 = vadd.xlane.f32.xlu1 %v1919_v27 }
 0x347   :  { %v1962_v7 = vsub.f32 %v1942_v30, %v1961_v15  ;;  %1992 = vmatmul.f32.vlgmr.msra.gmra.mxu1 %v1961_v15 }
 0x348   :  { %2188 = vmatpush.msra.mxu1 %v13810_v60 }
 0x349   :  { %2016 = vmatmul.f32.vlgmr.msra.gmra.mxu2 %v1962_v7  ;;  %v1963_v48 = vand.u32 4294901760, %v1962_v7 }
 0x34a   :  { %2214 = vmatpush.msra.mxu2 %v2139_v23  ;;  %v1880_v23 = vsub.f32 %v13773_v6, %v1870_v3 }
 0x34b   :  { %2040 = vmatmul.f32.vlgmr.msra.gmra.mxu3 %v1963_v48  ;;  %3462 = vrot.lane.b32.xlu2 %v13586_v51, %s13326_s26  ;;  %v1964_v46 = vsub.f32 %v1962_v7, %v1963_v48 }
 0x34c   :  { %2236 = vmatpush.msra.mxu3 %v13810_v60  ;;  %v1894_v11 = vmul.f32 1.442695, %v1880_v23 }
 0x34d   :  { %v1965_v32 = vand.u32 4294901760, %v1964_v46  ;;  %v2699_v46 = vpop.permute.xlu2 %2698 }
 0x34f   :  { %1966 = vmatmul.f32.vlgmr.msra.gmra.mxu0 %v1965_v32  ;;  %2086 = vmatmul.f32.vlgmr.msrb.gmra.mxu1 %v1961_v15 }
 0x350   :  { %2165 = vmatpush.msra.mxu0 %v13813_v44  ;;  %2294 = vmatpush.msrb.mxu1 %v2293_v9 }
 0x353   :  { %3616 = vrot.lane.b32.xlu2 %v13590_v58, %s13326_s26 }
 0x357   :  { %2064 = vmatmul.f32.vlgmr.msrb.gmra.mxu0 %v1961_v15 }
 0x358   :  { %2264 = vmatpush.msrb.mxu0 %v2263_v55 }
 0x35a   :  { %v1903_v31 = vpop.xlane.xlu1 %1902 }
 0x35b   :  { %13174 = vrcp.f32 %v1903_v31  ;;  %3926 = vrot.lane.b32.xlu2 %v13553_v49, %s13325_s25 }
 0x35c   :  { %13176 = vpow2.f32 %v1894_v11 }
 0x35f   :  { %3002 = vrot.lane.b32.xlu1 %v13564_v0, %s13323_s22 }
 0x361   :  { %v13175_v60 = vpop.eup %13174 }
 0x362   :  { %v13862_v44 = vpop.eup %13176  ;;  %v1931_v4 = vmul.f32 %v13175_v60, %v13801_v29 }
 0x363   :  { %4078 = vrot.lane.b32.xlu2 %v13638_v14, %s13326_s26  ;;  %v1916_v40 = vsel %vm588_vm1, %v13862_v44, 0.0 }
 0x364   :  { %v2094_v6 = vsel %vm588_vm1, %v1931_v4, 0 }
 0x365   :  { %v2113_v3 = vand.u32 4294901760, %v2094_v6 }
 0x366   :  { %1917 = vadd.xlane.f32.xlu0 %v1916_v40 }
 0x367   :  { %v2114_v36 = vsub.f32 %v2094_v6, %v2113_v3  ;;  %3464 = vrot.lane.b32.xlu1 %v13538_v13, %s13325_s25  ;;  %2144 = vmatmul.f32.vlgmr.msrb.gmra.mxu3 %v2113_v3 }
 0x368   :  { %2340 = vmatpush.msrb.mxu3 %v2263_v55 }
 0x369   :  { %2168 = vmatmul.f32.vlgmr.msra.gmra.mxu0 %v2114_v36  ;;  %v2115_v12 = vand.u32 4294901760, %v2114_v36 }
 0x36a   :  { %2366 = vmatpush.msra.mxu0 %v2291_v20 }
 0x36b   :  { %4482 = vrot.lane.b32.xlu2 %v13528_v45, %s13327_s27  ;;  %2192 = vmatmul.f32.vlgmr.msra.gmra.mxu1 %v2115_v12  ;;  %v2116_v29 = vsub.f32 %v2114_v36, %v2115_v12  ;;  %v2719_v12 = vand.u32 4294901760, %v2699_v46 }
 0x36c   :  { %2388 = vmatpush.msra.mxu1 %v2263_v55 }
 0x36d   :  { %v2117_v30 = vand.u32 4294901760, %v2116_v29 }
 0x36e   :  { %v1906_v27 = vpop.xlane.xlu1 %1905 }
 0x36f   :  { %13178 = vrcp.f32 %v1906_v27  ;;  %3618 = vrot.lane.b32.xlu1 %v13543_v24, %s13325_s25  ;;  %2118 = vmatmul.f32.vlgmr.msrb.gmra.mxu2 %v2117_v30 }
 0x370   :  { %2238 = vmatmul.f32.vlgmr.msra.gmra.mxu3 %v2113_v3  ;;  %2317 = vmatpush.msrb.mxu2 %v2290_v38 }
 0x375   :  { %v13179_v15 = vpop.eup %13178 }
 0x376   :  { %v1932_v7 = vmul.f32 %v13179_v15, %v13806_v41  ;;  %v2746_v15 = vsub.f32 %v2699_v46, %v2719_v12 }
 0x377   :  { %3772 = vrot.lane.b32.xlu1 %v13548_v33, %s13325_s25  ;;  %2216 = vmatmul.f32.vlgmr.msra.gmra.mxu2 %v2113_v3 }
 0x378   :  { %v2246_v20 = vsel %vm588_vm1, %v1932_v7, 0 }
 0x379   :  { %v2265_v48 = vand.u32 4294901760, %v2246_v20 }
 0x37a   :  { %3308 = vrot.lane.b32.xlu0 %v13577_v28, %s13326_s26 }
 0x37b   :  { %v2266_v55 = vsub.f32 %v2246_v20, %v2265_v48  ;;  %2296 = vmatmul.f32.vlgmr.msrb.gmra.mxu1 %v2265_v48 }
 0x37d   :  { %v2267_v22 = vand.u32 4294901760, %v2266_v55 }
 0x37f   :  { %3924 = vrot.lane.b32.xlu1 %v13647_v17, %s13326_s26  ;;  %2320 = vmatmul.f32.vlgmr.msrb.gmra.mxu2 %v2266_v55  ;;  %v2268_v38 = vsub.f32 %v2266_v55, %v2267_v22  ;;  %v2747_v55 = vand.u32 4294901760, %v2746_v15 }
 0x380   :  { %2344 = vmatmul.f32.vlgmr.msrb.gmra.mxu3 %v2267_v22 }
 0x381   :  { %v2269_v41 = vand.u32 4294901760, %v2268_v38 }
 0x382   :  { %3770 = vrot.lane.b32.xlu0 %v13598_v56, %s13326_s26 }
 0x383   :  { %2270 = vmatmul.f32.vlgmr.msrb.gmra.mxu0 %v2269_v41  ;;  %2390 = vmatmul.f32.vlgmr.msra.gmra.mxu1 %v2265_v48 }
 0x386   :  { %v2395_v32 = vpop.permute.xlu1 %2394  ;;  %v1912_v31 = vpop.xlane.xlu2 %1911 }
 0x387   :  { %v2415_v9 = vand.u32 4294901760, %v2395_v32  ;;  %4234 = vrot.lane.b32.xlu1 %v13564_v0, %s13325_s25  ;;  %13180 = vrcp.f32 %v1912_v31 }
 0x389   :  { %v2442_v23 = vsub.f32 %v2395_v32, %v2415_v9  ;;  %2416 = vmatpush.msra.mxu2 %v2415_v9  ;;  %2492 = vmatpush.msrb.mxu1 %v2415_v9 }
 0x38a   :  { %4080 = vrot.lane.b32.xlu0 %v13560_v63, %s13325_s25 }
 0x38b   :  { %v2443_v11 = vand.u32 4294901760, %v2442_v23  ;;  %2368 = vmatmul.f32.vlgmr.msra.gmra.mxu0 %v2265_v48 }
 0x38c   :  { %2469 = vmatpush.msrb.mxu0 %v2442_v23 }
 0x38d   :  { %v2444_v60 = vsub.f32 %v2442_v23, %v2443_v11  ;;  %2518 = vmatpush.msrb.mxu2 %v2443_v11  ;;  %v13181_v6 = vpop.eup %13180 }
 0x38e   :  { %v1934_v3 = vmul.f32 %v13181_v6, %v13819_v37  ;;  %v2851_v31 = vpop.permute.xlu2 %2850 }
 0x38f   :  { %v2445_v4 = vand.u32 4294901760, %v2444_v60 }
 0x390   :  { %v2550_v36 = vsel %vm588_vm1, %v1934_v3, 0  ;;  %v2871_v3 = vand.u32 4294901760, %v2851_v31 }
 0x391   :  { %2446 = vmatpush.msra.mxu3 %v2445_v4  ;;  %v13894_v29 = vand.u32 4294901760, %v2550_v36 }
 0x392   :  { %4232 = vrot.lane.b32.xlu0 %v13679_v26, %s13326_s26 }
 0x393   :  { %2540 = vmatpush.msrb.mxu3 %v2415_v9  ;;  %v2570_v7 = vsub.f32 %v2550_v36, %v13894_v29  ;;  %v2748_v9 = vsub.f32 %v2746_v15, %v2747_v55 }
 0x395   :  { %v2571_v37 = vand.u32 4294901760, %v2570_v7  ;;  %v2749_v60 = vand.u32 4294901760, %v2748_v9 }
 0x397   :  { %v2572_v32 = vsub.f32 %v2570_v7, %v2571_v37 }
 0x399   :  { %v2573_v46 = vand.u32 4294901760, %v2572_v32 }
 0x39b   :  { %v1909_v40 = vpop.xlane.xlu0 %1908 }
 0x39c   :  { %13182 = vrcp.f32 %v1909_v40 }
 0x3a2   :  { %v13183_v30 = vpop.eup %13182 }
 0x3a3   :  { %v1933_v27 = vmul.f32 %v13183_v30, %v13826_v16  ;;  %v2898_v30 = vsub.f32 %v2851_v31, %v2871_v3 }
 0x3a5   :  { %v2398_v20 = vsel %vm588_vm1, %v1933_v27, 0 }
 0x3a6   :  { %v2417_v48 = vand.u32 4294901760, %v2398_v20 }
 0x3a8   :  { %v2418_v22 = vsub.f32 %v2398_v20, %v2417_v48  ;;  %2448 = vmatmul.f32.vlgmr.msra.gmra.mxu3 %v2417_v48 }
 0x3aa   :  { %2472 = vmatmul.f32.vlgmr.msrb.gmra.mxu0 %v2418_v22  ;;  %v2419_v38 = vand.u32 4294901760, %v2418_v22 }
 0x3ac   :  { %2496 = vmatmul.f32.vlgmr.msrb.gmra.mxu1 %v2419_v38  ;;  %v2420_v41 = vsub.f32 %v2418_v22, %v2419_v38  ;;  %v2899_v38 = vand.u32 4294901760, %v2898_v30 }
 0x3ae   :  { %v2547_v23 = vpop.permute.xlu0 %2546  ;;  %v2421_v11 = vand.u32 4294901760, %v2420_v41 }
 0x3af   :  { %v2567_v16 = vand.u32 4294901760, %v2547_v23 }
 0x3b0   :  { %2422 = vmatmul.f32.vlgmr.msra.gmra.mxu2 %v2421_v11  ;;  %2542 = vmatmul.f32.vlgmr.msrb.gmra.mxu3 %v2417_v48 }
 0x3b1   :  { %v2594_v4 = vsub.f32 %v2547_v23, %v2567_v16  ;;  %2568 = vmatpush.msra.mxu0 %v2567_v16  ;;  %2644 = vmatpush.msra.mxu3 %v2567_v16  ;;  %v1915_v6 = vpop.xlane.xlu1 %1914 }
 0x3b2   :  { %13184 = vrcp.f32 %v1915_v6  ;;  %2574 = vmatmul.f32.vlgmr.msra.gmra.mxu0 %v2573_v46 }
 0x3b3   :  { %2750 = vmatpush.msrb.mxu3 %v2749_v60  ;;  %v2595_v40 = vand.u32 4294901760, %v2594_v4  ;;  %2621 = vmatpush.msra.mxu2 %v2594_v4 }
 0x3b5   :  { %v2596_v36 = vsub.f32 %v2594_v4, %v2595_v40  ;;  %2670 = vmatpush.msrb.mxu0 %v2595_v40 }
 0x3b7   :  { %2773 = vmatpush.msra.mxu0 %v2746_v15  ;;  %v2597_v27 = vand.u32 4294901760, %v2596_v36  ;;  %v2900_v15 = vsub.f32 %v2898_v30, %v2899_v38 }
 0x3b8   :  { %v13185_v20 = vpop.eup %13184  ;;  %2520 = vmatmul.f32.vlgmr.msrb.gmra.mxu2 %v2417_v48  ;;  %2648 = vmatmul.f32.vlgmr.msra.gmra.mxu3 %v2571_v37 }
 0x3b9   :  { %v1935_v22 = vmul.f32 %v13185_v20, %v13834_v21  ;;  %2720 = vmatpush.msrb.mxu2 %v2719_v12  ;;  %2844 = vmatpush.msra.mxu3 %v2719_v12  ;;  %v2901_v21 = vand.u32 4294901760, %v2900_v15  ;;  %v1921_v11 = vpop.xlane.xlu1 %1920 }
 0x3ba   :  { %2598 = vmatpush.msra.mxu1 %v2597_v27  ;;  %2672 = vmatmul.f32.vlgmr.msrb.gmra.mxu0 %v13894_v29  ;;  %13186 = vrcp.f32 %v1921_v11 }
 0x3bb   :  { %v2702_v41 = vsel %vm588_vm1, %v1935_v22, 0  ;;  %2600 = vmatmul.f32.vlgmr.msra.gmra.mxu1 %v13894_v29  ;;  %2872 = vmatpush.msrb.mxu0 %v2871_v3 }
 0x3bc   :  { %v2721_v32 = vand.u32 4294901760, %v2702_v41  ;;  %2692 = vmatpush.msrb.mxu1 %v2567_v16 }
 0x3be   :  { %2796 = vmatpush.msra.mxu1 %v2719_v12  ;;  %v2722_v9 = vsub.f32 %v2702_v41, %v2721_v32  ;;  %v3157_v12 = vpop.permute.xlu2 %3156 }
 0x3bf   :  { %v3160_v40 = vsel %vm588_vm1, %v3157_v12, 0 }
 0x3c0   :  { %2624 = vmatmul.f32.vlgmr.msra.gmra.mxu2 %v2570_v7  ;;  %2752 = vmatmul.f32.vlgmr.msrb.gmra.mxu3 %v2721_v32  ;;  %v2723_v48 = vand.u32 4294901760, %v2722_v9  ;;  %v13187_v31 = vpop.eup %13186 }
 0x3c1   :  { %2822 = vmatpush.msra.mxu2 %v2747_v55  ;;  %2948 = vmatpush.msrb.mxu3 %v2871_v3 }
 0x3c2   :  { %2776 = vmatmul.f32.vlgmr.msra.gmra.mxu0 %v2722_v9  ;;  %v2724_v37 = vsub.f32 %v2722_v9, %v2723_v48 }
 0x3c3   :  { %2694 = vmatmul.f32.vlgmr.msrb.gmra.mxu1 %v13894_v29  ;;  %2974 = vmatpush.msra.mxu0 %v2899_v38  ;;  %v1937_v29 = vmul.f32 %v13187_v31, %v13842_v39 }
 0x3c4   :  { %2902 = vmatpush.msrb.mxu1 %v2901_v21  ;;  %v2725_v23 = vand.u32 4294901760, %v2724_v37 }
 0x3c6   :  { %v3155_v4 = vpop.permute.xlu2 %3154 }
 0x3c8   :  { %2726 = vmatmul.f32.vlgmr.msrb.gmra.mxu2 %v2725_v23  ;;  %2846 = vmatmul.f32.vlgmr.msra.gmra.mxu3 %v2721_v32 }
 0x3c9   :  { %2925 = vmatpush.msrb.mxu2 %v2898_v30  ;;  %v3177_v30 = vand.u32 4294901760, %v3160_v40 }
 0x3cb   :  { %2800 = vmatmul.f32.vlgmr.msra.gmra.mxu1 %v2723_v48  ;;  %v13907_v22 = vsub.f32 %v3160_v40, %v3177_v30 }
 0x3cc   :  { %2996 = vmatpush.msra.mxu1 %v2871_v3  ;;  %v3006_v3 = vsel %vm588_vm1, %v1937_v29, 0 }
 0x3cd   :  { %v3025_v27 = vand.u32 4294901760, %v3006_v3  ;;  %v3205_v9 = vand.u32 4294901760, %v13907_v22 }
 0x3cf   :  { %v3026_v41 = vsub.f32 %v3006_v3, %v3025_v27  ;;  %v3206_v11 = vsub.f32 %v13907_v22, %v3205_v9  ;;  %v3158_v3 = vsel %vm588_vm1, %v3155_v4, 0 }
 0x3d0   :  { %2824 = vmatmul.f32.vlgmr.msra.gmra.mxu2 %v2721_v32  ;;  %v3311_v32 = vpop.permute.xlu2 %3310 }
 0x3d1   :  { %v3003_v7 = vpop.permute.xlu1 %3002  ;;  %v3314_v48 = vsel %vm588_vm1, %v3311_v32, 0  ;;  %v3027_v37 = vand.u32 4294901760, %v3026_v41  ;;  %v3207_v29 = vand.u32 4294901760, %v3206_v11 }
 0x3d2   :  { %v3023_v55 = vand.u32 4294901760, %v3003_v7  ;;  %v3331_v12 = vand.u32 4294901760, %v3314_v48 }
 0x3d4   :  { %v3050_v16 = vsub.f32 %v3003_v7, %v3023_v55  ;;  %3024 = vmatpush.msra.mxu2 %v3023_v55  ;;  %v3028_v7 = vsub.f32 %v3026_v41, %v3027_v37 }
 0x3d6   :  { %v3051_v46 = vand.u32 4294901760, %v3050_v16 }
 0x3d8   :  { %v3052_v60 = vsub.f32 %v3050_v16, %v3051_v46 }
 0x3d9   :  { %v1918_v6 = vpop.xlane.xlu0 %1917  ;;  %v3465_v40 = vpop.permute.xlu1 %3464 }
 0x3da   :  { %v3053_v36 = vand.u32 4294901760, %v3052_v60  ;;  %13188 = vrcp.f32 %v1918_v6  ;;  %v3358_v60 = vsub.f32 %v3314_v48, %v3331_v12  ;;  %v3029_v6 = vand.u32 4294901760, %v3028_v7  ;;  %v3463_v7 = vpop.permute.xlu2 %3462 }
 0x3dc   :  { %3054 = vmatpush.msra.mxu3 %v3053_v36 }
 0x3e0   :  { %v13189_v20 = vpop.eup %13188 }
 0x3e1   :  { %v1936_v38 = vmul.f32 %v13189_v20, %v13862_v44  ;;  %v3359_v20 = vand.u32 4294901760, %v3358_v60 }
 0x3e3   :  { %v2854_v39 = vsel %vm588_vm1, %v1936_v38, 0  ;;  %v3179_v38 = vand.u32 4294901760, %v3158_v3  ;;  %v3360_v32 = vsub.f32 %v3358_v60, %v3359_v20 }
 0x3e4   :  { %v2873_v15 = vand.u32 4294901760, %v2854_v39 }
 0x3e5   :  { %v3361_v4 = vand.u32 4294901760, %v3360_v32 }
 0x3e6   :  { %v2874_v21 = vsub.f32 %v2854_v39, %v2873_v15  ;;  %2904 = vmatmul.f32.vlgmr.msrb.gmra.mxu1 %v2873_v15 }
 0x3e7   :  { %3100 = vmatpush.msrb.mxu1 %v3023_v55 }
 0x3e8   :  { %2928 = vmatmul.f32.vlgmr.msrb.gmra.mxu2 %v2874_v21  ;;  %v2875_v23 = vand.u32 4294901760, %v2874_v21 }
 0x3e9   :  { %3126 = vmatpush.msrb.mxu2 %v3051_v46  ;;  %v3468_v46 = vsel %vm588_vm1, %v3465_v40, 0 }
 0x3ea   :  { %2952 = vmatmul.f32.vlgmr.msrb.gmra.mxu3 %v2875_v23  ;;  %v2876_v44 = vsub.f32 %v2874_v21, %v2875_v23  ;;  %v3485_v39 = vand.u32 4294901760, %v3468_v46  ;;  %v3619_v23 = vpop.permute.xlu1 %3618 }
 0x3eb   :  { %3148 = vmatpush.msrb.mxu3 %v3023_v55 }
 0x3ec   :  { %v2877_v31 = vand.u32 4294901760, %v2876_v44  ;;  %v3309_v36 = vpop.permute.xlu0 %3308  ;;  %v13920_v21 = vsub.f32 %v3468_v46, %v3485_v39 }
 0x3ed   :  { %v3312_v55 = vsel %vm588_vm1, %v3309_v36, 0 }
 0x3ee   :  { %2878 = vmatmul.f32.vlgmr.msrb.gmra.mxu0 %v2877_v31  ;;  %2998 = vmatmul.f32.vlgmr.msra.gmra.mxu1 %v2873_v15  ;;  %v13918_v48 = vand.u32 4294901760, %v3312_v55  ;;  %v3513_v44 = vand.u32 4294901760, %v13920_v21 }
 0x3ef   :  { %3077 = vmatpush.msrb.mxu0 %v3050_v16  ;;  %3208 = vmatpush.xpose.msra.mxu1 %v3207_v29  ;;  %v3180_v16 = vsub.f32 %v3158_v3, %v3179_v38 }
 0x3f0   :  { %3030 = vmatmul.f32.vlgmr.msra.gmra.mxu2 %v3029_v6  ;;  %v3514_v31 = vsub.f32 %v13920_v21, %v3513_v44 }
 0x3f1   :  { %3231 = vmatpush.xpose.msra.mxu2 %v13907_v22  ;;  %v3334_v22 = vsub.f32 %v3312_v55, %v13918_v48  ;;  %v3181_v11 = vand.u32 4294901760, %v3180_v16 }
 0x3f2   :  { %3056 = vmatmul.f32.vlgmr.msra.gmra.mxu3 %v3025_v27  ;;  %v3515_v40 = vand.u32 4294901760, %v3514_v31  ;;  %v3773_v46 = vpop.permute.xlu1 %3772 }
 0x3f3   :  { %3254 = vmatpush.xpose.msra.mxu3 %v3177_v30 }
 0x3f6   :  { %2976 = vmatmul.f32.vlgmr.msra.gmra.mxu0 %v2873_v15  ;;  %3104 = vmatmul.f32.vlgmr.msrb.gmra.mxu1 %v3027_v37  ;;  %v3622_v15 = vsel %vm588_vm1, %v3619_v23, 0  ;;  %v3335_v37 = vand.u32 4294901760, %v3334_v22 }
 0x3f7   :  { %3178 = vmatpush.xpose.msra.mxu0 %v3177_v30  ;;  %3302 = vmatpush.xpose.msrb.mxu1 %v3177_v30  ;;  %v3182_v30 = vsub.f32 %v3180_v16, %v3181_v11  ;;  %v3639_v29 = vand.u32 4294901760, %v3622_v15 }
 0x3f8   :  { %3128 = vmatmul.f32.vlgmr.msrb.gmra.mxu2 %v3025_v27 }
 0x3f9   :  { %3332 = vmatpush.xpose.msrb.mxu2 %v3331_v12  ;;  %v3183_v6 = vand.u32 4294901760, %v3182_v30  ;;  %v3666_v36 = vsub.f32 %v3622_v15, %v3639_v29  ;;  %v13946_v30 = vpop.f32.mrf.mxu1 }
 0x3fa   :  { %3150 = vmatmul.f32.vlgmr.msrb.gmra.mxu3 %v3025_v27  ;;  %v3336_v27 = vsub.f32 %v3334_v22, %v3335_v37 }
 0x3fb   :  { %3362 = vmatpush.xpose.msrb.mxu3 %v3361_v4  ;;  %v3667_v55 = vand.u32 4294901760, %v3666_v36 }
 0x3fc   :  { %v3337_v3 = vand.u32 4294901760, %v3336_v27 }
 0x3fe   :  { %3080 = vmatmul.f32.vlgmr.msrb.gmra.mxu0 %v3026_v41  ;;  %3210 = vmatmul.f32.vlgmr.msra.gmra.mxu1 %v3179_v38  ;;  %v3617_v41 = vpop.permute.xlu2 %3616 }
 0x3ff   :  { %3280 = vmatpush.xpose.msrb.mxu0 %v3205_v9  ;;  %3408 = vmatpush.xpose.msra.mxu1 %v3331_v12  ;;  %v3466_v9 = vsel %vm588_vm1, %v3463_v7, 0 }
 0x400   :  { %3234 = vmatmul.f32.vlgmr.msra.gmra.mxu2 %v3180_v16  ;;  %v13931_v32 = vand.u32 4294901760, %v3466_v9  ;;  %v3668_v16 = vsub.f32 %v3666_v36, %v3667_v55 }
 0x401   :  { %3434 = vmatpush.xpose.msra.mxu2 %v3359_v20  ;;  %v3776_v20 = vsel %vm588_vm1, %v3773_v46, 0 }
 0x402   :  { %3258 = vmatmul.f32.vlgmr.msra.gmra.mxu3 %v3181_v11  ;;  %v13933_v4 = vand.u32 4294901760, %v3776_v20  ;;  %v3669_v23 = vand.u32 4294901760, %v3668_v16 }
 0x403   :  { %3456 = vmatpush.xpose.msra.mxu3 %v3331_v12  ;;  %v3620_v12 = vsel %vm588_vm1, %v3617_v41, 0 }
 0x404   :  { %v13940_v11 = vsub.f32 %v3776_v20, %v13933_v4  ;;  %v13967_v20 = vpop.f32.mrf.mxu1 }
 0x406   :  { %3184 = vmatmul.f32.vlgmr.msra.gmra.mxu0 %v3183_v6  ;;  %3304 = vmatmul.f32.vlgmr.msrb.gmra.mxu1 %v3179_v38  ;;  %v3927_v15 = vpop.permute.xlu2 %3926  ;;  %v13952_v6 = vpop.f32.mrf.mxu2 }
 0x407   :  { %3385 = vmatpush.xpose.msra.mxu0 %v3358_v60  ;;  %3516 = vmatpush.xpose.msrb.mxu1 %v3515_v40  ;;  %v13935_v60 = vand.u32 4294901760, %v3620_v12  ;;  %v3930_v27 = vsel %vm588_vm1, %v3927_v15, 0  ;;  %v13954_v40 = vpop.f32.mrf.mxu0 }
 0x408   :  { %3338 = vmatmul.f32.vlgmr.msrb.gmra.mxu2 %v3337_v3  ;;  %v13956_v3 = vand.u32 4294901760, %v3930_v27 }
 0x409   :  { %3539 = vmatpush.xpose.msrb.mxu2 %v13920_v21  ;;  %v3488_v21 = vsub.f32 %v3466_v9, %v13931_v32  ;;  %v13943_v7 = vsub.f32 %v3620_v12, %v13935_v60 }
 0x40a   :  { %3364 = vmatmul.f32.vlgmr.msrb.gmra.mxu3 %v13918_v48 }
 0x40b   :  { %3562 = vmatpush.xpose.msrb.mxu3 %v3485_v39  ;;  %v3643_v31 = vand.u32 4294901760, %v13943_v7 }
 0x40d   :  { %v3644_v41 = vsub.f32 %v13943_v7, %v3643_v31 }
 0x40e   :  { %3282 = vmatmul.f32.vlgmr.msrb.gmra.mxu0 %v3179_v38  ;;  %3412 = vmatmul.f32.vlgmr.msra.gmra.mxu1 %v3335_v37  ;;  %v3489_v38 = vand.u32 4294901760, %v3488_v21  ;;  %v3771_v37 = vpop.permute.xlu0 %3770 }
 0x40f   :  { %3486 = vmatpush.xpose.msrb.mxu0 %v3485_v39  ;;  %3610 = vmatpush.xpose.msra.mxu1 %v3485_v39  ;;  %v16022_v39 = vand.u32 4294901760, %v13940_v11  ;;  %v3645_v16 = vand.u32 4294901760, %v3644_v41  ;;  %v3774_v15 = vsel %vm588_vm1, %v3771_v37, 0 }
 0x410   :  { %3436 = vmatmul.f32.vlgmr.msra.gmra.mxu2 %v13918_v48 }
 0x411   :  { %3640 = vmatpush.xpose.msra.mxu2 %v3639_v29  ;;  %v3822_v46 = vsub.f32 %v13940_v11, %v16022_v39 }
 0x412   :  { %3458 = vmatmul.f32.vlgmr.msra.gmra.mxu3 %v13918_v48  ;;  %v3490_v48 = vsub.f32 %v3488_v21, %v3489_v38 }
 0x413   :  { %3670 = vmatpush.xpose.msra.mxu3 %v3669_v23  ;;  %v3823_v12 = vand.u32 4294901760, %v3822_v46  ;;  %v3925_v23 = vpop.permute.xlu1 %3924 }
 0x414   :  { %v3491_v9 = vand.u32 4294901760, %v3490_v48  ;;  %v3928_v46 = vsel %vm588_vm1, %v3925_v23, 0 }
 0x416   :  { %3388 = vmatmul.f32.vlgmr.msra.gmra.mxu0 %v3334_v22  ;;  %3518 = vmatmul.f32.vlgmr.msrb.gmra.mxu1 %v13931_v32  ;;  %v13962_v22 = vpop.f32.mrf.mxu3 }
 0x417   :  { %3588 = vmatpush.xpose.msra.mxu0 %v3513_v44  ;;  %3716 = vmatpush.xpose.msrb.mxu1 %v3639_v29  ;;  %v13965_v44 = vsub.f32 %v3930_v27, %v13956_v3 }
 0x418   :  { %3542 = vmatmul.f32.vlgmr.msrb.gmra.mxu2 %v3488_v21  ;;  %v13970_v21 = vpop.f32.mrf.mxu2 }
 0x419   :  { %3742 = vmatpush.xpose.msrb.mxu2 %v3667_v55  ;;  %v4081_v55 = vpop.permute.xlu0 %4080 }
 0x41a   :  { %3566 = vmatmul.f32.vlgmr.msrb.gmra.mxu3 %v3489_v38  ;;  %v13975_v38 = vpop.f32.mrf.mxu0  ;;  %v4084_v27 = vsel %vm588_vm1, %v4081_v55, 0 }
 0x41b   :  { %3764 = vmatpush.xpose.msrb.mxu3 %v3639_v29  ;;  %v3975_v29 = vand.u32 4294901760, %v13965_v44  ;;  %v13988_v37 = vand.u32 4294901760, %v4084_v27 }
 0x41d   :  { %v3976_v41 = vsub.f32 %v13965_v44, %v3975_v29  ;;  %v14000_v39 = vsub.f32 %v4084_v27, %v13988_v37 }
 0x41e   :  { %3492 = vmatmul.f32.vlgmr.msrb.gmra.mxu0 %v3491_v9  ;;  %3612 = vmatmul.f32.vlgmr.msra.gmra.mxu1 %v13931_v32  ;;  %v13979_v48 = vpop.f32.mrf.mxu3  ;;  %v13986_v9 = vpop.f32.mrf.mxu1 }
 0x41f   :  { %3693 = vmatpush.xpose.msrb.mxu0 %v3666_v36  ;;  %3824 = vmatpush.xpose.msra.mxu1 %v3823_v12  ;;  %v13983_v36 = vand.u32 4294901760, %v3774_v15  ;;  %v13990_v12 = vand.u32 4294901760, %v3928_v46  ;;  %v3977_v55 = vand.u32 4294901760, %v3976_v41  ;;  %v16031_v19 = vand.u32 4294901760, %v14000_v39 }
 0x420   :  { %3646 = vmatmul.f32.vlgmr.msra.gmra.mxu2 %v3645_v16  ;;  %v13997_v23 = vpop.f32.mrf.mxu2 }
 0x421   :  { %3847 = vmatpush.xpose.msra.mxu2 %v13940_v11  ;;  %v3796_v16 = vsub.f32 %v3774_v15, %v13983_v36  ;;  %v4130_v5 = vsub.f32 %v14000_v39, %v16031_v19 }
 0x422   :  { %3672 = vmatmul.f32.vlgmr.msra.gmra.mxu3 %v13935_v60  ;;  %v14003_v25 = vpop.f32.mrf.mxu0 }
 0x423   :  { %3870 = vmatpush.xpose.msra.mxu3 %v13933_v4 }
 0x426   :  { %3590 = vmatmul.f32.vlgmr.msra.gmra.mxu0 %v13931_v32  ;;  %3720 = vmatmul.f32.vlgmr.msrb.gmra.mxu1 %v3643_v31  ;;  %v14006_v32 = vsub.f32 %v3928_v46, %v13990_v12  ;;  %v3797_v31 = vand.u32 4294901760, %v3796_v16  ;;  %v14009_v15 = vpop.f32.mrf.mxu3  ;;  %v14011_v41 = vpop.f32.mrf.mxu1  ;;  %v16083_v46 = vand.u32 4294901760, %v13940_v11 }
 0x427   :  { %3794 = vmatpush.xpose.msra.mxu0 %v13933_v4  ;;  %3918 = vmatpush.xpose.msrb.mxu1 %v13933_v4  ;;  %v4235_v4 = vpop.permute.xlu1 %4234 }
 0x428   :  { %3744 = vmatmul.f32.vlgmr.msrb.gmra.mxu2 %v13935_v60  ;;  %v3951_v27 = vand.u32 4294901760, %v14006_v32  ;;  %v4238_v35 = vsel %vm588_vm1, %v4235_v4, 0  ;;  %v14029_v57 = vpop.f32.mrf.mxu2 }
 0x429   :  { %3948 = vmatpush.xpose.msrb.mxu2 %v13956_v3  ;;  %v14021_v8 = vand.u32 4294901760, %v4238_v35 }
 0x42a   :  { %3766 = vmatmul.f32.vlgmr.msrb.gmra.mxu3 %v13935_v60  ;;  %v4079_v60 = vpop.permute.xlu2 %4078  ;;  %v3952_v4 = vsub.f32 %v14006_v32, %v3951_v27 }
 0x42b   :  { %3978 = vmatpush.xpose.msrb.mxu3 %v3977_v55  ;;  %v3798_v55 = vsub.f32 %v3796_v16, %v3797_v31  ;;  %v4082_v19 = vsel %vm588_vm1, %v4079_v60, 0 }
 0x42c   :  { %v3953_v1 = vand.u32 4294901760, %v3952_v4  ;;  %v4103_v4 = vand.u32 4294901760, %v4082_v19 }
 0x42d   :  { %v3799_v11 = vand.u32 4294901760, %v3798_v55 }
 0x42e   :  { %3696 = vmatmul.f32.vlgmr.msrb.gmra.mxu0 %v13943_v7  ;;  %3826 = vmatmul.f32.vlgmr.msra.gmra.mxu1 %v13983_v36  ;;  %v14027_v7 = vpop.f32.mrf.mxu0  ;;  %v14033_v53 = vpop.f32.mrf.mxu3 }
 0x42f   :  { %3896 = vmatpush.xpose.msrb.mxu0 %v16083_v46  ;;  %4024 = vmatpush.xpose.msra.mxu1 %v13956_v3  ;;  %v4282_v46 = vsub.f32 %v4238_v35, %v14021_v8 }
 0x430   :  { %3850 = vmatmul.f32.vlgmr.msra.gmra.mxu2 %v3796_v16  ;;  %v4131_v16 = vand.u32 4294901760, %v4130_v5 }
 0x431   :  { %4050 = vmatpush.xpose.msra.mxu2 %v3975_v29  ;;  %v14036_v29 = vpop.f32.mrf.mxu1 }
 0x432   :  { %3874 = vmatmul.f32.vlgmr.msra.gmra.mxu3 %v3797_v31  ;;  %16084 = vst [vmem:[#allocation25_spill] sm:$0xff] %v14036_v29  ;;  %v4233_v31 = vpop.permute.xlu0 %4232  ;;  %v4483_v35 = vpop.permute.xlu2 %4482 }
 0x433   :  { %4072 = vmatpush.xpose.msra.mxu3 %v13956_v3  ;;  %v4283_v3 = vand.u32 4294901760, %v4282_v46  ;;  %v4236_v5 = vsel %vm588_vm1, %v4233_v31, 0  ;;  %v14043_v55 = vpop.f32.mrf.mxu2  ;;  %v4104_v31 = vsub.f32 %v4082_v19, %v4103_v4 }
 0x434   :  { %v4257_v60 = vand.u32 4294901760, %v4236_v5 }
 0x436   :  { %3800 = vmatmul.f32.vlgmr.msra.gmra.mxu0 %v3799_v11  ;;  %3920 = vmatmul.f32.vlgmr.msrb.gmra.mxu1 %v13983_v36  ;;  %v14046_v11 = vpop.f32.mrf.mxu0  ;;  %v4258_v29 = vsub.f32 %v4236_v5, %v4257_v60 }
 0x437   :  { %4001 = vmatpush.xpose.msra.mxu0 %v13965_v44  ;;  %4132 = vmatpush.xpose.msrb.mxu1 %v4131_v16  ;;  %16085 = vst [vmem:[#allocation26_spill] sm:$0xff] %v14046_v11  ;;  %v4503_v44 = vand.u32 4294901760, %v4483_v35  ;;  %v4284_v16 = vsub.f32 %v4282_v46, %v4283_v3  ;;  %v4105_v11 = vand.u32 4294901760, %v4104_v31 }
 0x438   :  { %3954 = vmatmul.f32.vlgmr.msrb.gmra.mxu2 %v3953_v1  ;;  %v14048_v1 = vpop.f32.mrf.mxu3 }
 0x439   :  { %4155 = vmatpush.xpose.msrb.mxu2 %v14000_v39  ;;  %16086 = vst [vmem:[#allocation27_spill] sm:$0xff] %v14048_v1  ;;  %v14051_v61 = vpop.f32.mrf.mxu1  ;;  %v4530_v52 = vsub.f32 %v4483_v35, %v4503_v44  ;;  %v4285_v50 = vand.u32 4294901760, %v4284_v16  ;;  %v4259_v1 = vand.u32 4294901760, %v4258_v29  ;;  %v16092_v35 = vand.u32 4294901760, %v14000_v39 }
 0x43a   :  { %3980 = vmatmul.f32.vlgmr.msrb.gmra.mxu3 %v13990_v12  ;;  %16087 = vst [vmem:[#allocation28_spill] sm:$0xff] %v14051_v61 }
 0x43b   :  { %4178 = vmatpush.xpose.msrb.mxu3 %v13988_v37  ;;  %v14060_v61 = vpop.f32.mrf.mxu2  ;;  %v4260_v5 = vsub.f32 %v4258_v29, %v4259_v1 }
 0x43c   :  { %16089 = vst [vmem:[#allocation30_spill] sm:$0xff] %v14060_v61 }
 0x43d   :  { %v4261_v61 = vand.u32 4294901760, %v4260_v5 }
 0x43e   :  { %3898 = vmatmul.f32.vlgmr.msrb.gmra.mxu0 %v13983_v36  ;;  %4028 = vmatmul.f32.vlgmr.msra.gmra.mxu1 %v3951_v27  ;;  %v14058_v36 = vpop.f32.mrf.mxu0  ;;  %v4531_v27 = vand.u32 4294901760, %v4530_v52 }
 0x43f   :  { %4102 = vmatpush.xpose.msrb.mxu0 %v13988_v37  ;;  %4226 = vmatpush.xpose.msra.mxu1 %v13988_v37  ;;  %16088 = vst [vmem:[#allocation29_spill] sm:$0xff] %v14058_v36 }
 0x440   :  { %4052 = vmatmul.f32.vlgmr.msra.gmra.mxu2 %v13990_v12  ;;  %v14063_v19 = vpop.f32.mrf.mxu3 }
 0x441   :  { %4256 = vmatpush.xpose.msra.mxu2 %v14021_v8  ;;  %16090 = vst [vmem:[#allocation31_spill] sm:$0xff] %v14063_v19  ;;  %v14065_v37 = vpop.f32.mrf.mxu1 }
 0x442   :  { %4074 = vmatmul.f32.vlgmr.msra.gmra.mxu3 %v13990_v12  ;;  %16091 = vst [vmem:[#allocation32_spill] sm:$0xff] %v14065_v37  ;;  %v4532_v12 = vsub.f32 %v4530_v52, %v4531_v27 }
 0x443   :  { %4286 = vmatpush.xpose.msra.mxu3 %v4285_v50  ;;  %v4106_v50 = vsub.f32 %v4104_v31, %v4105_v11  ;;  %v14073_v19 = vpop.f32.mrf.mxu2 }
 0x444   :  { %16094 = vst [vmem:[#allocation34_spill] sm:$0xff] %v14073_v19 }
 0x445   :  { %v4107_v16 = vand.u32 4294901760, %v4106_v50 }
 0x446   :  { %4004 = vmatmul.f32.vlgmr.msra.gmra.mxu0 %v14006_v32  ;;  %4134 = vmatmul.f32.vlgmr.msrb.gmra.mxu1 %v4103_v4  ;;  %v4533_v32 = vand.u32 4294901760, %v4532_v12  ;;  %v14071_v36 = vpop.f32.mrf.mxu0 }
 0x447   :  { %4204 = vmatpush.xpose.msra.mxu0 %v16092_v35  ;;  %4332 = vmatpush.xpose.msrb.mxu1 %v14021_v8  ;;  %16093 = vst [vmem:[#allocation33_spill] sm:$0xff] %v14071_v36 }
 0x448   :  { %4158 = vmatmul.f32.vlgmr.msrb.gmra.mxu2 %v4104_v31  ;;  %v14075_v39 = vpop.f32.mrf.mxu3 }
 0x449   :  { %4358 = vmatpush.xpose.msrb.mxu2 %v4283_v3  ;;  %16095 = vst [vmem:[#allocation35_spill] sm:$0xff] %v14075_v39  ;;  %v14077_v31 = vpop.f32.mrf.mxu1 }
 0x44a   :  { %4182 = vmatmul.f32.vlgmr.msrb.gmra.mxu3 %v4105_v11  ;;  %16096 = vst [vmem:[#allocation36_spill] sm:$0xff] %v14077_v31 }
 0x44b   :  { %4380 = vmatpush.xpose.msrb.mxu3 %v14021_v8  ;;  %v14081_v3 = vpop.f32.mrf.mxu2 }
 0x44c   :  { %16098 = vst [vmem:[#allocation38_spill] sm:$0xff] %v14081_v3 }
 0x44e   :  { %4108 = vmatmul.f32.vlgmr.msrb.gmra.mxu0 %v4107_v16  ;;  %4228 = vmatmul.f32.vlgmr.msra.gmra.mxu1 %v4103_v4  ;;  %v14079_v8 = vpop.f32.mrf.mxu0 }
 0x44f   :  { %4309 = vmatpush.xpose.msrb.mxu0 %v4282_v46  ;;  %4534 = vmatpush.msra.mxu1 %v4533_v32  ;;  %16097 = vst [vmem:[#allocation37_spill] sm:$0xff] %v14079_v8 }
 0x450   :  { %4262 = vmatmul.f32.vlgmr.msra.gmra.mxu2 %v4261_v61  ;;  %v14083_v46 = vpop.f32.mrf.mxu3 }
 0x451   :  { %4557 = vmatpush.msra.mxu2 %v4530_v52  ;;  %16099 = vst [vmem:[#allocation39_spill] sm:$0xff] %v14083_v46  ;;  %v14085_v61 = vpop.f32.mrf.mxu1 }
 0x452   :  { %4288 = vmatmul.f32.vlgmr.msra.gmra.mxu3 %v4257_v60  ;;  %16100 = vst [vmem:[#allocation40_spill] sm:$0xff] %v14085_v61 }
 0x453   :  { %4580 = vmatpush.msra.mxu3 %v4503_v44  ;;  %v14089_v52 = vpop.f32.mrf.mxu2 }
 0x454   :  { %16102 = vst [vmem:[#allocation42_spill] sm:$0xff] %v14089_v52 }
 0x456   :  { %4206 = vmatmul.f32.vlgmr.msra.gmra.mxu0 %v4103_v4  ;;  %4336 = vmatmul.f32.vlgmr.msrb.gmra.mxu1 %v4259_v1  ;;  %v14087_v11 = vpop.f32.mrf.mxu0 }
 0x457   :  { %4504 = vmatpush.msra.mxu0 %v4503_v44  ;;  %4628 = vmatpush.msrb.mxu1 %v4503_v44  ;;  %16101 = vst [vmem:[#allocation41_spill] sm:$0xff] %v14087_v11 }
 0x458   :  { %4360 = vmatmul.f32.vlgmr.msrb.gmra.mxu2 %v4257_v60  ;;  %v14093_v1 = vpop.f32.mrf.mxu3 }
 0x459   :  { %16104 = vst [vmem:[#allocation44_spill] sm:$0xff] %v14093_v1 }
 0x45a   :  { %4382 = vmatmul.f32.vlgmr.msrb.gmra.mxu3 %v4257_v60 }
 0x45e   :  { %4312 = vmatmul.f32.vlgmr.msrb.gmra.mxu0 %v4258_v29 }
 0x45f   :  { %4606 = vmatpush.msrb.mxu0 %v4531_v27 }
 0x463   :  { %v14091_v4 = vpop.f32.mrf.mxu1 }
 0x464   :  { %16103 = vst [vmem:[#allocation43_spill] sm:$0xff] %v14091_v4 }
 0x46b   :  { %v14095_v44 = vpop.f32.mrf.mxu0  ;;  %v14097_v35 = vpop.f32.mrf.mxu2 }
 0x46c   :  { %16105 = vst [vmem:[#allocation45_spill] sm:$0xff] %v14095_v44  ;;  %v14099_v50 = vpop.f32.mrf.mxu1 }
 0x46d   :  { %16106 = vst [vmem:[#allocation46_spill] sm:$0xff] %v14097_v35  ;;  %v14101_v60 = vpop.f32.mrf.mxu3 }
 0x46e   :  { %16107 = vst [vmem:[#allocation47_spill] sm:$0xff] %v14099_v50 }
 0x46f   :  { %16108 = vst [vmem:[#allocation48_spill] sm:$0xff] %v14101_v60 }
 0x473   :  { %v14103_v12 = vpop.f32.mrf.mxu0  ;;  %v14105_v29 = vpop.f32.mrf.mxu2 }
 0x474   :  { %16109 = vst [vmem:[#allocation49_spill] sm:$0xff] %v14103_v12  ;;  %v14107_v27 = vpop.f32.mrf.mxu1 }
 0x475   :  { %16110 = vst [vmem:[#allocation50_spill] sm:$0xff] %v14105_v29  ;;  %v14109_v5 = vpop.f32.mrf.mxu3 }
 0x476   :  { %16111 = vst [vmem:[#allocation51_spill] sm:$0xff] %v14107_v27 }
 0x477   :  { %16112 = vst [vmem:[#allocation52_spill] sm:$0xff] %v14109_v5 }
 0x47b   :  { %v14111_v16 = vpop.f32.mrf.mxu0  ;;  %v14113_v32 = vpop.f32.mrf.mxu2 }
 0x47c   :  { %16113 = vst [vmem:[#allocation53_spill] sm:$0xff] %v14111_v16  ;;  %v3211_v1 = vpop.f32.mrf.mxu1 }
 0x47d   :  { %16114 = vst [vmem:[#allocation54_spill] sm:$0xff] %v14113_v32  ;;  %v14115_v52 = vpop.f32.mrf.mxu3 }
 0x47e   :  { %16115 = vst [vmem:[#allocation55_spill] sm:$0xff] %v14115_v52 }
 0x483   :  { %v3185_v35 = vpop.f32.mrf.mxu0  ;;  %v3235_v4 = vpop.f32.mrf.mxu2 }
 0x484   :  { %v3212_v50 = vadd.f32 %v3211_v1, %v3185_v35  ;;  %v3305_v44 = vpop.f32.mrf.mxu1 }
 0x485   :  { %v3259_v60 = vpop.f32.mrf.mxu3 }
 0x486   :  { %v3236_v61 = vadd.f32 %v3235_v4, %v3212_v50 }
 0x488   :  { %v3260_v12 = vadd.f32 %v3259_v60, %v3236_v61 }
 0x48b   :  { %v3283_v31 = vpop.f32.mrf.mxu0  ;;  %v3339_v29 = vpop.f32.mrf.mxu2 }
 0x48c   :  { %v3284_v11 = vadd.f32 %v3283_v31, %v3260_v12  ;;  %v3413_v27 = vpop.f32.mrf.mxu1 }
 0x48d   :  { %v3365_v8 = vpop.f32.mrf.mxu3 }
 0x48e   :  { %v3306_v5 = vadd.f32 %v3305_v44, %v3284_v11  ;;  %v3366_v32 = vadd.f32 %v3365_v8, %v3339_v29 }
 0x490   :  { %v14119_v16 = vsel %vm13701_vm3, %v3306_v5, -1e+30 }
 0x491   :  { %v4394_v52 = vsel %vm588_vm1, %v14119_v16, -inf }
 0x492   :  { %4395 = vmax.xlane.f32.xlu2 %v4394_v52 }
 0x493   :  { %v3389_v1 = vpop.f32.mrf.mxu0  ;;  %v3437_v35 = vpop.f32.mrf.mxu2 }
 0x494   :  { %v3390_v46 = vadd.f32 %v3389_v1, %v3366_v32  ;;  %v3519_v4 = vpop.f32.mrf.mxu1 }
 0x495   :  { %v3459_v61 = vpop.f32.mrf.mxu3 }
 0x496   :  { %v3414_v50 = vadd.f32 %v3413_v27, %v3390_v46 }
 0x498   :  { %v3438_v60 = vadd.f32 %v3437_v35, %v3414_v50 }
 0x49a   :  { %v3460_v31 = vadd.f32 %v3459_v61, %v3438_v60 }
 0x49b   :  { %v3493_v12 = vpop.f32.mrf.mxu0  ;;  %v3543_v3 = vpop.f32.mrf.mxu2 }
 0x49c   :  { %v3520_v11 = vadd.f32 %v3519_v4, %v3493_v12  ;;  %v3613_v44 = vpop.f32.mrf.mxu1  ;;  %v14125_v5 = vsel %vm13713_vm5, %v3460_v31, -1e+30 }
 0x49d   :  { %v3567_v43 = vpop.f32.mrf.mxu3  ;;  %v4397_v8 = vsel %vm588_vm1, %v14125_v5, -inf }
 0x49e   :  { %v3544_v52 = vadd.f32 %v3543_v3, %v3520_v11  ;;  %4398 = vmax.xlane.f32.xlu1 %v4397_v8 }
 0x4a0   :  { %v3568_v29 = vadd.f32 %v3567_v43, %v3544_v52 }
 0x4a3   :  { %v3591_v32 = vpop.f32.mrf.mxu0  ;;  %v3647_v1 = vpop.f32.mrf.mxu2 }
 0x4a4   :  { %v3592_v46 = vadd.f32 %v3591_v32, %v3568_v29  ;;  %v3721_v27 = vpop.f32.mrf.mxu1 }
 0x4a5   :  { %v3673_v35 = vpop.f32.mrf.mxu3 }
 0x4a6   :  { %v3614_v61 = vadd.f32 %v3613_v44, %v3592_v46  ;;  %v3674_v54 = vadd.f32 %v3673_v35, %v3647_v1 }
 0x4a8   :  { %v14131_v4 = vsel %vm13725_vm7, %v3614_v61, -1e+30 }
 0x4a9   :  { %v4400_v50 = vsel %vm588_vm1, %v14131_v4, -inf }
 0x4aa   :  { %4786 = vrot.lane.b32.xlu2 %v13538_v13, %s13327_s27  ;;  %4401 = vmax.xlane.f32.xlu0 %v4400_v50 }
 0x4ab   :  { %v3697_v3 = vpop.f32.mrf.mxu0  ;;  %v3745_v60 = vpop.f32.mrf.mxu2 }
 0x4ac   :  { %v3827_v43 = vpop.f32.mrf.mxu1  ;;  %v3698_v19 = vadd.f32 %v3697_v3, %v3674_v54 }
 0x4ad   :  { %v3767_v31 = vpop.f32.mrf.mxu3 }
 0x4b3   :  { %v3801_v12 = vpop.f32.mrf.mxu0  ;;  %v3851_v11 = vpop.f32.mrf.mxu2 }
 0x4b4   :  { %v3828_v8 = vadd.f32 %v3827_v43, %v3801_v12  ;;  %v3921_v29 = vpop.f32.mrf.mxu1  ;;  %v3722_v12 = vadd.f32 %v3721_v27, %v3698_v19 }
 0x4b5   :  { %v3875_v52 = vpop.f32.mrf.mxu3 }
 0x4b6   :  { %v3852_v44 = vadd.f32 %v3851_v11, %v3828_v8  ;;  %v3746_v1 = vadd.f32 %v3745_v60, %v3722_v12 }
 0x4b8   :  { %v3876_v32 = vadd.f32 %v3875_v52, %v3852_v44  ;;  %v3768_v35 = vadd.f32 %v3767_v31, %v3746_v1 }
 0x4bb   :  { %v3899_v46 = vpop.f32.mrf.mxu0  ;;  %v3955_v61 = vpop.f32.mrf.mxu2 }
 0x4bc   :  { %v3900_v18 = vadd.f32 %v3899_v46, %v3876_v32  ;;  %v4029_v36 = vpop.f32.mrf.mxu1 }
 0x4bd   :  { %v3981_v39 = vpop.f32.mrf.mxu3 }
 0x4be   :  { %4634 = vrot.lane.b32.xlu0 %v13533_v59, %s13327_s27  ;;  %v3922_v50 = vadd.f32 %v3921_v29, %v3900_v18  ;;  %v14147_v29 = vsel %vm13755_vm12, %v3768_v35, -1e+30 }
 0x4bf   :  { %v4403_v19 = vsel %vm588_vm1, %v14147_v29, -inf }
 0x4c0   :  { %v14141_v37 = vsel %vm13739_vm9, %v3922_v50, -1e+30  ;;  %v3982_v50 = vadd.f32 %v3981_v39, %v3955_v61 }
 0x4c1   :  { %v4406_v43 = vsel %vm588_vm1, %v14141_v37, -inf }
 0x4c2   :  { %4407 = vmax.xlane.f32.xlu1 %v4406_v43 }
 0x4c3   :  { %v4005_v11 = vpop.f32.mrf.mxu0  ;;  %v4053_v8 = vpop.f32.mrf.mxu2 }
 0x4c4   :  { %v4135_v44 = vpop.f32.mrf.mxu1  ;;  %v4006_v43 = vadd.f32 %v4005_v11, %v3982_v50 }
 0x4c5   :  { %v4075_v52 = vpop.f32.mrf.mxu3 }
 0x4cb   :  { %v4109_v32 = vpop.f32.mrf.mxu0  ;;  %v4159_v18 = vpop.f32.mrf.mxu2 }
 0x4cc   :  { %v4136_v46 = vadd.f32 %v4135_v44, %v4109_v32  ;;  %v4229_v31 = vpop.f32.mrf.mxu1  ;;  %v4030_v44 = vadd.f32 %v4029_v36, %v4006_v43 }
 0x4cd   :  { %v4183_v54 = vpop.f32.mrf.mxu3 }
 0x4ce   :  { %v4160_v3 = vadd.f32 %v4159_v18, %v4136_v46  ;;  %v4054_v18 = vadd.f32 %v4053_v8, %v4030_v44 }
 0x4d0   :  { %v4184_v2 = vadd.f32 %v4183_v54, %v4160_v3  ;;  %v4076_v11 = vadd.f32 %v4075_v52, %v4054_v18 }
 0x4d2   :  { %v14159_v36 = vsel %vm13783_vm4, %v4076_v11, -1e+30 }
 0x4d3   :  { %4404 = vmax.xlane.f32.xlu2 %v4403_v19  ;;  %v4207_v27 = vpop.f32.mrf.mxu0  ;;  %v4263_v46 = vpop.f32.mrf.mxu2  ;;  %v4409_v43 = vsel %vm588_vm1, %v14159_v36, -inf }
 0x4d4   :  { %v4208_v60 = vadd.f32 %v4207_v27, %v4184_v2  ;;  %v4337_v3 = vpop.f32.mrf.mxu1 }
 0x4d5   :  { %v4289_v1 = vpop.f32.mrf.mxu3 }
 0x4d6   :  { %v4230_v12 = vadd.f32 %v4229_v31, %v4208_v60  ;;  %v4290_v61 = vadd.f32 %v4289_v1, %v4263_v46 }
 0x4d8   :  { %v14153_v32 = vsel %vm13765_vm13, %v4230_v12, -1e+30 }
 0x4d9   :  { %v4412_v39 = vsel %vm588_vm1, %v14153_v32, -inf }
 0x4da   :  { %4413 = vmax.xlane.f32.xlu1 %v4412_v39 }
 0x4db   :  { %v4313_v35 = vpop.f32.mrf.mxu0  ;;  %v4361_v50 = vpop.f32.mrf.mxu2 }
 0x4dc   :  { %v4314_v54 = vadd.f32 %v4313_v35, %v4290_v61 }
 0x4dd   :  { %v4383_v27 = vpop.f32.mrf.mxu3 }
 0x4de   :  { %v4338_v2 = vadd.f32 %v4337_v3, %v4314_v54 }
 0x4e0   :  { %v4362_v19 = vadd.f32 %v4361_v50, %v4338_v2 }
 0x4e2   :  { %v4384_v60 = vadd.f32 %v4383_v27, %v4362_v19 }
 0x4e4   :  { %v14165_v31 = vsel %vm13779_vm2, %v4384_v60, -1e+30 }
 0x4e5   :  { %v4415_v8 = vsel %vm588_vm1, %v14165_v31, -inf }
 0x4e8   :  { %4410 = vmax.xlane.f32.xlu0 %v4409_v43 }
 0x4f0   :  { %4416 = vmax.xlane.f32.xlu0 %v4415_v8 }
 0x504   :  { %5090 = vrot.lane.b32.xlu0 %v13548_v33, %s13327_s27 }
 0x505   :  { %v4396_v52 = vpop.xlane.xlu2 %4395 }
 0x506   :  { %v4418_v12 = vsub.f32 %v14119_v16, %v4396_v52 }
 0x508   :  { %v4426_v1 = vmul.f32 1.442695, %v4418_v12 }
 0x50a   :  { %13190 = vpow2.f32 %v4426_v1 }
 0x50d   :  { %v4787_v8 = vpop.permute.xlu2 %4786 }
 0x510   :  { %v14172_v44 = vpop.eup %13190 }
 0x511   :  { %v4399_v46 = vpop.xlane.xlu1 %4398  ;;  %v4442_v39 = vsel %vm588_vm1, %v14172_v44, 0.0 }
 0x512   :  { %v4419_v61 = vsub.f32 %v14125_v5, %v4399_v46  ;;  %4443 = vadd.xlane.f32.xlu2 %v4442_v39 }
 0x514   :  { %v4428_v35 = vmul.f32 1.442695, %v4419_v61 }
 0x516   :  { %13192 = vpow2.f32 %v4428_v35 }
 0x51c   :  { %v14177_v18 = vpop.eup %13192 }
 0x51d   :  { %v4402_v54 = vpop.xlane.xlu0 %4401  ;;  %v4445_v3 = vsel %vm588_vm1, %v14177_v18, 0.0 }
 0x51e   :  { %v4420_v16 = vsub.f32 %v14131_v4, %v4402_v54  ;;  %4446 = vadd.xlane.f32.xlu1 %v4445_v3 }
 0x520   :  { %v4430_v11 = vmul.f32 1.442695, %v4420_v16 }
 0x522   :  { %13194 = vpow2.f32 %v4430_v11 }
 0x528   :  { %v14182_v2 = vpop.eup %13194 }
 0x529   :  { %v4448_v50 = vsel %vm588_vm1, %v14182_v2, 0.0 }
 0x52a   :  { %5242 = vrot.lane.b32.xlu2 %v13553_v49, %s13327_s27  ;;  %4449 = vadd.xlane.f32.xlu1 %v4448_v50 }
 0x530   :  { %v4635_v5 = vpop.permute.xlu0 %4634 }
 0x531   :  { %v14188_v19 = vand.u32 4294901760, %v4635_v5 }
 0x533   :  { %v14191_v27 = vsub.f32 %v4635_v5, %v14188_v19  ;;  %4656 = vmatpush.msrb.mxu2 %v14188_v19 }
 0x535   :  { %v4683_v4 = vand.u32 4294901760, %v14191_v27  ;;  %v4408_v52 = vpop.xlane.xlu1 %4407 }
 0x536   :  { %v4422_v12 = vsub.f32 %v14141_v37, %v4408_v52 }
 0x537   :  { %v4684_v43 = vsub.f32 %v14191_v27, %v4683_v4 }
 0x538   :  { %v4434_v1 = vmul.f32 1.442695, %v4422_v12  ;;  %v4807_v12 = vand.u32 4294901760, %v4787_v8 }
 0x539   :  { %v4685_v60 = vand.u32 4294901760, %v4684_v43 }
 0x53a   :  { %13196 = vpow2.f32 %v4434_v1 }
 0x53b   :  { %4686 = vmatpush.msrb.mxu3 %v4685_v60 }
 0x540   :  { %v14201_v3 = vpop.eup %13196 }
 0x541   :  { %v4454_v37 = vsel %vm588_vm1, %v14201_v3, 0.0 }
 0x546   :  { %v4405_v46 = vpop.xlane.xlu2 %4404 }
 0x547   :  { %v4421_v39 = vsub.f32 %v14147_v29, %v4405_v46 }
 0x549   :  { %v4432_v61 = vmul.f32 1.442695, %v4421_v39 }
 0x54b   :  { %13198 = vpow2.f32 %v4432_v61  ;;  %v4834_v61 = vsub.f32 %v4787_v8, %v4807_v12 }
 0x54d   :  { %v4414_v35 = vpop.xlane.xlu1 %4413 }
 0x54e   :  { %v4424_v54 = vsub.f32 %v14153_v32, %v4414_v35 }
 0x550   :  { %v4438_v16 = vmul.f32 1.442695, %v4424_v54 }
 0x551   :  { %v14203_v11 = vpop.eup %13198 }
 0x552   :  { %13200 = vpow2.f32 %v4438_v16  ;;  %v4451_v50 = vsel %vm588_vm1, %v14203_v11, 0.0 }
 0x553   :  { %4452 = vadd.xlane.f32.xlu1 %v4451_v50  ;;  %4455 = vadd.xlane.f32.xlu2 %v4454_v37  ;;  %v4835_v50 = vand.u32 4294901760, %v4834_v61 }
 0x558   :  { %v14209_v29 = vpop.eup %13200 }
 0x559   :  { %v4460_v5 = vsel %vm588_vm1, %v14209_v29, 0.0 }
 0x55a   :  { %4461 = vadd.xlane.f32.xlu0 %v4460_v5 }
 0x55b   :  { %v4411_v32 = vpop.xlane.xlu0 %4410 }
 0x55c   :  { %v4423_v43 = vsub.f32 %v14159_v36, %v4411_v32 }
 0x55e   :  { %v4436_v52 = vmul.f32 1.442695, %v4423_v43 }
 0x563   :  { %v4417_v1 = vpop.xlane.xlu0 %4416 }
 0x564   :  { %v4425_v39 = vsub.f32 %v14165_v31, %v4417_v1 }
 0x566   :  { %v4440_v54 = vmul.f32 1.442695, %v4425_v39 }
 0x56b   :  { %5394 = vrot.lane.b32.xlu2 %v13560_v63, %s13327_s27 }
 0x56c   :  { %4938 = vrot.lane.b32.xlu1 %v13543_v24, %s13327_s27 }
 0x56e   :  { %6626 = vrot.lane.b32.xlu0 %v13577_v28, %s13328_s28 }
 0x573   :  { %6474 = vrot.lane.b32.xlu2 %v13528_v45, %s13329_s29 }
 0x576   :  { %7090 = vrot.lane.b32.xlu0 %v13548_v33, %s13329_s29 }
 0x57b   :  { %6472 = vrot.lane.b32.xlu2 %v13571_v10, %s13328_s28 }
 0x57e   :  { %7242 = vrot.lane.b32.xlu0 %v13647_v17, %s13328_s28 }
 0x583   :  { %6628 = vrot.lane.b32.xlu2 %v13533_v59, %s13329_s29 }
 0x585   :  { %v4444_v60 = vpop.xlane.xlu2 %4443 }
 0x586   :  { %13202 = vrcp.f32 %v4444_v60  ;;  %7552 = vrot.lane.b32.xlu0 %v13564_v0, %s13329_s29 }
 0x587   :  { %13204 = vpow2.f32 %v4436_v52 }
 0x58b   :  { %6780 = vrot.lane.b32.xlu2 %v13586_v51, %s13328_s28 }
 0x58c   :  { %v13203_v46 = vpop.eup %13202 }
 0x58d   :  { %v4474_v35 = vmul.f32 %v13203_v46, %v14172_v44  ;;  %v14237_v5 = vpop.eup %13204  ;;  %v4836_v44 = vsub.f32 %v4834_v61, %v4835_v50 }
 0x58e   :  { %v4457_v8 = vsel %vm588_vm1, %v14237_v5, 0.0 }
 0x58f   :  { %v4486_v36 = vsel %vm588_vm1, %v4474_v35, 0  ;;  %v4837_v1 = vand.u32 4294901760, %v4836_v44 }
 0x590   :  { %v4505_v16 = vand.u32 4294901760, %v4486_v36 }
 0x591   :  { %v4447_v37 = vpop.xlane.xlu1 %4446 }
 0x592   :  { %v4506_v32 = vsub.f32 %v4486_v36, %v4505_v16  ;;  %13206 = vrcp.f32 %v4447_v37  ;;  %4536 = vmatmul.f32.vlgmr.msra.gmra.mxu1 %v4505_v16 }
 0x593   :  { %4732 = vmatpush.msra.mxu1 %v14188_v19  ;;  %6934 = vrot.lane.b32.xlu2 %v13590_v58, %s13328_s28  ;;  %13208 = vpow2.f32 %v4440_v54 }
 0x594   :  { %4560 = vmatmul.f32.vlgmr.msra.gmra.mxu2 %v4506_v32  ;;  %v4507_v31 = vand.u32 4294901760, %v4506_v32 }
 0x595   :  { %4758 = vmatpush.msra.mxu2 %v4683_v4 }
 0x596   :  { %4584 = vmatmul.f32.vlgmr.msra.gmra.mxu3 %v4507_v31  ;;  %4458 = vadd.xlane.f32.xlu1 %v4457_v8  ;;  %v4508_v43 = vsub.f32 %v4506_v32, %v4507_v31 }
 0x597   :  { %4780 = vmatpush.msra.mxu3 %v14188_v19 }
 0x598   :  { %v13207_v60 = vpop.eup %13206  ;;  %v4509_v52 = vand.u32 4294901760, %v4508_v43 }
 0x599   :  { %v4475_v46 = vmul.f32 %v13207_v60, %v14177_v18  ;;  %v14248_v39 = vpop.eup %13208 }
 0x59a   :  { %4510 = vmatmul.f32.vlgmr.msra.gmra.mxu0 %v4509_v52  ;;  %4630 = vmatmul.f32.vlgmr.msrb.gmra.mxu1 %v4505_v16  ;;  %v4463_v19 = vsel %vm588_vm1, %v14248_v39, 0.0 }
 0x59b   :  { %v4638_v35 = vsel %vm588_vm1, %v4475_v46, 0  ;;  %4709 = vmatpush.msra.mxu0 %v14191_v27  ;;  %4838 = vmatpush.msrb.mxu1 %v4837_v1  ;;  %v5091_v1 = vpop.permute.xlu0 %5090 }
 0x59c   :  { %v4657_v4 = vand.u32 4294901760, %v4638_v35  ;;  %7244 = vrot.lane.b32.xlu2 %v13553_v49, %s13329_s29 }
 0x59d   :  { %v4450_v36 = vpop.xlane.xlu1 %4449 }
 0x59e   :  { %v4658_v54 = vsub.f32 %v4638_v35, %v4657_v4  ;;  %13210 = vrcp.f32 %v4450_v36  ;;  %4464 = vadd.xlane.f32.xlu1 %v4463_v19  ;;  %4688 = vmatmul.f32.vlgmr.msrb.gmra.mxu3 %v4657_v4 }
 0x59f   :  { %4884 = vmatpush.msrb.mxu3 %v4807_v12 }
 0x5a0   :  { %v4659_v18 = vand.u32 4294901760, %v4658_v54 }
 0x5a2   :  { %4608 = vmatmul.f32.vlgmr.msrb.gmra.mxu0 %v4505_v16  ;;  %4736 = vmatmul.f32.vlgmr.msra.gmra.mxu1 %v4659_v18  ;;  %v4660_v37 = vsub.f32 %v4658_v54, %v4659_v18 }
 0x5a3   :  { %4808 = vmatpush.msrb.mxu0 %v4807_v12  ;;  %4932 = vmatpush.msra.mxu1 %v4807_v12 }
 0x5a4   :  { %v13211_v27 = vpop.eup %13210  ;;  %7396 = vrot.lane.b32.xlu2 %v13638_v14, %s13328_s28  ;;  %v4661_v32 = vand.u32 4294901760, %v4660_v37 }
 0x5a5   :  { %v4476_v31 = vmul.f32 %v13211_v27, %v14182_v2  ;;  %v5243_v2 = vpop.permute.xlu2 %5242 }
 0x5a6   :  { %4662 = vmatmul.f32.vlgmr.msrb.gmra.mxu2 %v4661_v32  ;;  %4782 = vmatmul.f32.vlgmr.msra.gmra.mxu3 %v4657_v4 }
 0x5a7   :  { %v4790_v44 = vsel %vm588_vm1, %v4476_v31, 0  ;;  %4861 = vmatpush.msrb.mxu2 %v4834_v61 }
 0x5a8   :  { %v4809_v8 = vand.u32 4294901760, %v4790_v44 }
 0x5aa   :  { %v4810_v43 = vsub.f32 %v4790_v44, %v4809_v8  ;;  %4712 = vmatmul.f32.vlgmr.msra.gmra.mxu0 %v4658_v54  ;;  %4840 = vmatmul.f32.vlgmr.msrb.gmra.mxu1 %v4809_v8 }
 0x5ab   :  { %4910 = vmatpush.msra.mxu0 %v4835_v50 }
 0x5ac   :  { %v4811_v16 = vand.u32 4294901760, %v4810_v43 }
 0x5ae   :  { %4760 = vmatmul.f32.vlgmr.msra.gmra.mxu2 %v4657_v4  ;;  %4888 = vmatmul.f32.vlgmr.msrb.gmra.mxu3 %v4811_v16  ;;  %v4812_v12 = vsub.f32 %v4810_v43, %v4811_v16  ;;  %v5111_v4 = vand.u32 4294901760, %v5091_v1 }
 0x5b0   :  { %v4813_v60 = vand.u32 4294901760, %v4812_v12  ;;  %v5138_v37 = vsub.f32 %v5091_v1, %v5111_v4 }
 0x5b2   :  { %4814 = vmatmul.f32.vlgmr.msrb.gmra.mxu0 %v4813_v60  ;;  %4934 = vmatmul.f32.vlgmr.msra.gmra.mxu1 %v4809_v8  ;;  %v5139_v31 = vand.u32 4294901760, %v5138_v37 }
 0x5b6   :  { %4864 = vmatmul.f32.vlgmr.msrb.gmra.mxu2 %v4810_v43 }
 0x5b7   :  { %5546 = vrot.lane.b32.xlu1 %v13564_v0, %s13327_s27 }
 0x5ba   :  { %4912 = vmatmul.f32.vlgmr.msra.gmra.mxu0 %v4809_v8  ;;  %v5140_v8 = vsub.f32 %v5138_v37, %v5139_v31 }
 0x5bf   :  { %6782 = vrot.lane.b32.xlu1 %v13538_v13, %s13329_s29 }
 0x5c6   :  { %v4453_v61 = vpop.xlane.xlu1 %4452  ;;  %v4456_v50 = vpop.xlane.xlu2 %4455 }
 0x5c7   :  { %6936 = vrot.lane.b32.xlu1 %v13543_v24, %s13329_s29  ;;  %13212 = vrcp.f32 %v4453_v61  ;;  %v5141_v61 = vand.u32 4294901760, %v5140_v8 }
 0x5c8   :  { %13214 = vrcp.f32 %v4456_v50  ;;  %v5263_v50 = vand.u32 4294901760, %v5243_v2 }
 0x5cd   :  { %v13213_v52 = vpop.eup %13212 }
 0x5ce   :  { %v4477_v46 = vmul.f32 %v13213_v52, %v14203_v11  ;;  %v13215_v35 = vpop.eup %13214  ;;  %v5395_v12 = vpop.permute.xlu2 %5394 }
 0x5cf   :  { %7088 = vrot.lane.b32.xlu1 %v13598_v56, %s13328_s28  ;;  %v4478_v54 = vmul.f32 %v13215_v35, %v14201_v3  ;;  %v14276_v1 = vand.u32 4294901760, %v5395_v12 }
 0x5d0   :  { %v4942_v36 = vsel %vm588_vm1, %v4477_v46, 0 }
 0x5d1   :  { %v4961_v19 = vand.u32 4294901760, %v4942_v36  ;;  %v5094_v27 = vsel %vm588_vm1, %v4478_v54, 0 }
 0x5d2   :  { %v5113_v11 = vand.u32 4294901760, %v5094_v27 }
 0x5d3   :  { %v4962_v18 = vsub.f32 %v4942_v36, %v4961_v19  ;;  %v5290_v36 = vsub.f32 %v5243_v2, %v5263_v50 }
 0x5d4   :  { %v5114_v16 = vsub.f32 %v5094_v27, %v5113_v11  ;;  %v14279_v27 = vsub.f32 %v5395_v12, %v14276_v1 }
 0x5d5   :  { %v4963_v32 = vand.u32 4294901760, %v4962_v18 }
 0x5d6   :  { %v5115_v35 = vand.u32 4294901760, %v5114_v16 }
 0x5d7   :  { %7398 = vrot.lane.b32.xlu1 %v13560_v63, %s13329_s29  ;;  %v4964_v44 = vsub.f32 %v4962_v18, %v4963_v32 }
 0x5d8   :  { %v5116_v8 = vsub.f32 %v5114_v16, %v5115_v35 }
 0x5d9   :  { %v4965_v3 = vand.u32 4294901760, %v4964_v44 }
 0x5de   :  { %v4939_v43 = vpop.permute.xlu1 %4938 }
 0x5df   :  { %v4959_v60 = vand.u32 4294901760, %v4939_v43  ;;  %7550 = vrot.lane.b32.xlu1 %v13679_v26, %s13328_s28 }
 0x5e1   :  { %v4986_v52 = vsub.f32 %v4939_v43, %v4959_v60  ;;  %4960 = vmatpush.msra.mxu2 %v4959_v60  ;;  %5036 = vmatpush.msrb.mxu1 %v4959_v60  ;;  %v5291_v43 = vand.u32 4294901760, %v5290_v36 }
 0x5e2   :  { %4966 = vmatmul.f32.vlgmr.msra.gmra.mxu2 %v4965_v3  ;;  %5040 = vmatmul.f32.vlgmr.msrb.gmra.mxu1 %v4963_v32  ;;  %v5443_v32 = vand.u32 4294901760, %v14279_v27 }
 0x5e3   :  { %v4987_v46 = vand.u32 4294901760, %v4986_v52  ;;  %5142 = vmatpush.msra.mxu1 %v5141_v61  ;;  %5013 = vmatpush.msrb.mxu0 %v4986_v52  ;;  %v5292_v2 = vsub.f32 %v5290_v36, %v5291_v43 }
 0x5e4   :  { %5016 = vmatmul.f32.vlgmr.msrb.gmra.mxu0 %v4962_v18  ;;  %v5117_v18 = vand.u32 4294901760, %v5116_v8  ;;  %v5444_v12 = vsub.f32 %v14279_v27, %v5443_v32 }
 0x5e5   :  { %5236 = vmatpush.msrb.mxu1 %v5111_v4  ;;  %v4988_v54 = vsub.f32 %v4986_v52, %v4987_v46  ;;  %5112 = vmatpush.msra.mxu0 %v5111_v4 }
 0x5e6   :  { %5062 = vmatpush.msrb.mxu2 %v4987_v46 }
 0x5e7   :  { %5214 = vmatpush.msrb.mxu0 %v5139_v31  ;;  %v4989_v44 = vand.u32 4294901760, %v4988_v54  ;;  %v5445_v31 = vand.u32 4294901760, %v5444_v12 }
 0x5e8   :  { %5165 = vmatpush.msra.mxu2 %v5138_v37  ;;  %v5293_v37 = vand.u32 4294901760, %v5292_v2 }
 0x5e9   :  { %4990 = vmatpush.msra.mxu3 %v4989_v44 }
 0x5ea   :  { %4992 = vmatmul.f32.vlgmr.msra.gmra.mxu3 %v4961_v19  ;;  %5064 = vmatmul.f32.vlgmr.msrb.gmra.mxu2 %v4961_v19 }
 0x5eb   :  { %5084 = vmatpush.msrb.mxu3 %v4959_v60  ;;  %5144 = vmatmul.f32.vlgmr.msra.gmra.mxu1 %v5113_v11  ;;  %v4462_v60 = vpop.xlane.xlu0 %4461 }
 0x5ec   :  { %5264 = vmatpush.msrb.mxu2 %v5263_v50  ;;  %5340 = vmatpush.msra.mxu1 %v5263_v50  ;;  %13216 = vrcp.f32 %v4462_v60 }
 0x5ed   :  { %5188 = vmatpush.msra.mxu3 %v5111_v4  ;;  %5118 = vmatmul.f32.vlgmr.msra.gmra.mxu0 %v5117_v18 }
 0x5ee   :  { %5317 = vmatpush.msra.mxu0 %v5290_v36 }
 0x5f2   :  { %5086 = vmatmul.f32.vlgmr.msrb.gmra.mxu3 %v4961_v19  ;;  %5168 = vmatmul.f32.vlgmr.msra.gmra.mxu2 %v5114_v16  ;;  %v13217_v4 = vpop.eup %13216 }
 0x5f3   :  { %5238 = vmatmul.f32.vlgmr.msrb.gmra.mxu1 %v5113_v11  ;;  %5294 = vmatpush.msrb.mxu3 %v5293_v37  ;;  %v4480_v3 = vmul.f32 %v13217_v4, %v14209_v29 }
 0x5f4   :  { %5366 = vmatpush.msra.mxu2 %v5291_v43  ;;  %5446 = vmatpush.msrb.mxu1 %v5445_v31  ;;  %v26_v43 = vld [vmem:[%s16014_s3 + $0x28] sm:$0xff] }
 0x5f5   :  { %5216 = vmatmul.f32.vlgmr.msrb.gmra.mxu0 %v5113_v11  ;;  %v5398_v52 = vsel %vm588_vm1, %v4480_v3, 0  ;;  %v14296_v4 = vand.u32 4294901760, %v26_v43 }
 0x5f6   :  { %5416 = vmatpush.msrb.mxu0 %v14276_v1  ;;  %v5417_v19 = vand.u32 4294901760, %v5398_v52 }
 0x5f8   :  { %v14287_v54 = vsub.f32 %v5398_v52, %v5417_v19 }
 0x5fa   :  { %5192 = vmatmul.f32.vlgmr.msra.gmra.mxu3 %v5115_v35  ;;  %v5419_v44 = vand.u32 4294901760, %v14287_v54 }
 0x5fb   :  { %5388 = vmatpush.msra.mxu3 %v5263_v50 }
 0x5fc   :  { %v5420_v60 = vsub.f32 %v14287_v54, %v5419_v44 }
 0x609   :  { %v4459_v61 = vpop.xlane.xlu1 %4458 }
 0x60a   :  { %13218 = vrcp.f32 %v4459_v61 }
 0x60f   :  { %v4537_v29 = vpop.f32.mrf.mxu1 }
 0x610   :  { %v13219_v16 = vpop.eup %13218 }
 0x611   :  { %v4479_v46 = vmul.f32 %v13219_v16, %v14237_v5  ;;  %v4465_v36 = vpop.xlane.xlu1 %4464 }
 0x612   :  { %13220 = vrcp.f32 %v4465_v36 }
 0x613   :  { %v5246_v11 = vsel %vm588_vm1, %v4479_v46, 0  ;;  %v5421_v46 = vand.u32 4294901760, %v5420_v60 }
 0x614   :  { %v5265_v35 = vand.u32 4294901760, %v5246_v11 }
 0x616   :  { %v5266_v50 = vsub.f32 %v5246_v11, %v5265_v35  ;;  %5296 = vmatmul.f32.vlgmr.msrb.gmra.mxu3 %v5265_v35 }
 0x617   :  { %5492 = vmatpush.msrb.mxu3 %v14276_v1  ;;  %v4511_v8 = vpop.f32.mrf.mxu0  ;;  %v4561_v2 = vpop.f32.mrf.mxu2 }
 0x618   :  { %v4538_v5 = vadd.f32 %v4537_v29, %v4511_v8  ;;  %5320 = vmatmul.f32.vlgmr.msra.gmra.mxu0 %v5266_v50  ;;  %v5267_v18 = vand.u32 4294901760, %v5266_v50  ;;  %v13221_v12 = vpop.eup %13220  ;;  %v4631_v29 = vpop.f32.mrf.mxu1 }
 0x619   :  { %5518 = vmatpush.msra.mxu0 %v5443_v32  ;;  %v4481_v61 = vmul.f32 %v13221_v12, %v14248_v39  ;;  %v4585_v52 = vpop.f32.mrf.mxu3  ;;  %v5820_v32 = vsub.f32 %v26_v43, %v14296_v4 }
 0x61a   :  { %v4562_v37 = vadd.f32 %v4561_v2, %v4538_v5  ;;  %5344 = vmatmul.f32.vlgmr.msra.gmra.mxu1 %v5267_v18  ;;  %v5268_v31 = vsub.f32 %v5266_v50, %v5267_v18 }
 0x61b   :  { %5540 = vmatpush.msra.mxu1 %v14276_v1  ;;  %v5550_v50 = vsel %vm588_vm1, %v4481_v61, 0  ;;  %v5821_v1 = vand.u32 4294901760, %v5820_v32 }
 0x61c   :  { %v5269_v3 = vand.u32 4294901760, %v5268_v31  ;;  %v4586_v16 = vadd.f32 %v4585_v52, %v4562_v37  ;;  %v14303_v5 = vand.u32 4294901760, %v5550_v50 }
 0x61d   :  { %v5822_v43 = vsub.f32 %v5820_v32, %v5821_v1 }
 0x61e   :  { %5270 = vmatmul.f32.vlgmr.msrb.gmra.mxu2 %v5269_v3  ;;  %5390 = vmatmul.f32.vlgmr.msra.gmra.mxu3 %v5265_v35 }
 0x61f   :  { %5469 = vmatpush.msrb.mxu2 %v14279_v27  ;;  %v4609_v36 = vpop.f32.mrf.mxu0  ;;  %v5570_v27 = vsub.f32 %v5550_v50, %v14303_v5  ;;  %v5823_v61 = vand.u32 4294901760, %v5822_v43 }
 0x620   :  { %v4610_v11 = vadd.f32 %v4609_v36, %v4586_v16  ;;  %5422 = vmatmul.f32.vlgmr.msrb.gmra.mxu0 %v5421_v46  ;;  %v4737_v52 = vpop.f32.mrf.mxu1 }
 0x621   :  { %v4689_v2 = vpop.f32.mrf.mxu3  ;;  %v5571_v36 = vand.u32 4294901760, %v5570_v27 }
 0x622   :  { %v4632_v8 = vadd.f32 %v4631_v29, %v4610_v11  ;;  %5448 = vmatmul.f32.vlgmr.msrb.gmra.mxu1 %v5417_v19 }
 0x623   :  { %v5572_v29 = vsub.f32 %v5570_v27, %v5571_v36 }
 0x624   :  { %v5699_v39 = vsel %vm588_vm1, %v4632_v8, 0 }
 0x625   :  { %v14306_v18 = vand.u32 4294901760, %v5699_v39 }
 0x626   :  { %5368 = vmatmul.f32.vlgmr.msra.gmra.mxu2 %v5265_v35  ;;  %5496 = vmatmul.f32.vlgmr.msrb.gmra.mxu3 %v5419_v44 }
 0x627   :  { %v4713_v12 = vpop.f32.mrf.mxu0  ;;  %v14310_v31 = vsub.f32 %v5699_v39, %v14306_v18 }
 0x628   :  { %5520 = vmatmul.f32.vlgmr.msra.gmra.mxu0 %v5417_v19 }
 0x629   :  { %v4663_v37 = vpop.f32.mrf.mxu2  ;;  %v5547_v3 = vpop.permute.xlu1 %5546  ;;  %v5741_v44 = vand.u32 4294901760, %v14310_v31 }
 0x62a   :  { %v4690_v60 = vadd.f32 %v4689_v2, %v4663_v37  ;;  %5542 = vmatmul.f32.vlgmr.msra.gmra.mxu1 %v5417_v19  ;;  %v5567_v16 = vand.u32 4294901760, %v5547_v3  ;;  %v4783_v8 = vpop.f32.mrf.mxu3 }
 0x62b   :  { %v5742_v43 = vsub.f32 %v14310_v31, %v5741_v44 }
 0x62c   :  { %v4714_v46 = vadd.f32 %v4713_v12, %v4690_v60  ;;  %v5594_v35 = vsub.f32 %v5547_v3, %v5567_v16  ;;  %5568 = vmatpush.msra.mxu2 %v5567_v16  ;;  %5644 = vmatpush.msrb.mxu1 %v5567_v16  ;;  %v5573_v60 = vand.u32 4294901760, %v5572_v29  ;;  %v4841_v3 = vpop.f32.mrf.mxu1 }
 0x62e   :  { %5472 = vmatmul.f32.vlgmr.msrb.gmra.mxu2 %v14287_v54  ;;  %5824 = vmatpush.msra.mxu1 %v5823_v61  ;;  %v5595_v11 = vand.u32 4294901760, %v5594_v35  ;;  %v4738_v50 = vadd.f32 %v4737_v52, %v4714_v46 }
 0x62f   :  { %5621 = vmatpush.msrb.mxu0 %v5594_v35  ;;  %v4815_v37 = vpop.f32.mrf.mxu0 }
 0x630   :  { %5624 = vmatmul.f32.vlgmr.msrb.gmra.mxu0 %v5570_v27  ;;  %v5596_v19 = vsub.f32 %v5594_v35, %v5595_v11  ;;  %5670 = vmatpush.msrb.mxu2 %v5595_v11  ;;  %v5743_v27 = vand.u32 4294901760, %v5742_v43  ;;  %v4842_v46 = vadd.f32 %v4841_v3, %v4815_v37 }
 0x631   :  { %v4761_v39 = vpop.f32.mrf.mxu2  ;;  %5738 = vmatpush.msra.mxu0 %v14296_v4 }
 0x632   :  { %v4762_v2 = vadd.f32 %v4761_v39, %v4738_v50  ;;  %5648 = vmatmul.f32.vlgmr.msrb.gmra.mxu1 %v5571_v36  ;;  %v5597_v12 = vand.u32 4294901760, %v5596_v19  ;;  %v4889_v11 = vpop.f32.mrf.mxu3 }
 0x633   :  { %6001 = vmatpush.msrb.mxu0 %v5821_v1  ;;  %6051 = vmatpush.msrb.mxu1 %v14296_v4 }
 0x634   :  { %v4784_v54 = vadd.f32 %v4783_v8, %v4762_v2  ;;  %5598 = vmatpush.msra.mxu3 %v5597_v12 }
 0x635   :  { %5600 = vmatmul.f32.vlgmr.msra.gmra.mxu3 %v14303_v5 }
 0x636   :  { %v5702_v61 = vsel %vm588_vm1, %v4784_v54, 0  ;;  %5574 = vmatmul.f32.vlgmr.msra.gmra.mxu2 %v5573_v60  ;;  %5692 = vmatpush.msrb.mxu3 %v5567_v16 }
 0x637   :  { %v14319_v52 = vand.u32 4294901760, %v5702_v61  ;;  %5875 = vmatpush.msra.mxu2 %v5820_v32  ;;  %v4913_v8 = vpop.f32.mrf.mxu0  ;;  %v4935_v32 = vpop.f32.mrf.mxu1 }
 0x638   :  { %5744 = vmatmul.f32.vlgmr.msra.gmra.mxu0 %v5743_v27  ;;  %5933 = vmatpush.msra.mxu3 %v14296_v4 }
 0x639   :  { %v5748_v1 = vsub.f32 %v5702_v61, %v14319_v52  ;;  %v4865_v36 = vpop.f32.mrf.mxu2 }
 0x63a   :  { %v4866_v35 = vadd.f32 %v4865_v36, %v4842_v46  ;;  %5826 = vmatmul.f32.vlgmr.msra.gmra.mxu1 %v14306_v18 }
 0x63b   :  { %v5749_v50 = vand.u32 4294901760, %v5748_v1 }
 0x63c   :  { %v4890_v29 = vadd.f32 %v4889_v11, %v4866_v35 }
 0x63d   :  { %v5750_v19 = vsub.f32 %v5748_v1, %v5749_v50  ;;  %5694 = vmatmul.f32.vlgmr.msrb.gmra.mxu3 %v14303_v5 }
 0x63e   :  { %v4914_v39 = vadd.f32 %v4913_v8, %v4890_v29  ;;  %5672 = vmatmul.f32.vlgmr.msrb.gmra.mxu2 %v14303_v5 }
 0x63f   :  { %v5751_v16 = vand.u32 4294901760, %v5750_v19 }
 0x640   :  { %v4936_v43 = vadd.f32 %v4935_v32, %v4914_v39 }
 0x641   :  { %5752 = vmatmul.f32.gmra.mxu0 %v5751_v16 }
 0x642   :  { %5830 = vmatmul.f32.gmra.mxu1 %v14319_v52  ;;  %v5705_v4 = vsel %vm588_vm1, %v4936_v43, 0 }
 0x643   :  { %v14328_v2 = vand.u32 4294901760, %v5705_v4 }
 0x645   :  { %v5756_v12 = vsub.f32 %v5705_v4, %v14328_v2  ;;  %5937 = vmatmul.f32.vlgmr.msra.gmra.mxu3 %v5741_v44 }
 0x646   :  { %5878 = vmatmul.f32.vlgmr.msra.gmra.mxu2 %v14310_v31 }
 0x647   :  { %v5757_v37 = vand.u32 4294901760, %v5756_v12 }
 0x649   :  { %v5758_v54 = vsub.f32 %v5756_v12, %v5757_v37 }
 0x64a   :  { %5834 = vmatmul.f32.gmra.mxu1 %v14328_v2 }
 0x64b   :  { %v5759_v5 = vand.u32 4294901760, %v5758_v54 }
 0x64d   :  { %5760 = vmatmul.f32.gmra.mxu0 %v5759_v5  ;;  %5943 = vmatmul.f32.gmra.mxu3 %v5749_v50 }
 0x64e   :  { %5883 = vmatmul.f32.gmra.mxu2 %v5748_v1 }
 0x655   :  { %5949 = vmatmul.f32.gmra.mxu3 %v5757_v37 }
 0x656   :  { %5888 = vmatmul.f32.gmra.mxu2 %v5756_v12 }
 0x65f   :  { %v5041_v27 = vpop.f32.mrf.mxu1 }
 0x661   :  { %v5017_v3 = vpop.f32.mrf.mxu0 }
 0x665   :  { %v4967_v60 = vpop.f32.mrf.mxu2 }
 0x668   :  { %v5145_v19 = vpop.f32.mrf.mxu1 }
 0x66a   :  { %v5119_v31 = vpop.f32.mrf.mxu0 }
 0x66b   :  { %v5146_v50 = vadd.f32 %v5145_v19, %v5119_v31 }
 0x66d   :  { %v4993_v61 = vpop.f32.mrf.mxu3  ;;  %v5065_v36 = vpop.f32.mrf.mxu2 }
 0x66e   :  { %v4994_v46 = vadd.f32 %v4993_v61, %v4967_v60 }
 0x670   :  { %v5018_v35 = vadd.f32 %v5017_v3, %v4994_v46  ;;  %v5239_v3 = vpop.f32.mrf.mxu1 }
 0x672   :  { %v5042_v44 = vadd.f32 %v5041_v27, %v5018_v35  ;;  %v5217_v54 = vpop.f32.mrf.mxu0 }
 0x674   :  { %v5066_v11 = vadd.f32 %v5065_v36, %v5042_v44 }
 0x675   :  { %v5087_v29 = vpop.f32.mrf.mxu3  ;;  %v5169_v1 = vpop.f32.mrf.mxu2 }
 0x676   :  { %v5088_v8 = vadd.f32 %v5087_v29, %v5066_v11  ;;  %v5170_v43 = vadd.f32 %v5169_v1, %v5146_v50 }
 0x678   :  { %v5708_v39 = vsel %vm588_vm1, %v5088_v8, 0 }
 0x679   :  { %v14334_v32 = vand.u32 4294901760, %v5708_v39 }
 0x67b   :  { %5838 = vmatmul.f32.gmra.mxu1 %v14334_v32  ;;  %v5764_v16 = vsub.f32 %v5708_v39, %v14334_v32 }
 0x67d   :  { %v5193_v4 = vpop.f32.mrf.mxu3  ;;  %5893 = vmatmul.f32.gmra.mxu2 %v5764_v16  ;;  %v5765_v12 = vand.u32 4294901760, %v5764_v16 }
 0x67e   :  { %v5194_v37 = vadd.f32 %v5193_v4, %v5170_v43 }
 0x67f   :  { %5955 = vmatmul.f32.gmra.mxu3 %v5765_v12  ;;  %v5766_v5 = vsub.f32 %v5764_v16, %v5765_v12 }
 0x680   :  { %v5218_v60 = vadd.f32 %v5217_v54, %v5194_v37 }
 0x681   :  { %v5767_v27 = vand.u32 4294901760, %v5766_v5  ;;  %v25_v5 = vld [vmem:[%s16014_s3 + $0x8] sm:$0xff] }
 0x682   :  { %v5240_v61 = vadd.f32 %v5239_v3, %v5218_v60  ;;  %v1994_v60 = vadd.f32 %v13946_v30, %v13954_v40 }
 0x683   :  { %5768 = vmatmul.f32.gmra.mxu0 %v5767_v27  ;;  %v6124_v27 = vand.u32 4294901760, %v25_v5 }
 0x684   :  { %v5711_v46 = vsel %vm588_vm1, %v5240_v61, 0 }
 0x685   :  { %v14339_v36 = vand.u32 4294901760, %v5711_v46  ;;  %6125 = vmatpush.msrb.mxu2 %v6124_v27  ;;  %6320 = vmatpush.msra.mxu1 %v6124_v27 }
 0x687   :  { %5842 = vmatmul.f32.gmra.mxu1 %v14339_v36  ;;  %v5772_v35 = vsub.f32 %v5711_v46, %v14339_v36  ;;  %v6207_v46 = vsub.f32 %v25_v5, %v6124_v27 }
 0x689   :  { %5898 = vmatmul.f32.gmra.mxu2 %v5772_v35  ;;  %v5773_v44 = vand.u32 4294901760, %v5772_v35  ;;  %6262 = vmatpush.msra.mxu0 %v6207_v46 }
 0x68b   :  { %5961 = vmatmul.f32.gmra.mxu3 %v5773_v44  ;;  %v5774_v11 = vsub.f32 %v5772_v35, %v5773_v44  ;;  %v2018_v44 = vadd.f32 %v13952_v6, %v1994_v60  ;;  %v2146_v6 = vadd.f32 %v13979_v48, %v13970_v21  ;;  %v6475_v21 = vpop.permute.xlu2 %6474 }
 0x68d   :  { %v5775_v31 = vand.u32 4294901760, %v5774_v11  ;;  %v2170_v60 = vadd.f32 %v14003_v25, %v2146_v6  ;;  %v6478_v25 = vsel %vm588_vm1, %v6475_v21, 0 }
 0x68f   :  { %5776 = vmatmul.f32.gmra.mxu0 %v5775_v31 }
 0x695   :  { %v5321_v29 = vpop.f32.mrf.mxu0 }
 0x697   :  { %v5345_v19 = vpop.f32.mrf.mxu1 }
 0x699   :  { %v5297_v8 = vpop.f32.mrf.mxu3 }
 0x69d   :  { %v5423_v16 = vpop.f32.mrf.mxu0 }
 0x69f   :  { %v5449_v54 = vpop.f32.mrf.mxu1 }
 0x6a0   :  { %v5450_v11 = vadd.f32 %v5449_v54, %v5423_v16 }
 0x6a1   :  { %v5271_v39 = vpop.f32.mrf.mxu2  ;;  %v5391_v43 = vpop.f32.mrf.mxu3 }
 0x6a2   :  { %v5298_v1 = vadd.f32 %v5297_v8, %v5271_v39 }
 0x6a4   :  { %v5322_v50 = vadd.f32 %v5321_v29, %v5298_v1  ;;  %v6208_v29 = vand.u32 4294901760, %v6207_v46 }
 0x6a5   :  { %v5521_v31 = vpop.f32.mrf.mxu0 }
 0x6a6   :  { %v5346_v4 = vadd.f32 %v5345_v19, %v5322_v50  ;;  %v6209_v39 = vsub.f32 %v6207_v46, %v6208_v29  ;;  %6388 = vmatpush.msra.mxu2 %v6208_v29  ;;  %v2042_v50 = vadd.f32 %v13962_v22, %v2018_v44 }
 0x6a9   :  { %v5369_v12 = vpop.f32.mrf.mxu2  ;;  %v5497_v8 = vpop.f32.mrf.mxu3 }
 0x6aa   :  { %v5370_v37 = vadd.f32 %v5369_v12, %v5346_v4  ;;  %v5543_v4 = vpop.f32.mrf.mxu1 }
 0x6ac   :  { %v5392_v3 = vadd.f32 %v5391_v43, %v5370_v37  ;;  %v6210_v43 = vand.u32 4294901760, %v6209_v39  ;;  %v2066_v37 = vadd.f32 %v13975_v38, %v2042_v50  ;;  %v2194_v38 = vadd.f32 %v13986_v9, %v2170_v60 }
 0x6ad   :  { %v14372_v9 = vand.u32 4294901760, %v6478_v25 }
 0x6ae   :  { %v5714_v61 = vsel %vm588_vm1, %v5392_v3, 0  ;;  %6211 = vmatpush.msrb.mxu3 %v6210_v43  ;;  %v2088_v22 = vadd.f32 %v13967_v20, %v2066_v37 }
 0x6af   :  { %v14349_v35 = vand.u32 4294901760, %v5714_v61 }
 0x6b0   :  { %6438 = vmatpush.msra.mxu3 %v6124_v27  ;;  %v2298_v27 = vadd.f32 %v14011_v41, %v14027_v7  ;;  %v6086_v20 = vsel %vm588_vm1, %v2088_v22, 0 }
 0x6b1   :  { %v5473_v19 = vpop.f32.mrf.mxu2  ;;  %5846 = vmatmul.f32.gmra.mxu1 %v14349_v35  ;;  %v5780_v30 = vsub.f32 %v5714_v61, %v14349_v35  ;;  %v14374_v41 = vand.u32 4294901760, %v6086_v20 }
 0x6b2   :  { %v5474_v40 = vadd.f32 %v5473_v19, %v5450_v11  ;;  %v5625_v11 = vpop.f32.mrf.mxu0  ;;  %v2218_v19 = vadd.f32 %v13997_v23, %v2194_v38  ;;  %v2322_v39 = vadd.f32 %v14029_v57, %v2298_v27  ;;  %v14381_v57 = vsub.f32 %v6478_v25, %v14372_v9  ;;  %v16121_v25 = vld [vmem:[#allocation32_spill] sm:$0xff] }
 0x6b3   :  { %5903 = vmatmul.f32.gmra.mxu2 %v5780_v30  ;;  %v5781_v1 = vand.u32 4294901760, %v5780_v30 }
 0x6b4   :  { %v5498_v16 = vadd.f32 %v5497_v8, %v5474_v40  ;;  %v2240_v6 = vadd.f32 %v14009_v15, %v2218_v19  ;;  %v2346_v23 = vadd.f32 %v14033_v53, %v2322_v39  ;;  %v16118_v53 = vld [vmem:[#allocation29_spill] sm:$0xff] }
 0x6b5   :  { %5967 = vmatmul.f32.gmra.mxu3 %v5781_v1  ;;  %v5782_v12 = vsub.f32 %v5780_v30, %v5781_v1  ;;  %v5649_v30 = vpop.f32.mrf.mxu1 }
 0x6b6   :  { %v5522_v54 = vadd.f32 %v5521_v31, %v5498_v16  ;;  %v6089_v60 = vsel %vm588_vm1, %v2240_v6, 0 }
 0x6b7   :  { %v5783_v5 = vand.u32 4294901760, %v5782_v12  ;;  %v16116_v12 = vld [vmem:[#allocation27_spill] sm:$0xff] }
 0x6b8   :  { %v5544_v3 = vadd.f32 %v5543_v4, %v5522_v54  ;;  %v5601_v61 = vpop.f32.mrf.mxu3  ;;  %v2450_v37 = vadd.f32 %v16116_v12, %v14043_v55  ;;  %v6523_v55 = vand.u32 4294901760, %v14381_v57 }
 0x6b9   :  { %v5575_v46 = vpop.f32.mrf.mxu2  ;;  %5784 = vmatmul.f32.gmra.mxu0 %v5783_v5  ;;  %v14384_v5 = vsub.f32 %v6086_v20, %v14374_v41  ;;  %v16122_v20 = vld [vmem:[#allocation28_spill] sm:$0xff] }
 0x6ba   :  { %v5602_v48 = vadd.f32 %v5601_v61, %v5575_v46  ;;  %v5717_v44 = vsel %vm588_vm1, %v5544_v3, 0  ;;  %v16117_v3 = vld [vmem:[#allocation26_spill] sm:$0xff]  ;;  %v2474_v22 = vadd.f32 %v16118_v53, %v2450_v37 }
 0x6bb   :  { %v14361_v29 = vand.u32 4294901760, %v5717_v44  ;;  %v2370_v15 = vadd.f32 %v16117_v3, %v2346_v23  ;;  %v6128_v21 = vand.u32 4294901760, %v14384_v5  ;;  %v16127_v53 = vld [vmem:[#allocation38_spill] sm:$0xff] }
 0x6bc   :  { %v5626_v31 = vadd.f32 %v5625_v11, %v5602_v48  ;;  %v14394_v48 = vand.u32 4294901760, %v6089_v60  ;;  %v16119_v11 = vld [vmem:[#allocation25_spill] sm:$0xff]  ;;  %v2498_v19 = vadd.f32 %v16122_v20, %v2474_v22  ;;  %v16128_v22 = vld [vmem:[#allocation39_spill] sm:$0xff] }
 0x6bd   :  { %5850 = vmatmul.f32.gmra.mxu1 %v14361_v29  ;;  %v5788_v8 = vsub.f32 %v5717_v44, %v14361_v29  ;;  %v2392_v38 = vadd.f32 %v16119_v11, %v2370_v15  ;;  %v16126_v15 = vld [vmem:[#allocation35_spill] sm:$0xff] }
 0x6be   :  { %v5650_v1 = vadd.f32 %v5649_v30, %v5626_v31  ;;  %v16120_v31 = vld [vmem:[#allocation33_spill] sm:$0xff]  ;;  %v6524_v30 = vsub.f32 %v14381_v57, %v6523_v55  ;;  %v14409_v39 = vsub.f32 %v6089_v60, %v14394_v48  ;;  %v16125_v60 = vld [vmem:[#allocation31_spill] sm:$0xff] }
 0x6bf   :  { %5908 = vmatmul.f32.gmra.mxu2 %v5788_v8  ;;  %v5789_v40 = vand.u32 4294901760, %v5788_v8 }
 0x6c0   :  { %v5695_v43 = vpop.f32.mrf.mxu3  ;;  %v6525_v23 = vand.u32 4294901760, %v6524_v30 }
 0x6c1   :  { %v5673_v7 = vpop.f32.mrf.mxu2  ;;  %5973 = vmatmul.f32.gmra.mxu3 %v5789_v40  ;;  %v5790_v50 = vsub.f32 %v5788_v8, %v5789_v40  ;;  %v2602_v8 = vadd.f32 %v16121_v25, %v16120_v31  ;;  %v6129_v40 = vsub.f32 %v14384_v5, %v6128_v21  ;;  %v16129_v31 = vld [vmem:[#allocation37_spill] sm:$0xff] }
 0x6c2   :  { %v5674_v16 = vadd.f32 %v5673_v7, %v5650_v1  ;;  %v6092_v7 = vsel %vm588_vm1, %v2392_v38, 0 }
 0x6c3   :  { %v5791_v4 = vand.u32 4294901760, %v5790_v50  ;;  %v16123_v50 = vld [vmem:[#allocation30_spill] sm:$0xff]  ;;  %v6130_v12 = vand.u32 4294901760, %v6129_v40  ;;  %v14414_v37 = vand.u32 4294901760, %v6092_v7 }
 0x6c4   :  { %v5696_v54 = vadd.f32 %v5695_v43, %v5674_v16  ;;  %v2522_v6 = vadd.f32 %v16123_v50, %v2498_v19  ;;  %v16124_v16 = vld [vmem:[#allocation34_spill] sm:$0xff]  ;;  %v16132_v50 = vld [vmem:[#allocation40_spill] sm:$0xff] }
 0x6c5   :  { %5792 = vmatmul.f32.gmra.mxu0 %v5791_v4  ;;  %v2626_v43 = vadd.f32 %v16124_v16, %v2602_v8  ;;  %v14424_v11 = vsub.f32 %v6092_v7, %v14414_v37  ;;  %v16130_v8 = vld [vmem:[#allocation41_spill] sm:$0xff] }
 0x6c6   :  { %v5720_v61 = vsel %vm588_vm1, %v5696_v54, 0  ;;  %v6136_v54 = vand.u32 4294901760, %v14409_v39  ;;  %v2544_v3 = vadd.f32 %v16125_v60, %v2522_v6  ;;  %v16133_v16 = vld [vmem:[#allocation45_spill] sm:$0xff]  ;;  %v16135_v60 = vld [vmem:[#allocation42_spill] sm:$0xff] }
 0x6c7   :  { %v14389_v46 = vand.u32 4294901760, %v5720_v61  ;;  %v6144_v40 = vand.u32 4294901760, %v14424_v11 }
 0x6c8   :  { %v6137_v38 = vsub.f32 %v14409_v39, %v6136_v54 }
 0x6c9   :  { %5854 = vmatmul.f32.gmra.mxu1 %v14389_v46  ;;  %v5796_v44 = vsub.f32 %v5720_v61, %v14389_v46  ;;  %v2650_v61 = vadd.f32 %v16126_v15, %v2626_v43  ;;  %v16134_v43 = vld [vmem:[#allocation43_spill] sm:$0xff]  ;;  %v16136_v15 = vld [vmem:[#allocation46_spill] sm:$0xff] }
 0x6ca   :  { %v6138_v30 = vand.u32 4294901760, %v6137_v38  ;;  %v16137_v38 = vld [vmem:[#allocation44_spill] sm:$0xff] }
 0x6cb   :  { %5913 = vmatmul.f32.gmra.mxu2 %v5796_v44  ;;  %v5797_v27 = vand.u32 4294901760, %v5796_v44  ;;  %v2674_v25 = vadd.f32 %v16129_v31, %v2650_v61  ;;  %v16138_v31 = vld [vmem:[#allocation48_spill] sm:$0xff] }
 0x6cd   :  { %5979 = vmatmul.f32.gmra.mxu3 %v5797_v27  ;;  %v5798_v1 = vsub.f32 %v5796_v44, %v5797_v27  ;;  %v2754_v44 = vadd.f32 %v16128_v22, %v16127_v53  ;;  %v6095_v27 = vsel %vm588_vm1, %v2544_v3, 0 }
 0x6ce   :  { %v14434_v19 = vand.u32 4294901760, %v6095_v27 }
 0x6cf   :  { %v5799_v4 = vand.u32 4294901760, %v5798_v1  ;;  %v2778_v20 = vadd.f32 %v16130_v8, %v2754_v44  ;;  %v16131_v1 = vld [vmem:[#allocation36_spill] sm:$0xff]  ;;  %v16139_v8 = vld [vmem:[#allocation50_spill] sm:$0xff] }
 0x6d0   :  { %v2696_v7 = vadd.f32 %v16131_v1, %v2674_v25 }
 0x6d1   :  { %5800 = vmatmul.f32.gmra.mxu0 %v5799_v4  ;;  %6053 = vmatmul.f32.vlgmr.msrb.gmra.mxu1 %v14306_v18  ;;  %v2802_v6 = vadd.f32 %v16132_v50, %v2778_v20  ;;  %v2906_v4 = vadd.f32 %v16134_v43, %v16133_v16  ;;  %v16140_v20 = vld [vmem:[#allocation52_spill] sm:$0xff]  ;;  %v16141_v50 = vld [vmem:[#allocation49_spill] sm:$0xff] }
 0x6d2   :  { %6526 = vmatpush.xpose.msrb.mxu1 %v6525_v23  ;;  %v14445_v23 = vsub.f32 %v6095_v27, %v14434_v19  ;;  %v16142_v16 = vld [vmem:[#allocation53_spill] sm:$0xff] }
 0x6d3   :  { %6131 = vmatmul.f32.vlgmr.msrb.gmra.mxu2 %v6130_v12  ;;  %v6098_v12 = vsel %vm588_vm1, %v2696_v7, 0  ;;  %v2826_v3 = vadd.f32 %v16135_v60, %v2802_v6  ;;  %v2930_v61 = vadd.f32 %v16136_v15, %v2906_v4 }
 0x6d4   :  { %6549 = vmatpush.xpose.msrb.mxu2 %v14381_v57  ;;  %v14454_v53 = vand.u32 4294901760, %v6098_v12  ;;  %v6152_v44 = vand.u32 4294901760, %v14445_v23 }
 0x6d5   :  { %6213 = vmatmul.f32.vlgmr.msrb.gmra.mxu3 %v14374_v41  ;;  %v2848_v27 = vadd.f32 %v16137_v38, %v2826_v3  ;;  %v2954_v25 = vadd.f32 %v16138_v31, %v2930_v61  ;;  %v16143_v3 = vld [vmem:[#allocation47_spill] sm:$0xff] }
 0x6d6   :  { %6572 = vmatpush.xpose.msrb.mxu3 %v14372_v9  ;;  %v6153_v1 = vsub.f32 %v14445_v23, %v6152_v44  ;;  %v16144_v61 = vld [vmem:[#allocation51_spill] sm:$0xff] }
 0x6d7   :  { %v6101_v7 = vsel %vm588_vm1, %v2848_v27, 0  ;;  %v2978_v6 = vadd.f32 %v16141_v50, %v2954_v25  ;;  %v16145_v27 = vld [vmem:[#allocation54_spill] sm:$0xff] }
 0x6d8   :  { %v14473_v4 = vand.u32 4294901760, %v6101_v7 }
 0x6d9   :  { %6003 = vmatmul.f32.vlgmr.msrb.gmra.mxu0 %v14306_v18  ;;  %6057 = vmatmul.f32.gmra.mxu1 %v14319_v52  ;;  %v6145_v18 = vsub.f32 %v14424_v11, %v6144_v40  ;;  %v3000_v15 = vadd.f32 %v16143_v3, %v2978_v6 }
 0x6da   :  { %6496 = vmatpush.xpose.msrb.mxu0 %v14372_v9 }
 0x6db   :  { %6139 = vmatmul.f32.gmra.mxu2 %v6138_v30  ;;  %v6146_v22 = vand.u32 4294901760, %v6145_v18  ;;  %v3058_v30 = vadd.f32 %v16140_v20, %v16139_v8  ;;  %v6154_v18 = vand.u32 4294901760, %v6153_v1 }
 0x6dd   :  { %6217 = vmatmul.f32.gmra.mxu3 %v14394_v48  ;;  %v3082_v43 = vadd.f32 %v16142_v16, %v3058_v30  ;;  %v16146_v30 = vld [vmem:[#allocation55_spill] sm:$0xff] }
 0x6e1   :  { %6007 = vmatmul.f32.gmra.mxu0 %v14319_v52  ;;  %6061 = vmatmul.f32.gmra.mxu1 %v14328_v2  ;;  %v14468_v52 = vsub.f32 %v6098_v12, %v14454_v53  ;;  %v3106_v12 = vadd.f32 %v16144_v61, %v3082_v43 }
 0x6e3   :  { %6147 = vmatmul.f32.gmra.mxu2 %v6146_v22  ;;  %v6160_v60 = vand.u32 4294901760, %v14468_v52  ;;  %v14481_v22 = vsub.f32 %v6101_v7, %v14473_v4  ;;  %v3130_v31 = vadd.f32 %v16145_v27, %v3106_v12  ;;  %v14495_v7 = vpop.permute.xlu2 %6472 }
 0x6e5   :  { %6221 = vmatmul.f32.gmra.mxu3 %v14414_v37  ;;  %v6161_v38 = vsub.f32 %v14468_v52, %v6160_v60  ;;  %v6168_v20 = vand.u32 4294901760, %v14481_v22  ;;  %v3152_v1 = vadd.f32 %v16146_v30, %v3130_v31 }
 0x6e7   :  { %v6162_v8 = vand.u32 4294901760, %v6161_v38  ;;  %v6169_v6 = vsub.f32 %v14481_v22, %v6168_v20 }
 0x6e9   :  { %6011 = vmatmul.f32.gmra.mxu0 %v14328_v2  ;;  %6065 = vmatmul.f32.gmra.mxu1 %v14334_v32  ;;  %v6104_v2 = vsel %vm588_vm1, %v3000_v15, 0  ;;  %v6170_v43 = vand.u32 4294901760, %v6169_v6  ;;  %v14539_v6 = vpop.f32.mrf.mxu0 }
 0x6ea   :  { %v14489_v25 = vand.u32 4294901760, %v6104_v2 }
 0x6eb   :  { %6155 = vmatmul.f32.gmra.mxu2 %v6154_v18  ;;  %v6629_v61 = vpop.permute.xlu2 %6628 }
 0x6ec   :  { %v14498_v50 = vsub.f32 %v6104_v2, %v14489_v25  ;;  %v6632_v12 = vsel %vm588_vm1, %v6629_v61, 0 }
 0x6ed   :  { %6225 = vmatmul.f32.gmra.mxu3 %v14434_v19  ;;  %v14521_v2 = vand.u32 4294901760, %v6632_v12 }
 0x6ee   :  { %v6176_v18 = vand.u32 4294901760, %v14498_v50 }
 0x6ef   :  { %v14528_v31 = vsub.f32 %v6632_v12, %v14521_v2 }
 0x6f0   :  { %v6177_v15 = vsub.f32 %v14498_v50, %v6176_v18 }
 0x6f1   :  { %6015 = vmatmul.f32.gmra.mxu0 %v14334_v32  ;;  %6069 = vmatmul.f32.gmra.mxu1 %v14339_v36  ;;  %v6107_v32 = vsel %vm588_vm1, %v3152_v1, 0  ;;  %v16043_v30 = vand.u32 4294901760, %v14528_v31 }
 0x6f2   :  { %v14505_v16 = vand.u32 4294901760, %v6107_v32 }
 0x6f3   :  { %6163 = vmatmul.f32.gmra.mxu2 %v6162_v8  ;;  %v14532_v8 = vpop.f32.mrf.mxu1  ;;  %v6678_v1 = vsub.f32 %v14528_v31, %v16043_v30 }
 0x6f4   :  { %v14511_v3 = vsub.f32 %v6107_v32, %v14505_v16  ;;  %v14541_v32 = vpop.f32.mrf.mxu2 }
 0x6f5   :  { %6229 = vmatmul.f32.gmra.mxu3 %v14454_v53 }
 0x6f6   :  { %v16044_v38 = vand.u32 4294901760, %v14511_v3 }
 0x6f8   :  { %v6185_v27 = vsub.f32 %v14511_v3, %v16044_v38 }
 0x6f9   :  { %6019 = vmatmul.f32.gmra.mxu0 %v14339_v36  ;;  %6073 = vmatmul.f32.gmra.mxu1 %v14349_v35  ;;  %v6178_v36 = vand.u32 4294901760, %v6177_v15 }
 0x6fb   :  { %6171 = vmatmul.f32.gmra.mxu2 %v6170_v43  ;;  %v6679_v43 = vand.u32 4294901760, %v6678_v1  ;;  %v14550_v15 = vpop.f32.mrf.mxu1 }
 0x6fd   :  { %6233 = vmatmul.f32.gmra.mxu3 %v14473_v4 }
 0x701   :  { %6023 = vmatmul.f32.gmra.mxu0 %v14349_v35  ;;  %6077 = vmatmul.f32.gmra.mxu1 %v14361_v29  ;;  %v6186_v35 = vand.u32 4294901760, %v6185_v27  ;;  %v6627_v27 = vpop.permute.xlu0 %6626 }
 0x703   :  { %6179 = vmatmul.f32.gmra.mxu2 %v6178_v36 }
 0x705   :  { %6237 = vmatmul.f32.gmra.mxu3 %v14489_v25 }
 0x709   :  { %6027 = vmatmul.f32.gmra.mxu0 %v14361_v29  ;;  %6081 = vmatmul.f32.gmra.mxu1 %v14389_v46  ;;  %v14546_v29 = vpop.f32.mrf.mxu3 }
 0x70b   :  { %6187 = vmatmul.f32.gmra.mxu2 %v6186_v35  ;;  %v6476_v35 = vsel %vm588_vm1, %v14495_v7, 0  ;;  %v16154_v7 = vand.u32 4294901760, %v14511_v3 }
 0x70d   :  { %6241 = vmatmul.f32.gmra.mxu3 %v14505_v16 }
 0x711   :  { %6031 = vmatmul.f32.gmra.mxu0 %v14389_v46  ;;  %6324 = vmatmul.f32.vlgmr.msra.gmra.mxu1 %v6128_v21  ;;  %v14557_v46 = vpop.f32.mrf.mxu0  ;;  %v14559_v21 = vpop.f32.mrf.mxu2 }
 0x712   :  { %6620 = vmatpush.xpose.msra.mxu1 %v14372_v9  ;;  %v14564_v9 = vpop.f32.mrf.mxu3 }
 0x713   :  { %6390 = vmatmul.f32.vlgmr.msra.gmra.mxu2 %v14374_v41 }
 0x714   :  { %6650 = vmatpush.xpose.msra.mxu2 %v14521_v2 }
 0x715   :  { %6440 = vmatmul.f32.vlgmr.msra.gmra.mxu3 %v14374_v41  ;;  %v14567_v41 = vpop.f32.mrf.mxu1 }
 0x716   :  { %6680 = vmatpush.xpose.msra.mxu3 %v6679_v43 }
 0x719   :  { %6265 = vmatmul.f32.vlgmr.msra.gmra.mxu0 %v14384_v5  ;;  %6330 = vmatmul.f32.gmra.mxu1 %v6136_v54  ;;  %v14572_v5 = vpop.f32.mrf.mxu0  ;;  %v14575_v54 = vpop.f32.mrf.mxu2 }
 0x71a   :  { %6598 = vmatpush.xpose.msra.mxu0 %v6523_v55  ;;  %v14578_v57 = vpop.f32.mrf.mxu3 }
 0x71b   :  { %6394 = vmatmul.f32.gmra.mxu2 %v14394_v48 }
 0x71d   :  { %6444 = vmatmul.f32.gmra.mxu3 %v14394_v48  ;;  %v14580_v55 = vpop.f32.mrf.mxu1 }
 0x721   :  { %6270 = vmatmul.f32.gmra.mxu0 %v14409_v39  ;;  %6336 = vmatmul.f32.gmra.mxu1 %v6144_v40  ;;  %v14585_v48 = vpop.f32.mrf.mxu0  ;;  %v14588_v39 = vpop.f32.mrf.mxu2 }
 0x722   :  { %v14591_v40 = vpop.f32.mrf.mxu3 }
 0x723   :  { %6398 = vmatmul.f32.gmra.mxu2 %v14414_v37 }
 0x725   :  { %6448 = vmatmul.f32.gmra.mxu3 %v14414_v37  ;;  %v14593_v37 = vpop.f32.mrf.mxu1 }
 0x729   :  { %6275 = vmatmul.f32.gmra.mxu0 %v14424_v11  ;;  %6342 = vmatmul.f32.gmra.mxu1 %v6152_v44  ;;  %v14598_v11 = vpop.f32.mrf.mxu0  ;;  %v14601_v44 = vpop.f32.mrf.mxu2 }
 0x72a   :  { %16147 = vst [vmem:[#allocation27_spill] sm:$0xff] %v14601_v44  ;;  %v14604_v61 = vpop.f32.mrf.mxu3 }
 0x72b   :  { %6402 = vmatmul.f32.gmra.mxu2 %v14434_v19  ;;  %16148 = vst [vmem:[#allocation26_spill] sm:$0xff] %v14604_v61 }
 0x72d   :  { %6452 = vmatmul.f32.gmra.mxu3 %v14434_v19 }
 0x72e   :  { %v14606_v19 = vpop.f32.mrf.mxu1 }
 0x72f   :  { %16149 = vst [vmem:[#allocation29_spill] sm:$0xff] %v14606_v19 }
 0x731   :  { %6280 = vmatmul.f32.gmra.mxu0 %v14445_v23  ;;  %6348 = vmatmul.f32.gmra.mxu1 %v6160_v60 }
 0x733   :  { %6406 = vmatmul.f32.gmra.mxu2 %v14454_v53 }
 0x735   :  { %6456 = vmatmul.f32.gmra.mxu3 %v14454_v53 }
 0x736   :  { %v14611_v23 = vpop.f32.mrf.mxu0  ;;  %v14614_v60 = vpop.f32.mrf.mxu2 }
 0x737   :  { %16150 = vst [vmem:[#allocation25_spill] sm:$0xff] %v14611_v23 }
 0x738   :  { %16151 = vst [vmem:[#allocation33_spill] sm:$0xff] %v14614_v60  ;;  %v14617_v12 = vpop.f32.mrf.mxu3  ;;  %v6781_v60 = vpop.permute.xlu2 %6780 }
 0x739   :  { %6285 = vmatmul.f32.gmra.mxu0 %v14468_v52  ;;  %6354 = vmatmul.f32.gmra.mxu1 %v6168_v20  ;;  %16152 = vst [vmem:[#allocation32_spill] sm:$0xff] %v14617_v12  ;;  %v6783_v52 = vpop.permute.xlu1 %6782 }
 0x73a   :  { %v5851_v53 = vpop.f32.mrf.mxu1 }
 0x73b   :  { %6410 = vmatmul.f32.gmra.mxu2 %v14473_v4 }
 0x73d   :  { %6460 = vmatmul.f32.gmra.mxu3 %v14473_v4  ;;  %v6786_v4 = vsel %vm588_vm1, %v6783_v52, 0 }
 0x741   :  { %6290 = vmatmul.f32.gmra.mxu0 %v14481_v22  ;;  %6360 = vmatmul.f32.gmra.mxu1 %v6176_v18  ;;  %v6630_v22 = vsel %vm588_vm1, %v6627_v27, 0  ;;  %v14628_v18 = vand.u32 4294901760, %v6476_v35 }
 0x742   :  { %v5793_v36 = vpop.f32.mrf.mxu0  ;;  %v5909_v1 = vpop.f32.mrf.mxu2 }
 0x743   :  { %v5852_v20 = vadd.f32 %v5851_v53, %v5793_v36  ;;  %6414 = vmatmul.f32.gmra.mxu2 %v14489_v25  ;;  %v14632_v53 = vand.u32 4294901760, %v6786_v4  ;;  %v14634_v36 = vand.u32 4294901760, %v6630_v22  ;;  %v6498_v52 = vsub.f32 %v6476_v35, %v14628_v18 }
 0x744   :  { %v5974_v30 = vpop.f32.mrf.mxu3 }
 0x745   :  { %v5910_v43 = vadd.f32 %v5909_v1, %v5852_v20  ;;  %6464 = vmatmul.f32.gmra.mxu3 %v14489_v25  ;;  %v14642_v25 = vsub.f32 %v6786_v4, %v14632_v53  ;;  %v14645_v27 = vsub.f32 %v6630_v22, %v14634_v36 }
 0x746   :  { %v5855_v38 = vpop.f32.mrf.mxu1 }
 0x747   :  { %v14630_v12 = vadd.f32 %v5974_v30, %v5910_v43  ;;  %v6937_v30 = vpop.permute.xlu1 %6936  ;;  %v6499_v43 = vand.u32 4294901760, %v6498_v52  ;;  %v16045_v35 = vand.u32 4294901760, %v14642_v25  ;;  %v6653_v4 = vand.u32 4294901760, %v14645_v27 }
 0x748   :  { %v6940_v22 = vsel %vm588_vm1, %v6937_v30, 0  ;;  %v16156_v30 = vand.u32 4294901760, %v14528_v31 }
 0x749   :  { %16153 = vst [vmem:[#allocation28_spill] sm:$0xff] %v14630_v12  ;;  %6295 = vmatmul.f32.gmra.mxu0 %v14498_v50  ;;  %6366 = vmatmul.f32.gmra.mxu1 %v16154_v7  ;;  %v5828_v50 = vadd.f32 %v14532_v8, %v14539_v6  ;;  %v6832_v8 = vsub.f32 %v14642_v25, %v16045_v35  ;;  %v14662_v6 = vand.u32 4294901760, %v6940_v22 }
 0x74b   :  { %6418 = vmatmul.f32.gmra.mxu2 %v14505_v16  ;;  %v5880_v44 = vadd.f32 %v14541_v32, %v5828_v50  ;;  %v6654_v32 = vsub.f32 %v14645_v27, %v6653_v4  ;;  %v14672_v35 = vsub.f32 %v6940_v22, %v14662_v6 }
 0x74d   :  { %6468 = vmatmul.f32.gmra.mxu3 %v14505_v16  ;;  %v6500_v16 = vsub.f32 %v6498_v52, %v6499_v43 }
 0x74e   :  { %v5801_v20 = vpop.f32.mrf.mxu0  ;;  %v5914_v1 = vpop.f32.mrf.mxu2 }
 0x74f   :  { %v5856_v7 = vadd.f32 %v5855_v38, %v5801_v20  ;;  %v6054_v12 = vpop.f32.mrf.mxu1 }
 0x750   :  { %v5980_v61 = vpop.f32.mrf.mxu3 }
 0x751   :  { %v5915_v19 = vadd.f32 %v5914_v1, %v5856_v7  ;;  %6300 = vmatmul.f32.gmra.mxu0 %v14511_v3  ;;  %6528 = vmatmul.f32.vlgmr.msrb.gmra.mxu1 %v14628_v18  ;;  %v5939_v3 = vadd.f32 %v14546_v29, %v5880_v44  ;;  %v6833_v7 = vand.u32 4294901760, %v6832_v8  ;;  %v6935_v29 = vpop.permute.xlu2 %6934  ;;  %v6985_v44 = vand.u32 4294901760, %v14672_v35 }
 0x752   :  { %6726 = vmatpush.xpose.msrb.mxu1 %v14521_v2 }
 0x753   :  { %v14657_v38 = vadd.f32 %v5980_v61, %v5915_v19  ;;  %6552 = vmatmul.f32.vlgmr.msrb.gmra.mxu2 %v6498_v52  ;;  %v6501_v19 = vand.u32 4294901760, %v6500_v16  ;;  %v5832_v52 = vadd.f32 %v14550_v15, %v14557_v46  ;;  %v6784_v46 = vsel %vm588_vm1, %v6781_v60, 0 }
 0x754   :  { %6752 = vmatpush.xpose.msrb.mxu2 %v16156_v30  ;;  %v5836_v60 = vadd.f32 %v14567_v41, %v14572_v5 }
 0x755   :  { %16155 = vst [vmem:[#allocation30_spill] sm:$0xff] %v14657_v38  ;;  %6576 = vmatmul.f32.vlgmr.msrb.gmra.mxu3 %v6499_v43  ;;  %v6655_v38 = vand.u32 4294901760, %v6654_v32  ;;  %v5885_v43 = vadd.f32 %v14559_v21, %v5832_v52 }
 0x756   :  { %6774 = vmatpush.xpose.msrb.mxu3 %v14521_v2  ;;  %v6004_v20 = vpop.f32.mrf.mxu0  ;;  %v6132_v61 = vpop.f32.mrf.mxu2 }
 0x757   :  { %v6005_v1 = vadd.f32 %v6004_v20, %v5939_v3  ;;  %v6058_v50 = vpop.f32.mrf.mxu1  ;;  %v7091_v2 = vpop.permute.xlu0 %7090  ;;  %v6986_v20 = vsub.f32 %v14672_v35, %v6985_v44 }
 0x758   :  { %v6214_v30 = vpop.f32.mrf.mxu3  ;;  %v7094_v22 = vsel %vm588_vm1, %v7091_v2, 0 }
 0x759   :  { %v6055_v23 = vadd.f32 %v6054_v12, %v6005_v1  ;;  %6502 = vmatmul.f32.vlgmr.msrb.gmra.mxu0 %v6501_v19  ;;  %6622 = vmatmul.f32.vlgmr.msra.gmra.mxu1 %v14628_v18  ;;  %v5945_v12 = vadd.f32 %v14564_v9, %v5885_v43  ;;  %v14691_v3 = vand.u32 4294901760, %v7094_v22  ;;  %v5890_v9 = vadd.f32 %v14575_v54, %v5836_v60 }
 0x75a   :  { %6703 = vmatpush.xpose.msrb.mxu0 %v14528_v31  ;;  %6834 = vmatpush.xpose.msra.mxu1 %v6833_v7  ;;  %v6938_v31 = vsel %vm588_vm1, %v6935_v29, 0  ;;  %v6987_v7 = vand.u32 4294901760, %v6986_v20 }
 0x75b   :  { %v6133_v15 = vadd.f32 %v6132_v61, %v6055_v23  ;;  %6656 = vmatmul.f32.vlgmr.msra.gmra.mxu2 %v6655_v38  ;;  %v14687_v38 = vand.u32 4294901760, %v6784_v46  ;;  %v14694_v19 = vand.u32 4294901760, %v6938_v31  ;;  %v14703_v1 = vsub.f32 %v7094_v22, %v14691_v3  ;;  %v7089_v22 = vpop.permute.xlu1 %7088 }
 0x75c   :  { %6857 = vmatpush.xpose.msra.mxu2 %v14642_v25 }
 0x75d   :  { %v14681_v21 = vadd.f32 %v6214_v30, %v6133_v15  ;;  %6682 = vmatmul.f32.vlgmr.msra.gmra.mxu3 %v14634_v36  ;;  %v6806_v41 = vsub.f32 %v6784_v46, %v14687_v38  ;;  %v14707_v54 = vsub.f32 %v6938_v31, %v14694_v19  ;;  %v7139_v46 = vand.u32 4294901760, %v14703_v1 }
 0x75e   :  { %6880 = vmatpush.xpose.msra.mxu3 %v14632_v53  ;;  %v6008_v23 = vpop.f32.mrf.mxu0  ;;  %v6140_v16 = vpop.f32.mrf.mxu2 }
 0x75f   :  { %v6009_v8 = vadd.f32 %v6008_v23, %v5945_v12  ;;  %v6062_v32 = vpop.f32.mrf.mxu1  ;;  %v6807_v2 = vand.u32 4294901760, %v6806_v41  ;;  %v6961_v31 = vand.u32 4294901760, %v14707_v54  ;;  %v7140_v60 = vsub.f32 %v14703_v1, %v7139_v46 }
 0x760   :  { %v6218_v61 = vpop.f32.mrf.mxu3 }
 0x761   :  { %v6059_v52 = vadd.f32 %v6058_v50, %v6009_v8  ;;  %6600 = vmatmul.f32.vlgmr.msra.gmra.mxu0 %v14628_v18  ;;  %6730 = vmatmul.f32.vlgmr.msrb.gmra.mxu1 %v6653_v4  ;;  %v7245_v18 = vpop.permute.xlu2 %7244  ;;  %v5840_v4 = vadd.f32 %v14580_v55, %v14585_v48 }
 0x762   :  { %6804 = vmatpush.xpose.msra.mxu0 %v14632_v53  ;;  %6928 = vmatpush.xpose.msrb.mxu1 %v14632_v53  ;;  %v5951_v53 = vadd.f32 %v14578_v57, %v5890_v9  ;;  %v7248_v55 = vsel %vm588_vm1, %v7245_v18, 0  ;;  %v16157_v57 = vand.u32 4294901760, %v14642_v25 }
 0x763   :  { %v6141_v5 = vadd.f32 %v6140_v16, %v6059_v52  ;;  %6754 = vmatmul.f32.vlgmr.msrb.gmra.mxu2 %v14634_v36  ;;  %v5895_v48 = vadd.f32 %v14588_v39, %v5840_v4  ;;  %v14727_v8 = vand.u32 4294901760, %v7248_v55  ;;  %v6962_v39 = vsub.f32 %v14707_v54, %v6961_v31 }
 0x764   :  { %6958 = vmatpush.xpose.msrb.mxu2 %v14662_v6 }
 0x765   :  { %v14711_v50 = vadd.f32 %v6218_v61, %v6141_v5  ;;  %6776 = vmatmul.f32.vlgmr.msrb.gmra.mxu3 %v14634_v36  ;;  %v6808_v36 = vsub.f32 %v6806_v41, %v6807_v2  ;;  %v14737_v5 = vsub.f32 %v7248_v55, %v14727_v8 }
 0x766   :  { %6988 = vmatpush.xpose.msrb.mxu3 %v6987_v7  ;;  %v6012_v30 = vpop.f32.mrf.mxu0  ;;  %v6148_v43 = vpop.f32.mrf.mxu2  ;;  %v6963_v7 = vand.u32 4294901760, %v6962_v39 }
 0x767   :  { %v6013_v29 = vadd.f32 %v6012_v30, %v5951_v53  ;;  %v6066_v15 = vpop.f32.mrf.mxu1  ;;  %v6809_v61 = vand.u32 4294901760, %v6808_v36  ;;  %v7293_v53 = vand.u32 4294901760, %v14737_v5  ;;  %v7092_v30 = vsel %vm588_vm1, %v7089_v22, 0 }
 0x768   :  { %v6222_v12 = vpop.f32.mrf.mxu3 }
 0x769   :  { %v6063_v23 = vadd.f32 %v6062_v32, %v6013_v29  ;;  %6706 = vmatmul.f32.vlgmr.msrb.gmra.mxu0 %v14645_v27  ;;  %6836 = vmatmul.f32.vlgmr.msra.gmra.mxu1 %v14687_v38  ;;  %v5957_v27 = vadd.f32 %v14591_v40, %v5895_v48  ;;  %v7399_v40 = vpop.permute.xlu1 %7398  ;;  %v7294_v22 = vsub.f32 %v14737_v5, %v7293_v53 }
 0x76a   :  { %6906 = vmatpush.xpose.msrb.mxu0 %v16157_v57  ;;  %7034 = vmatpush.xpose.msra.mxu1 %v14662_v6 }
 0x76b   :  { %v6149_v16 = vadd.f32 %v6148_v43, %v6063_v23  ;;  %6860 = vmatmul.f32.vlgmr.msra.gmra.mxu2 %v6806_v41  ;;  %v7141_v41 = vand.u32 4294901760, %v7140_v60  ;;  %v7402_v43 = vsel %vm588_vm1, %v7399_v40, 0 }
 0x76c   :  { %7060 = vmatpush.xpose.msra.mxu2 %v6985_v44  ;;  %v14759_v48 = vand.u32 4294901760, %v7402_v43 }
 0x76d   :  { %v14731_v32 = vadd.f32 %v6222_v12, %v6149_v16  ;;  %6884 = vmatmul.f32.vlgmr.msra.gmra.mxu3 %v6807_v2  ;;  %v14754_v12 = vand.u32 4294901760, %v7092_v30  ;;  %v7295_v16 = vand.u32 4294901760, %v7294_v22 }
 0x76e   :  { %7082 = vmatpush.xpose.msra.mxu3 %v14662_v6  ;;  %v6016_v25 = vpop.f32.mrf.mxu0  ;;  %v6156_v20 = vpop.f32.mrf.mxu2  ;;  %v14771_v60 = vsub.f32 %v7402_v43, %v14759_v48 }
 0x76f   :  { %v6017_v9 = vadd.f32 %v6016_v25, %v5957_v27  ;;  %v14734_v52 = vpop.f32.mrf.mxu1  ;;  %v7243_v6 = vpop.permute.xlu0 %7242  ;;  %v7114_v36 = vsub.f32 %v7092_v30, %v14754_v12 }
 0x770   :  { %v6226_v44 = vpop.f32.mrf.mxu3  ;;  %v7246_v29 = vsel %vm588_vm1, %v7243_v6, 0 }
 0x771   :  { %v6067_v18 = vadd.f32 %v6066_v15, %v6017_v9  ;;  %6810 = vmatmul.f32.vlgmr.msra.gmra.mxu0 %v6809_v61  ;;  %6930 = vmatmul.f32.vlgmr.msrb.gmra.mxu1 %v14687_v38  ;;  %v14763_v57 = vand.u32 4294901760, %v7246_v29 }
 0x772   :  { %7011 = vmatpush.xpose.msra.mxu0 %v14672_v35  ;;  %7142 = vmatpush.xpose.msrb.mxu1 %v7141_v41 }
 0x773   :  { %v6157_v4 = vadd.f32 %v6156_v20, %v6067_v18  ;;  %6964 = vmatmul.f32.vlgmr.msrb.gmra.mxu2 %v6963_v7  ;;  %v14775_v39 = vsub.f32 %v7246_v29, %v14763_v57  ;;  %v7447_v20 = vand.u32 4294901760, %v14771_v60  ;;  %v7397_v29 = vpop.permute.xlu2 %7396 }
 0x774   :  { %7165 = vmatpush.xpose.msrb.mxu2 %v14703_v1  ;;  %v7400_v22 = vsel %vm588_vm1, %v7397_v29, 0 }
 0x775   :  { %v14745_v2 = vadd.f32 %v6226_v44, %v6157_v4  ;;  %6990 = vmatmul.f32.vlgmr.msrb.gmra.mxu3 %v14694_v19  ;;  %v7269_v9 = vand.u32 4294901760, %v14775_v39  ;;  %v7448_v7 = vsub.f32 %v14771_v60, %v7447_v20 }
 0x776   :  { %7188 = vmatpush.xpose.msrb.mxu3 %v14691_v3  ;;  %v14750_v35 = vpop.f32.mrf.mxu0  ;;  %v14752_v15 = vpop.f32.mrf.mxu2 }
 0x777   :  { %16158 = vst [vmem:[#allocation34_spill] sm:$0xff] %v14745_v2  ;;  %v14756_v55 = vpop.f32.mrf.mxu1  ;;  %v7553_v27 = vpop.permute.xlu0 %7552  ;;  %v7270_v18 = vsub.f32 %v14775_v39, %v7269_v9  ;;  %v7449_v4 = vand.u32 4294901760, %v7448_v7 }
 0x778   :  { %16159 = vst [vmem:[#allocation31_spill] sm:$0xff] %v14752_v15  ;;  %v14761_v23 = vpop.f32.mrf.mxu3  ;;  %v7556_v41 = vsel %vm588_vm1, %v7553_v27, 0 }
 0x779   :  { %16160 = vst [vmem:[#allocation35_spill] sm:$0xff] %v14756_v55  ;;  %6908 = vmatmul.f32.vlgmr.msrb.gmra.mxu0 %v14687_v38  ;;  %7038 = vmatmul.f32.vlgmr.msra.gmra.mxu1 %v6961_v31  ;;  %v7115_v31 = vand.u32 4294901760, %v7114_v36  ;;  %v7573_v44 = vand.u32 4294901760, %v7556_v41  ;;  %v7271_v43 = vand.u32 4294901760, %v7270_v18 }
 0x77a   :  { %16161 = vst [vmem:[#allocation38_spill] sm:$0xff] %v14761_v23  ;;  %7112 = vmatpush.xpose.msrb.mxu0 %v14691_v3  ;;  %7236 = vmatpush.xpose.msra.mxu1 %v14691_v3 }
 0x77b   :  { %7062 = vmatmul.f32.vlgmr.msra.gmra.mxu2 %v14694_v19 }
 0x77c   :  { %7266 = vmatpush.xpose.msra.mxu2 %v14727_v8 }
 0x77d   :  { %7084 = vmatmul.f32.vlgmr.msra.gmra.mxu3 %v14694_v19  ;;  %v7116_v19 = vsub.f32 %v7114_v36, %v7115_v31 }
 0x77e   :  { %7296 = vmatpush.xpose.msra.mxu3 %v7295_v16  ;;  %v14778_v38 = vpop.f32.mrf.mxu0  ;;  %v14780_v3 = vpop.f32.mrf.mxu2 }
 0x77f   :  { %16162 = vst [vmem:[#allocation39_spill] sm:$0xff] %v14780_v3  ;;  %v14782_v25 = vpop.f32.mrf.mxu1  ;;  %v7117_v6 = vand.u32 4294901760, %v7116_v19 }
 0x780   :  { %16163 = vst [vmem:[#allocation37_spill] sm:$0xff] %v14782_v25  ;;  %v14785_v61 = vpop.f32.mrf.mxu3 }
 0x781   :  { %16164 = vst [vmem:[#allocation41_spill] sm:$0xff] %v14785_v61  ;;  %7014 = vmatmul.f32.vlgmr.msra.gmra.mxu0 %v14707_v54  ;;  %7144 = vmatmul.f32.vlgmr.msrb.gmra.mxu1 %v14754_v12 }
 0x782   :  { %7214 = vmatpush.xpose.msra.mxu0 %v7139_v46  ;;  %7342 = vmatpush.xpose.msrb.mxu1 %v14727_v8  ;;  %v7600_v46 = vsub.f32 %v7556_v41, %v7573_v44 }
 0x783   :  { %7168 = vmatmul.f32.vlgmr.msrb.gmra.mxu2 %v7114_v36 }
 0x784   :  { %7368 = vmatpush.xpose.msrb.mxu2 %v7293_v53  ;;  %v7601_v53 = vand.u32 4294901760, %v7600_v46 }
 0x785   :  { %7192 = vmatmul.f32.vlgmr.msrb.gmra.mxu3 %v7115_v31  ;;  %v7421_v31 = vand.u32 4294901760, %v7400_v22 }
 0x786   :  { %7390 = vmatpush.xpose.msrb.mxu3 %v14727_v8  ;;  %v14797_v40 = vpop.f32.mrf.mxu0  ;;  %v14799_v54 = vpop.f32.mrf.mxu2  ;;  %v7602_v41 = vsub.f32 %v7600_v46, %v7601_v53 }
 0x787   :  { %16165 = vst [vmem:[#allocation36_spill] sm:$0xff] %v14797_v40  ;;  %v14801_v1 = vpop.f32.mrf.mxu1  ;;  %v7551_v8 = vpop.permute.xlu1 %7550 }
 0x788   :  { %16166 = vst [vmem:[#allocation40_spill] sm:$0xff] %v14799_v54  ;;  %v14803_v30 = vpop.f32.mrf.mxu3  ;;  %v7554_v36 = vsel %vm588_vm1, %v7551_v8, 0  ;;  %v7603_v18 = vand.u32 4294901760, %v7602_v41 }
 0x789   :  { %16167 = vst [vmem:[#allocation45_spill] sm:$0xff] %v14801_v1  ;;  %7118 = vmatmul.f32.vlgmr.msrb.gmra.mxu0 %v7117_v6  ;;  %7238 = vmatmul.f32.vlgmr.msra.gmra.mxu1 %v14754_v12  ;;  %v7575_v7 = vand.u32 4294901760, %v7554_v36 }
 0x78a   :  { %16168 = vst [vmem:[#allocation43_spill] sm:$0xff] %v14803_v30  ;;  %7319 = vmatpush.xpose.msrb.mxu0 %v14737_v5  ;;  %7450 = vmatpush.xpose.msra.mxu1 %v7449_v4 }
 0x78b   :  { %7272 = vmatmul.f32.vlgmr.msra.gmra.mxu2 %v7271_v43  ;;  %v7576_v6 = vsub.f32 %v7554_v36, %v7575_v7 }
 0x78c   :  { %7473 = vmatpush.xpose.msra.mxu2 %v14771_v60  ;;  %v7422_v60 = vsub.f32 %v7400_v22, %v7421_v31 }
 0x78d   :  { %7298 = vmatmul.f32.vlgmr.msra.gmra.mxu3 %v14763_v57  ;;  %v7577_v8 = vand.u32 4294901760, %v7576_v6 }
 0x78e   :  { %7496 = vmatpush.xpose.msra.mxu3 %v14759_v48  ;;  %v14812_v16 = vpop.f32.mrf.mxu0  ;;  %v14814_v27 = vpop.f32.mrf.mxu2  ;;  %v7423_v29 = vand.u32 4294901760, %v7422_v60 }
 0x78f   :  { %16169 = vst [vmem:[#allocation42_spill] sm:$0xff] %v14812_v16  ;;  %v14816_v5 = vpop.f32.mrf.mxu1 }
 0x790   :  { %16170 = vst [vmem:[#allocation46_spill] sm:$0xff] %v14814_v27  ;;  %v14818_v19 = vpop.f32.mrf.mxu3 }
 0x791   :  { %16171 = vst [vmem:[#allocation44_spill] sm:$0xff] %v14818_v19  ;;  %7216 = vmatmul.f32.vlgmr.msra.gmra.mxu0 %v14754_v12  ;;  %7346 = vmatmul.f32.vlgmr.msrb.gmra.mxu1 %v7269_v9 }
 0x792   :  { %7420 = vmatpush.xpose.msra.mxu0 %v14759_v48  ;;  %7544 = vmatpush.xpose.msrb.mxu1 %v14759_v48  ;;  %v7424_v48 = vsub.f32 %v7422_v60, %v7423_v29 }
 0x793   :  { %7370 = vmatmul.f32.vlgmr.msrb.gmra.mxu2 %v14763_v57 }
 0x794   :  { %7574 = vmatpush.xpose.msrb.mxu2 %v7573_v44  ;;  %v7425_v41 = vand.u32 4294901760, %v7424_v48 }
 0x795   :  { %7392 = vmatmul.f32.vlgmr.msrb.gmra.mxu3 %v14763_v57  ;;  %v7578_v57 = vsub.f32 %v7576_v6, %v7577_v8 }
 0x796   :  { %7604 = vmatpush.xpose.msrb.mxu3 %v7603_v18  ;;  %v14825_v4 = vpop.f32.mrf.mxu0  ;;  %v14827_v43 = vpop.f32.mrf.mxu2 }
 0x797   :  { %v14829_v12 = vpop.f32.mrf.mxu1  ;;  %v7579_v30 = vand.u32 4294901760, %v7578_v57 }
 0x798   :  { %v14831_v9 = vpop.f32.mrf.mxu3 }
 0x799   :  { %7322 = vmatmul.f32.vlgmr.msrb.gmra.mxu0 %v14775_v39  ;;  %7452 = vmatmul.f32.vlgmr.msra.gmra.mxu1 %v7421_v31 }
 0x79a   :  { %7522 = vmatpush.xpose.msrb.mxu0 %v7447_v20  ;;  %7650 = vmatpush.xpose.msra.mxu1 %v7573_v44 }
 0x79b   :  { %7476 = vmatmul.f32.vlgmr.msra.gmra.mxu2 %v7422_v60 }
 0x79c   :  { %7676 = vmatpush.xpose.msra.mxu2 %v7601_v53 }
 0x79d   :  { %7500 = vmatmul.f32.vlgmr.msra.gmra.mxu3 %v7423_v29 }
 0x79e   :  { %7698 = vmatpush.xpose.msra.mxu3 %v7573_v44  ;;  %v14834_v22 = vpop.f32.mrf.mxu0  ;;  %v14836_v36 = vpop.f32.mrf.mxu2 }
 0x79f   :  { %16172 = vst [vmem:[#allocation48_spill] sm:$0xff] %v14836_v36  ;;  %v14838_v18 = vpop.f32.mrf.mxu1 }
 0x7a0   :  { %16173 = vst [vmem:[#allocation50_spill] sm:$0xff] %v14838_v18  ;;  %v14840_v19 = vpop.f32.mrf.mxu3 }
 0x7a1   :  { %16174 = vst [vmem:[#allocation52_spill] sm:$0xff] %v14840_v19  ;;  %7426 = vmatmul.f32.vlgmr.msra.gmra.mxu0 %v7425_v41  ;;  %7546 = vmatmul.f32.vlgmr.msrb.gmra.mxu1 %v7421_v31 }
 0x7a2   :  { %7627 = vmatpush.xpose.msra.mxu0 %v7600_v46 }
 0x7a3   :  { %7580 = vmatmul.f32.vlgmr.msrb.gmra.mxu2 %v7579_v30 }
 0x7a5   :  { %7606 = vmatmul.f32.vlgmr.msrb.gmra.mxu3 %v7575_v7 }
 0x7a6   :  { %v14842_v39 = vpop.f32.mrf.mxu0  ;;  %v14844_v20 = vpop.f32.mrf.mxu2 }
 0x7a7   :  { %16175 = vst [vmem:[#allocation49_spill] sm:$0xff] %v14844_v20  ;;  %v14846_v44 = vpop.f32.mrf.mxu1 }
 0x7a8   :  { %16176 = vst [vmem:[#allocation53_spill] sm:$0xff] %v14846_v44  ;;  %v14848_v53 = vpop.f32.mrf.mxu3 }
 0x7a9   :  { %16177 = vst [vmem:[#allocation47_spill] sm:$0xff] %v14848_v53  ;;  %7524 = vmatmul.f32.vlgmr.msrb.gmra.mxu0 %v7421_v31  ;;  %7654 = vmatmul.f32.vlgmr.msra.gmra.mxu1 %v7577_v8 }
 0x7ab   :  { %7678 = vmatmul.f32.vlgmr.msra.gmra.mxu2 %v7575_v7 }
 0x7ad   :  { %7700 = vmatmul.f32.vlgmr.msra.gmra.mxu3 %v7575_v7 }
 0x7ae   :  { %v14850_v60 = vpop.f32.mrf.mxu0  ;;  %v14852_v29 = vpop.f32.mrf.mxu2 }
 0x7af   :  { %16178 = vst [vmem:[#allocation51_spill] sm:$0xff] %v14850_v60  ;;  %v14854_v48 = vpop.f32.mrf.mxu1 }
 0x7b0   :  { %16179 = vst [vmem:[#allocation54_spill] sm:$0xff] %v14852_v29  ;;  %v14856_v46 = vpop.f32.mrf.mxu3 }
 0x7b1   :  { %16180 = vst [vmem:[#allocation55_spill] sm:$0xff] %v14854_v48  ;;  %7630 = vmatmul.f32.vlgmr.msra.gmra.mxu0 %v7576_v6 }
 0x7b2   :  { %16181 = vst [vmem:[#allocation56_spill] sm:$0xff] %v14856_v46 }
 0x7b6   :  { %v14858_v30 = vpop.f32.mrf.mxu0  ;;  %v14860_v57 = vpop.f32.mrf.mxu2 }
 0x7b7   :  { %16182 = vst [vmem:[#allocation57_spill] sm:$0xff] %v14858_v30  ;;  %v14862_v41 = vpop.f32.mrf.mxu1 }
 0x7b8   :  { %16183 = vst [vmem:[#allocation58_spill] sm:$0xff] %v14860_v57  ;;  %v14864_v27 = vpop.f32.mrf.mxu3 }
 0x7b9   :  { %16184 = vst [vmem:[#allocation59_spill] sm:$0xff] %v14862_v41 }
 0x7ba   :  { %16185 = vst [vmem:[#allocation60_spill] sm:$0xff] %v14864_v27 }
 0x7be   :  { %v14866_v31 = vpop.f32.mrf.mxu0  ;;  %v14868_v7 = vpop.f32.mrf.mxu2 }
 0x7bf   :  { %16186 = vst [vmem:[#allocation61_spill] sm:$0xff] %v14866_v31  ;;  %v14870_v8 = vpop.f32.mrf.mxu1 }
 0x7c0   :  { %16187 = vst [vmem:[#allocation62_spill] sm:$0xff] %v14868_v7  ;;  %v14872_v29 = vpop.f32.mrf.mxu3 }
 0x7c1   :  { %16188 = vst [vmem:[#allocation63_spill] sm:$0xff] %v14870_v8 }
 0x7c2   :  { %16189 = vst [vmem:[#allocation64_spill] sm:$0xff] %v14872_v29 }
 0x7c6   :  { %v14874_v48 = vpop.f32.mrf.mxu0  ;;  %v14876_v46 = vpop.f32.mrf.mxu2 }
 0x7c7   :  { %16190 = vst [vmem:[#allocation65_spill] sm:$0xff] %v14874_v48  ;;  %v14878_v6 = vpop.f32.mrf.mxu1 }
 0x7c8   :  { %16191 = vst [vmem:[#allocation66_spill] sm:$0xff] %v14876_v46  ;;  %v14880_v30 = vpop.f32.mrf.mxu3 }
 0x7c9   :  { %16192 = vst [vmem:[#allocation67_spill] sm:$0xff] %v14878_v6 }
 0x7ca   :  { %16193 = vst [vmem:[#allocation68_spill] sm:$0xff] %v14880_v30 }
 0x7ce   :  { %v14882_v57 = vpop.f32.mrf.mxu0  ;;  %v14884_v41 = vpop.f32.mrf.mxu2 }
 0x7cf   :  { %16194 = vst [vmem:[#allocation69_spill] sm:$0xff] %v14882_v57  ;;  %v6529_v27 = vpop.f32.mrf.mxu1 }
 0x7d0   :  { %16195 = vst [vmem:[#allocation70_spill] sm:$0xff] %v14884_v41  ;;  %v14886_v31 = vpop.f32.mrf.mxu3 }
 0x7d1   :  { %16196 = vst [vmem:[#allocation71_spill] sm:$0xff] %v14886_v31 }
 0x7d6   :  { %v6503_v7 = vpop.f32.mrf.mxu0  ;;  %v6553_v53 = vpop.f32.mrf.mxu2 }
 0x7d7   :  { %v6530_v8 = vadd.f32 %v6529_v27, %v6503_v7  ;;  %v6623_v1 = vpop.f32.mrf.mxu1 }
 0x7d8   :  { %v6577_v29 = vpop.f32.mrf.mxu3 }
 0x7d9   :  { %v6554_v54 = vadd.f32 %v6553_v53, %v6530_v8 }
 0x7db   :  { %v6578_v48 = vadd.f32 %v6577_v29, %v6554_v54 }
 0x7de   :  { %v6601_v61 = vpop.f32.mrf.mxu0  ;;  %v6657_v46 = vpop.f32.mrf.mxu2 }
 0x7df   :  { %v6602_v23 = vadd.f32 %v6601_v61, %v6578_v48  ;;  %v6731_v6 = vpop.f32.mrf.mxu1 }
 0x7e0   :  { %v6683_v44 = vpop.f32.mrf.mxu3 }
 0x7e1   :  { %v6624_v30 = vadd.f32 %v6623_v1, %v6602_v23  ;;  %v6684_v41 = vadd.f32 %v6683_v44, %v6657_v46 }
 0x7e3   :  { %v14890_v57 = vsel %vm13701_vm3, %v6624_v30, -1e+30 }
 0x7e4   :  { %v7712_v31 = vsel %vm588_vm1, %v14890_v57, -inf }
 0x7e5   :  { %7713 = vmax.xlane.f32.xlu2 %v7712_v31 }
 0x7e6   :  { %v6707_v27 = vpop.f32.mrf.mxu0  ;;  %v6755_v7 = vpop.f32.mrf.mxu2 }
 0x7e7   :  { %v6708_v19 = vadd.f32 %v6707_v27, %v6684_v41  ;;  %v6837_v53 = vpop.f32.mrf.mxu1 }
 0x7e8   :  { %v6777_v54 = vpop.f32.mrf.mxu3 }
 0x7e9   :  { %v6732_v29 = vadd.f32 %v6731_v6, %v6708_v19 }
 0x7eb   :  { %v6756_v8 = vadd.f32 %v6755_v7, %v6732_v29 }
 0x7ed   :  { %v6778_v61 = vadd.f32 %v6777_v54, %v6756_v8 }
 0x7ee   :  { %v6811_v48 = vpop.f32.mrf.mxu0  ;;  %v6861_v16 = vpop.f32.mrf.mxu2 }
 0x7ef   :  { %v6838_v23 = vadd.f32 %v6837_v53, %v6811_v48  ;;  %v6931_v1 = vpop.f32.mrf.mxu1  ;;  %v14896_v30 = vsel %vm13713_vm5, %v6778_v61, -1e+30 }
 0x7f0   :  { %v6885_v3 = vpop.f32.mrf.mxu3  ;;  %v7715_v44 = vsel %vm588_vm1, %v14896_v30, -inf }
 0x7f1   :  { %v6862_v46 = vadd.f32 %v6861_v16, %v6838_v23  ;;  %7716 = vmax.xlane.f32.xlu0 %v7715_v44 }
 0x7f3   :  { %v6886_v41 = vadd.f32 %v6885_v3, %v6862_v46 }
 0x7f6   :  { %v6909_v31 = vpop.f32.mrf.mxu0  ;;  %v6965_v27 = vpop.f32.mrf.mxu2 }
 0x7f7   :  { %v6910_v19 = vadd.f32 %v6909_v31, %v6886_v41  ;;  %v7039_v6 = vpop.f32.mrf.mxu1 }
 0x7f8   :  { %v6991_v7 = vpop.f32.mrf.mxu3 }
 0x7f9   :  { %v6932_v54 = vadd.f32 %v6931_v1, %v6910_v19  ;;  %v6992_v61 = vadd.f32 %v6991_v7, %v6965_v27 }
 0x7fb   :  { %v14902_v53 = vsel %vm13725_vm7, %v6932_v54, -1e+30 }
 0x7fc   :  { %v7718_v8 = vsel %vm588_vm1, %v14902_v53, -inf }
 0x7fd   :  { %7719 = vmax.xlane.f32.xlu1 %v7718_v8 }
 0x7fe   :  { %v7015_v48 = vpop.f32.mrf.mxu0  ;;  %v7063_v15 = vpop.f32.mrf.mxu2 }
 0x7ff   :  { %v7016_v16 = vadd.f32 %v7015_v48, %v6992_v61  ;;  %v7145_v23 = vpop.f32.mrf.mxu1 }
 0x800   :  { %v7085_v3 = vpop.f32.mrf.mxu3 }
 0x801   :  { %v7040_v44 = vadd.f32 %v7039_v6, %v7016_v16 }
 0x803   :  { %v7064_v46 = vadd.f32 %v7063_v15, %v7040_v44 }
 0x805   :  { %v7086_v41 = vadd.f32 %v7085_v3, %v7064_v46 }
 0x806   :  { %v7119_v31 = vpop.f32.mrf.mxu0  ;;  %v7169_v60 = vpop.f32.mrf.mxu2 }
 0x807   :  { %v7146_v1 = vadd.f32 %v7145_v23, %v7119_v31  ;;  %v14908_v19 = vsel %vm13755_vm12, %v7086_v41, -1e+30  ;;  %v7239_v8 = vpop.f32.mrf.mxu1 }
 0x808   :  { %v7193_v54 = vpop.f32.mrf.mxu3  ;;  %v7721_v27 = vsel %vm588_vm1, %v14908_v19, -inf }
 0x809   :  { %v7170_v7 = vadd.f32 %v7169_v60, %v7146_v1  ;;  %7722 = vmax.xlane.f32.xlu2 %v7721_v27 }
 0x80b   :  { %v7194_v61 = vadd.f32 %v7193_v54, %v7170_v7 }
 0x80e   :  { %v7217_v48 = vpop.f32.mrf.mxu0  ;;  %v7273_v2 = vpop.f32.mrf.mxu2 }
 0x80f   :  { %v7218_v6 = vadd.f32 %v7217_v48, %v7194_v61  ;;  %v7347_v44 = vpop.f32.mrf.mxu1 }
 0x810   :  { %v7299_v15 = vpop.f32.mrf.mxu3 }
 0x811   :  { %v7240_v16 = vadd.f32 %v7239_v8, %v7218_v6  ;;  %v7300_v41 = vadd.f32 %v7299_v15, %v7273_v2 }
 0x813   :  { %v14914_v23 = vsel %vm13739_vm9, %v7240_v16, -1e+30 }
 0x814   :  { %v7724_v46 = vsel %vm588_vm1, %v14914_v23, -inf }
 0x815   :  { %7725 = vmax.xlane.f32.xlu2 %v7724_v46 }
 0x816   :  { %v7323_v31 = vpop.f32.mrf.mxu0  ;;  %v7371_v60 = vpop.f32.mrf.mxu2 }
 0x817   :  { %v7324_v1 = vadd.f32 %v7323_v31, %v7300_v41  ;;  %v7453_v61 = vpop.f32.mrf.mxu1 }
 0x818   :  { %v7393_v54 = vpop.f32.mrf.mxu3 }
 0x819   :  { %v7348_v27 = vadd.f32 %v7347_v44, %v7324_v1 }
 0x81b   :  { %v7372_v7 = vadd.f32 %v7371_v60, %v7348_v27 }
 0x81d   :  { %v7394_v18 = vadd.f32 %v7393_v54, %v7372_v7 }
 0x81e   :  { %v7427_v48 = vpop.f32.mrf.mxu0  ;;  %v7477_v16 = vpop.f32.mrf.mxu2 }
 0x81f   :  { %v7454_v8 = vadd.f32 %v7453_v61, %v7427_v48  ;;  %v14920_v6 = vsel %vm13783_vm4, %v7394_v18, -1e+30  ;;  %v7547_v31 = vpop.f32.mrf.mxu1 }
 0x820   :  { %v7727_v36 = vsel %vm588_vm1, %v14920_v6, -inf  ;;  %v7501_v15 = vpop.f32.mrf.mxu3 }
 0x821   :  { %v7478_v2 = vadd.f32 %v7477_v16, %v7454_v8  ;;  %7728 = vmax.xlane.f32.xlu1 %v7727_v36 }
 0x823   :  { %v7502_v46 = vadd.f32 %v7501_v15, %v7478_v2 }
 0x826   :  { %v7525_v41 = vpop.f32.mrf.mxu0 }
 0x827   :  { %v7526_v44 = vadd.f32 %v7525_v41, %v7502_v46 }
 0x829   :  { %v7548_v60 = vadd.f32 %v7547_v31, %v7526_v44 }
 0x82b   :  { %v14926_v1 = vsel %vm13765_vm13, %v7548_v60, -1e+30 }
 0x82c   :  { %v7730_v18 = vsel %vm588_vm1, %v14926_v1, -inf }
 0x82d   :  { %7731 = vmax.xlane.f32.xlu2 %v7730_v18 }
 0x83a   :  { %7952 = vrot.lane.b32.xlu1 %v13533_v59, %s13330_s8 }
 0x842   :  { %8104 = vrot.lane.b32.xlu1 %v13538_v13, %s13330_s8 }
 0x84a   :  { %8560 = vrot.lane.b32.xlu1 %v13553_v49, %s13330_s8 }
 0x858   :  { %v7714_v36 = vpop.xlane.xlu2 %7713 }
 0x859   :  { %v7736_v27 = vsub.f32 %v14890_v57, %v7714_v36 }
 0x85b   :  { %v7744_v54 = vmul.f32 1.442695, %v7736_v27 }
 0x85d   :  { %13222 = vpow2.f32 %v7744_v54 }
 0x863   :  { %v14937_v7 = vpop.eup %13222 }
 0x864   :  { %v7717_v61 = vpop.xlane.xlu0 %7716  ;;  %v7760_v48 = vsel %vm588_vm1, %v14937_v7, 0.0 }
 0x865   :  { %v7737_v8 = vsub.f32 %v14896_v30, %v7717_v61  ;;  %7761 = vadd.xlane.f32.xlu0 %v7760_v48  ;;  %v7607_v61 = vpop.f32.mrf.mxu3 }
 0x867   :  { %v7746_v16 = vmul.f32 1.442695, %v7737_v8  ;;  %v7581_v8 = vpop.f32.mrf.mxu2 }
 0x869   :  { %13224 = vpow2.f32 %v7746_v16  ;;  %v7631_v16 = vpop.f32.mrf.mxu0 }
 0x86f   :  { %v14942_v2 = vpop.eup %13224 }
 0x870   :  { %v7720_v15 = vpop.xlane.xlu1 %7719  ;;  %v7763_v46 = vsel %vm588_vm1, %v14942_v2, 0.0 }
 0x871   :  { %v7738_v57 = vsub.f32 %v14902_v53, %v7720_v15  ;;  %7764 = vadd.xlane.f32.xlu2 %v7763_v46  ;;  %v7608_v15 = vadd.f32 %v7607_v61, %v7581_v8 }
 0x873   :  { %v7748_v41 = vmul.f32 1.442695, %v7738_v57  ;;  %v7632_v46 = vadd.f32 %v7631_v16, %v7608_v15 }
 0x875   :  { %13226 = vpow2.f32 %v7748_v41 }
 0x879   :  { %7800 = vrot.lane.b32.xlu0 %v13528_v45, %s13330_s8 }
 0x87b   :  { %v14949_v44 = vpop.eup %13226 }
 0x87c   :  { %v7723_v30 = vpop.xlane.xlu2 %7722  ;;  %v7766_v31 = vsel %vm588_vm1, %v14949_v44, 0.0 }
 0x87d   :  { %v7739_v60 = vsub.f32 %v14908_v19, %v7723_v30  ;;  %7767 = vadd.xlane.f32.xlu2 %v7766_v31  ;;  %v7655_v19 = vpop.f32.mrf.mxu1  ;;  %v7679_v31 = vpop.f32.mrf.mxu2 }
 0x87e   :  { %v7656_v41 = vadd.f32 %v7655_v19, %v7632_v46 }
 0x87f   :  { %v7750_v18 = vmul.f32 1.442695, %v7739_v60 }
 0x880   :  { %v7680_v60 = vadd.f32 %v7679_v31, %v7656_v41 }
 0x881   :  { %13228 = vpow2.f32 %v7750_v18  ;;  %v7701_v18 = vpop.f32.mrf.mxu3 }
 0x887   :  { %v14954_v36 = vpop.eup %13228 }
 0x888   :  { %v7726_v53 = vpop.xlane.xlu2 %7725  ;;  %v7769_v27 = vsel %vm588_vm1, %v14954_v36, 0.0 }
 0x889   :  { %v7740_v54 = vsub.f32 %v14914_v23, %v7726_v53  ;;  %7770 = vadd.xlane.f32.xlu2 %v7769_v27  ;;  %v7702_v23 = vadd.f32 %v7701_v18, %v7680_v60 }
 0x88b   :  { %v7752_v48 = vmul.f32 1.442695, %v7740_v54  ;;  %v14965_v53 = vsel %vm13779_vm2, %v7702_v23, -1e+30 }
 0x88c   :  { %v7733_v27 = vsel %vm588_vm1, %v14965_v53, -inf }
 0x88d   :  { %13230 = vpow2.f32 %v7752_v48 }
 0x893   :  { %v14959_v57 = vpop.eup %13230 }
 0x894   :  { %v7772_v30 = vsel %vm588_vm1, %v14959_v57, 0.0  ;;  %v7729_v54 = vpop.xlane.xlu1 %7728 }
 0x895   :  { %7773 = vadd.xlane.f32.xlu1 %v7772_v30  ;;  %v7741_v61 = vsub.f32 %v14920_v6, %v7729_v54 }
 0x897   :  { %v7754_v48 = vmul.f32 1.442695, %v7741_v61 }
 0x899   :  { %13232 = vpow2.f32 %v7754_v48 }
 0x89f   :  { %v14980_v8 = vpop.eup %13232 }
 0x8a0   :  { %v7775_v16 = vsel %vm588_vm1, %v14980_v8, 0.0  ;;  %v7732_v15 = vpop.xlane.xlu2 %7731 }
 0x8a1   :  { %8256 = vrot.lane.b32.xlu2 %v13543_v24, %s13330_s8  ;;  %v7742_v6 = vsub.f32 %v14926_v1, %v7732_v15 }
 0x8a3   :  { %7734 = vmax.xlane.f32.xlu0 %v7733_v27  ;;  %v7756_v46 = vmul.f32 1.442695, %v7742_v6 }
 0x8a5   :  { %13234 = vpow2.f32 %v7756_v46 }
 0x8ab   :  { %v14991_v41 = vpop.eup %13234 }
 0x8ac   :  { %v7953_v19 = vpop.permute.xlu1 %7952  ;;  %v7778_v1 = vsel %vm588_vm1, %v14991_v41, 0.0 }
 0x8ae   :  { %8712 = vrot.lane.b32.xlu1 %v13560_v63, %s13330_s8 }
 0x8b6   :  { %9413 = vrot.lane.b32.xlu1 %v13528_v45, %s13331_s9 }
 0x8b7   :  { %8408 = vrot.lane.b32.xlu0 %v13548_v33, %s13330_s8 }
 0x8be   :  { %9411 = vrot.lane.b32.xlu1 %v13571_v10, %s13332_s10 }
 0x8c6   :  { %9565 = vrot.lane.b32.xlu1 %v13577_v28, %s13332_s10  ;;  %v14993_v28 = vand.u32 4294901760, %v7953_v19 }
 0x8ca   :  { %7776 = vadd.xlane.f32.xlu2 %v7775_v16  ;;  %v8105_v16 = vpop.permute.xlu1 %8104 }
 0x8ce   :  { %9719 = vrot.lane.b32.xlu1 %v13586_v51, %s13332_s10 }
 0x8d6   :  { %9873 = vrot.lane.b32.xlu1 %v13590_v58, %s13332_s10  ;;  %v8000_v58 = vsub.f32 %v7953_v19, %v14993_v28 }
 0x8d8   :  { %v7762_v10 = vpop.xlane.xlu0 %7761  ;;  %v8001_v27 = vand.u32 4294901760, %v8000_v58 }
 0x8d9   :  { %13236 = vrcp.f32 %v7762_v10 }
 0x8da   :  { %v8002_v61 = vsub.f32 %v8000_v58, %v8001_v27 }
 0x8dc   :  { %v8003_v19 = vand.u32 4294901760, %v8002_v61 }
 0x8de   :  { %10183 = vrot.lane.b32.xlu1 %v13553_v49, %s13331_s9 }
 0x8df   :  { %v13237_v30 = vpop.eup %13236 }
 0x8e0   :  { %v7792_v51 = vmul.f32 %v13237_v30, %v14937_v7  ;;  %v15008_v30 = vand.u32 4294901760, %v8105_v16 }
 0x8e1   :  { %7779 = vadd.xlane.f32.xlu0 %v7778_v1 }
 0x8e2   :  { %v7804_v31 = vsel %vm588_vm1, %v7792_v51, 0 }
 0x8e3   :  { %v15002_v60 = vand.u32 4294901760, %v7804_v31 }
 0x8e4   :  { %v7765_v18 = vpop.xlane.xlu2 %7764 }
 0x8e5   :  { %v7824_v23 = vsub.f32 %v7804_v31, %v15002_v60  ;;  %13238 = vrcp.f32 %v7765_v18 }
 0x8e6   :  { %10335 = vrot.lane.b32.xlu1 %v13638_v14, %s13332_s10 }
 0x8e7   :  { %v7825_v54 = vand.u32 4294901760, %v7824_v23 }
 0x8e9   :  { %v7826_v7 = vsub.f32 %v7824_v23, %v7825_v54 }
 0x8eb   :  { %v13239_v48 = vpop.eup %13238  ;;  %v7801_v15 = vpop.permute.xlu0 %7800  ;;  %v7827_v10 = vand.u32 4294901760, %v7826_v7 }
 0x8ec   :  { %v7793_v6 = vmul.f32 %v13239_v48, %v14942_v2  ;;  %v7821_v46 = vand.u32 4294901760, %v7801_v15  ;;  %v8152_v2 = vsub.f32 %v8105_v16, %v15008_v30 }
 0x8ee   :  { %v7956_v51 = vsel %vm588_vm1, %v7793_v6, 0  ;;  %v7848_v1 = vsub.f32 %v7801_v15, %v7821_v46  ;;  %7822 = vmatpush.msrb.mxu0 %v7821_v46  ;;  %7898 = vmatpush.msrb.mxu3 %v7821_v46  ;;  %v8153_v15 = vand.u32 4294901760, %v8152_v2 }
 0x8ef   :  { %v7975_v31 = vand.u32 4294901760, %v7956_v51  ;;  %7828 = vmatmul.f32.vlgmr.msrb.gmra.mxu0 %v7827_v10  ;;  %7902 = vmatmul.f32.vlgmr.msrb.gmra.mxu3 %v7825_v54 }
 0x8f0   :  { %v7849_v14 = vand.u32 4294901760, %v7848_v1  ;;  %8004 = vmatpush.msra.mxu3 %v8003_v19  ;;  %7875 = vmatpush.msrb.mxu2 %v7848_v1  ;;  %v7768_v18 = vpop.xlane.xlu2 %7767 }
 0x8f1   :  { %v7976_v40 = vsub.f32 %v7956_v51, %v7975_v31  ;;  %13240 = vrcp.f32 %v7768_v18  ;;  %7878 = vmatmul.f32.vlgmr.msrb.gmra.mxu2 %v7824_v23 }
 0x8f2   :  { %8098 = vmatpush.msrb.mxu3 %v14993_v28  ;;  %v7850_v7 = vsub.f32 %v7848_v1, %v7849_v14  ;;  %7974 = vmatpush.msra.mxu2 %v14993_v28  ;;  %v8561_v1 = vpop.permute.xlu1 %8560 }
 0x8f3   :  { %7924 = vmatpush.msra.mxu0 %v7849_v14  ;;  %v7977_v61 = vand.u32 4294901760, %v7976_v40 }
 0x8f4   :  { %8076 = vmatpush.msrb.mxu2 %v8001_v27  ;;  %v7851_v48 = vand.u32 4294901760, %v7850_v7 }
 0x8f5   :  { %8027 = vmatpush.msrb.mxu0 %v8000_v58  ;;  %9567 = vrot.lane.b32.xlu0 %v13533_v59, %s13331_s9  ;;  %v7978_v54 = vsub.f32 %v7976_v40, %v7977_v61  ;;  %v8154_v58 = vsub.f32 %v8152_v2, %v8153_v15 }
 0x8f6   :  { %7852 = vmatpush.msrb.mxu1 %v7851_v48 }
 0x8f7   :  { %v13241_v6 = vpop.eup %13240  ;;  %7854 = vmatmul.f32.vlgmr.msrb.gmra.mxu1 %v15002_v60  ;;  %7926 = vmatmul.f32.vlgmr.msra.gmra.mxu0 %v15002_v60  ;;  %v7979_v23 = vand.u32 4294901760, %v7978_v54 }
 0x8f8   :  { %v7794_v16 = vmul.f32 %v13241_v6, %v14949_v44  ;;  %7946 = vmatpush.msra.mxu1 %v7821_v46  ;;  %8006 = vmatmul.f32.vlgmr.msra.gmra.mxu3 %v7975_v31  ;;  %v8155_v44 = vand.u32 4294901760, %v8154_v58 }
 0x8f9   :  { %8126 = vmatpush.msra.mxu0 %v15008_v30  ;;  %8202 = vmatpush.msra.mxu3 %v15008_v30 }
 0x8fa   :  { %v8108_v27 = vsel %vm588_vm1, %v7794_v16, 0  ;;  %8050 = vmatpush.msrb.mxu1 %v14993_v28  ;;  %7980 = vmatmul.f32.vlgmr.msra.gmra.mxu2 %v7979_v23 }
 0x8fb   :  { %v8127_v10 = vand.u32 4294901760, %v8108_v27  ;;  %8179 = vmatpush.msra.mxu2 %v8152_v2 }
 0x8fc   :  { %v7771_v19 = vpop.xlane.xlu2 %7770 }
 0x8fd   :  { %v8128_v51 = vsub.f32 %v8108_v27, %v8127_v10  ;;  %13242 = vrcp.f32 %v7771_v19  ;;  %10029 = vrot.lane.b32.xlu0 %v13548_v33, %s13331_s9 }
 0x8ff   :  { %7948 = vmatmul.f32.vlgmr.msra.gmra.mxu1 %v15002_v60  ;;  %8030 = vmatmul.f32.vlgmr.msrb.gmra.mxu0 %v7976_v40  ;;  %v8129_v46 = vand.u32 4294901760, %v8128_v51 }
 0x900   :  { %8100 = vmatmul.f32.vlgmr.msrb.gmra.mxu3 %v7975_v31  ;;  %8156 = vmatpush.msra.mxu1 %v8155_v44 }
 0x901   :  { %8228 = vmatpush.msrb.mxu0 %v8153_v15  ;;  %v8130_v14 = vsub.f32 %v8128_v51, %v8129_v46 }
 0x902   :  { %8078 = vmatmul.f32.vlgmr.msrb.gmra.mxu2 %v7975_v31 }
 0x903   :  { %v13243_v28 = vpop.eup %13242  ;;  %v8131_v48 = vand.u32 4294901760, %v8130_v14  ;;  %v8581_v14 = vand.u32 4294901760, %v8561_v1 }
 0x904   :  { %v7795_v18 = vmul.f32 %v13243_v28, %v14954_v36  ;;  %v8257_v2 = vpop.permute.xlu2 %8256 }
 0x905   :  { %v8277_v7 = vand.u32 4294901760, %v8257_v2  ;;  %10181 = vrot.lane.b32.xlu0 %v13647_v17, %s13332_s10 }
 0x906   :  { %v8260_v54 = vsel %vm588_vm1, %v7795_v18, 0  ;;  %v8608_v18 = vsub.f32 %v8561_v1, %v8581_v14 }
 0x907   :  { %v8279_v60 = vand.u32 4294901760, %v8260_v54  ;;  %v8304_v40 = vsub.f32 %v8257_v2, %v8277_v7  ;;  %8054 = vmatmul.f32.vlgmr.msrb.gmra.mxu1 %v7977_v61  ;;  %8132 = vmatmul.f32.vlgmr.msra.gmra.mxu0 %v8131_v48 }
 0x908   :  { %8206 = vmatmul.f32.vlgmr.msra.gmra.mxu3 %v8129_v46  ;;  %8250 = vmatpush.msrb.mxu1 %v15008_v30  ;;  %v7774_v15 = vpop.xlane.xlu1 %7773 }
 0x909   :  { %v8280_v31 = vsub.f32 %v8260_v54, %v8279_v60  ;;  %v8305_v6 = vand.u32 4294901760, %v8304_v40  ;;  %8278 = vmatpush.msrb.mxu2 %v8277_v7  ;;  %8331 = vmatpush.msra.mxu0 %v8304_v40  ;;  %13244 = vrcp.f32 %v7774_v15 }
 0x90a   :  { %8182 = vmatmul.f32.vlgmr.msra.gmra.mxu2 %v8128_v51 }
 0x90b   :  { %v8306_v36 = vsub.f32 %v8304_v40, %v8305_v6  ;;  %8380 = vmatpush.msra.mxu2 %v8305_v6  ;;  %v8281_v17 = vand.u32 4294901760, %v8280_v31 }
 0x90d   :  { %v8307_v23 = vand.u32 4294901760, %v8306_v36  ;;  %10491 = vrot.lane.b32.xlu0 %v13564_v0, %s13331_s9  ;;  %v8282_v16 = vsub.f32 %v8280_v31, %v8281_v17 }
 0x90f   :  { %8158 = vmatmul.f32.vlgmr.msra.gmra.mxu1 %v8127_v10  ;;  %8230 = vmatmul.f32.vlgmr.msrb.gmra.mxu0 %v8127_v10  ;;  %v8283_v61 = vand.u32 4294901760, %v8282_v16  ;;  %v13245_v30 = vpop.eup %13244 }
 0x910   :  { %8308 = vmatpush.msrb.mxu3 %v8307_v23  ;;  %8354 = vmatpush.msra.mxu1 %v8277_v7  ;;  %v7796_v58 = vmul.f32 %v13245_v30, %v14959_v57 }
 0x911   :  { %8310 = vmatmul.f32.vlgmr.msrb.gmra.mxu3 %v8279_v60 }
 0x912   :  { %8402 = vmatpush.msra.mxu3 %v8277_v7  ;;  %8284 = vmatmul.f32.vlgmr.msrb.gmra.mxu2 %v8283_v61  ;;  %v8412_v51 = vsel %vm588_vm1, %v7796_v58, 0 }
 0x913   :  { %v8431_v46 = vand.u32 4294901760, %v8412_v51 }
 0x915   :  { %v8432_v28 = vsub.f32 %v8412_v51, %v8431_v46 }
 0x916   :  { %v7735_v27 = vpop.xlane.xlu0 %7734 }
 0x917   :  { %v7743_v19 = vsub.f32 %v14965_v53, %v7735_v27  ;;  %8252 = vmatmul.f32.vlgmr.msrb.gmra.mxu1 %v8127_v10  ;;  %8334 = vmatmul.f32.vlgmr.msra.gmra.mxu0 %v8280_v31  ;;  %v8433_v53 = vand.u32 4294901760, %v8432_v28  ;;  %v8609_v10 = vand.u32 4294901760, %v8608_v18 }
 0x919   :  { %v7758_v44 = vmul.f32 1.442695, %v7743_v19  ;;  %8404 = vmatmul.f32.vlgmr.msra.gmra.mxu3 %v8279_v60  ;;  %v8434_v7 = vsub.f32 %v8432_v28, %v8433_v53  ;;  %v8610_v48 = vsub.f32 %v8608_v18, %v8609_v10 }
 0x91a   :  { %8382 = vmatmul.f32.vlgmr.msra.gmra.mxu2 %v8279_v60 }
 0x91b   :  { %13246 = vpow2.f32 %v7758_v44  ;;  %v8435_v60 = vand.u32 4294901760, %v8434_v7  ;;  %v8611_v31 = vand.u32 4294901760, %v8610_v48 }
 0x91f   :  { %8358 = vmatmul.f32.vlgmr.msra.gmra.mxu1 %v8281_v17 }
 0x920   :  { %v8713_v54 = vpop.permute.xlu1 %8712 }
 0x921   :  { %v15036_v2 = vpop.eup %13246  ;;  %v8733_v6 = vand.u32 4294901760, %v8713_v54 }
 0x922   :  { %v7781_v57 = vsel %vm588_vm1, %v15036_v2, 0.0 }
 0x923   :  { %7782 = vadd.xlane.f32.xlu2 %v7781_v57  ;;  %v8760_v17 = vsub.f32 %v8713_v54, %v8733_v6 }
 0x925   :  { %v8761_v61 = vand.u32 4294901760, %v8760_v17 }
 0x927   :  { %v8762_v30 = vsub.f32 %v8760_v17, %v8761_v61 }
 0x929   :  { %v8409_v40 = vpop.permute.xlu0 %8408  ;;  %v8763_v58 = vand.u32 4294901760, %v8762_v30 }
 0x92a   :  { %v8429_v15 = vand.u32 4294901760, %v8409_v40 }
 0x92c   :  { %v8456_v36 = vsub.f32 %v8409_v40, %v8429_v15  ;;  %8430 = vmatpush.msrb.mxu0 %v8429_v15  ;;  %8506 = vmatpush.msrb.mxu3 %v8429_v15 }
 0x92d   :  { %8436 = vmatmul.f32.vlgmr.msrb.gmra.mxu0 %v8435_v60  ;;  %8510 = vmatmul.f32.vlgmr.msrb.gmra.mxu3 %v8433_v53 }
 0x92e   :  { %v8457_v1 = vand.u32 4294901760, %v8456_v36  ;;  %8612 = vmatpush.msra.mxu3 %v8611_v31  ;;  %8483 = vmatpush.msrb.mxu2 %v8456_v36 }
 0x92f   :  { %8486 = vmatmul.f32.vlgmr.msrb.gmra.mxu2 %v8432_v28 }
 0x930   :  { %8706 = vmatpush.msrb.mxu3 %v8581_v14  ;;  %v8458_v23 = vsub.f32 %v8456_v36, %v8457_v1  ;;  %8582 = vmatpush.msra.mxu2 %v8581_v14 }
 0x931   :  { %8532 = vmatpush.msra.mxu0 %v8457_v1 }
 0x932   :  { %8684 = vmatpush.msrb.mxu2 %v8609_v10  ;;  %v8459_v16 = vand.u32 4294901760, %v8458_v23 }
 0x933   :  { %8635 = vmatpush.msrb.mxu0 %v8608_v18 }
 0x934   :  { %8460 = vmatpush.msrb.mxu1 %v8459_v16 }
 0x935   :  { %8462 = vmatmul.f32.vlgmr.msrb.gmra.mxu1 %v8431_v46  ;;  %8534 = vmatmul.f32.vlgmr.msra.gmra.mxu0 %v8431_v46 }
 0x936   :  { %8554 = vmatpush.msra.mxu1 %v8429_v15  ;;  %8734 = vmatpush.msra.mxu0 %v8733_v6 }
 0x938   :  { %8658 = vmatpush.msrb.mxu1 %v8581_v14 }
 0x93b   :  { %8864 = vrot.lane.b32.xlu2 %v13564_v0, %s13330_s8 }
 0x93d   :  { %v7777_v27 = vpop.xlane.xlu2 %7776  ;;  %8556 = vmatmul.f32.vlgmr.msra.gmra.mxu1 %v8431_v46 }
 0x93e   :  { %13248 = vrcp.f32 %v7777_v27  ;;  %8764 = vmatpush.msra.mxu1 %v8763_v58 }
 0x943   :  { %9721 = vrot.lane.b32.xlu2 %v13538_v13, %s13331_s9 }
 0x944   :  { %v13249_v19 = vpop.eup %13248 }
 0x945   :  { %v7797_v51 = vmul.f32 %v13249_v19, %v14980_v8 }
 0x947   :  { %v8564_v44 = vsel %vm588_vm1, %v7797_v51, 0  ;;  %v27_v51 = vld [vmem:[%s16014_s3 + $0x48] sm:$0xff] }
 0x948   :  { %v8583_v28 = vand.u32 4294901760, %v8564_v44 }
 0x94a   :  { %v8584_v18 = vsub.f32 %v8564_v44, %v8583_v28  ;;  %8614 = vmatmul.f32.vlgmr.msra.gmra.mxu3 %v8583_v28 }
 0x94b   :  { %8810 = vmatpush.msra.mxu3 %v8733_v6  ;;  %9875 = vrot.lane.b32.xlu2 %v13543_v24, %s13331_s9 }
 0x94c   :  { %8638 = vmatmul.f32.vlgmr.msrb.gmra.mxu0 %v8584_v18  ;;  %v8585_v14 = vand.u32 4294901760, %v8584_v18 }
 0x94d   :  { %8836 = vmatpush.msrb.mxu0 %v8761_v61 }
 0x94e   :  { %8662 = vmatmul.f32.vlgmr.msrb.gmra.mxu1 %v8585_v14  ;;  %v8586_v46 = vsub.f32 %v8584_v18, %v8585_v14  ;;  %v15059_v14 = vand.u32 4294901760, %v27_v51 }
 0x94f   :  { %8858 = vmatpush.msrb.mxu1 %v8733_v6 }
 0x950   :  { %v8587_v57 = vand.u32 4294901760, %v8586_v46 }
 0x952   :  { %8588 = vmatmul.f32.vlgmr.msra.gmra.mxu2 %v8587_v57  ;;  %8708 = vmatmul.f32.vlgmr.msrb.gmra.mxu3 %v8583_v28 }
 0x953   :  { %8787 = vmatpush.msra.mxu2 %v8760_v17  ;;  %10027 = vrot.lane.b32.xlu2 %v13598_v56, %s13332_s10 }
 0x954   :  { %v7780_v8 = vpop.xlane.xlu0 %7779 }
 0x955   :  { %13250 = vrcp.f32 %v7780_v8 }
 0x95a   :  { %8686 = vmatmul.f32.vlgmr.msrb.gmra.mxu2 %v8583_v28 }
 0x95b   :  { %v13251_v53 = vpop.eup %13250  ;;  %10337 = vrot.lane.b32.xlu2 %v13560_v63, %s13331_s9 }
 0x95c   :  { %v7798_v10 = vmul.f32 %v13251_v53, %v14991_v41 }
 0x95e   :  { %v8716_v7 = vsel %vm588_vm1, %v7798_v10, 0  ;;  %v15062_v10 = vsub.f32 %v27_v51, %v15059_v14 }
 0x95f   :  { %v8735_v48 = vand.u32 4294901760, %v8716_v7 }
 0x961   :  { %v8736_v54 = vsub.f32 %v8716_v7, %v8735_v48  ;;  %8766 = vmatmul.f32.vlgmr.msra.gmra.mxu1 %v8735_v48 }
 0x963   :  { %10489 = vrot.lane.b32.xlu2 %v13679_v26, %s13332_s10  ;;  %8790 = vmatmul.f32.vlgmr.msra.gmra.mxu2 %v8736_v54  ;;  %v8737_v40 = vand.u32 4294901760, %v8736_v54 }
 0x965   :  { %8814 = vmatmul.f32.vlgmr.msra.gmra.mxu3 %v8737_v40  ;;  %v8738_v56 = vsub.f32 %v8736_v54, %v8737_v40 }
 0x967   :  { %v8739_v15 = vand.u32 4294901760, %v8738_v56  ;;  %v9139_v56 = vand.u32 4294901760, %v15062_v10 }
 0x969   :  { %8740 = vmatmul.f32.vlgmr.msra.gmra.mxu0 %v8739_v15  ;;  %8860 = vmatmul.f32.vlgmr.msrb.gmra.mxu1 %v8735_v48 }
 0x96c   :  { %v7829_v60 = vpop.f32.mrf.mxu0 }
 0x971   :  { %8838 = vmatmul.f32.vlgmr.msrb.gmra.mxu0 %v8735_v48 }
 0x972   :  { %v7903_v31 = vpop.f32.mrf.mxu3 }
 0x974   :  { %v7855_v6 = vpop.f32.mrf.mxu1  ;;  %v7879_v41 = vpop.f32.mrf.mxu2 }
 0x975   :  { %v7927_v36 = vpop.f32.mrf.mxu0  ;;  %v7856_v16 = vadd.f32 %v7855_v6, %v7829_v60 }
 0x977   :  { %v7880_v26 = vadd.f32 %v7879_v41, %v7856_v16 }
 0x979   :  { %v7904_v19 = vadd.f32 %v7903_v31, %v7880_v26 }
 0x97b   :  { %v8007_v17 = vpop.f32.mrf.mxu3  ;;  %v7928_v46 = vadd.f32 %v7927_v36, %v7904_v19  ;;  %v9414_v36 = vpop.permute.xlu1 %9413 }
 0x97c   :  { %v7949_v1 = vpop.f32.mrf.mxu1  ;;  %v9417_v19 = vsel %vm588_vm1, %v9414_v36, 0 }
 0x97d   :  { %v7981_v23 = vpop.f32.mrf.mxu2  ;;  %v8031_v61 = vpop.f32.mrf.mxu0  ;;  %v7950_v7 = vadd.f32 %v7949_v1, %v7928_v46 }
 0x97e   :  { %v8008_v18 = vadd.f32 %v8007_v17, %v7981_v23  ;;  %v9140_v23 = vsub.f32 %v15062_v10, %v9139_v56 }
 0x97f   :  { %v9017_v15 = vsel %vm588_vm1, %v7950_v7, 0 }
 0x980   :  { %v8032_v53 = vadd.f32 %v8031_v61, %v8008_v18  ;;  %v15066_v17 = vand.u32 4294901760, %v9017_v15  ;;  %v9141_v18 = vand.u32 4294901760, %v9140_v23 }
 0x982   :  { %v15071_v51 = vsub.f32 %v9017_v15, %v15066_v17 }
 0x983   :  { %v8101_v58 = vpop.f32.mrf.mxu3 }
 0x984   :  { %v8055_v30 = vpop.f32.mrf.mxu1  ;;  %v9059_v15 = vand.u32 4294901760, %v15071_v51 }
 0x985   :  { %v8079_v27 = vpop.f32.mrf.mxu2  ;;  %v8133_v44 = vpop.f32.mrf.mxu0  ;;  %v8056_v48 = vadd.f32 %v8055_v30, %v8032_v53 }
 0x987   :  { %v8080_v6 = vadd.f32 %v8079_v27, %v8056_v48  ;;  %v15076_v48 = vand.u32 4294901760, %v9417_v19 }
 0x989   :  { %v8102_v1 = vadd.f32 %v8101_v58, %v8080_v6 }
 0x98b   :  { %v8207_v57 = vpop.f32.mrf.mxu3 }
 0x98c   :  { %v8159_v28 = vpop.f32.mrf.mxu1 }
 0x98d   :  { %v8183_v8 = vpop.f32.mrf.mxu2  ;;  %v8160_v54 = vadd.f32 %v8159_v28, %v8133_v44  ;;  %v8231_v60 = vpop.f32.mrf.mxu0 }
 0x98f   :  { %v8184_v41 = vadd.f32 %v8183_v8, %v8160_v54  ;;  %v9020_v8 = vsel %vm588_vm1, %v8102_v1, 0 }
 0x991   :  { %v8208_v30 = vadd.f32 %v8207_v57, %v8184_v41 }
 0x993   :  { %v8232_v53 = vadd.f32 %v8231_v60, %v8208_v30  ;;  %v9060_v30 = vsub.f32 %v15071_v51, %v9059_v15 }
 0x994   :  { %v8253_v31 = vpop.f32.mrf.mxu1  ;;  %v8311_v16 = vpop.f32.mrf.mxu3 }
 0x995   :  { %v8285_v61 = vpop.f32.mrf.mxu2  ;;  %v8335_v58 = vpop.f32.mrf.mxu0  ;;  %v8254_v60 = vadd.f32 %v8253_v31, %v8232_v53 }
 0x996   :  { %v7783_v40 = vpop.xlane.xlu2 %7782  ;;  %v8312_v44 = vadd.f32 %v8311_v16, %v8285_v61  ;;  %v15083_v16 = vsub.f32 %v9417_v19, %v15076_v48 }
 0x997   :  { %13252 = vrcp.f32 %v7783_v40 }
 0x998   :  { %v8336_v6 = vadd.f32 %v8335_v58, %v8312_v44  ;;  %v9462_v58 = vand.u32 4294901760, %v15083_v16 }
 0x99c   :  { %v8359_v54 = vpop.f32.mrf.mxu1 }
 0x99d   :  { %v13253_v26 = vpop.eup %13252  ;;  %v8360_v23 = vadd.f32 %v8359_v54, %v8336_v6  ;;  %v8383_v31 = vpop.f32.mrf.mxu2  ;;  %v9061_v54 = vand.u32 4294901760, %v9060_v30 }
 0x99e   :  { %v7799_v28 = vmul.f32 %v13253_v26, %v15036_v2  ;;  %v8865_v27 = vpop.permute.xlu2 %8864  ;;  %v15079_v2 = vand.u32 4294901760, %v9020_v8  ;;  %v8405_v6 = vpop.f32.mrf.mxu3 }
 0x99f   :  { %v8885_v46 = vand.u32 4294901760, %v8865_v27  ;;  %v8384_v53 = vadd.f32 %v8383_v31, %v8360_v23  ;;  %v9463_v23 = vsub.f32 %v15083_v16, %v9462_v58 }
 0x9a0   :  { %v8868_v7 = vsel %vm588_vm1, %v7799_v28, 0  ;;  %v15089_v44 = vsub.f32 %v9020_v8, %v15079_v2 }
 0x9a1   :  { %v8887_v57 = vand.u32 4294901760, %v8868_v7  ;;  %v8912_v40 = vsub.f32 %v8865_v27, %v8885_v46  ;;  %8886 = vmatpush.msrb.mxu2 %v8885_v46  ;;  %8962 = vmatpush.msra.mxu1 %v8885_v46 }
 0x9a3   :  { %9142 = vmatpush.msrb.mxu1 %v9141_v18  ;;  %v8888_v41 = vsub.f32 %v8868_v7, %v8887_v57  ;;  %v8913_v36 = vand.u32 4294901760, %v8912_v40  ;;  %8939 = vmatpush.msra.mxu0 %v8912_v40  ;;  %v9023_v18 = vsel %vm588_vm1, %v8254_v60, 0 }
 0x9a5   :  { %9056 = vmatpush.msrb.mxu0 %v15059_v14  ;;  %v8914_v61 = vsub.f32 %v8912_v40, %v8913_v36  ;;  %8988 = vmatpush.msra.mxu2 %v8913_v36  ;;  %v8889_v1 = vand.u32 4294901760, %v8888_v41  ;;  %v15100_v40 = vand.u32 4294901760, %v9023_v18  ;;  %v8406_v36 = vadd.f32 %v8405_v6, %v8384_v53 }
 0x9a6   :  { %8942 = vmatmul.f32.vlgmr.msra.gmra.mxu0 %v8888_v41  ;;  %v9722_v26 = vpop.permute.xlu2 %9721 }
 0x9a7   :  { %9319 = vmatpush.msra.mxu0 %v9139_v56  ;;  %v8915_v28 = vand.u32 4294901760, %v8914_v61  ;;  %v9725_v27 = vsel %vm588_vm1, %v9722_v26, 0  ;;  %8966 = vmatmul.f32.vlgmr.msra.gmra.mxu1 %v8889_v1  ;;  %v8890_v19 = vsub.f32 %v8888_v41, %v8889_v1  ;;  %v9067_v41 = vand.u32 4294901760, %v15089_v44 }
 0x9a8   :  { %v15093_v7 = vand.u32 4294901760, %v9725_v27  ;;  %9369 = vmatpush.msra.mxu1 %v15059_v14  ;;  %v9026_v30 = vsel %vm588_vm1, %v8406_v36, 0 }
 0x9a9   :  { %8916 = vmatpush.msrb.mxu3 %v8915_v28  ;;  %v8891_v56 = vand.u32 4294901760, %v8890_v19  ;;  %v9068_v1 = vsub.f32 %v15089_v44, %v9067_v41  ;;  %v15116_v26 = vand.u32 4294901760, %v9026_v30 }
 0x9aa   :  { %v15098_v8 = vsub.f32 %v9725_v27, %v15093_v7  ;;  %8918 = vmatmul.f32.vlgmr.msrb.gmra.mxu3 %v8887_v57  ;;  %v8437_v61 = vpop.f32.mrf.mxu0 }
 0x9ab   :  { %9010 = vmatpush.msra.mxu3 %v8885_v46  ;;  %8892 = vmatmul.f32.vlgmr.msrb.gmra.mxu2 %v8891_v56  ;;  %v9074_v46 = vsub.f32 %v9023_v18, %v15100_v40  ;;  %v9069_v28 = vand.u32 4294901760, %v9068_v1  ;;  %v9082_v56 = vsub.f32 %v9026_v30, %v15116_v26 }
 0x9ac   :  { %v16046_v60 = vand.u32 4294901760, %v15098_v8  ;;  %9193 = vmatpush.msrb.mxu2 %v15062_v10 }
 0x9ad   :  { %9251 = vmatpush.msrb.mxu3 %v15059_v14  ;;  %v9464_v14 = vand.u32 4294901760, %v9463_v23  ;;  %v9075_v27 = vand.u32 4294901760, %v9074_v46  ;;  %v9083_v1 = vand.u32 4294901760, %v9082_v56 }
 0x9ae   :  { %9062 = vmatmul.f32.vlgmr.msrb.gmra.mxu0 %v9061_v54 }
 0x9af   :  { %9845 = vmatpush.xpose.msrb.mxu0 %v16046_v60  ;;  %9144 = vmatmul.f32.vlgmr.msrb.gmra.mxu1 %v15066_v17  ;;  %v9076_v6 = vsub.f32 %v9074_v46, %v9075_v27 }
 0x9b0   :  { %9867 = vmatpush.xpose.msrb.mxu1 %v15093_v7  ;;  %v8511_v53 = vpop.f32.mrf.mxu3 }
 0x9b2   :  { %v8463_v10 = vpop.f32.mrf.mxu1  ;;  %9012 = vmatmul.f32.vlgmr.msra.gmra.mxu3 %v8887_v57  ;;  %v8487_v19 = vpop.f32.mrf.mxu2 }
 0x9b3   :  { %v8464_v31 = vadd.f32 %v8463_v10, %v8437_v61  ;;  %9465 = vmatpush.xpose.msra.mxu3 %v9464_v14  ;;  %8990 = vmatmul.f32.vlgmr.msra.gmra.mxu2 %v8887_v57  ;;  %v8535_v36 = vpop.f32.mrf.mxu0  ;;  %v9077_v61 = vand.u32 4294901760, %v9076_v6  ;;  %v9084_v10 = vsub.f32 %v9082_v56, %v9083_v1 }
 0x9b4   :  { %9435 = vmatpush.xpose.msra.mxu2 %v15076_v48 }
 0x9b5   :  { %v8488_v18 = vadd.f32 %v8487_v19, %v8464_v31 }
 0x9b6   :  { %9070 = vmatmul.f32.gmra.mxu0 %v9069_v28 }
 0x9b7   :  { %v8512_v54 = vadd.f32 %v8511_v53, %v8488_v18  ;;  %9148 = vmatmul.f32.gmra.mxu1 %v15079_v2 }
 0x9b9   :  { %v8536_v23 = vadd.f32 %v8535_v36, %v8512_v54 }
 0x9ba   :  { %v8557_v60 = vpop.f32.mrf.mxu1  ;;  %9255 = vmatmul.f32.vlgmr.msrb.gmra.mxu3 %v9059_v15  ;;  %v9085_v15 = vand.u32 4294901760, %v9084_v10 }
 0x9bb   :  { %v8558_v57 = vadd.f32 %v8557_v60, %v8536_v23  ;;  %9511 = vmatpush.xpose.msrb.mxu3 %v15076_v48  ;;  %9196 = vmatmul.f32.vlgmr.msrb.gmra.mxu2 %v15071_v51 }
 0x9bc   :  { %9488 = vmatpush.xpose.msrb.mxu2 %v15083_v16 }
 0x9bd   :  { %v9029_v30 = vsel %vm588_vm1, %v8558_v57, 0 }
 0x9be   :  { %9078 = vmatmul.f32.gmra.mxu0 %v9077_v61  ;;  %v15127_v14 = vand.u32 4294901760, %v9029_v30 }
 0x9bf   :  { %9152 = vmatmul.f32.gmra.mxu1 %v15100_v40 }
 0x9c0   :  { %v9090_v31 = vsub.f32 %v9029_v30, %v15127_v14 }
 0x9c2   :  { %9261 = vmatmul.f32.gmra.mxu3 %v9067_v41  ;;  %v9091_v60 = vand.u32 4294901760, %v9090_v31 }
 0x9c3   :  { %9201 = vmatmul.f32.gmra.mxu2 %v15089_v44 }
 0x9c4   :  { %v9092_v51 = vsub.f32 %v9090_v31, %v9091_v60 }
 0x9c6   :  { %9086 = vmatmul.f32.gmra.mxu0 %v9085_v15  ;;  %v9093_v28 = vand.u32 4294901760, %v9092_v51 }
 0x9c7   :  { %9156 = vmatmul.f32.gmra.mxu1 %v15116_v26 }
 0x9c9   :  { %v8639_v41 = vpop.f32.mrf.mxu0 }
 0x9ca   :  { %9267 = vmatmul.f32.gmra.mxu3 %v9075_v27 }
 0x9cb   :  { %9206 = vmatmul.f32.gmra.mxu2 %v9074_v46  ;;  %v8663_v44 = vpop.f32.mrf.mxu1 }
 0x9cd   :  { %v8615_v19 = vpop.f32.mrf.mxu3 }
 0x9ce   :  { %9094 = vmatmul.f32.gmra.mxu0 %v9093_v28 }
 0x9cf   :  { %9160 = vmatmul.f32.gmra.mxu1 %v15127_v14 }
 0x9d2   :  { %9273 = vmatmul.f32.gmra.mxu3 %v9083_v1 }
 0x9d3   :  { %9211 = vmatmul.f32.gmra.mxu2 %v9082_v56 }
 0x9d5   :  { %v8589_v18 = vpop.f32.mrf.mxu2  ;;  %v8709_v57 = vpop.f32.mrf.mxu3 }
 0x9d6   :  { %v8616_v53 = vadd.f32 %v8615_v19, %v8589_v18 }
 0x9d8   :  { %v8640_v54 = vadd.f32 %v8639_v41, %v8616_v53 }
 0x9da   :  { %9279 = vmatmul.f32.gmra.mxu3 %v9091_v60  ;;  %v8664_v6 = vadd.f32 %v8663_v44, %v8640_v54 }
 0x9db   :  { %9216 = vmatmul.f32.gmra.mxu2 %v9090_v31 }
 0x9dd   :  { %v8687_v36 = vpop.f32.mrf.mxu2 }
 0x9de   :  { %v8688_v23 = vadd.f32 %v8687_v36, %v8664_v6  ;;  %v8767_v1 = vpop.f32.mrf.mxu1 }
 0x9e0   :  { %v8710_v27 = vadd.f32 %v8709_v57, %v8688_v23 }
 0x9e2   :  { %v9032_v46 = vsel %vm588_vm1, %v8710_v27, 0 }
 0x9e3   :  { %v15135_v61 = vand.u32 4294901760, %v9032_v46 }
 0x9e5   :  { %9164 = vmatmul.f32.gmra.mxu1 %v15135_v61  ;;  %v9098_v56 = vsub.f32 %v9032_v46, %v15135_v61 }
 0x9e6   :  { %v8741_v30 = vpop.f32.mrf.mxu0  ;;  %v8791_v60 = vpop.f32.mrf.mxu2 }
 0x9e7   :  { %v8768_v10 = vadd.f32 %v8767_v1, %v8741_v30  ;;  %9221 = vmatmul.f32.gmra.mxu2 %v9098_v56  ;;  %v9099_v15 = vand.u32 4294901760, %v9098_v56  ;;  %v8861_v54 = vpop.f32.mrf.mxu1 }
 0x9e8   :  { %v8815_v19 = vpop.f32.mrf.mxu3 }
 0x9e9   :  { %v8792_v31 = vadd.f32 %v8791_v60, %v8768_v10  ;;  %9285 = vmatmul.f32.gmra.mxu3 %v9099_v15  ;;  %v9100_v51 = vsub.f32 %v9098_v56, %v9099_v15  ;;  %v9412_v10 = vpop.permute.xlu1 %9411 }
 0x9eb   :  { %v9101_v28 = vand.u32 4294901760, %v9100_v51  ;;  %v8816_v18 = vadd.f32 %v8815_v19, %v8792_v31  ;;  %v9415_v31 = vsel %vm588_vm1, %v9412_v10, 0 }
 0x9ec   :  { %v9436_v19 = vand.u32 4294901760, %v9415_v31 }
 0x9ed   :  { %9102 = vmatmul.f32.gmra.mxu0 %v9101_v28 }
 0x9ee   :  { %v8839_v53 = vpop.f32.mrf.mxu0 }
 0x9ef   :  { %v8840_v41 = vadd.f32 %v8839_v53, %v8816_v18 }
 0x9f1   :  { %v8862_v44 = vadd.f32 %v8861_v54, %v8840_v41 }
 0x9f3   :  { %v9035_v6 = vsel %vm588_vm1, %v8862_v44, 0  ;;  %v9437_v44 = vsub.f32 %v9415_v31, %v9436_v19 }
 0x9f4   :  { %v15140_v36 = vand.u32 4294901760, %v9035_v6 }
 0x9f6   :  { %9168 = vmatmul.f32.gmra.mxu1 %v15140_v36  ;;  %v9106_v23 = vsub.f32 %v9035_v6, %v15140_v36  ;;  %v9568_v6 = vpop.permute.xlu0 %9567 }
 0x9f8   :  { %9226 = vmatmul.f32.gmra.mxu2 %v9106_v23  ;;  %v9107_v57 = vand.u32 4294901760, %v9106_v23 }
 0x9fa   :  { %9291 = vmatmul.f32.gmra.mxu3 %v9107_v57  ;;  %v9108_v27 = vsub.f32 %v9106_v23, %v9107_v57 }
 0x9fc   :  { %v9109_v46 = vand.u32 4294901760, %v9108_v27  ;;  %v9438_v27 = vand.u32 4294901760, %v9437_v44 }
 0x9fe   :  { %9110 = vmatmul.f32.gmra.mxu0 %v9109_v46  ;;  %v9571_v46 = vsel %vm588_vm1, %v9568_v6, 0 }
 0x9ff   :  { %v9588_v10 = vand.u32 4294901760, %v9571_v46 }
 0xa23   :  { %v8943_v15 = vpop.f32.mrf.mxu0 }
 0xa24   :  { %v8967_v51 = vpop.f32.mrf.mxu1 }
 0xa2d   :  { %v8919_v56 = vpop.f32.mrf.mxu3 }
 0xa2e   :  { %v8893_v1 = vpop.f32.mrf.mxu2 }
 0xa2f   :  { %v8920_v30 = vadd.f32 %v8919_v56, %v8893_v1  ;;  %v9876_v1 = vpop.permute.xlu2 %9875 }
 0xa31   :  { %v8944_v60 = vadd.f32 %v8943_v15, %v8920_v30  ;;  %v9439_v15 = vsub.f32 %v9437_v44, %v9438_v27 }
 0xa33   :  { %v8968_v28 = vadd.f32 %v8967_v51, %v8944_v60  ;;  %v9879_v60 = vsel %vm588_vm1, %v9876_v1, 0 }
 0xa35   :  { %v9013_v41 = vpop.f32.mrf.mxu3 }
 0xa36   :  { %v8991_v18 = vpop.f32.mrf.mxu2 }
 0xa37   :  { %v8992_v53 = vadd.f32 %v8991_v18, %v8968_v28  ;;  %v9615_v28 = vsub.f32 %v9571_v46, %v9588_v10  ;;  %v15152_v18 = vand.u32 4294901760, %v9879_v60 }
 0xa39   :  { %v9014_v54 = vadd.f32 %v9013_v41, %v8992_v53  ;;  %v9440_v53 = vand.u32 4294901760, %v9439_v15  ;;  %v9566_v41 = vpop.permute.xlu1 %9565  ;;  %v15161_v46 = vsub.f32 %v9879_v60, %v15152_v18 }
 0xa3a   :  { %v9569_v6 = vsel %vm588_vm1, %v9566_v41, 0 }
 0xa3b   :  { %v9038_v23 = vsel %vm588_vm1, %v9014_v54, 0  ;;  %v9616_v54 = vand.u32 4294901760, %v9615_v28 }
 0xa3c   :  { %v15146_v57 = vand.u32 4294901760, %v9038_v23 }
 0xa3e   :  { %9172 = vmatmul.f32.gmra.mxu1 %v15146_v57  ;;  %v9114_v56 = vsub.f32 %v9038_v23, %v15146_v57  ;;  %v9617_v23 = vsub.f32 %v9615_v28, %v9616_v54 }
 0xa40   :  { %9231 = vmatmul.f32.gmra.mxu2 %v9114_v56  ;;  %v9115_v30 = vand.u32 4294901760, %v9114_v56  ;;  %v9618_v1 = vand.u32 4294901760, %v9617_v23 }
 0xa42   :  { %9297 = vmatmul.f32.gmra.mxu3 %v9115_v30  ;;  %v9116_v31 = vsub.f32 %v9114_v56, %v9115_v30  ;;  %v9590_v56 = vand.u32 4294901760, %v9569_v6 }
 0xa44   :  { %v9117_v51 = vand.u32 4294901760, %v9116_v31  ;;  %v9591_v16 = vsub.f32 %v9569_v6, %v9590_v56 }
 0xa46   :  { %9118 = vmatmul.f32.gmra.mxu0 %v9117_v51  ;;  %9371 = vmatmul.f32.vlgmr.msra.gmra.mxu1 %v15066_v17 }
 0xa47   :  { %9973 = vmatpush.xpose.msra.mxu1 %v15152_v18 }
 0xa48   :  { %9441 = vmatmul.f32.vlgmr.msra.gmra.mxu2 %v9440_v53 }
 0xa49   :  { %9537 = vmatpush.xpose.msra.mxu2 %v9462_v58  ;;  %v9592_v58 = vand.u32 4294901760, %v9591_v16 }
 0xa4a   :  { %9467 = vmatmul.f32.vlgmr.msra.gmra.mxu3 %v9436_v19 }
 0xa4b   :  { %9559 = vmatpush.xpose.msra.mxu3 %v15076_v48  ;;  %v9593_v48 = vsub.f32 %v9591_v16, %v9592_v58 }
 0xa4e   :  { %9321 = vmatmul.f32.vlgmr.msra.gmra.mxu0 %v15066_v17  ;;  %9375 = vmatmul.f32.gmra.mxu1 %v15079_v2  ;;  %v9594_v17 = vand.u32 4294901760, %v9593_v48 }
 0xa4f   :  { %9950 = vmatpush.xpose.msra.mxu0 %v15161_v46 }
 0xa50   :  { %9491 = vmatmul.f32.vlgmr.msrb.gmra.mxu2 %v9437_v44  ;;  %v9720_v44 = vpop.permute.xlu1 %9719 }
 0xa51   :  { %9589 = vmatpush.xpose.msrb.mxu2 %v9588_v10 }
 0xa52   :  { %9515 = vmatmul.f32.vlgmr.msrb.gmra.mxu3 %v9438_v27  ;;  %v9723_v27 = vsel %vm588_vm1, %v9720_v44, 0 }
 0xa53   :  { %9619 = vmatpush.xpose.msrb.mxu3 %v9618_v1  ;;  %v15174_v15 = vand.u32 4294901760, %v9723_v27 }
 0xa56   :  { %9325 = vmatmul.f32.gmra.mxu0 %v15079_v2  ;;  %9379 = vmatmul.f32.gmra.mxu1 %v15100_v40  ;;  %v16201_v2 = vand.u32 4294901760, %v15098_v8 }
 0xa58   :  { %9539 = vmatmul.f32.vlgmr.msra.gmra.mxu2 %v9436_v19  ;;  %v9771_v30 = vsub.f32 %v15098_v8, %v16201_v2  ;;  %v9874_v31 = vpop.permute.xlu1 %9873  ;;  %v15212_v2 = vpop.f32.mrf.mxu2 }
 0xa59   :  { %9642 = vmatpush.xpose.msra.mxu2 %v9615_v28  ;;  %v9877_v53 = vsel %vm588_vm1, %v9874_v31, 0 }
 0xa5a   :  { %9561 = vmatmul.f32.vlgmr.msra.gmra.mxu3 %v9436_v19  ;;  %v9745_v19 = vsub.f32 %v9723_v27, %v15174_v15  ;;  %v15188_v6 = vand.u32 4294901760, %v9877_v53  ;;  %v15210_v27 = vpop.f32.mrf.mxu0 }
 0xa5b   :  { %9665 = vmatpush.xpose.msra.mxu3 %v9588_v10 }
 0xa5c   :  { %v9746_v60 = vand.u32 4294901760, %v9745_v19 }
 0xa5e   :  { %9329 = vmatmul.f32.gmra.mxu0 %v15100_v40  ;;  %9383 = vmatmul.f32.gmra.mxu1 %v15116_v26  ;;  %v9772_v40 = vand.u32 4294901760, %v9771_v30  ;;  %v9747_v51 = vsub.f32 %v9745_v19, %v9746_v60 }
 0xa60   :  { %9595 = vmatmul.f32.vlgmr.msrb.gmra.mxu2 %v9594_v17 }
 0xa61   :  { %9691 = vmatpush.xpose.msrb.mxu2 %v9616_v54  ;;  %v9748_v54 = vand.u32 4294901760, %v9747_v51 }
 0xa62   :  { %9621 = vmatmul.f32.vlgmr.msrb.gmra.mxu3 %v9590_v56 }
 0xa63   :  { %9713 = vmatpush.xpose.msrb.mxu3 %v9588_v10  ;;  %v10030_v10 = vpop.permute.xlu0 %10029 }
 0xa64   :  { %v10033_v28 = vsel %vm588_vm1, %v10030_v10, 0 }
 0xa65   :  { %v10050_v41 = vand.u32 4294901760, %v10033_v28 }
 0xa66   :  { %9333 = vmatmul.f32.gmra.mxu0 %v15116_v26  ;;  %9387 = vmatmul.f32.gmra.mxu1 %v15127_v14  ;;  %v9924_v26 = vand.u32 4294901760, %v15161_v46 }
 0xa68   :  { %9645 = vmatmul.f32.vlgmr.msra.gmra.mxu2 %v9591_v16 }
 0xa69   :  { %9743 = vmatpush.xpose.msra.mxu2 %v15093_v7 }
 0xa6a   :  { %9669 = vmatmul.f32.vlgmr.msra.gmra.mxu3 %v9592_v58 }
 0xa6b   :  { %9773 = vmatpush.xpose.msra.mxu3 %v9772_v40 }
 0xa6e   :  { %9337 = vmatmul.f32.gmra.mxu0 %v15127_v14  ;;  %9391 = vmatmul.f32.gmra.mxu1 %v15135_v61  ;;  %v9925_v14 = vsub.f32 %v15161_v46, %v9924_v26  ;;  %v15199_v46 = vpop.f32.mrf.mxu1 }
 0xa70   :  { %9693 = vmatmul.f32.vlgmr.msrb.gmra.mxu2 %v9590_v56  ;;  %v9926_v23 = vand.u32 4294901760, %v9925_v14 }
 0xa71   :  { %9796 = vmatpush.xpose.msrb.mxu2 %v15098_v8  ;;  %v15192_v8 = vsub.f32 %v10033_v28, %v10050_v41 }
 0xa72   :  { %9715 = vmatmul.f32.vlgmr.msrb.gmra.mxu3 %v9590_v56  ;;  %v15196_v56 = vsub.f32 %v9877_v53, %v15188_v6  ;;  %v15232_v53 = vpop.f32.mrf.mxu0 }
 0xa73   :  { %9819 = vmatpush.xpose.msrb.mxu3 %v15093_v7  ;;  %v10184_v7 = vpop.permute.xlu1 %10183  ;;  %v10078_v1 = vand.u32 4294901760, %v15192_v8 }
 0xa74   :  { %v9900_v16 = vand.u32 4294901760, %v15196_v56  ;;  %v10187_v58 = vsel %vm588_vm1, %v10184_v7, 0 }
 0xa75   :  { %v15206_v48 = vand.u32 4294901760, %v10187_v58  ;;  %v10079_v17 = vsub.f32 %v15192_v8, %v10078_v1 }
 0xa76   :  { %9341 = vmatmul.f32.gmra.mxu0 %v15135_v61  ;;  %9395 = vmatmul.f32.gmra.mxu1 %v15140_v36  ;;  %v10028_v61 = vpop.permute.xlu2 %10027  ;;  %v9901_v44 = vsub.f32 %v15196_v56, %v9900_v16  ;;  %v15218_v40 = vpop.f32.mrf.mxu1 }
 0xa77   :  { %v15216_v30 = vsub.f32 %v10187_v58, %v15206_v48 }
 0xa78   :  { %9749 = vmatmul.f32.vlgmr.msra.gmra.mxu2 %v9748_v54  ;;  %v9902_v10 = vand.u32 4294901760, %v9901_v44 }
 0xa79   :  { %9897 = vmatpush.xpose.msra.mxu2 %v15152_v18 }
 0xa7a   :  { %9775 = vmatmul.f32.vlgmr.msra.gmra.mxu3 %v15174_v15 }
 0xa7b   :  { %9927 = vmatpush.xpose.msra.mxu3 %v9926_v23  ;;  %v15237_v23 = vpop.f32.mrf.mxu2  ;;  %v10336_v55 = vpop.permute.xlu1 %10335 }
 0xa7e   :  { %9345 = vmatmul.f32.gmra.mxu0 %v15140_v36  ;;  %9399 = vmatmul.f32.gmra.mxu1 %v15146_v57  ;;  %v10080_v36 = vand.u32 4294901760, %v10079_v17  ;;  %v10338_v31 = vpop.permute.xlu2 %10337 }
 0xa7f   :  { %v10341_v51 = vsel %vm588_vm1, %v10338_v31, 0 }
 0xa80   :  { %9799 = vmatmul.f32.vlgmr.msrb.gmra.mxu2 %v9745_v19  ;;  %v15220_v19 = vpop.f32.mrf.mxu3  ;;  %v15235_v54 = vand.u32 4294901760, %v10341_v51 }
 0xa81   :  { %9999 = vmatpush.xpose.msrb.mxu2 %v9924_v26  ;;  %v10232_v26 = vand.u32 4294901760, %v15216_v30 }
 0xa82   :  { %9823 = vmatmul.f32.vlgmr.msrb.gmra.mxu3 %v9746_v60  ;;  %v10182_v60 = vpop.permute.xlu0 %10181  ;;  %v15249_v44 = vsub.f32 %v10341_v51, %v15235_v54 }
 0xa83   :  { %10021 = vmatpush.xpose.msrb.mxu3 %v15152_v18  ;;  %v10031_v18 = vsel %vm588_vm1, %v10028_v61, 0  ;;  %v10185_v28 = vsel %vm588_vm1, %v10182_v60, 0  ;;  %v10233_v14 = vsub.f32 %v15216_v30, %v10232_v26  ;;  %v15259_v60 = vpop.f32.mrf.mxu0 }
 0xa84   :  { %v15239_v7 = vand.u32 4294901760, %v10185_v28 }
 0xa85   :  { %v10234_v17 = vand.u32 4294901760, %v10233_v14 }
 0xa86   :  { %9349 = vmatmul.f32.gmra.mxu0 %v15146_v57  ;;  %9869 = vmatmul.f32.vlgmr.msrb.gmra.mxu1 %v15174_v15  ;;  %v15230_v57 = vand.u32 4294901760, %v10031_v18 }
 0xa87   :  { %10081 = vmatpush.xpose.msrb.mxu1 %v10080_v36  ;;  %v15253_v36 = vsub.f32 %v10185_v28, %v15239_v7 }
 0xa88   :  { %9903 = vmatmul.f32.vlgmr.msra.gmra.mxu2 %v9902_v10  ;;  %v15244_v61 = vpop.f32.mrf.mxu3  ;;  %v10053_v58 = vsub.f32 %v10031_v18, %v15230_v57  ;;  %v15263_v18 = vpop.f32.mrf.mxu2 }
 0xa89   :  { %10104 = vmatpush.xpose.msra.mxu2 %v15192_v8  ;;  %v15242_v8 = vpop.f32.mrf.mxu1  ;;  %v10208_v10 = vand.u32 4294901760, %v15253_v36  ;;  %16203 = vst [vmem:[#allocation22_spill] sm:$0xff] %v15263_v18 }
 0xa8a   :  { %9929 = vmatmul.f32.vlgmr.msra.gmra.mxu3 %v15188_v6  ;;  %16202 = vst [vmem:[#allocation21_spill] sm:$0xff] %v15242_v8 }
 0xa8b   :  { %10127 = vmatpush.xpose.msra.mxu3 %v10050_v41 }
 0xa8e   :  { %9847 = vmatmul.f32.vlgmr.msrb.gmra.mxu0 %v15174_v15  ;;  %9977 = vmatmul.f32.vlgmr.msra.gmra.mxu1 %v9900_v16  ;;  %v10492_v15 = vpop.permute.xlu0 %10491  ;;  %v10054_v16 = vand.u32 4294901760, %v10053_v58 }
 0xa8f   :  { %10051 = vmatpush.xpose.msrb.mxu0 %v10050_v41  ;;  %10175 = vmatpush.xpose.msra.mxu1 %v10050_v41  ;;  %v10386_v41 = vand.u32 4294901760, %v15249_v44  ;;  %v10495_v31 = vsel %vm588_vm1, %v10492_v15, 0  ;;  %v10209_v15 = vsub.f32 %v15253_v36, %v10208_v10 }
 0xa90   :  { %10001 = vmatmul.f32.vlgmr.msrb.gmra.mxu2 %v15188_v6  ;;  %v10512_v51 = vand.u32 4294901760, %v10495_v31 }
 0xa91   :  { %10205 = vmatpush.xpose.msrb.mxu2 %v15206_v48  ;;  %v10387_v28 = vsub.f32 %v15249_v44, %v10386_v41  ;;  %v15267_v14 = vpop.f32.mrf.mxu1  ;;  %v10210_v8 = vand.u32 4294901760, %v10209_v15 }
 0xa92   :  { %10023 = vmatmul.f32.vlgmr.msrb.gmra.mxu3 %v15188_v6  ;;  %v10055_v6 = vsub.f32 %v10053_v58, %v10054_v16  ;;  %16204 = vst [vmem:[#allocation23_spill] sm:$0xff] %v15267_v14  ;;  %v10539_v18 = vsub.f32 %v10495_v31, %v10512_v51  ;;  %v15275_v14 = vpop.f32.mrf.mxu0 }
 0xa93   :  { %10235 = vmatpush.xpose.msrb.mxu3 %v10234_v17  ;;  %v15269_v17 = vpop.f32.mrf.mxu3 }
 0xa94   :  { %16205 = vst [vmem:[#allocation24_spill] sm:$0xff] %v15269_v17  ;;  %v15278_v17 = vpop.f32.mrf.mxu2 }
 0xa95   :  { %16206 = vst [vmem:[#allocation72_spill] sm:$0xff] %v15278_v17 }
 0xa96   :  { %9953 = vmatmul.f32.vlgmr.msra.gmra.mxu0 %v15196_v56  ;;  %10083 = vmatmul.f32.vlgmr.msrb.gmra.mxu1 %v15230_v57  ;;  %v10056_v56 = vand.u32 4294901760, %v10055_v6 }
 0xa97   :  { %10153 = vmatpush.xpose.msra.mxu0 %v10078_v1  ;;  %10281 = vmatpush.xpose.msrb.mxu1 %v15206_v48  ;;  %v10388_v1 = vand.u32 4294901760, %v10387_v28 }
 0xa98   :  { %10107 = vmatmul.f32.vlgmr.msra.gmra.mxu2 %v10053_v58  ;;  %v10490_v58 = vpop.permute.xlu2 %10489 }
 0xa99   :  { %10307 = vmatpush.xpose.msra.mxu2 %v10232_v26  ;;  %v10339_v26 = vsel %vm588_vm1, %v10336_v55, 0  ;;  %v15283_v31 = vpop.f32.mrf.mxu1 }
 0xa9a   :  { %10131 = vmatmul.f32.vlgmr.msra.gmra.mxu3 %v10054_v16  ;;  %v10540_v16 = vand.u32 4294901760, %v10539_v18  ;;  %16207 = vst [vmem:[#allocation73_spill] sm:$0xff] %v15283_v31 }
 0xa9b   :  { %10329 = vmatpush.xpose.msra.mxu3 %v15206_v48  ;;  %v10493_v48 = vsel %vm588_vm1, %v10490_v58, 0  ;;  %v15285_v6 = vpop.f32.mrf.mxu3 }
 0xa9c   :  { %16208 = vst [vmem:[#allocation74_spill] sm:$0xff] %v15285_v6  ;;  %v10541_v28 = vsub.f32 %v10539_v18, %v10540_v16 }
 0xa9e   :  { %10057 = vmatmul.f32.vlgmr.msrb.gmra.mxu0 %v10056_v56  ;;  %10177 = vmatmul.f32.vlgmr.msra.gmra.mxu1 %v15230_v57  ;;  %v15292_v56 = vpop.f32.mrf.mxu0 }
 0xa9f   :  { %10258 = vmatpush.xpose.msrb.mxu0 %v15216_v30  ;;  %10389 = vmatpush.xpose.msra.mxu1 %v10388_v1  ;;  %v10360_v30 = vand.u32 4294901760, %v10339_v26  ;;  %16209 = vst [vmem:[#allocation75_spill] sm:$0xff] %v15292_v56  ;;  %v15295_v1 = vpop.f32.mrf.mxu2 }
 0xaa0   :  { %10211 = vmatmul.f32.vlgmr.msrb.gmra.mxu2 %v10210_v8  ;;  %v10514_v8 = vand.u32 4294901760, %v10493_v48  ;;  %16210 = vst [vmem:[#allocation76_spill] sm:$0xff] %v15295_v1 }
 0xaa1   :  { %10412 = vmatpush.xpose.msrb.mxu2 %v15249_v44  ;;  %v10361_v55 = vsub.f32 %v10339_v26, %v10360_v30  ;;  %v10542_v44 = vand.u32 4294901760, %v10541_v28  ;;  %v15297_v58 = vpop.f32.mrf.mxu1 }
 0xaa2   :  { %10237 = vmatmul.f32.vlgmr.msrb.gmra.mxu3 %v15239_v7  ;;  %v10515_v15 = vsub.f32 %v10493_v48, %v10514_v8  ;;  %16211 = vst [vmem:[#allocation77_spill] sm:$0xff] %v15297_v58 }
 0xaa3   :  { %10435 = vmatpush.xpose.msrb.mxu3 %v15235_v54 }
 0xaa4   :  { %v10516_v6 = vand.u32 4294901760, %v10515_v15 }
 0xaa6   :  { %10155 = vmatmul.f32.vlgmr.msra.gmra.mxu0 %v15230_v57  ;;  %10285 = vmatmul.f32.vlgmr.msrb.gmra.mxu1 %v10208_v10  ;;  %v10362_v57 = vand.u32 4294901760, %v10361_v55  ;;  %v15299_v10 = vpop.f32.mrf.mxu3  ;;  %v10517_v26 = vsub.f32 %v10515_v15, %v10516_v6  ;;  %v15302_v48 = vpop.f32.mrf.mxu0 }
 0xaa7   :  { %10359 = vmatpush.xpose.msra.mxu0 %v15235_v54  ;;  %10483 = vmatpush.xpose.msrb.mxu1 %v15235_v54  ;;  %16212 = vst [vmem:[#allocation78_spill] sm:$0xff] %v15299_v10 }
 0xaa8   :  { %10309 = vmatmul.f32.vlgmr.msra.gmra.mxu2 %v15239_v7  ;;  %v10363_v54 = vsub.f32 %v10361_v55, %v10362_v57  ;;  %16213 = vst [vmem:[#allocation79_spill] sm:$0xff] %v15302_v48  ;;  %v10518_v10 = vand.u32 4294901760, %v10517_v26 }
 0xaa9   :  { %10513 = vmatpush.xpose.msra.mxu2 %v10512_v51  ;;  %v15306_v28 = vpop.f32.mrf.mxu1 }
 0xaaa   :  { %10331 = vmatmul.f32.vlgmr.msra.gmra.mxu3 %v15239_v7  ;;  %v15304_v7 = vpop.f32.mrf.mxu2  ;;  %16215 = vst [vmem:[#allocation81_spill] sm:$0xff] %v15306_v28 }
 0xaab   :  { %10543 = vmatpush.xpose.msra.mxu3 %v10542_v44  ;;  %16214 = vst [vmem:[#allocation80_spill] sm:$0xff] %v15304_v7  ;;  %v10364_v44 = vand.u32 4294901760, %v10363_v54 }
 0xaae   :  { %10261 = vmatmul.f32.vlgmr.msrb.gmra.mxu0 %v15253_v36  ;;  %10391 = vmatmul.f32.vlgmr.msra.gmra.mxu1 %v10360_v30  ;;  %v15308_v58 = vpop.f32.mrf.mxu3  ;;  %v15310_v36 = vpop.f32.mrf.mxu0 }
 0xaaf   :  { %10461 = vmatpush.xpose.msrb.mxu0 %v10386_v41  ;;  %10589 = vmatpush.xpose.msra.mxu1 %v10512_v51  ;;  %16216 = vst [vmem:[#allocation82_spill] sm:$0xff] %v15308_v58 }
 0xab0   :  { %10415 = vmatmul.f32.vlgmr.msrb.gmra.mxu2 %v10361_v55  ;;  %16217 = vst [vmem:[#allocation83_spill] sm:$0xff] %v15310_v36 }
 0xab1   :  { %10615 = vmatpush.xpose.msrb.mxu2 %v10540_v16 }
 0xab2   :  { %10439 = vmatmul.f32.vlgmr.msrb.gmra.mxu3 %v10362_v57  ;;  %v15312_v41 = vpop.f32.mrf.mxu2 }
 0xab3   :  { %10637 = vmatpush.xpose.msrb.mxu3 %v10512_v51  ;;  %16218 = vst [vmem:[#allocation84_spill] sm:$0xff] %v15312_v41 }
 0xab6   :  { %10365 = vmatmul.f32.vlgmr.msra.gmra.mxu0 %v10364_v44  ;;  %10485 = vmatmul.f32.vlgmr.msrb.gmra.mxu1 %v10360_v30  ;;  %v15316_v55 = vpop.f32.mrf.mxu3 }
 0xab7   :  { %10566 = vmatpush.xpose.msra.mxu0 %v10539_v18  ;;  %16220 = vst [vmem:[#allocation86_spill] sm:$0xff] %v15316_v55 }
 0xab8   :  { %10519 = vmatmul.f32.vlgmr.msra.gmra.mxu2 %v10518_v10 }
 0xaba   :  { %10545 = vmatmul.f32.vlgmr.msra.gmra.mxu3 %v10514_v8 }
 0xabb   :  { %v15314_v16 = vpop.f32.mrf.mxu1 }
 0xabc   :  { %16219 = vst [vmem:[#allocation85_spill] sm:$0xff] %v15314_v16 }
 0xabe   :  { %10463 = vmatmul.f32.vlgmr.msrb.gmra.mxu0 %v10360_v30  ;;  %10593 = vmatmul.f32.vlgmr.msra.gmra.mxu1 %v10516_v6 }
 0xac0   :  { %10617 = vmatmul.f32.vlgmr.msrb.gmra.mxu2 %v10514_v8 }
 0xac2   :  { %10639 = vmatmul.f32.vlgmr.msrb.gmra.mxu3 %v10514_v8 }
 0xac3   :  { %v15318_v51 = vpop.f32.mrf.mxu0  ;;  %v15320_v57 = vpop.f32.mrf.mxu2 }
 0xac4   :  { %16221 = vst [vmem:[#allocation87_spill] sm:$0xff] %v15318_v51  ;;  %v15322_v54 = vpop.f32.mrf.mxu1 }
 0xac5   :  { %16222 = vst [vmem:[#allocation88_spill] sm:$0xff] %v15320_v57  ;;  %v15324_v18 = vpop.f32.mrf.mxu3 }
 0xac6   :  { %16223 = vst [vmem:[#allocation89_spill] sm:$0xff] %v15324_v18  ;;  %10569 = vmatmul.f32.vlgmr.msra.gmra.mxu0 %v10515_v15 }
 0xacb   :  { %v15326_v10 = vpop.f32.mrf.mxu0  ;;  %v9442_v26 = vpop.f32.mrf.mxu2 }
 0xacc   :  { %v15328_v44 = vpop.f32.mrf.mxu1 }
 0xacd   :  { %v9468_v16 = vpop.f32.mrf.mxu3 }
 0xace   :  { %v9469_v30 = vadd.f32 %v9468_v16, %v9442_v26 }
 0xad3   :  { %v15330_v55 = vpop.f32.mrf.mxu0  ;;  %v9492_v6 = vpop.f32.mrf.mxu2 }
 0xad4   :  { %v15332_v8 = vpop.f32.mrf.mxu1  ;;  %v9493_v41 = vadd.f32 %v9492_v6, %v9469_v30 }
 0xad5   :  { %16224 = vst [vmem:[#allocation90_spill] sm:$0xff] %v15332_v8  ;;  %v9516_v51 = vpop.f32.mrf.mxu3 }
 0xad6   :  { %v9517_v57 = vadd.f32 %v9516_v51, %v9493_v41 }
 0xadb   :  { %v15334_v58 = vpop.f32.mrf.mxu0  ;;  %v9540_v28 = vpop.f32.mrf.mxu2 }
 0xadc   :  { %16225 = vst [vmem:[#allocation91_spill] sm:$0xff] %v15334_v58  ;;  %v15336_v18 = vpop.f32.mrf.mxu1  ;;  %v9541_v15 = vadd.f32 %v9540_v28, %v9517_v57 }
 0xadd   :  { %16226 = vst [vmem:[#allocation92_spill] sm:$0xff] %v15336_v18  ;;  %v9562_v36 = vpop.f32.mrf.mxu3 }
 0xade   :  { %v9563_v7 = vadd.f32 %v9562_v36, %v9541_v15 }
 0xae0   :  { %v15340_v48 = vsel %vm13701_vm3, %v9563_v7, -1e+30 }
 0xae1   :  { %v10651_v16 = vsel %vm588_vm1, %v15340_v48, -inf }
 0xae2   :  { %10652 = vmax.xlane.f32.xlu1 %v10651_v16 }
 0xae3   :  { %v15344_v26 = vpop.f32.mrf.mxu0  ;;  %v9596_v6 = vpop.f32.mrf.mxu2 }
 0xae4   :  { %16227 = vst [vmem:[#allocation93_spill] sm:$0xff] %v15344_v26  ;;  %v15346_v41 = vpop.f32.mrf.mxu1 }
 0xae5   :  { %16228 = vst [vmem:[#allocation94_spill] sm:$0xff] %v15346_v41  ;;  %v9622_v51 = vpop.f32.mrf.mxu3 }
 0xae6   :  { %v9623_v28 = vadd.f32 %v9622_v51, %v9596_v6 }
 0xaeb   :  { %v15348_v30 = vpop.f32.mrf.mxu0  ;;  %v9646_v18 = vpop.f32.mrf.mxu2 }
 0xaec   :  { %16229 = vst [vmem:[#allocation95_spill] sm:$0xff] %v15348_v30  ;;  %v15350_v57 = vpop.f32.mrf.mxu1  ;;  %v9647_v20 = vadd.f32 %v9646_v18, %v9623_v28 }
 0xaed   :  { %16230 = vst [vmem:[#allocation96_spill] sm:$0xff] %v15350_v57  ;;  %v9670_v36 = vpop.f32.mrf.mxu3 }
 0xaee   :  { %v9671_v7 = vadd.f32 %v9670_v36, %v9647_v20 }
 0xaf3   :  { %v15352_v15 = vpop.f32.mrf.mxu0  ;;  %v9694_v1 = vpop.f32.mrf.mxu2 }
 0xaf4   :  { %16231 = vst [vmem:[#allocation97_spill] sm:$0xff] %v15352_v15  ;;  %v15354_v31 = vpop.f32.mrf.mxu1  ;;  %v9695_v16 = vadd.f32 %v9694_v1, %v9671_v7 }
 0xaf5   :  { %16232 = vst [vmem:[#allocation98_spill] sm:$0xff] %v15354_v31  ;;  %v9716_v26 = vpop.f32.mrf.mxu3 }
 0xaf6   :  { %v9717_v56 = vadd.f32 %v9716_v26, %v9695_v16 }
 0xaf8   :  { %v15358_v41 = vsel %vm13713_vm5, %v9717_v56, -1e+30  ;;  %vm12477_vm5 = vcmask 7168  }
 0xaf9   :  { %v10654_v6 = vsel %vm588_vm1, %v15358_v41, -inf }
 0xafa   :  { %10655 = vmax.xlane.f32.xlu0 %v10654_v6 }
 0xafb   :  { %v15362_v51 = vpop.f32.mrf.mxu0  ;;  %v9750_v18 = vpop.f32.mrf.mxu2 }
 0xafc   :  { %16233 = vst [vmem:[#allocation99_spill] sm:$0xff] %v15362_v51  ;;  %v15364_v28 = vpop.f32.mrf.mxu1 }
 0xafd   :  { %16234 = vst [vmem:[#allocation100_spill] sm:$0xff] %v15364_v28  ;;  %v9776_v36 = vpop.f32.mrf.mxu3 }
 0xafe   :  { %v9777_v1 = vadd.f32 %v9776_v36, %v9750_v18 }
 0xb03   :  { %v15366_v20 = vpop.f32.mrf.mxu0  ;;  %v9800_v31 = vpop.f32.mrf.mxu2 }
 0xb04   :  { %16235 = vst [vmem:[#allocation101_spill] sm:$0xff] %v15366_v20  ;;  %v9870_v7 = vpop.f32.mrf.mxu1  ;;  %v9801_v16 = vadd.f32 %v9800_v31, %v9777_v1 }
 0xb05   :  { %v9824_v26 = vpop.f32.mrf.mxu3 }
 0xb06   :  { %v9825_v25 = vadd.f32 %v9824_v26, %v9801_v16 }
 0xb0b   :  { %v9848_v56 = vpop.f32.mrf.mxu0  ;;  %v9904_v57 = vpop.f32.mrf.mxu2 }
 0xb0c   :  { %v9849_v15 = vadd.f32 %v9848_v56, %v9825_v25  ;;  %v9978_v30 = vpop.f32.mrf.mxu1 }
 0xb0d   :  { %v9930_v8 = vpop.f32.mrf.mxu3 }
 0xb0e   :  { %v9871_v6 = vadd.f32 %v9870_v7, %v9849_v15  ;;  %v9931_v20 = vadd.f32 %v9930_v8, %v9904_v57 }
 0xb10   :  { %v15370_v51 = vsel %vm13725_vm7, %v9871_v6, -1e+30 }
 0xb11   :  { %v10657_v28 = vsel %vm588_vm1, %v15370_v51, -inf }
 0xb12   :  { %10658 = vmax.xlane.f32.xlu2 %v10657_v28 }
 0xb13   :  { %v9954_v18 = vpop.f32.mrf.mxu0  ;;  %v10002_v36 = vpop.f32.mrf.mxu2 }
 0xb14   :  { %v9955_v17 = vadd.f32 %v9954_v18, %v9931_v20  ;;  %v10084_v31 = vpop.f32.mrf.mxu1 }
 0xb15   :  { %v10024_v1 = vpop.f32.mrf.mxu3 }
 0xb16   :  { %v9979_v26 = vadd.f32 %v9978_v30, %v9955_v17 }
 0xb18   :  { %v10003_v16 = vadd.f32 %v10002_v36, %v9979_v26 }
 0xb1a   :  { %v10025_v25 = vadd.f32 %v10024_v1, %v10003_v16 }
 0xb1b   :  { %v10058_v56 = vpop.f32.mrf.mxu0  ;;  %v10108_v58 = vpop.f32.mrf.mxu2 }
 0xb1c   :  { %v10085_v15 = vadd.f32 %v10084_v31, %v10058_v56  ;;  %v15376_v29 = vsel %vm13755_vm12, %v10025_v25, -1e+30  ;;  %v10178_v28 = vpop.f32.mrf.mxu1 }
 0xb1d   :  { %v10132_v7 = vpop.f32.mrf.mxu3  ;;  %v10660_v8 = vsel %vm588_vm1, %v15376_v29, -inf }
 0xb1e   :  { %v10109_v57 = vadd.f32 %v10108_v58, %v10085_v15  ;;  %10661 = vmax.xlane.f32.xlu1 %v10660_v8 }
 0xb20   :  { %v10133_v20 = vadd.f32 %v10132_v7, %v10109_v57 }
 0xb23   :  { %v10156_v6 = vpop.f32.mrf.mxu0  ;;  %v10212_v18 = vpop.f32.mrf.mxu2 }
 0xb24   :  { %v10157_v17 = vadd.f32 %v10156_v6, %v10133_v20  ;;  %v10286_v47 = vpop.f32.mrf.mxu1 }
 0xb25   :  { %v10238_v30 = vpop.f32.mrf.mxu3 }
 0xb26   :  { %v10179_v36 = vadd.f32 %v10178_v28, %v10157_v17  ;;  %v10239_v26 = vadd.f32 %v10238_v30, %v10212_v18 }
 0xb28   :  { %v15382_v31 = vsel %vm13739_vm9, %v10179_v36, -1e+30 }
 0xb29   :  { %v10663_v1 = vsel %vm588_vm1, %v15382_v31, -inf }
 0xb2a   :  { %10664 = vmax.xlane.f32.xlu2 %v10663_v1 }
 0xb2b   :  { %v10262_v16 = vpop.f32.mrf.mxu0  ;;  %v10310_v58 = vpop.f32.mrf.mxu2 }
 0xb2c   :  { %v10263_v25 = vadd.f32 %v10262_v16, %v10239_v26  ;;  %v10392_v57 = vpop.f32.mrf.mxu1 }
 0xb2d   :  { %v10332_v15 = vpop.f32.mrf.mxu3 }
 0xb2e   :  { %v10287_v56 = vadd.f32 %v10286_v47, %v10263_v25 }
 0xb30   :  { %v10311_v7 = vadd.f32 %v10310_v58, %v10287_v56 }
 0xb32   :  { %v10333_v8 = vadd.f32 %v10332_v15, %v10311_v7 }
 0xb33   :  { %v10366_v20 = vpop.f32.mrf.mxu0  ;;  %v10416_v6 = vpop.f32.mrf.mxu2 }
 0xb34   :  { %v10393_v28 = vadd.f32 %v10392_v57, %v10366_v20  ;;  %v15388_v3 = vsel %vm13783_vm4, %v10333_v8, -1e+30  ;;  %v10486_v26 = vpop.f32.mrf.mxu1  ;;  %vm12550_vm4 = vcmask 1045509  }
 0xb35   :  { %v10666_v17 = vsel %vm588_vm1, %v15388_v3, -inf  ;;  %v10440_v30 = vpop.f32.mrf.mxu3 }
 0xb36   :  { %v10417_v18 = vadd.f32 %v10416_v6, %v10393_v28  ;;  %10667 = vmax.xlane.f32.xlu1 %v10666_v17 }
 0xb38   :  { %v10441_v36 = vadd.f32 %v10440_v30, %v10417_v18 }
 0xb3b   :  { %v10464_v1 = vpop.f32.mrf.mxu0  ;;  %v10520_v17 = vpop.f32.mrf.mxu2 }
 0xb3c   :  { %v10465_v47 = vadd.f32 %v10464_v1, %v10441_v36  ;;  %v10594_v36 = vpop.f32.mrf.mxu1 }
 0xb3d   :  { %v10546_v28 = vpop.f32.mrf.mxu3 }
 0xb3e   :  { %v10487_v16 = vadd.f32 %v10486_v26, %v10465_v47  ;;  %v10547_v30 = vadd.f32 %v10546_v28, %v10520_v17 }
 0xb40   :  { %v15394_v58 = vsel %vm13765_vm13, %v10487_v16, -1e+30  ;;  %vm12538_vm13 = vcmask 1041409  }
 0xb41   :  { %v10669_v62 = vsel %vm588_vm1, %v15394_v58, -inf }
 0xb42   :  { %10670 = vmax.xlane.f32.xlu2 %v10669_v62 }
 0xb43   :  { %v10570_v18 = vpop.f32.mrf.mxu0  ;;  %v10618_v62 = vpop.f32.mrf.mxu2 }
 0xb4f   :  { %10891 = vrot.lane.b32.xlu1 %v13533_v59, %s13333_s13 }
 0xb55   :  { %v10653_v25 = vpop.xlane.xlu1 %10652 }
 0xb56   :  { %v10675_v56 = vsub.f32 %v15340_v48, %v10653_v25 }
 0xb57   :  { %11043 = vrot.lane.b32.xlu1 %v13538_v13, %s13333_s13 }
 0xb58   :  { %v10683_v15 = vmul.f32 1.442695, %v10675_v56  ;;  %v10640_v56 = vpop.f32.mrf.mxu3 }
 0xb5a   :  { %13254 = vpow2.f32 %v10683_v15 }
 0xb5f   :  { %11499 = vrot.lane.b32.xlu1 %v13553_v49, %s13333_s13 }
 0xb60   :  { %v15405_v42 = vpop.eup %13254 }
 0xb61   :  { %v10699_v7 = vsel %vm588_vm1, %v15405_v42, 0.0 }
 0xb62   :  { %10700 = vadd.xlane.f32.xlu0 %v10699_v7 }
 0xb6d   :  { %v10656_v8 = vpop.xlane.xlu0 %10655 }
 0xb6e   :  { %v10676_v59 = vsub.f32 %v15358_v41, %v10656_v8  ;;  %v10571_v41 = vadd.f32 %v10570_v18, %v10547_v30 }
 0xb70   :  { %v10685_v57 = vmul.f32 1.442695, %v10676_v59 }
 0xb72   :  { %13256 = vpow2.f32 %v10685_v57 }
 0xb76   :  { %10739 = vrot.lane.b32.xlu0 %v13528_v45, %s13333_s13  ;;  %v10595_v45 = vadd.f32 %v10594_v36, %v10571_v41 }
 0xb78   :  { %v15412_v13 = vpop.eup %13256 }
 0xb79   :  { %v10702_v48 = vsel %vm588_vm1, %v15412_v13, 0.0 }
 0xb7a   :  { %10703 = vadd.xlane.f32.xlu2 %v10702_v48 }
 0xb85   :  { %v10659_v49 = vpop.xlane.xlu2 %10658 }
 0xb86   :  { %v10677_v20 = vsub.f32 %v15370_v51, %v10659_v49  ;;  %v10619_v51 = vadd.f32 %v10618_v62, %v10595_v45 }
 0xb88   :  { %v10687_v6 = vmul.f32 1.442695, %v10677_v20  ;;  %v10641_v15 = vadd.f32 %v10640_v56, %v10619_v51 }
 0xb8a   :  { %13258 = vpow2.f32 %v10687_v6  ;;  %v15426_v8 = vsel %vm13779_vm2, %v10641_v15, -1e+30  ;;  %vm12547_vm2 = vcmask 1044484  }
 0xb90   :  { %v15417_v1 = vpop.eup %13258 }
 0xb91   :  { %v10662_v47 = vpop.xlane.xlu1 %10661  ;;  %v10705_v26 = vsel %vm588_vm1, %v15417_v1, 0.0 }
 0xb92   :  { %v10678_v16 = vsub.f32 %v15376_v29, %v10662_v47  ;;  %10706 = vadd.xlane.f32.xlu2 %v10705_v26  ;;  %v10672_v29 = vsel %vm588_vm1, %v15426_v8, -inf }
 0xb94   :  { %v10689_v25 = vmul.f32 1.442695, %v10678_v16 }
 0xb96   :  { %13260 = vpow2.f32 %v10689_v25 }
 0xb9c   :  { %v15422_v7 = vpop.eup %13260 }
 0xb9d   :  { %v10665_v59 = vpop.xlane.xlu2 %10664  ;;  %v10708_v57 = vsel %vm588_vm1, %v15422_v7, 0.0 }
 0xb9e   :  { %v10679_v48 = vsub.f32 %v15382_v31, %v10665_v59  ;;  %10709 = vadd.xlane.f32.xlu2 %v10708_v57 }
 0xba0   :  { %v10691_v49 = vmul.f32 1.442695, %v10679_v48  ;;  %10673 = vmax.xlane.f32.xlu0 %v10672_v29 }
 0xba2   :  { %13262 = vpow2.f32 %v10691_v49 }
 0xba8   :  { %v15433_v20 = vpop.eup %13262 }
 0xba9   :  { %v10711_v34 = vsel %vm588_vm1, %v15433_v20, 0.0  ;;  %v10668_v28 = vpop.xlane.xlu1 %10667 }
 0xbaa   :  { %10712 = vadd.xlane.f32.xlu1 %v10711_v34  ;;  %v10680_v17 = vsub.f32 %v15388_v3, %v10668_v28 }
 0xbac   :  { %v10693_v30 = vmul.f32 1.442695, %v10680_v17 }
 0xbb4   :  { %11347 = vrot.lane.b32.xlu0 %v13548_v33, %s13333_s13 }
 0xbb5   :  { %v10671_v31 = vpop.xlane.xlu2 %10670 }
 0xbb6   :  { %11195 = vrot.lane.b32.xlu2 %v13543_v24, %s13333_s13  ;;  %v10681_v6 = vsub.f32 %v15394_v58, %v10671_v31 }
 0xbb8   :  { %v10695_v18 = vmul.f32 1.442695, %v10681_v6 }
 0xbba   :  { %13264 = vpow2.f32 %v10695_v18 }
 0xbbb   :  { %13266 = vpow2.f32 %v10693_v30 }
 0xbc0   :  { %v15445_v33 = vpop.eup %13264 }
 0xbc1   :  { %v10892_v36 = vpop.permute.xlu1 %10891  ;;  %v15447_v45 = vpop.eup %13266  ;;  %v10717_v58 = vsel %vm588_vm1, %v15445_v33, 0.0 }
 0xbc2   :  { %v10912_v24 = vand.u32 4294901760, %v10892_v36  ;;  %v10714_v3 = vsel %vm588_vm1, %v15447_v45, 0.0 }
 0xbc3   :  { %11651 = vrot.lane.b32.xlu1 %v13560_v63, %s13333_s13 }
 0xbc4   :  { %v10939_v26 = vsub.f32 %v10892_v36, %v10912_v24 }
 0xbc6   :  { %v10940_v25 = vand.u32 4294901760, %v10939_v26 }
 0xbc8   :  { %v10941_v59 = vsub.f32 %v10939_v26, %v10940_v25 }
 0xbc9   :  { %v11044_v57 = vpop.permute.xlu1 %11043 }
 0xbca   :  { %v10942_v49 = vand.u32 4294901760, %v10941_v59  ;;  %v11064_v34 = vand.u32 4294901760, %v11044_v57 }
 0xbcc   :  { %v11091_v17 = vsub.f32 %v11044_v57, %v11064_v34 }
 0xbd5   :  { %v10701_v41 = vpop.xlane.xlu0 %10700 }
 0xbd6   :  { %13268 = vrcp.f32 %v10701_v41  ;;  %v11092_v41 = vand.u32 4294901760, %v11091_v17 }
 0xbdc   :  { %v13269_v47 = vpop.eup %13268 }
 0xbdd   :  { %v10731_v63 = vmul.f32 %v13269_v47, %v15405_v42 }
 0xbde   :  { %10718 = vadd.xlane.f32.xlu0 %v10717_v58 }
 0xbdf   :  { %v10743_v16 = vsel %vm588_vm1, %v10731_v63, 0  ;;  %10715 = vadd.xlane.f32.xlu2 %v10714_v3  ;;  %v11093_v63 = vsub.f32 %v11091_v17, %v11092_v41 }
 0xbe0   :  { %v10762_v62 = vand.u32 4294901760, %v10743_v16 }
 0xbe2   :  { %v10763_v51 = vsub.f32 %v10743_v16, %v10762_v62 }
 0xbe4   :  { %v10764_v56 = vand.u32 4294901760, %v10763_v51 }
 0xbe6   :  { %v10765_v15 = vsub.f32 %v10763_v51, %v10764_v56 }
 0xbe8   :  { %v10740_v48 = vpop.permute.xlu0 %10739  ;;  %v10766_v29 = vand.u32 4294901760, %v10765_v15 }
 0xbe9   :  { %v10760_v42 = vand.u32 4294901760, %v10740_v48 }
 0xbeb   :  { %v10787_v31 = vsub.f32 %v10740_v48, %v10760_v42  ;;  %10761 = vmatpush.msrb.mxu0 %v10760_v42  ;;  %10837 = vmatpush.msra.mxu3 %v10760_v42 }
 0xbec   :  { %10767 = vmatmul.f32.vlgmr.msrb.gmra.mxu0 %v10766_v29  ;;  %10841 = vmatmul.f32.vlgmr.msra.gmra.mxu3 %v10764_v56 }
 0xbed   :  { %v10788_v28 = vand.u32 4294901760, %v10787_v31  ;;  %10943 = vmatpush.msrb.mxu3 %v10942_v49  ;;  %v10704_v6 = vpop.xlane.xlu2 %10703  ;;  %10814 = vmatpush.msra.mxu2 %v10787_v31 }
 0xbee   :  { %13270 = vrcp.f32 %v10704_v6  ;;  %10817 = vmatmul.f32.vlgmr.msra.gmra.mxu2 %v10763_v51  ;;  %v11094_v51 = vand.u32 4294901760, %v11093_v63 }
 0xbef   :  { %11037 = vmatpush.msra.mxu3 %v10912_v24  ;;  %v10789_v18 = vsub.f32 %v10787_v31, %v10788_v28  ;;  %10913 = vmatpush.msrb.mxu2 %v10912_v24  ;;  %v11500_v31 = vpop.permute.xlu1 %11499 }
 0xbf0   :  { %10863 = vmatpush.msra.mxu0 %v10788_v28 }
 0xbf1   :  { %11015 = vmatpush.msra.mxu2 %v10940_v25  ;;  %v10790_v30 = vand.u32 4294901760, %v10789_v18 }
 0xbf2   :  { %10966 = vmatpush.msrb.mxu0 %v10939_v26 }
 0xbf3   :  { %10791 = vmatpush.msrb.mxu1 %v10790_v30 }
 0xbf4   :  { %v13271_v36 = vpop.eup %13270  ;;  %10793 = vmatmul.f32.vlgmr.msrb.gmra.mxu1 %v10762_v62  ;;  %10865 = vmatmul.f32.vlgmr.msra.gmra.mxu0 %v10762_v62 }
 0xbf5   :  { %v10732_v47 = vmul.f32 %v13271_v36, %v15412_v13  ;;  %10885 = vmatpush.msra.mxu1 %v10760_v42  ;;  %11065 = vmatpush.msra.mxu0 %v11064_v34  ;;  %v11520_v36 = vand.u32 4294901760, %v11500_v31 }
 0xbf7   :  { %10989 = vmatpush.msrb.mxu1 %v10912_v24  ;;  %v10895_v58 = vsel %vm588_vm1, %v10732_v47, 0 }
 0xbf8   :  { %v10914_v3 = vand.u32 4294901760, %v10895_v58 }
 0xbfa   :  { %v10915_v16 = vsub.f32 %v10895_v58, %v10914_v3  ;;  %10945 = vmatmul.f32.vlgmr.msrb.gmra.mxu3 %v10914_v3 }
 0xbfb   :  { %11141 = vmatpush.msrb.mxu3 %v11064_v34 }
 0xbfc   :  { %10887 = vmatmul.f32.vlgmr.msra.gmra.mxu1 %v10762_v62  ;;  %10969 = vmatmul.f32.vlgmr.msrb.gmra.mxu0 %v10915_v16  ;;  %v10916_v26 = vand.u32 4294901760, %v10915_v16 }
 0xbfd   :  { %11095 = vmatpush.msra.mxu1 %v11094_v51  ;;  %11167 = vmatpush.msrb.mxu0 %v11092_v41  ;;  %v11547_v51 = vsub.f32 %v11500_v31, %v11520_v36 }
 0xbfe   :  { %v10917_v25 = vsub.f32 %v10915_v16, %v10916_v26 }
 0xc00   :  { %v10918_v56 = vand.u32 4294901760, %v10917_v25 }
 0xc02   :  { %10919 = vmatmul.f32.vlgmr.msrb.gmra.mxu2 %v10918_v56  ;;  %11039 = vmatmul.f32.vlgmr.msra.gmra.mxu3 %v10914_v3 }
 0xc03   :  { %11118 = vmatpush.msrb.mxu2 %v11091_v17 }
 0xc04   :  { %10993 = vmatmul.f32.vlgmr.msrb.gmra.mxu1 %v10916_v26 }
 0xc05   :  { %11189 = vmatpush.msrb.mxu1 %v11064_v34  ;;  %v10707_v13 = vpop.xlane.xlu2 %10706 }
 0xc06   :  { %13272 = vrcp.f32 %v10707_v13 }
 0xc0a   :  { %11017 = vmatmul.f32.vlgmr.msra.gmra.mxu2 %v10914_v3 }
 0xc0c   :  { %v13273_v24 = vpop.eup %13272 }
 0xc0d   :  { %v10733_v15 = vmul.f32 %v13273_v24, %v15417_v1 }
 0xc0f   :  { %v11047_v59 = vsel %vm588_vm1, %v10733_v15, 0  ;;  %v11548_v15 = vand.u32 4294901760, %v11547_v51 }
 0xc10   :  { %v11066_v62 = vand.u32 4294901760, %v11047_v59 }
 0xc11   :  { %v10710_v57 = vpop.xlane.xlu2 %10709 }
 0xc12   :  { %v11067_v48 = vsub.f32 %v11047_v59, %v11066_v62  ;;  %13274 = vrcp.f32 %v10710_v57  ;;  %11097 = vmatmul.f32.vlgmr.msra.gmra.mxu1 %v11066_v62 }
 0xc13   :  { %v10674_v42 = vpop.xlane.xlu0 %10673 }
 0xc14   :  { %v10682_v29 = vsub.f32 %v15426_v8, %v10674_v42  ;;  %11121 = vmatmul.f32.vlgmr.msrb.gmra.mxu2 %v11067_v48  ;;  %v11068_v49 = vand.u32 4294901760, %v11067_v48 }
 0xc16   :  { %v10697_v34 = vmul.f32 1.442695, %v10682_v29  ;;  %11145 = vmatmul.f32.vlgmr.msrb.gmra.mxu3 %v11068_v49  ;;  %v11069_v28 = vsub.f32 %v11067_v48, %v11068_v49  ;;  %v11549_v49 = vsub.f32 %v11547_v51, %v11548_v15 }
 0xc18   :  { %v13275_v6 = vpop.eup %13274  ;;  %13276 = vpow2.f32 %v10697_v34  ;;  %v11070_v17 = vand.u32 4294901760, %v11069_v28 }
 0xc19   :  { %v10734_v1 = vmul.f32 %v13275_v6, %v15422_v7  ;;  %v11196_v18 = vpop.permute.xlu2 %11195  ;;  %v11550_v6 = vand.u32 4294901760, %v11549_v49 }
 0xc1a   :  { %v11216_v30 = vand.u32 4294901760, %v11196_v18  ;;  %11071 = vmatmul.f32.vlgmr.msra.gmra.mxu0 %v11070_v17  ;;  %11191 = vmatmul.f32.vlgmr.msrb.gmra.mxu1 %v11066_v62 }
 0xc1b   :  { %v11199_v41 = vsel %vm588_vm1, %v10734_v1, 0 }
 0xc1c   :  { %v11218_v47 = vand.u32 4294901760, %v11199_v41  ;;  %v11243_v8 = vsub.f32 %v11196_v18, %v11216_v30  ;;  %11217 = vmatpush.msra.mxu2 %v11216_v30  ;;  %11293 = vmatpush.msra.mxu1 %v11216_v30 }
 0xc1d   :  { %v10713_v63 = vpop.xlane.xlu1 %10712 }
 0xc1e   :  { %v15462_v58 = vpop.eup %13276  ;;  %v11219_v3 = vsub.f32 %v11199_v41, %v11218_v47  ;;  %v11244_v16 = vand.u32 4294901760, %v11243_v8  ;;  %13278 = vrcp.f32 %v10713_v63  ;;  %11270 = vmatpush.msra.mxu0 %v11243_v8 }
 0xc1f   :  { %v10720_v7 = vsel %vm588_vm1, %v15462_v58, 0.0 }
 0xc20   :  { %v11245_v26 = vsub.f32 %v11243_v8, %v11244_v16  ;;  %10721 = vadd.xlane.f32.xlu2 %v10720_v7  ;;  %11319 = vmatpush.msrb.mxu2 %v11244_v16  ;;  %v11220_v25 = vand.u32 4294901760, %v11219_v3 }
 0xc22   :  { %v11246_v56 = vand.u32 4294901760, %v11245_v26  ;;  %11169 = vmatmul.f32.vlgmr.msrb.gmra.mxu0 %v11066_v62  ;;  %11297 = vmatmul.f32.vlgmr.msra.gmra.mxu1 %v11220_v25  ;;  %v11221_v13 = vsub.f32 %v11219_v3, %v11220_v25 }
 0xc24   :  { %v13279_v24 = vpop.eup %13278  ;;  %11247 = vmatpush.msra.mxu3 %v11246_v56  ;;  %v11222_v59 = vand.u32 4294901760, %v11221_v13 }
 0xc25   :  { %v10735_v57 = vmul.f32 %v13279_v24, %v15433_v20  ;;  %11249 = vmatmul.f32.vlgmr.msra.gmra.mxu3 %v11218_v47 }
 0xc26   :  { %11341 = vmatpush.msrb.mxu3 %v11216_v30  ;;  %v11348_v48 = vpop.permute.xlu0 %11347  ;;  %11223 = vmatmul.f32.vlgmr.msra.gmra.mxu2 %v11222_v59 }
 0xc27   :  { %v11351_v42 = vsel %vm588_vm1, %v10735_v57, 0  ;;  %v11368_v29 = vand.u32 4294901760, %v11348_v48 }
 0xc28   :  { %v11370_v31 = vand.u32 4294901760, %v11351_v42 }
 0xc29   :  { %v11395_v34 = vsub.f32 %v11348_v48, %v11368_v29  ;;  %11369 = vmatpush.msrb.mxu0 %v11368_v29  ;;  %11445 = vmatpush.msra.mxu3 %v11368_v29 }
 0xc2a   :  { %v11371_v62 = vsub.f32 %v11351_v42, %v11370_v31  ;;  %11273 = vmatmul.f32.vlgmr.msra.gmra.mxu0 %v11219_v3 }
 0xc2b   :  { %v11396_v28 = vand.u32 4294901760, %v11395_v34  ;;  %11422 = vmatpush.msra.mxu2 %v11395_v34 }
 0xc2c   :  { %v11372_v17 = vand.u32 4294901760, %v11371_v62 }
 0xc2d   :  { %v11397_v1 = vsub.f32 %v11395_v34, %v11396_v28  ;;  %11343 = vmatmul.f32.vlgmr.msrb.gmra.mxu3 %v11218_v47  ;;  %11471 = vmatpush.msra.mxu0 %v11396_v28 }
 0xc2e   :  { %11551 = vmatpush.msrb.mxu3 %v11550_v6  ;;  %11321 = vmatmul.f32.vlgmr.msrb.gmra.mxu2 %v11218_v47  ;;  %v11373_v20 = vsub.f32 %v11371_v62, %v11372_v17 }
 0xc2f   :  { %v11398_v18 = vand.u32 4294901760, %v11397_v1  ;;  %11521 = vmatpush.msrb.mxu2 %v11520_v36 }
 0xc30   :  { %v11374_v30 = vand.u32 4294901760, %v11373_v20 }
 0xc31   :  { %11399 = vmatpush.msrb.mxu1 %v11398_v18 }
 0xc32   :  { %11375 = vmatmul.f32.vlgmr.msrb.gmra.mxu0 %v11374_v30  ;;  %11401 = vmatmul.f32.vlgmr.msrb.gmra.mxu1 %v11370_v31 }
 0xc33   :  { %11493 = vmatpush.msra.mxu1 %v11368_v29  ;;  %11574 = vmatpush.msrb.mxu0 %v11547_v51 }
 0xc35   :  { %11597 = vmatpush.msrb.mxu1 %v11520_v36  ;;  %11449 = vmatmul.f32.vlgmr.msra.gmra.mxu3 %v11372_v17  ;;  %v11652_v41 = vpop.permute.xlu1 %11651 }
 0xc36   :  { %11645 = vmatpush.msra.mxu3 %v11520_v36  ;;  %v11672_v8 = vand.u32 4294901760, %v11652_v41  ;;  %11425 = vmatmul.f32.vlgmr.msra.gmra.mxu2 %v11371_v62 }
 0xc37   :  { %11623 = vmatpush.msra.mxu2 %v11548_v15 }
 0xc38   :  { %v11699_v63 = vsub.f32 %v11652_v41, %v11672_v8  ;;  %11803 = vrot.lane.b32.xlu2 %v13564_v0, %s13333_s13  ;;  %v28_v41 = vld [vmem:[%s16014_s3 + $0x68] sm:$0xff] }
 0xc3a   :  { %v11700_v47 = vand.u32 4294901760, %v11699_v63  ;;  %11473 = vmatmul.f32.vlgmr.msra.gmra.mxu0 %v11370_v31  ;;  %11495 = vmatmul.f32.vlgmr.msra.gmra.mxu1 %v11370_v31 }
 0xc3b   :  { %11673 = vmatpush.msra.mxu0 %v11672_v8 }
 0xc3c   :  { %v11701_v3 = vsub.f32 %v11699_v63, %v11700_v47 }
 0xc3e   :  { %v11702_v16 = vand.u32 4294901760, %v11701_v3 }
 0xc40   :  { %11703 = vmatpush.msra.mxu1 %v11702_v16 }
 0xc51   :  { %v10719_v7 = vpop.xlane.xlu0 %10718 }
 0xc52   :  { %13280 = vrcp.f32 %v10719_v7  ;;  %v10716_v51 = vpop.xlane.xlu2 %10715  ;;  %v13295_v7 = vld [vmem:[%s16013_s2] sm:$0xff] }
 0xc53   :  { %13282 = vrcp.f32 %v10716_v51  ;;  %v12375_v51 = vsel %vm588_vm1, %v13295_v7, 0.0 }
 0xc54   :  { %12376 = vadd.xlane.f32.xlu1 %v12375_v51 }
 0xc58   :  { %v13281_v26 = vpop.eup %13280 }
 0xc59   :  { %v13283_v36 = vpop.eup %13282  ;;  %v10737_v25 = vmul.f32 %v13281_v26, %v15445_v33 }
 0xc5a   :  { %v10736_v56 = vmul.f32 %v13283_v36, %v15447_v45 }
 0xc5b   :  { %v11655_v13 = vsel %vm588_vm1, %v10737_v25, 0 }
 0xc5c   :  { %v11674_v0 = vand.u32 4294901760, %v11655_v13  ;;  %v11503_v24 = vsel %vm588_vm1, %v10736_v56, 0 }
 0xc5d   :  { %v11522_v15 = vand.u32 4294901760, %v11503_v24 }
 0xc5e   :  { %v11675_v59 = vsub.f32 %v11655_v13, %v11674_v0 }
 0xc5f   :  { %v11523_v57 = vsub.f32 %v11503_v24, %v11522_v15  ;;  %11553 = vmatmul.f32.vlgmr.msrb.gmra.mxu3 %v11522_v15 }
 0xc60   :  { %11749 = vmatpush.msrb.mxu3 %v11672_v8  ;;  %v11676_v48 = vand.u32 4294901760, %v11675_v59 }
 0xc61   :  { %11577 = vmatmul.f32.vlgmr.msrb.gmra.mxu0 %v11523_v57  ;;  %v11524_v42 = vand.u32 4294901760, %v11523_v57 }
 0xc62   :  { %11775 = vmatpush.msrb.mxu0 %v11700_v47  ;;  %v11677_v49 = vsub.f32 %v11675_v59, %v11676_v48  ;;  %v15477_v47 = vand.u32 4294901760, %v28_v41 }
 0xc63   :  { %11601 = vmatmul.f32.vlgmr.msrb.gmra.mxu1 %v11524_v42  ;;  %v11525_v29 = vsub.f32 %v11523_v57, %v11524_v42 }
 0xc64   :  { %11797 = vmatpush.msrb.mxu1 %v11672_v8  ;;  %v11678_v45 = vand.u32 4294901760, %v11677_v49  ;;  %v15484_v25 = vsub.f32 %v28_v41, %v15477_v47 }
 0xc65   :  { %v11526_v33 = vand.u32 4294901760, %v11525_v29 }
 0xc67   :  { %11527 = vmatmul.f32.vlgmr.msrb.gmra.mxu2 %v11526_v33  ;;  %11647 = vmatmul.f32.vlgmr.msra.gmra.mxu3 %v11522_v15 }
 0xc68   :  { %11726 = vmatpush.msrb.mxu2 %v11699_v63 }
 0xc69   :  { %11679 = vmatmul.f32.vlgmr.msra.gmra.mxu0 %v11678_v45  ;;  %v10768_v31 = vpop.f32.mrf.mxu0 }
 0xc6b   :  { %11705 = vmatmul.f32.vlgmr.msra.gmra.mxu1 %v11674_v0 }
 0xc6f   :  { %11625 = vmatmul.f32.vlgmr.msra.gmra.mxu2 %v11522_v15  ;;  %11753 = vmatmul.f32.vlgmr.msrb.gmra.mxu3 %v11676_v48  ;;  %v10842_v6 = vpop.f32.mrf.mxu3  ;;  %v12078_v15 = vand.u32 4294901760, %v15484_v25 }
 0xc71   :  { %11777 = vmatmul.f32.vlgmr.msrb.gmra.mxu0 %v11674_v0  ;;  %v10794_v34 = vpop.f32.mrf.mxu1  ;;  %v10818_v62 = vpop.f32.mrf.mxu2  ;;  %v12079_v33 = vsub.f32 %v15484_v25, %v12078_v15 }
 0xc72   :  { %v10795_v28 = vadd.f32 %v10794_v34, %v10768_v31  ;;  %v10866_v1 = vpop.f32.mrf.mxu0 }
 0xc73   :  { %11799 = vmatmul.f32.vlgmr.msrb.gmra.mxu1 %v11674_v0 }
 0xc74   :  { %v10819_v17 = vadd.f32 %v10818_v62, %v10795_v28 }
 0xc76   :  { %v10843_v30 = vadd.f32 %v10842_v6, %v10819_v17 }
 0xc77   :  { %11729 = vmatmul.f32.vlgmr.msrb.gmra.mxu2 %v11675_v59 }
 0xc78   :  { %v10867_v3 = vadd.f32 %v10866_v1, %v10843_v30 }
 0xc79   :  { %v10888_v20 = vpop.f32.mrf.mxu1 }
 0xc7a   :  { %v10970_v16 = vpop.f32.mrf.mxu0  ;;  %v10889_v56 = vadd.f32 %v10888_v20, %v10867_v3  ;;  %v12080_v20 = vand.u32 4294901760, %v12079_v33 }
 0xc7c   :  { %v11956_v59 = vsel %vm588_vm1, %v10889_v56, 0 }
 0xc7d   :  { %v10946_v8 = vpop.f32.mrf.mxu3  ;;  %v15488_v42 = vand.u32 4294901760, %v11956_v59 }
 0xc7f   :  { %v15492_v6 = vsub.f32 %v11956_v59, %v15488_v42 }
 0xc81   :  { %v10994_v26 = vpop.f32.mrf.mxu1  ;;  %v11998_v7 = vand.u32 4294901760, %v15492_v6 }
 0xc85   :  { %v10920_v18 = vpop.f32.mrf.mxu2  ;;  %v11040_v57 = vpop.f32.mrf.mxu3 }
 0xc86   :  { %v10947_v63 = vadd.f32 %v10946_v8, %v10920_v18 }
 0xc88   :  { %v10971_v36 = vadd.f32 %v10970_v16, %v10947_v63 }
 0xc8a   :  { %v10995_v0 = vadd.f32 %v10994_v26, %v10971_v36 }
 0xc8d   :  { %v11018_v13 = vpop.f32.mrf.mxu2 }
 0xc8e   :  { %v11019_v48 = vadd.f32 %v11018_v13, %v10995_v0 }
 0xc8f   :  { %v11098_v29 = vpop.f32.mrf.mxu1 }
 0xc90   :  { %v11041_v31 = vadd.f32 %v11040_v57, %v11019_v48  ;;  %v11999_v57 = vsub.f32 %v15492_v6, %v11998_v7 }
 0xc92   :  { %v11959_v30 = vsel %vm588_vm1, %v11041_v31, 0  ;;  %v12000_v31 = vand.u32 4294901760, %v11999_v57 }
 0xc93   :  { %v10722_v24 = vpop.xlane.xlu2 %10721  ;;  %v15498_v26 = vand.u32 4294901760, %v11959_v30 }
 0xc94   :  { %13284 = vrcp.f32 %v10722_v24 }
 0xc95   :  { %v12005_v48 = vsub.f32 %v11959_v30, %v15498_v26 }
 0xc97   :  { %v11072_v49 = vpop.f32.mrf.mxu0  ;;  %v11122_v34 = vpop.f32.mrf.mxu2 }
 0xc98   :  { %v11099_v45 = vadd.f32 %v11098_v29, %v11072_v49  ;;  %v11192_v13 = vpop.f32.mrf.mxu1 }
 0xc99   :  { %v11146_v8 = vpop.f32.mrf.mxu3 }
 0xc9a   :  { %v13285_v62 = vpop.eup %13284  ;;  %v11123_v28 = vadd.f32 %v11122_v34, %v11099_v45 }
 0xc9b   :  { %v10738_v17 = vmul.f32 %v13285_v62, %v15462_v58  ;;  %v11804_v1 = vpop.permute.xlu2 %11803 }
 0xc9c   :  { %v11824_v18 = vand.u32 4294901760, %v11804_v1  ;;  %v11147_v3 = vadd.f32 %v11146_v8, %v11123_v28 }
 0xc9d   :  { %v11807_v41 = vsel %vm588_vm1, %v10738_v17, 0 }
 0xc9e   :  { %v11826_v63 = vand.u32 4294901760, %v11807_v41  ;;  %v11851_v16 = vsub.f32 %v11804_v1, %v11824_v18  ;;  %11825 = vmatpush.msra.mxu2 %v11824_v18  ;;  %11901 = vmatpush.msra.mxu1 %v11824_v18 }
 0xc9f   :  { %v11170_v51 = vpop.f32.mrf.mxu0 }
 0xca0   :  { %12081 = vmatpush.msrb.mxu1 %v12080_v20  ;;  %v11827_v58 = vsub.f32 %v11807_v41, %v11826_v63  ;;  %v11852_v36 = vand.u32 4294901760, %v11851_v16  ;;  %v11171_v56 = vadd.f32 %v11170_v51, %v11147_v3  ;;  %11878 = vmatpush.msra.mxu0 %v11851_v16  ;;  %v11298_v8 = vpop.f32.mrf.mxu1 }
 0xca2   :  { %11995 = vmatpush.msrb.mxu0 %v15477_v47  ;;  %v11853_v0 = vsub.f32 %v11851_v16, %v11852_v36  ;;  %v11193_v24 = vadd.f32 %v11192_v13, %v11171_v56  ;;  %11927 = vmatpush.msrb.mxu2 %v11852_v36  ;;  %v11828_v59 = vand.u32 4294901760, %v11827_v58 }
 0xca3   :  { %11881 = vmatmul.f32.vlgmr.msra.gmra.mxu0 %v11827_v58 }
 0xca4   :  { %12258 = vmatpush.msra.mxu0 %v12078_v15  ;;  %v11854_v29 = vand.u32 4294901760, %v11853_v0  ;;  %11905 = vmatmul.f32.vlgmr.msra.gmra.mxu1 %v11828_v59  ;;  %v11829_v49 = vsub.f32 %v11827_v58, %v11828_v59  ;;  %v11962_v33 = vsel %vm588_vm1, %v11193_v24, 0  ;;  %v12006_v15 = vand.u32 4294901760, %v12005_v48 }
 0xca5   :  { %12308 = vmatpush.msra.mxu1 %v15477_v47  ;;  %v15505_v34 = vand.u32 4294901760, %v11962_v33 }
 0xca6   :  { %11855 = vmatpush.msra.mxu3 %v11854_v29  ;;  %v11830_v45 = vand.u32 4294901760, %v11829_v49  ;;  %v12007_v41 = vsub.f32 %v12005_v48, %v12006_v15 }
 0xca7   :  { %11857 = vmatmul.f32.vlgmr.msra.gmra.mxu3 %v11826_v63  ;;  %v11274_v28 = vpop.f32.mrf.mxu0  ;;  %v12013_v20 = vsub.f32 %v11962_v33, %v15505_v34 }
 0xca8   :  { %11949 = vmatpush.msrb.mxu3 %v11824_v18  ;;  %v11250_v62 = vpop.f32.mrf.mxu3  ;;  %11831 = vmatmul.f32.vlgmr.msra.gmra.mxu2 %v11830_v45  ;;  %v12008_v3 = vand.u32 4294901760, %v12007_v41 }
 0xca9   :  { %v11224_v17 = vpop.f32.mrf.mxu2  ;;  %12132 = vmatpush.msra.mxu2 %v15484_v25  ;;  %v12014_v16 = vand.u32 4294901760, %v12013_v20 }
 0xcaa   :  { %12190 = vmatpush.msra.mxu3 %v15477_v47  ;;  %v11251_v1 = vadd.f32 %v11250_v62, %v11224_v17 }
 0xcab   :  { %12001 = vmatmul.f32.vlgmr.msrb.gmra.mxu0 %v12000_v31  ;;  %v12015_v56 = vsub.f32 %v12013_v20, %v12014_v16 }
 0xcac   :  { %v11275_v30 = vadd.f32 %v11274_v28, %v11251_v1  ;;  %12083 = vmatmul.f32.vlgmr.msrb.gmra.mxu1 %v15488_v42 }
 0xcae   :  { %v11299_v18 = vadd.f32 %v11298_v8, %v11275_v30 }
 0xcaf   :  { %11951 = vmatmul.f32.vlgmr.msrb.gmra.mxu3 %v11826_v63  ;;  %v11376_v47 = vpop.f32.mrf.mxu0  ;;  %v11402_v13 = vpop.f32.mrf.mxu1 }
 0xcb0   :  { %11929 = vmatmul.f32.vlgmr.msrb.gmra.mxu2 %v11826_v63  ;;  %v11344_v51 = vpop.f32.mrf.mxu3  ;;  %v11403_v59 = vadd.f32 %v11402_v13, %v11376_v47  ;;  %v12016_v63 = vand.u32 4294901760, %v12015_v56 }
 0xcb1   :  { %v11322_v58 = vpop.f32.mrf.mxu2 }
 0xcb2   :  { %v11323_v36 = vadd.f32 %v11322_v58, %v11299_v18 }
 0xcb3   :  { %12009 = vmatmul.f32.gmra.mxu0 %v12008_v3 }
 0xcb4   :  { %v11345_v25 = vadd.f32 %v11344_v51, %v11323_v36  ;;  %12087 = vmatmul.f32.gmra.mxu1 %v15498_v26 }
 0xcb6   :  { %v11965_v0 = vsel %vm588_vm1, %v11345_v25, 0 }
 0xcb7   :  { %v15513_v24 = vand.u32 4294901760, %v11965_v0  ;;  %12194 = vmatmul.f32.vlgmr.msra.gmra.mxu3 %v11998_v7  ;;  %v11474_v62 = vpop.f32.mrf.mxu0  ;;  %v11496_v1 = vpop.f32.mrf.mxu1 }
 0xcb8   :  { %12135 = vmatmul.f32.vlgmr.msra.gmra.mxu2 %v15492_v6  ;;  %v11450_v33 = vpop.f32.mrf.mxu3 }
 0xcb9   :  { %v12021_v57 = vsub.f32 %v11965_v0, %v15513_v24  ;;  %v11426_v29 = vpop.f32.mrf.mxu2 }
 0xcba   :  { %v11427_v49 = vadd.f32 %v11426_v29, %v11403_v59 }
 0xcbb   :  { %12017 = vmatmul.f32.gmra.mxu0 %v12016_v63  ;;  %v12022_v45 = vand.u32 4294901760, %v12021_v57 }
 0xcbc   :  { %v11451_v31 = vadd.f32 %v11450_v33, %v11427_v49  ;;  %12091 = vmatmul.f32.gmra.mxu1 %v15505_v34 }
 0xcbd   :  { %v12023_v28 = vsub.f32 %v12021_v57, %v12022_v45 }
 0xcbe   :  { %v11475_v17 = vadd.f32 %v11474_v62, %v11451_v31 }
 0xcbf   :  { %12200 = vmatmul.f32.gmra.mxu3 %v12006_v15  ;;  %v12024_v7 = vand.u32 4294901760, %v12023_v28 }
 0xcc0   :  { %v11497_v30 = vadd.f32 %v11496_v1, %v11475_v17  ;;  %12140 = vmatmul.f32.gmra.mxu2 %v12005_v48 }
 0xcc2   :  { %v11968_v6 = vsel %vm588_vm1, %v11497_v30, 0 }
 0xcc3   :  { %12025 = vmatmul.f32.gmra.mxu0 %v12024_v7  ;;  %v15519_v41 = vand.u32 4294901760, %v11968_v6 }
 0xcc4   :  { %12095 = vmatmul.f32.gmra.mxu1 %v15513_v24 }
 0xcc5   :  { %v12029_v8 = vsub.f32 %v11968_v6, %v15519_v41 }
 0xcc7   :  { %12206 = vmatmul.f32.gmra.mxu3 %v12014_v16  ;;  %v12030_v18 = vand.u32 4294901760, %v12029_v8 }
 0xcc8   :  { %12145 = vmatmul.f32.gmra.mxu2 %v12013_v20 }
 0xcc9   :  { %v12031_v3 = vsub.f32 %v12029_v8, %v12030_v18 }
 0xccb   :  { %v12032_v51 = vand.u32 4294901760, %v12031_v3  ;;  %v15529_v3 = vpop.xlane.xlu1 %12376 }
 0xccc   :  { %12099 = vmatmul.f32.gmra.mxu1 %v15519_v41  ;;  %vm12378_vm3 = vcmp.gt.f32.partialorder %v15529_v3, 0.0 }
 0xccd   :  { %12033 = vmatmul.f32.gmra.mxu0 %v12032_v51 }
 0xccf   :  { %12212 = vmatmul.f32.gmra.mxu3 %v12022_v45 }
 0xcd0   :  { %12150 = vmatmul.f32.gmra.mxu2 %v12021_v57 }
 0xcd7   :  { %12218 = vmatmul.f32.gmra.mxu3 %v12030_v18 }
 0xcd8   :  { %12155 = vmatmul.f32.gmra.mxu2 %v12029_v8 }
 0xcde   :  { %v11578_v15 = vpop.f32.mrf.mxu0 }
 0xce0   :  { %v11602_v47 = vpop.f32.mrf.mxu1 }
 0xce2   :  { %v11554_v48 = vpop.f32.mrf.mxu3 }
 0xce6   :  { %v11680_v20 = vpop.f32.mrf.mxu0 }
 0xce8   :  { %v11706_v63 = vpop.f32.mrf.mxu1 }
 0xce9   :  { %v11707_v57 = vadd.f32 %v11706_v63, %v11680_v20 }
 0xcea   :  { %v11528_v58 = vpop.f32.mrf.mxu2  ;;  %v11648_v13 = vpop.f32.mrf.mxu3 }
 0xceb   :  { %v11555_v36 = vadd.f32 %v11554_v48, %v11528_v58 }
 0xced   :  { %v11579_v25 = vadd.f32 %v11578_v15, %v11555_v36  ;;  %v13334_v15 = vmov 0.0  }
 0xcee   :  { %v11778_v1 = vpop.f32.mrf.mxu0  ;;  %v15535_v58 = vsel %vm12378_vm3, 1.0, %v13334_v15  ;;  %vm12553_vm3 = vcmask 1046534  }
 0xcef   :  { %v11603_v56 = vadd.f32 %v11602_v47, %v11579_v25  ;;  %v12478_v36 = vsel %vm12477_vm5, %v15535_v58, 0.0  ;;  %vm12556_vm5 = vcmask 1047559  }
 0xcf0   :  { %v11800_v6 = vpop.f32.mrf.mxu1  ;;  %12479 = vadd.xlane.f32.xlu0 %v12478_v36 }
 0xcf2   :  { %v11626_v16 = vpop.f32.mrf.mxu2  ;;  %v11754_v62 = vpop.f32.mrf.mxu3 }
 0xcf3   :  { %v11627_v0 = vadd.f32 %v11626_v16, %v11603_v56 }
 0xcf5   :  { %v11649_v59 = vadd.f32 %v11648_v13, %v11627_v0 }
 0xcf7   :  { %v11971_v29 = vsel %vm588_vm1, %v11649_v59, 0 }
 0xcf8   :  { %v15525_v49 = vand.u32 4294901760, %v11971_v29 }
 0xcfa   :  { %v11730_v33 = vpop.f32.mrf.mxu2  ;;  %12103 = vmatmul.f32.gmra.mxu1 %v15525_v49  ;;  %v12037_v45 = vsub.f32 %v11971_v29, %v15525_v49 }
 0xcfb   :  { %v11731_v31 = vadd.f32 %v11730_v33, %v11707_v57 }
 0xcfc   :  { %12160 = vmatmul.f32.gmra.mxu2 %v12037_v45  ;;  %v12038_v28 = vand.u32 4294901760, %v12037_v45 }
 0xcfd   :  { %v11755_v17 = vadd.f32 %v11754_v62, %v11731_v31 }
 0xcfe   :  { %12224 = vmatmul.f32.gmra.mxu3 %v12038_v28  ;;  %v12039_v7 = vsub.f32 %v12037_v45, %v12038_v28 }
 0xcff   :  { %v11779_v30 = vadd.f32 %v11778_v1, %v11755_v17 }
 0xd00   :  { %v12040_v8 = vand.u32 4294901760, %v12039_v7 }
 0xd01   :  { %v11801_v18 = vadd.f32 %v11800_v6, %v11779_v30 }
 0xd02   :  { %12041 = vmatmul.f32.gmra.mxu0 %v12040_v8 }
 0xd03   :  { %v11974_v51 = vsel %vm588_vm1, %v11801_v18, 0 }
 0xd04   :  { %v15533_v48 = vand.u32 4294901760, %v11974_v51 }
 0xd06   :  { %12107 = vmatmul.f32.gmra.mxu1 %v15533_v48  ;;  %v12045_v47 = vsub.f32 %v11974_v51, %v15533_v48 }
 0xd08   :  { %12165 = vmatmul.f32.gmra.mxu2 %v12045_v47  ;;  %v12046_v25 = vand.u32 4294901760, %v12045_v47 }
 0xd0a   :  { %12230 = vmatmul.f32.gmra.mxu3 %v12046_v25  ;;  %v12047_v56 = vsub.f32 %v12045_v47, %v12046_v25 }
 0xd0c   :  { %v12048_v13 = vand.u32 4294901760, %v12047_v56 }
 0xd0e   :  { %12049 = vmatmul.f32.gmra.mxu0 %v12048_v13 }
 0xd20   :  { %v11882_v16 = vpop.f32.mrf.mxu0 }
 0xd21   :  { %v11906_v0 = vpop.f32.mrf.mxu1 }
 0xd28   :  { %v12002_v20 = vpop.f32.mrf.mxu0 }
 0xd29   :  { %v12084_v59 = vpop.f32.mrf.mxu1 }
 0xd2a   :  { %v15540_v63 = vadd.f32 %v12084_v59, %v12002_v20  ;;  %v11858_v29 = vpop.f32.mrf.mxu3 }
 0xd2b   :  { %v11832_v57 = vpop.f32.mrf.mxu2 }
 0xd2c   :  { %v11859_v33 = vadd.f32 %v11858_v29, %v11832_v57 }
 0xd2e   :  { %v11883_v45 = vadd.f32 %v11882_v16, %v11859_v33 }
 0xd30   :  { %v12010_v31 = vpop.f32.mrf.mxu0  ;;  %v11907_v17 = vadd.f32 %v11906_v0, %v11883_v45 }
 0xd31   :  { %v12088_v62 = vpop.f32.mrf.mxu1 }
 0xd32   :  { %v15542_v28 = vadd.f32 %v12088_v62, %v12010_v31  ;;  %v11952_v30 = vpop.f32.mrf.mxu3 }
 0xd33   :  { %v11930_v1 = vpop.f32.mrf.mxu2 }
 0xd34   :  { %v11931_v7 = vadd.f32 %v11930_v1, %v11907_v17 }
 0xd36   :  { %v11953_v6 = vadd.f32 %v11952_v30, %v11931_v7 }
 0xd38   :  { %v12018_v8 = vpop.f32.mrf.mxu0  ;;  %v11977_v18 = vsel %vm588_vm1, %v11953_v6, 0  ;;  %v9146_v6 = vadd.f32 %v15199_v46, %v15210_v27 }
 0xd39   :  { %v12052_v51 = vand.u32 4294901760, %v11977_v18  ;;  %v12092_v15 = vpop.f32.mrf.mxu1 }
 0xd3a   :  { %v15545_v36 = vadd.f32 %v12092_v15, %v12018_v8  ;;  %v5844_v8 = vadd.f32 %v14593_v37, %v14598_v11  ;;  %v15589_v37 = vmax.f32 %v15529_v3, 1.0  ;;  %v6272_v3 = vadd.f32 %v14834_v22, %v14711_v50 }
 0xd3b   :  { %12111 = vmatmul.f32.gmra.mxu1 %v12052_v51  ;;  %v12053_v47 = vsub.f32 %v11977_v18, %v12052_v51  ;;  %v16236_v18 = vld [vmem:[#allocation25_spill] sm:$0xff] }
 0xd3c   :  { %v6332_v50 = vadd.f32 %v14829_v12, %v6272_v3  ;;  %v16252_v3 = vld [vmem:[#allocation39_spill] sm:$0xff]  ;;  %vm12387_vm9 = vweird.f32 %v15589_v37 }
 0xd3d   :  { %12170 = vmatmul.f32.gmra.mxu2 %v12053_v47  ;;  %v12054_v25 = vand.u32 4294901760, %v12053_v47 }
 0xd3f   :  { %12236 = vmatmul.f32.gmra.mxu3 %v12054_v25  ;;  %v12055_v56 = vsub.f32 %v12053_v47, %v12054_v25  ;;  %v6267_v47 = vadd.f32 %v14825_v4, %v14681_v21  ;;  %v9198_v25 = vadd.f32 %v15212_v2, %v9146_v6 }
 0xd40   :  { %v12026_v13 = vpop.f32.mrf.mxu0 }
 0xd41   :  { %v12096_v16 = vpop.f32.mrf.mxu1  ;;  %v12056_v0 = vand.u32 4294901760, %v12055_v56  ;;  %v12195_v56 = vpop.f32.mrf.mxu3  ;;  %v6326_v46 = vadd.f32 %v14816_v5, %v6267_v47  ;;  %v9257_v27 = vadd.f32 %v15220_v19, %v9198_v25 }
 0xd42   :  { %v15547_v20 = vadd.f32 %v12096_v16, %v12026_v13  ;;  %v16238_v13 = vld [vmem:[#allocation27_spill] sm:$0xff] }
 0xd43   :  { %12057 = vmatmul.f32.gmra.mxu0 %v12056_v0  ;;  %12310 = vmatmul.f32.vlgmr.msra.gmra.mxu1 %v15488_v42  ;;  %v5900_v16 = vadd.f32 %v16238_v13, %v5844_v8  ;;  %v9323_v21 = vadd.f32 %v15326_v10, %v9257_v27 }
 0xd49   :  { %v12100_v59 = vpop.f32.mrf.mxu1  ;;  %v12201_v22 = vpop.f32.mrf.mxu3 }
 0xd4a   :  { %v12034_v29 = vpop.f32.mrf.mxu0 }
 0xd4b   :  { %v15550_v57 = vadd.f32 %v12100_v59, %v12034_v29  ;;  %12260 = vmatmul.f32.vlgmr.msra.gmra.mxu0 %v15488_v42  ;;  %12314 = vmatmul.f32.gmra.mxu1 %v15498_v26  ;;  %v16239_v59 = vld [vmem:[#allocation33_spill] sm:$0xff] }
 0xd53   :  { %12264 = vmatmul.f32.gmra.mxu0 %v15498_v26  ;;  %12318 = vmatmul.f32.gmra.mxu1 %v15505_v34 }
 0xd5b   :  { %12268 = vmatmul.f32.gmra.mxu0 %v15505_v34  ;;  %12322 = vmatmul.f32.gmra.mxu1 %v15513_v24 }
 0xd63   :  { %12272 = vmatmul.f32.gmra.mxu0 %v15513_v24  ;;  %12326 = vmatmul.f32.gmra.mxu1 %v15519_v41  ;;  %v12480_v42 = vpop.xlane.xlu0 %12479 }
 0xd64   :  { %v12481_v26 = vrot.slane %v12480_v42, 4 }
 0xd66   :  { %v12482_v34 = vadd.f32 %v12481_v26, %v12480_v42 }
 0xd68   :  { %v12483_v33 = vrot.slane %v12482_v34, 2 }
 0xd6a   :  { %v12484_v62 = vadd.f32 %v12483_v33, %v12482_v34  ;;  %v16240_v34 = vld [vmem:[#allocation26_spill] sm:$0xff] }
 0xd6b   :  { %12276 = vmatmul.f32.gmra.mxu0 %v15519_v41  ;;  %12330 = vmatmul.f32.gmra.mxu1 %v15525_v49  ;;  %v5963_v33 = vadd.f32 %v16240_v34, %v5900_v16  ;;  %v16243_v16 = vld [vmem:[#allocation35_spill] sm:$0xff] }
 0xd6c   :  { %v12485_v17 = vrot.slane %v12484_v62, 1 }
 0xd6e   :  { %v12486_v41 = vadd.f32 %v12485_v17, %v12484_v62  ;;  %v6392_v62 = vadd.f32 %v14827_v43, %v6326_v46  ;;  %v6021_v17 = vadd.f32 %v14750_v35, %v5963_v33  ;;  %v6277_v35 = vadd.f32 %v14842_v39, %v14731_v32 }
 0xd70   :  { %13128 = vpush %v12486_v41  ;;  %v6442_v8 = vadd.f32 %v14831_v9, %v6392_v62  ;;  %v6071_v47 = vadd.f32 %v14734_v52, %v6021_v17 }
 0xd73   :  { %12280 = vmatmul.f32.gmra.mxu0 %v15525_v49  ;;  %12334 = vmatmul.f32.gmra.mxu1 %v15533_v48  ;;  %v12136_v49 = vpop.f32.mrf.mxu2 }
 0xd74   :  { %v12137_v4 = vadd.f32 %v12136_v49, %v15540_v63  ;;  %v9373_v49 = vadd.f32 %v15322_v54, %v9323_v21 }
 0xd77   :  { %v12104_v45 = vpop.f32.mrf.mxu1 }
 0xd7b   :  { %12284 = vmatmul.f32.gmra.mxu0 %v15533_v48  ;;  %12338 = vmatmul.f32.gmra.mxu1 %v12052_v51  ;;  %v12141_v2 = vpop.f32.mrf.mxu2 }
 0xd7c   :  { %v12142_v39 = vadd.f32 %v12141_v2, %v15542_v28  ;;  %v16250_v2 = vld [vmem:[#allocation51_spill] sm:$0xff] }
 0xd7e   :  { %v12202_v62 = vadd.f32 %v12201_v22, %v12142_v39 }
 0xd7f   :  { %v12042_v31 = vpop.f32.mrf.mxu0 }
 0xd80   :  { %v15565_v24 = vadd.f32 %v12104_v45, %v12042_v31  ;;  %v9150_v45 = vadd.f32 %v15218_v40, %v15232_v53  ;;  %v16241_v31 = vld [vmem:[#allocation32_spill] sm:$0xff]  ;;  %v12196_v40 = vadd.f32 %v12195_v56, %v12137_v4  ;;  %v9403_v56 = vadd.f32 %v9373_v49, %v6442_v8  ;;  %v16255_v49 = vld [vmem:[#allocation42_spill] sm:$0xff] }
 0xd81   :  { %v16257_v8 = vld [vmem:[#allocation52_spill] sm:$0xff] }
 0xd82   :  { %v9203_v10 = vadd.f32 %v15237_v23, %v9150_v45  ;;  %v16251_v45 = vld [vmem:[#allocation31_spill] sm:$0xff] }
 0xd83   :  { %12288 = vmatmul.f32.gmra.mxu0 %v12052_v51  ;;  %v15567_v1 = vpop.f32.mrf.mxu1  ;;  %v16237_v51 = vld [vmem:[#allocation29_spill] sm:$0xff]  ;;  %v12146_v27 = vpop.f32.mrf.mxu2 }
 0xd84   :  { %v5848_v15 = vadd.f32 %v16237_v51, %v16236_v18 }
 0xd86   :  { %v5905_v29 = vadd.f32 %v16239_v59, %v5848_v15  ;;  %v16245_v59 = vld [vmem:[#allocation36_spill] sm:$0xff] }
 0xd88   :  { %v5969_v19 = vadd.f32 %v16241_v31, %v5905_v29  ;;  %v16246_v29 = vld [vmem:[#allocation22_spill] sm:$0xff] }
 0xd8a   :  { %v6025_v41 = vadd.f32 %v14778_v38, %v5969_v19  ;;  %v9263_v38 = vadd.f32 %v15244_v61, %v9203_v10  ;;  %v15620_v61 = vld [vmem:[%s16015_s4 + $0x1] ss:$0 sm:$0xff]  ;;  %v16253_v10 = vld [vmem:[#allocation37_spill] sm:$0xff] }
 0xd8b   :  { %v15569_v7 = vpop.f32.mrf.mxu0 }
 0xd8c   :  { %v9327_v32 = vadd.f32 %v15330_v55, %v9263_v38  ;;  %v6075_v52 = vadd.f32 %v16243_v16, %v6025_v41  ;;  %v16248_v55 = vld [vmem:[#allocation50_spill] sm:$0xff]  ;;  %v16263_v16 = vld [vmem:[#allocation9_spill] sm:$0xff] }
 0xd8d   :  { %v6338_v4 = vadd.f32 %v16248_v55, %v6277_v35  ;;  %v16254_v41 = vld [vmem:[#allocation30_spill] sm:$0xff]  ;;  %v16258_v35 = vld [vmem:[#allocation49_spill] sm:$0xff] }
 0xd8e   :  { %v9377_v31 = vadd.f32 %v15328_v44, %v9327_v32  ;;  %v6173_v17 = vadd.f32 %v16252_v3, %v6075_v52  ;;  %v12207_v32 = vpop.f32.mrf.mxu3  ;;  %v16267_v55 = vld [vmem:[#allocation45_spill] sm:$0xff] }
 0xda1   :  { %s13129_s2 = spop %13128 }
 0xda2   :  { %s12488_s19 = smax.f32 %s13335_s18, %s13129_s2 }
 0xda3   :  { %v12489_v48 = vstv %s12488_s19 }
 0xda4   :  { %13286 = vrcp.f32 %v12489_v48  ;;  %v12501_v53 = vand.u32 2147483648, %v12489_v48  ;;  %vm12495_vm1 = vweird.f32 %v12489_v48  ;;  %v12499_v43 = vand.u32 2147483647, %v12489_v48 }
 0xda5   :  { %13288 = vrcp.f32 %v15589_v37 }
 0xda6   :  { %v12502_v18 = vor.u32 1.1754944e-38, %v12501_v53  ;;  %vm12500_vm8 = vcmp.eq.f32.partialorder %v12499_v43, 8.507059e+37  ;;  %v16256_v53 = vld [vmem:[#allocation24_spill] sm:$0xff] }
 0xdaa   :  { %v13287_v0 = vpop.eup %13286 }
 0xdab   :  { %v12491_v26 = vmul.f32 %v13287_v0, %v12489_v48  ;;  %vm12496_vm6 = vweird.f32 %v13287_v0  ;;  %v16242_v48 = vld [vmem:[#allocation21_spill] sm:$0xff]  ;;  %v15613_v12 = vpop.eup %13288 }
 0xdac   :  { %vm12497_vm7 = vmor %vm12495_vm1, %vm12496_vm6  ;;  %v9154_v9 = vadd.f32 %v16242_v48, %v15259_v60  ;;  %v12383_v33 = vmul.f32 %v15613_v12, %v15589_v37  ;;  %vm12388_vm10 = vweird.f32 %v15613_v12 }
 0xdad   :  { %v12492_v5 = vsub.f32 1.0, %v12491_v26  ;;  %v16247_v26 = vld [vmem:[#allocation48_spill] sm:$0xff]  ;;  %vm15673_vm11 = vmor %vm12387_vm9, %vm12388_vm10 }
 0xdae   :  { %v9208_v46 = vadd.f32 %v16246_v29, %v9154_v9  ;;  %v6396_v21 = vadd.f32 %v16247_v26, %v6332_v50  ;;  %v16262_v9 = vld [vmem:[#allocation91_spill] sm:$0xff]  ;;  %v16265_v29 = vld [vmem:[#allocation41_spill] sm:$0xff]  ;;  %v16266_v26 = vld [vmem:[#allocation40_spill] sm:$0xff] }
 0xdaf   :  { %v12493_v63 = vmul.f32 %v13287_v0, %v12492_v5  ;;  %v6165_v5 = vadd.f32 %v16251_v45, %v6071_v47  ;;  %v16261_v47 = vld [vmem:[#allocation23_spill] sm:$0xff]  ;;  %v12151_v45 = vpop.f32.mrf.mxu2 }
 0xdb0   :  { %v6446_v50 = vadd.f32 %v16257_v8, %v6396_v21  ;;  %v9158_v48 = vadd.f32 %v16261_v47, %v15275_v14  ;;  %v16268_v14 = vld [vmem:[#allocation72_spill] sm:$0xff]  ;;  %v12393_v8 = vand.u32 2147483648, %v15589_v37  ;;  %v16277_v47 = vld [vmem:[#allocation93_spill] sm:$0xff] }
 0xdb1   :  { %v12494_v6 = vadd.f32 %v13287_v0, %v12493_v63 }
 0xdb2   :  { %v9404_v39 = vadd.f32 %v9377_v31, %v6446_v50  ;;  %v16271_v31 = vld [vmem:[#allocation54_spill] sm:$0xff]  ;;  %v16276_v50 = vld [vmem:[#allocation12_spill] sm:$0xff] }
 0xdb3   :  { %v12498_v15 = vsel %vm12497_vm7, %v13287_v0, %v12494_v6  ;;  %v16244_v0 = vld [vmem:[#allocation28_spill] sm:$0xff]  ;;  %v9269_v6 = vadd.f32 %v16256_v53, %v9208_v46  ;;  %v6235_v46 = vadd.f32 %v16265_v29, %v6173_v17 }
 0xdb4   :  { %v12503_v25 = vsel %vm12500_vm8, %v12502_v18, %v12498_v15  ;;  %v6029_v60 = vadd.f32 %v16245_v59, %v16244_v0  ;;  %v16259_v18 = vld [vmem:[#allocation8_spill] sm:$0xff]  ;;  %v16260_v15 = vld [vmem:[#allocation53_spill] sm:$0xff]  ;;  %v16264_v59 = vld [vmem:[#allocation38_spill] sm:$0xff] }
 0xdb5   :  { %13130 = vpush %v12503_v25  ;;  %v9331_v25 = vadd.f32 %v16262_v9, %v9269_v6  ;;  %v16275_v6 = vld [vmem:[#allocation74_spill] sm:$0xff] }
 0xdb6   :  { %v6079_v63 = vadd.f32 %v16253_v10, %v6029_v60  ;;  %v6231_v60 = vadd.f32 %v16264_v59, %v6165_v5  ;;  %v16283_v59 = vld [vmem:[#allocation76_spill] sm:$0xff] }
 0xdb8   :  { %v15571_v30 = vpop.f32.mrf.mxu1  ;;  %v15652_v21 = vadd.f32 %v16266_v26, %v6079_v63  ;;  %v16273_v63 = vld [vmem:[#allocation75_spill] sm:$0xff]  ;;  %v16284_v26 = vld [vmem:[#allocation61_spill] sm:$0xff] }
 0xdc0   :  { %v15586_v42 = vpop.f32.mrf.mxu0  ;;  %v12311_v11 = vpop.f32.mrf.mxu1 }
 0xdc8   :  { %v12261_v23 = vpop.f32.mrf.mxu0  ;;  %v12315_v51 = vpop.f32.mrf.mxu1 }
 0xdc9   :  { %v12262_v54 = vadd.f32 %v12261_v23, %v12196_v40  ;;  %v6033_v40 = vadd.f32 %v16255_v49, %v16254_v41  ;;  %v6400_v23 = vadd.f32 %v16258_v35, %v6338_v4  ;;  %v16274_v41 = vld [vmem:[#allocation73_spill] sm:$0xff] }
 0xdca   :  { %v9162_v49 = vadd.f32 %v16274_v41, %v16273_v63  ;;  %v16289_v63 = vld [vmem:[#allocation79_spill] sm:$0xff] }
 0xdcb   :  { %v12312_v13 = vadd.f32 %v12311_v11, %v12262_v54  ;;  %v16249_v11 = vld [vmem:[#allocation34_spill] sm:$0xff]  ;;  %v6083_v4 = vadd.f32 %v16267_v55, %v6033_v40  ;;  %v6292_v55 = vadd.f32 %v16284_v26, %v6235_v46 }
 0xdcc   :  { %v6282_v34 = vadd.f32 %v16250_v2, %v16249_v11 }
 0xdcd   :  { %v12342_v28 = vadd.f32 %v12312_v13, %v9403_v56  ;;  %v12384_v56 = vsub.f32 1.0, %v12383_v33  ;;  %v12147_v13 = vadd.f32 %v12146_v27, %v15545_v36  ;;  %v16270_v36 = vld [vmem:[#allocation90_spill] sm:$0xff] }
 0xdce   :  { %v6344_v22 = vadd.f32 %v16260_v15, %v6282_v34  ;;  %v16269_v34 = vld [vmem:[#allocation47_spill] sm:$0xff]  ;;  %v9381_v27 = vadd.f32 %v16270_v36, %v9331_v25  ;;  %v12152_v25 = vadd.f32 %v12151_v45, %v15547_v20  ;;  %v16287_v45 = vld [vmem:[#allocation58_spill] sm:$0xff] }
 0xdcf   :  { %v12351_v19 = vadd.f32 %v15620_v61, %v12342_v28  ;;  %v9213_v28 = vadd.f32 %v16268_v14, %v9158_v48  ;;  %v6450_v33 = vadd.f32 %v16269_v34, %v6400_v23  ;;  %v12208_v10 = vadd.f32 %v12207_v32, %v12147_v13  ;;  %v16281_v13 = vld [vmem:[#allocation46_spill] sm:$0xff] }
 0xdd0   :  { %v12265_v43 = vpop.f32.mrf.mxu0  ;;  %v12319_v54 = vpop.f32.mrf.mxu1  ;;  %v12394_v14 = vor.u32 1.1754944e-38, %v12393_v8  ;;  %v16293_v8 = vld [vmem:[#allocation95_spill] sm:$0xff] }
 0xdd1   :  { %v12359_v38 = vmul.f32 %v12351_v19, %v16259_v18  ;;  %v12266_v44 = vadd.f32 %v12265_v43, %v12202_v62  ;;  %v6404_v19 = vadd.f32 %v16271_v31, %v6344_v22  ;;  %v16272_v62 = vld [vmem:[#allocation57_spill] sm:$0xff]  ;;  %v9275_v43 = vadd.f32 %v16275_v6, %v9213_v28  ;;  %v16292_v6 = vld [vmem:[#allocation59_spill] sm:$0xff] }
 0xdd2   :  { %v6287_v3 = vadd.f32 %v16272_v62, %v6231_v60  ;;  %v9405_v18 = vadd.f32 %v9381_v27, %v6450_v33  ;;  %v9218_v60 = vadd.f32 %v16283_v59, %v9162_v49  ;;  %v16286_v33 = vld [vmem:[#allocation92_spill] sm:$0xff]  ;;  %v12156_v62 = vpop.f32.mrf.mxu2 }
 0xdd3   :  { %v12367_v52 = vadd.f32 %v12359_v38, %v16263_v16  ;;  %v12316_v0 = vadd.f32 %v12315_v51, %v12266_v44  ;;  %v12385_v51 = vmul.f32 %v15613_v12, %v12384_v56  ;;  %v12391_v44 = vand.u32 2147483647, %v15589_v37  ;;  %v16280_v56 = vld [vmem:[#allocation13_spill] sm:$0xff]  ;;  %v12213_v37 = vpop.f32.mrf.mxu3 }
 0xdd4   :  { %v9335_v48 = vadd.f32 %v16277_v47, %v9275_v43  ;;  %v6189_v16 = vadd.f32 %v16281_v13, %v6083_v4  ;;  %v16285_v4 = vld [vmem:[#allocation56_spill] sm:$0xff]  ;;  %v6356_v43 = vadd.f32 %v16292_v6, %v6292_v55  ;;  %v16297_v13 = vld [vmem:[#allocation83_spill] sm:$0xff] }
 0xdd5   :  { %v12397_v11 = vsel %vm127_vm0, %v12367_v52, 0.0  ;;  %v12343_v2 = vadd.f32 %v12316_v0, %v9404_v39  ;;  %v12386_v38 = vadd.f32 %v15613_v12, %v12385_v51  ;;  %v16282_v52 = vld [vmem:[#allocation55_spill] sm:$0xff]  ;;  %vm12392_vm12 = vcmp.eq.f32.partialorder %v12391_v44, 8.507059e+37 }
 0xdd6   :  { %v12398_v5 = vrot.slane %v12397_v11, 4  ;;  %v6350_v0 = vadd.f32 %v16282_v52, %v6287_v3  ;;  %v6454_v34 = vadd.f32 %v16285_v4, %v6404_v19  ;;  %v9385_v36 = vadd.f32 %v16286_v33, %v9335_v48  ;;  %v16294_v44 = vld [vmem:[#allocation11_spill] sm:$0xff]  ;;  %v16298_v52 = vld [vmem:[#allocation81_spill] sm:$0xff] }
 0xdd7   :  { %v12352_v17 = vadd.f32 %v15620_v61, %v12343_v2  ;;  %v12390_v20 = vsel %vm15673_vm11, %v15613_v12, %v12386_v38  ;;  %v12214_v51 = vadd.f32 %v12213_v37, %v12152_v25  ;;  %v16290_v12 = vld [vmem:[#allocation77_spill] sm:$0xff]  ;;  %v12157_v38 = vadd.f32 %v12156_v62, %v15550_v57  ;;  %v16295_v48 = vld [vmem:[#allocation43_spill] sm:$0xff]  ;;  %v16299_v37 = vld [vmem:[#allocation44_spill] sm:$0xff] }
 0xdd8   :  { %v12399_v40 = vadd.f32 %v12398_v5, %v12397_v11  ;;  %v12269_v53 = vpop.f32.mrf.mxu0  ;;  %v12323_v22 = vpop.f32.mrf.mxu1  ;;  %v6408_v46 = vadd.f32 %v16287_v45, %v6350_v0  ;;  %v16288_v5 = vld [vmem:[#allocation78_spill] sm:$0xff]  ;;  %v9166_v41 = vadd.f32 %v16290_v12, %v16289_v63  ;;  %v15694_v49 = vsel %vm12392_vm12, %v12394_v14, %v12390_v20  ;;  %v16303_v4 = vld [vmem:[#allocation65_spill] sm:$0xff]  ;;  %v16308_v6 = vld [vmem:[#allocation15_spill] sm:$0xff] }
 0xdd9   :  { %v12360_v35 = vmul.f32 %v12352_v17, %v16276_v50  ;;  %v12270_v23 = vadd.f32 %v12269_v53, %v12208_v10  ;;  %v9281_v31 = vadd.f32 %v16288_v5, %v9218_v60  ;;  %v6239_v9 = vadd.f32 %v16295_v48, %v15652_v21  ;;  %v16300_v57 = vld [vmem:[#allocation94_spill] sm:$0xff]  ;;  %v16305_v5 = vld [vmem:[#allocation84_spill] sm:$0xff] }
 0xdda   :  { %v12400_v15 = vrot.slane %v12399_v40, 2  ;;  %v9170_v0 = vadd.f32 %v16298_v52, %v16297_v13  ;;  %v16306_v62 = vld [vmem:[#allocation14_spill] sm:$0xff]  ;;  %v12506_v12 = vrot.slane %v15535_v58, 1 }
 0xddb   :  { %v12368_v32 = vadd.f32 %v12360_v35, %v16280_v56  ;;  %v12320_v39 = vadd.f32 %v12319_v54, %v12270_v23  ;;  %v9339_v50 = vadd.f32 %v16293_v8, %v9281_v31  ;;  %v12219_v55 = vpop.f32.mrf.mxu3 }
 0xddc   :  { %v12401_v29 = vadd.f32 %v12400_v15, %v12399_v40  ;;  %v16291_v40 = vld [vmem:[#allocation10_spill] sm:$0xff]  ;;  %v9228_v31 = vadd.f32 %v16305_v5, %v9170_v0  ;;  %v16312_v0 = vld [vmem:[#allocation96_spill] sm:$0xff] }
 0xddd   :  { %v12404_v28 = vsel %vm127_vm0, %v12368_v32, 0.0  ;;  %v12344_v11 = vadd.f32 %v12320_v39, %v9405_v18  ;;  %v9406_v18 = vadd.f32 %v9385_v36, %v6454_v34  ;;  %v16296_v32 = vld [vmem:[#allocation80_spill] sm:$0xff]  ;;  %v9389_v26 = vadd.f32 %v16300_v57, %v9339_v50 }
 0xdde   :  { %v12402_v54 = vrot.slane %v12401_v29, 1  ;;  %v12405_v2 = vrot.slane %v12404_v28, 4  ;;  %v9223_v39 = vadd.f32 %v16296_v32, %v9166_v41  ;;  %v6297_v34 = vadd.f32 %v16303_v4, %v6239_v9  ;;  %v16309_v50 = vld [vmem:[#allocation64_spill] sm:$0xff]  ;;  %v16316_v4 = vld [vmem:[#allocation5_spill] sm:$0xff] }
 0xddf   :  { %v12353_v27 = vadd.f32 %v15620_v61, %v12344_v11  ;;  %v16302_v11 = vld [vmem:[#allocation62_spill] sm:$0xff]  ;;  %v12454_v36 = vrot.slane %v15694_v49, 1 }
 0xde0   :  { %v12403_v3 = vadd.f32 %v12402_v54, %v12401_v29  ;;  %v12406_v17 = vadd.f32 %v12405_v2, %v12404_v28  ;;  %v12273_v10 = vpop.f32.mrf.mxu0  ;;  %v12327_v56 = vpop.f32.mrf.mxu1  ;;  %v15711_v29 = vadd.f32 %v16299_v37, %v6189_v16  ;;  %v16301_v28 = vld [vmem:[#allocation60_spill] sm:$0xff]  ;;  %v6412_v20 = vadd.f32 %v16302_v11, %v6356_v43 }
 0xde1   :  { %v12361_v19 = vmul.f32 %v12353_v27, %v16291_v40  ;;  %v12274_v53 = vadd.f32 %v12273_v10, %v12214_v51  ;;  %v6458_v21 = vadd.f32 %v16301_v28, %v6408_v46  ;;  %v12220_v2 = vadd.f32 %v12219_v55, %v12157_v38  ;;  %v16304_v51 = vld [vmem:[#allocation82_spill] sm:$0xff]  ;;  %v12161_v10 = vpop.f32.mrf.mxu2  ;;  %v16307_v40 = vld [vmem:[#allocation97_spill] sm:$0xff] }
 0xde2   :  { %v15700_v35 = vmul.f32 %v12403_v3, %v15694_v49  ;;  %v12407_v23 = vrot.slane %v12406_v17, 2  ;;  %v9287_v45 = vadd.f32 %v16304_v51, %v9223_v39  ;;  %v12109_v37 = vadd.f32 %v15567_v1, %v15569_v7 }
 0xde3   :  { %v12369_v15 = vadd.f32 %v12361_v19, %v16294_v44  ;;  %v12324_v47 = vadd.f32 %v12323_v22, %v12274_v53  ;;  %v9407_v46 = vadd.f32 %v9389_v26, %v6458_v21  ;;  %v12162_v53 = vadd.f32 %v12161_v10, %v15565_v24  ;;  %v12225_v32 = vpop.f32.mrf.mxu3  ;;  %v16313_v21 = vld [vmem:[#allocation66_spill] sm:$0xff] }
 0xde4   :  { %v12408_v25 = vadd.f32 %v12407_v23, %v12406_v17  ;;  %v9343_v19 = vadd.f32 %v16307_v40, %v9287_v45  ;;  %v6462_v23 = vadd.f32 %v16309_v50, %v6412_v20  ;;  %v12521_v24 = vmul.f32 %v15535_v58, %v15700_v35  ;;  %v16314_v20 = vld [vmem:[#allocation87_spill] sm:$0xff]  ;;  %v16320_v40 = vld [vmem:[#allocation88_spill] sm:$0xff] }
 0xde5   :  { %v12411_v59 = vsel %vm127_vm0, %v12369_v15, 0.0  ;;  %v12345_v60 = vadd.f32 %v12324_v47, %v9406_v18  ;;  %v16310_v18 = vld [vmem:[#allocation63_spill] sm:$0xff]  ;;  %v16311_v47 = vld [vmem:[#allocation86_spill] sm:$0xff]  ;;  %v12455_v55 = vrot.slane %v15694_v49, 2 }
 0xde6   :  { %v12409_v22 = vrot.slane %v12408_v25, 1  ;;  %v12412_v14 = vrot.slane %v12411_v59, 4  ;;  %v6362_v38 = vadd.f32 %v16310_v18, %v6297_v34  ;;  %v9293_v48 = vadd.f32 %v16311_v47, %v9228_v31  ;;  %v16318_v31 = vld [vmem:[#allocation16_spill] sm:$0xff]  ;;  %s13131_s21 = spop %13130 }
 0xde7   :  { %v12354_v54 = vadd.f32 %v15620_v61, %v12345_v60  ;;  %v12226_v60 = vadd.f32 %v12225_v32, %v12162_v53  ;;  %v12113_v47 = vadd.f32 %v15571_v30, %v15586_v42  ;;  %v12508_v42 = vrot.slane %v15535_v58, 3 }
 0xde8   :  { %v12410_v33 = vadd.f32 %v12409_v22, %v12408_v25  ;;  %v12413_v27 = vadd.f32 %v12412_v14, %v12411_v59  ;;  %v12277_v16 = vpop.f32.mrf.mxu0  ;;  %v12331_v52 = vpop.f32.mrf.mxu1  ;;  %v9393_v59 = vadd.f32 %v16312_v0, %v9343_v19  ;;  %v6416_v11 = vadd.f32 %v16313_v21, %v6362_v38  ;;  %v16324_v0 = vld [vmem:[#allocation89_spill] sm:$0xff] }
 0xde9   :  { %v12362_v3 = vmul.f32 %v12354_v54, %v16306_v62  ;;  %v12278_v17 = vadd.f32 %v12277_v16, %v12220_v2  ;;  %v16315_v54 = vld [vmem:[#allocation85_spill] sm:$0xff]  ;;  %v12166_v1 = vpop.f32.mrf.mxu2  ;;  %v12507_v16 = vrot.slane %v15535_v58, 2 }
 0xdea   :  { %v15722_v63 = vmul.f32 %v12454_v36, %v12410_v33  ;;  %v12414_v41 = vrot.slane %v12413_v27, 2  ;;  %v9174_v2 = vadd.f32 %v16315_v54, %v16314_v20  ;;  %v16317_v36 = vld [vmem:[#allocation99_spill] sm:$0xff]  ;;  %v9408_v45 = vadd.f32 %v9393_v59, %v6462_v23  ;;  %v16327_v20 = vld [vmem:[#allocation18_spill] sm:$0xff] }
 0xdeb   :  { %v12370_v43 = vadd.f32 %v12362_v3, %v16308_v6  ;;  %v12328_v8 = vadd.f32 %v12327_v56, %v12278_v17  ;;  %v12167_v5 = vadd.f32 %v12166_v1, %v12109_v37  ;;  %v16319_v17 = vld [vmem:[#allocation69_spill] sm:$0xff]  ;;  %v12231_v50 = vpop.f32.mrf.mxu3 }
 0xdec   :  { %v12522_v44 = vmul.f32 %v12506_v12, %v15722_v63  ;;  %v12415_v15 = vadd.f32 %v12414_v41, %v12413_v27  ;;  %v9347_v27 = vadd.f32 %v16317_v36, %v9293_v48  ;;  %v9233_v19 = vadd.f32 %v16320_v40, %v9174_v2 }
 0xded   :  { %v12418_v9 = vsel %vm127_vm0, %v12370_v43, 0.0  ;;  %v12346_v25 = vadd.f32 %v12328_v8, %v9407_v46  ;;  %v6302_v46 = vadd.f32 %v16319_v17, %v15711_v29  ;;  %v16321_v43 = vld [vmem:[#allocation98_spill] sm:$0xff]  ;;  %v12232_v29 = vadd.f32 %v12231_v50, %v12167_v5 }
 0xdee   :  { %v12537_v56 = vrot.slane %v12522_v44, 7  ;;  %v12416_v39 = vrot.slane %v12415_v15, 1  ;;  %v12419_v13 = vrot.slane %v12418_v9, 4  ;;  %v9397_v8 = vadd.f32 %v16321_v43, %v9347_v27  ;;  %v16322_v44 = vld [vmem:[#allocation68_spill] sm:$0xff]  ;;  %v16331_v43 = vld [vmem:[#allocation19_spill] sm:$0xff] }
 0xdef   :  { %v12355_v57 = vadd.f32 %v15620_v61, %v12346_v25  ;;  %v12456_v25 = vrot.slane %v15694_v49, 3  ;;  %v9299_v59 = vadd.f32 %v16324_v0, %v9233_v19 }
 0xdf0   :  { %v12417_v26 = vadd.f32 %v12416_v39, %v12415_v15  ;;  %v12420_v22 = vadd.f32 %v12419_v13, %v12418_v9  ;;  %v12281_v14 = vpop.f32.mrf.mxu0  ;;  %v12539_v28 = vsel %vm12538_vm13, %v12537_v56, %v12521_v24  ;;  %v6466_v15 = vadd.f32 %v16322_v44, %v6416_v11  ;;  %v12335_v24 = vpop.f32.mrf.mxu1  ;;  %v16323_v13 = vld [vmem:[#allocation67_spill] sm:$0xff] }
 0xdf1   :  { %v12363_v34 = vmul.f32 %v12355_v57, %v16316_v4  ;;  %v12282_v33 = vadd.f32 %v12281_v14, %v12226_v60  ;;  %v16325_v60 = vld [vmem:[#allocation17_spill] sm:$0xff] }
 0xdf2   :  { %v15748_v7 = vmul.f32 %v12455_v55, %v12417_v26  ;;  %v12421_v51 = vrot.slane %v12420_v22, 2  ;;  %v9409_v26 = vadd.f32 %v9397_v8, %v6466_v15  ;;  %v12171_v55 = vpop.f32.mrf.mxu2  ;;  %v16326_v14 = vld [vmem:[#allocation101_spill] sm:$0xff] }
 0xdf3   :  { %v12371_v62 = vadd.f32 %v12363_v34, %v16318_v31  ;;  %v12332_v3 = vadd.f32 %v12331_v52, %v12282_v33  ;;  %v6368_v52 = vadd.f32 %v16323_v13, %v6302_v46  ;;  %v9351_v21 = vadd.f32 %v16326_v14, %v9299_v59  ;;  %v16328_v34 = vld [vmem:[#allocation70_spill] sm:$0xff]  ;;  %v12237_v1 = vpop.f32.mrf.mxu3  ;;  %v16329_v31 = vld [vmem:[#allocation100_spill] sm:$0xff] }
 0xdf4   :  { %v12523_v10 = vmul.f32 %v12507_v16, %v15748_v7  ;;  %v12422_v41 = vadd.f32 %v12421_v51, %v12420_v22  ;;  %v12172_v11 = vadd.f32 %v12171_v55, %v12113_v47  ;;  %v12458_v59 = vrot.slane %v15694_v49, 5 }
 0xdf5   :  { %v12425_v53 = vsel %vm127_vm0, %v12371_v62, 0.0  ;;  %v12347_v6 = vadd.f32 %v12332_v3, %v9408_v45  ;;  %v6420_v33 = vadd.f32 %v16328_v34, %v6368_v52  ;;  %v9401_v62 = vadd.f32 %v16329_v31, %v9351_v21  ;;  %v16334_v21 = vld [vmem:[#allocation7_spill] sm:$0xff] }
 0xdf6   :  { %v12540_v23 = vrot.slane %v12523_v10, 6  ;;  %v12423_v18 = vrot.slane %v12422_v41, 1  ;;  %v12426_v38 = vrot.slane %v12425_v53, 4  ;;  %v12238_v3 = vadd.f32 %v12237_v1, %v12172_v11 }
 0xdf7   :  { %v12356_v48 = vadd.f32 %v15620_v61, %v12347_v6  ;;  %v12457_v10 = vrot.slane %v15694_v49, 4 }
 0xdf8   :  { %v12424_v9 = vadd.f32 %v12423_v18, %v12422_v41  ;;  %v12427_v32 = vadd.f32 %v12426_v38, %v12425_v53  ;;  %v12285_v56 = vpop.f32.mrf.mxu0  ;;  %v12542_v39 = vsel %vm12541_vm14, %v12540_v23, %v12539_v28  ;;  %v16330_v53 = vld [vmem:[#allocation71_spill] sm:$0xff]  ;;  %v12509_v18 = vrot.slane %v15535_v58, 4  ;;  %v12339_v44 = vpop.f32.mrf.mxu1 }
 0xdf9   :  { %v12364_v37 = vmul.f32 %v12356_v48, %v16325_v60  ;;  %v12286_v57 = vadd.f32 %v12285_v56, %v12232_v29  ;;  %v6470_v6 = vadd.f32 %v16330_v53, %v6420_v33  ;;  %v16332_v29 = vld [vmem:[#allocation20_spill] sm:$0xff]  ;;  %v12459_v33 = vrot.slane %v15694_v49, 6 }
 0xdfa   :  { %v15769_v30 = vmul.f32 %v12456_v25, %v12424_v9  ;;  %v12428_v22 = vrot.slane %v12427_v32, 2 }
 0xdfb   :  { %v12372_v54 = vadd.f32 %v12364_v37, %v16327_v20  ;;  %v12336_v28 = vadd.f32 %v12335_v24, %v12286_v57  ;;  %v9410_v15 = vadd.f32 %v9401_v62, %v6470_v6  ;;  %v16333_v57 = vld [vmem:[#allocation6_spill] sm:$0xff] }
 0xdfc   :  { %v12524_v2 = vmul.f32 %v12508_v42, %v15769_v30  ;;  %v12429_v4 = vadd.f32 %v12428_v22, %v12427_v32  ;;  %v12510_v22 = vrot.slane %v15535_v58, 5 }
 0xdfd   :  { %v12432_v36 = vsel %vm127_vm0, %v12372_v54, 0.0  ;;  %v12348_v27 = vadd.f32 %v12336_v28, %v9409_v26 }
 0xdfe   :  { %v12543_v51 = vrot.slane %v12524_v2, 5  ;;  %v12430_v45 = vrot.slane %v12429_v4, 1  ;;  %v12433_v5 = vrot.slane %v12432_v36, 4 }
 0xdff   :  { %v12357_v17 = vadd.f32 %v15620_v61, %v12348_v27 }
 0xe00   :  { %v12431_v46 = vadd.f32 %v12430_v45, %v12429_v4  ;;  %v12434_v41 = vadd.f32 %v12433_v5, %v12432_v36  ;;  %v12289_v40 = vpop.f32.mrf.mxu0  ;;  %v12545_v19 = vsel %vm12544_vm15, %v12543_v51, %v12542_v39  ;;  %v12511_v45 = vrot.slane %v15535_v58, 6 }
 0xe01   :  { %v12365_v8 = vmul.f32 %v12357_v17, %v16331_v43  ;;  %v12290_v50 = vadd.f32 %v12289_v40, %v12238_v3  ;;  %v12512_v40 = vrot.slane %v15535_v58, 7 }
 0xe02   :  { %v15785_v23 = vmul.f32 %v12457_v10, %v12431_v46  ;;  %v12435_v38 = vrot.slane %v12434_v41, 2  ;;  %v12460_v46 = vrot.slane %v15694_v49, 7  ;;  %v15810_v49 = vstv %s13131_s21 }
 0xe03   :  { %v12373_v47 = vadd.f32 %v12365_v8, %v16332_v29  ;;  %v12340_v48 = vadd.f32 %v12339_v44, %v12290_v50 }
 0xe04   :  { %v12525_v9 = vmul.f32 %v12509_v18, %v15785_v23  ;;  %v12436_v25 = vadd.f32 %v12435_v38, %v12434_v41 }
 0xe05   :  { %v12439_v32 = vsel %vm127_vm0, %v12373_v47, 0.0  ;;  %v12349_v24 = vadd.f32 %v12340_v48, %v9410_v15 }
 0xe06   :  { %v12546_v56 = vrot.slane %v12525_v9, 4  ;;  %v12437_v39 = vrot.slane %v12436_v25, 1  ;;  %v12440_v13 = vrot.slane %v12439_v32, 4 }
 0xe07   :  { %v12358_v52 = vadd.f32 %v15620_v61, %v12349_v24 }
 0xe08   :  { %v12438_v0 = vadd.f32 %v12437_v39, %v12436_v25  ;;  %v12441_v60 = vadd.f32 %v12440_v13, %v12439_v32  ;;  %v12548_v37 = vsel %vm12547_vm2, %v12546_v56, %v12545_v19 }
 0xe09   :  { %v12366_v26 = vmul.f32 %v12358_v52, %v16333_v57 }
 0xe0a   :  { %v12474_v55 = vmul.f32 %v12458_v59, %v12438_v0  ;;  %v12442_v14 = vrot.slane %v12441_v60, 2 }
 0xe0b   :  { %v12374_v11 = vadd.f32 %v12366_v26, %v16334_v21 }
 0xe0c   :  { %v12526_v20 = vmul.f32 %v12510_v22, %v12474_v55  ;;  %v12443_v54 = vadd.f32 %v12442_v14, %v12441_v60 }
 0xe0d   :  { %v12446_v61 = vsel %vm127_vm0, %v12374_v11, 0.0 }
 0xe0e   :  { %v12444_v28 = vrot.slane %v12443_v54, 1  ;;  %v12447_v2 = vrot.slane %v12446_v61, 4  ;;  %v12549_v4 = vrot.slane %v12526_v20, 3 }
 0xe10   :  { %v12445_v34 = vadd.f32 %v12444_v28, %v12443_v54  ;;  %v12448_v36 = vadd.f32 %v12447_v2, %v12446_v61  ;;  %v12551_v27 = vsel %vm12550_vm4, %v12549_v4, %v12548_v37 }
 0xe12   :  { %v12475_v1 = vmul.f32 %v12459_v33, %v12445_v34  ;;  %v12449_v51 = vrot.slane %v12448_v36, 2 }
 0xe14   :  { %v12450_v5 = vadd.f32 %v12449_v51, %v12448_v36  ;;  %v12527_v31 = vmul.f32 %v12511_v45, %v12475_v1 }
 0xe16   :  { %v12451_v62 = vrot.slane %v12450_v5, 1  ;;  %v12552_v3 = vrot.slane %v12527_v31, 2  ;;  %v31_v31 = vld [vmem:[%s16014_s3 + $0x50] sm:$0xff] }
 0xe18   :  { %v12452_v17 = vadd.f32 %v12451_v62, %v12450_v5  ;;  %v12554_v10 = vsel %vm12553_vm3, %v12552_v3, %v12551_v27  ;;  %v32_v5 = vld [vmem:[%s16014_s3 + $0x70] sm:$0xff] }
 0xe19   :  { %v30_v62 = vld [vmem:[%s16014_s3 + $0x30] sm:$0xff]  ;;  %v15878_v3 = vand.u32 4294901760, %v32_v5 }
 0xe1a   :  { %v12476_v41 = vmul.f32 %v12460_v46, %v12452_v17  ;;  %v15880_v17 = vand.u32 4294901760, %v31_v31  ;;  %v15882_v46 = vand.u32 4294901760, %v30_v62 }
 0xe1b   :  { %12700 = vmatpush.msrb.mxu2 %v15878_v3 }
 0xe1c   :  { %v12528_v19 = vmul.f32 %v12512_v40, %v12476_v41 }
 0xe1d   :  { %12702 = vmatpush.msrb.mxu2 %v15880_v17 }
 0xe1e   :  { %v12555_v53 = vrot.slane %v12528_v19, 1  ;;  %v15890_v19 = vsub.f32 %v32_v5, %v15878_v3 }
 0xe1f   :  { %12704 = vmatpush.msrb.mxu2 %v15882_v46 }
 0xe20   :  { %v12557_v6 = vsel %vm12556_vm5, %v12555_v53, %v12554_v10  ;;  %v29_v10 = vld [vmem:[%s16014_s3 + $0x10] sm:$0xff]  ;;  %v15893_v53 = vsub.f32 %v31_v31, %v15880_v17 }
 0xe21   :  { %v12559_v43 = vsel %vm127_vm0, %v12557_v6, 0.0  ;;  %v15897_v6 = vsub.f32 %v30_v62, %v15882_v46 }
 0xe22   :  { %v12560_v8 = vrot.slane %v12559_v43, 4 }
 0xe24   :  { %v12561_v50 = vadd.f32 %v12560_v8, %v12559_v43 }
 0xe26   :  { %v12562_v38 = vrot.slane %v12561_v50, 2 }
 0xe28   :  { %v12563_v44 = vadd.f32 %v12562_v38, %v12561_v50  ;;  %v12730_v50 = vand.u32 4294901760, %v15890_v19  ;;  %v12736_v38 = vand.u32 4294901760, %v15893_v53 }
 0xe2a   :  { %v12564_v15 = vrot.slane %v12563_v44, 1 }
 0xe2c   :  { %v12565_v29 = vadd.f32 %v12564_v15, %v12563_v44  ;;  %v12742_v44 = vand.u32 4294901760, %v15897_v6 }
 0xe2e   :  { %v12567_v47 = vmul.f32 %v15810_v49, %v12565_v29 }
 0xe30   :  { %v12568_v48 = vperm.slane %v12567_v47, 0  ;;  %v12731_v47 = vsub.f32 %v15890_v19, %v12730_v50 }
 0xe32   :  { %v15814_v9 = vsub.f32 %v15700_v35, %v12568_v48  ;;  %v15817_v25 = vsub.f32 %v15722_v63, %v12568_v48  ;;  %v15820_v32 = vsub.f32 %v15748_v7, %v12568_v48  ;;  %v15823_v24 = vsub.f32 %v15769_v30, %v12568_v48 }
 0xe33   :  { %v15826_v56 = vsub.f32 %v15785_v23, %v12568_v48  ;;  %v15828_v39 = vsub.f32 %v12474_v55, %v12568_v48  ;;  %v15830_v13 = vsub.f32 %v12475_v1, %v12568_v48  ;;  %v15832_v52 = vsub.f32 %v12476_v41, %v12568_v48 }
 0xe34   :  { %v12577_v35 = vmul.f32 %v15814_v9, %v15814_v9  ;;  %v12578_v63 = vmul.f32 %v15817_v25, %v15817_v25  ;;  %v12579_v7 = vmul.f32 %v15820_v32, %v15820_v32  ;;  %v12580_v30 = vmul.f32 %v15823_v24, %v15823_v24 }
 0xe35   :  { %v12581_v23 = vmul.f32 %v15826_v56, %v15826_v56  ;;  %v12582_v0 = vmul.f32 %v15828_v39, %v15828_v39  ;;  %v12583_v59 = vmul.f32 %v15830_v13, %v15830_v13  ;;  %v12584_v60 = vmul.f32 %v15832_v52, %v15832_v52 }
 0xe36   :  { %v12586_v37 = vmul.f32 %v12578_v63, %v12506_v12  ;;  %v12587_v57 = vmul.f32 %v12579_v7, %v12507_v16  ;;  %v12588_v26 = vmul.f32 %v12580_v30, %v12508_v42  ;;  %v12585_v14 = vmul.f32 %v15535_v58, %v12577_v35 }
 0xe37   :  { %v12589_v55 = vmul.f32 %v12581_v23, %v12509_v18  ;;  %v12590_v21 = vmul.f32 %v12582_v0, %v12510_v22  ;;  %v12591_v54 = vmul.f32 %v12583_v59, %v12511_v45  ;;  %v12592_v61 = vmul.f32 %v12584_v60, %v12512_v40 }
 0xe38   :  { %v12601_v11 = vrot.slane %v12586_v37, 7  ;;  %v12603_v20 = vrot.slane %v12587_v57, 6  ;;  %v12605_v28 = vrot.slane %v12588_v26, 5  ;;  %v15887_v40 = vand.u32 4294901760, %v29_v10 }
 0xe39   :  { %v12607_v2 = vrot.slane %v12589_v55, 4  ;;  %v12609_v4 = vrot.slane %v12590_v21, 3  ;;  %v12611_v34 = vrot.slane %v12591_v54, 2  ;;  %v12613_v36 = vrot.slane %v12592_v61, 1  ;;  %v13154_v61 = vld [vmem:[%s16015_s4 + $0x2] ss:$0 sm:$0xff] }
 0xe3a   :  { %v12602_v12 = vsel %vm12538_vm13, %v12601_v11, %v12585_v14  ;;  %v15900_v8 = vsub.f32 %v29_v10, %v15887_v40  ;;  %v12737_v48 = vsub.f32 %v15893_v53, %v12736_v38  ;;  %v12743_v35 = vsub.f32 %v15897_v6, %v12742_v44  ;;  %12706 = vmatpush.msrb.mxu2 %v15887_v40 }
 0xe3b   :  { %v12604_v16 = vsel %vm12541_vm14, %v12603_v20, %v12602_v12  ;;  %v12732_v7 = vand.u32 4294901760, %v12731_v47 }
 0xe3c   :  { %v12606_v42 = vsel %vm12544_vm15, %v12605_v28, %v12604_v16  ;;  %v12748_v29 = vand.u32 4294901760, %v15900_v8  ;;  %v12738_v30 = vand.u32 4294901760, %v12737_v48  ;;  %12771 = vmatpush.msra.mxu2 %v15890_v19  ;;  %v12744_v59 = vand.u32 4294901760, %v12743_v35 }
 0xe3d   :  { %v12608_v18 = vsel %vm12547_vm2, %v12607_v2, %v12606_v42  ;;  %12733 = vmatpush.msrb.mxu3 %v12732_v7  ;;  %v13155_v42 = vld [vmem:[%s16015_s4 + $0x3] ss:$0 sm:$0xff] }
 0xe3e   :  { %v12610_v33 = vsel %vm12550_vm4, %v12609_v4, %v12608_v18  ;;  %v12749_v23 = vsub.f32 %v15900_v8, %v12748_v29  ;;  %12774 = vmatpush.msra.mxu2 %v15893_v53  ;;  %v34_v53 = vld [vmem:[%s16014_s3 + $0x38] sm:$0xff] }
 0xe3f   :  { %v12612_v22 = vsel %vm12553_vm3, %v12611_v34, %v12610_v33  ;;  %12739 = vmatpush.msrb.mxu3 %v12738_v30 }
 0xe40   :  { %v12614_v27 = vsel %vm12556_vm5, %v12613_v36, %v12612_v22  ;;  %v12750_v37 = vand.u32 4294901760, %v12749_v23  ;;  %12777 = vmatpush.msra.mxu2 %v15897_v6 }
 0xe41   :  { %v12616_v1 = vsel %vm127_vm0, %v12614_v27, 0.0  ;;  %12745 = vmatpush.msrb.mxu3 %v12744_v59 }
 0xe42   :  { %v12617_v51 = vrot.slane %v12616_v1, 4  ;;  %12780 = vmatpush.msra.mxu2 %v15900_v8 }
 0xe43   :  { %12751 = vmatpush.msrb.mxu3 %v12750_v37 }
 0xe44   :  { %v12618_v45 = vadd.f32 %v12617_v51, %v12616_v1 }
 0xe45   :  { %12800 = vmatpush.msra.mxu3 %v15878_v3 }
 0xe46   :  { %v12619_v41 = vrot.slane %v12618_v45, 2 }
 0xe47   :  { %12802 = vmatpush.msra.mxu3 %v15880_v17 }
 0xe48   :  { %v12620_v43 = vadd.f32 %v12619_v41, %v12618_v45 }
 0xe49   :  { %12804 = vmatpush.msra.mxu3 %v15882_v46 }
 0xe4a   :  { %v12621_v15 = vrot.slane %v12620_v43, 1 }
 0xe4b   :  { %12806 = vmatpush.msra.mxu3 %v15887_v40 }
 0xe4c   :  { %v12622_v63 = vadd.f32 %v12621_v15, %v12620_v43 }
 0xe4e   :  { %v12623_v0 = vmul.f32 %v12622_v63, %v15810_v49  ;;  %v43_v63 = vld [vmem:[%s16015_s4 + $0x6] sm:$0x1] }
 0xe4f   :  { %13132 = vpush %v43_v63 }
 0xe50   :  { %v12624_v60 = vadd.f32 1e-05, %v12623_v0 }
 0xe52   :  { %13290 = vrsqrt.f32 %v12624_v60  ;;  %vm12631_vm6 = vweird.f32 %v12624_v60 }
 0xe58   :  { %v13291_v57 = vpop.eup %13290 }
 0xe59   :  { %v12626_v26 = vmul.f32 %v13291_v57, %v12624_v60  ;;  %vm12632_vm1 = vweird.f32 %v13291_v57 }
 0xe5a   :  { %vm12633_vm7 = vmor %vm12631_vm6, %vm12632_vm1 }
 0xe5b   :  { %v12627_v55 = vmul.f32 %v13291_v57, %v12626_v26 }
 0xe5d   :  { %v12628_v14 = vmul.f32 0.5, %v12627_v55 }
 0xe5f   :  { %v12629_v21 = vsub.f32 1.5, %v12628_v14 }
 0xe61   :  { %v12630_v11 = vmul.f32 %v13291_v57, %v12629_v21 }
 0xe63   :  { %v12634_v20 = vsel %vm12633_vm7, %v13291_v57, %v12630_v11 }
 0xe64   :  { %v12635_v54 = vperm.slane %v12634_v20, 0 }
 0xe66   :  { %v12636_v12 = vmul.f32 %v12635_v54, %v15814_v9  ;;  %v12637_v28 = vmul.f32 %v12635_v54, %v15817_v25  ;;  %v12638_v16 = vmul.f32 %v12635_v54, %v15820_v32  ;;  %v12639_v2 = vmul.f32 %v12635_v54, %v15823_v24 }
 0xe67   :  { %v12640_v4 = vmul.f32 %v12635_v54, %v15826_v56  ;;  %v12641_v18 = vmul.f32 %v12635_v54, %v15828_v39  ;;  %v12642_v34 = vmul.f32 %v12635_v54, %v15830_v13  ;;  %v12643_v33 = vmul.f32 %v12635_v54, %v15832_v52 }
 0xe68   :  { %v12645_v36 = vmul.f32 %v13154_v61, %v12636_v12  ;;  %v12646_v9 = vmul.f32 %v13154_v61, %v12637_v28  ;;  %v12647_v22 = vmul.f32 %v13154_v61, %v12638_v16  ;;  %v12648_v25 = vmul.f32 %v13154_v61, %v12639_v2 }
 0xe69   :  { %v12649_v27 = vmul.f32 %v13154_v61, %v12640_v4  ;;  %v12650_v32 = vmul.f32 %v13154_v61, %v12641_v18  ;;  %v12651_v1 = vmul.f32 %v13154_v61, %v12642_v34  ;;  %v12652_v24 = vmul.f32 %v13154_v61, %v12643_v33 }
 0xe6a   :  { %v12655_v51 = vadd.f32 %v13155_v42, %v12646_v9  ;;  %v12656_v45 = vadd.f32 %v13155_v42, %v12647_v22  ;;  %v12657_v5 = vadd.f32 %v13155_v42, %v12648_v25  ;;  %v12654_v62 = vadd.f32 %v13155_v42, %v12645_v36  ;;  %v13156_v9 = vld [vmem:[%s16015_s4 + $0x4] ss:$0 sm:$0xff] }
 0xe6b   :  { %v12658_v31 = vadd.f32 %v13155_v42, %v12649_v27  ;;  %v12659_v56 = vadd.f32 %v13155_v42, %v12650_v32  ;;  %v12660_v41 = vadd.f32 %v13155_v42, %v12651_v1  ;;  %v12661_v13 = vadd.f32 %v13155_v42, %v12652_v24 }
 0xe6c   :  { %v12671_v10 = vrot.slane %v12655_v51, 7  ;;  %v12673_v39 = vrot.slane %v12656_v45, 6  ;;  %v12675_v43 = vrot.slane %v12657_v5, 5 }
 0xe6d   :  { %v12677_v47 = vrot.slane %v12658_v31, 4  ;;  %v12679_v35 = vrot.slane %v12659_v56, 3  ;;  %v12681_v30 = vrot.slane %v12660_v41, 2  ;;  %v12683_v0 = vrot.slane %v12661_v13, 1 }
 0xe6e   :  { %v12672_v52 = vsel %vm12538_vm13, %v12671_v10, %v12654_v62 }
 0xe6f   :  { %v12674_v15 = vsel %vm12541_vm14, %v12673_v39, %v12672_v52 }
 0xe70   :  { %v12676_v48 = vsel %vm12544_vm15, %v12675_v43, %v12674_v15 }
 0xe71   :  { %v12678_v7 = vsel %vm12547_vm2, %v12677_v47, %v12676_v48 }
 0xe72   :  { %v12680_v23 = vsel %vm12550_vm4, %v12679_v35, %v12678_v7  ;;  %v13157_v35 = vld [vmem:[%s16015_s4 + $0x5] ss:$0 sm:$0xff]  ;;  %s13336_s4 = smov [#allocation2]  }
 0xe73   :  { %v12682_v59 = vsel %vm12553_vm3, %v12681_v30, %v12680_v23  ;;  %s13108_s20 = sshll.u32 %s13336_s4, 4  ;;  %s13109_s20 = int_to_ptr.vmem [resolvable:$true] %s13108_s20 }
 0xe74   :  { %v12684_v60 = vsel %vm12556_vm5, %v12683_v0, %v12682_v59 }
 0xe75   :  { %v12685_v37 = vsel %vm127_vm0, %v12684_v60, 0 }
 0xe76   :  { %v12707_v57 = vand.u32 4294901760, %v12685_v37 }
 0xe78   :  { %v12708_v26 = vsub.f32 %v12685_v37, %v12707_v57  ;;  %12753 = vmatmul.f32.vlgmr.msrb.gmra.mxu3 %v12707_v57 }
 0xe79   :  { %12860 = vmatpush.msrb.mxu3 %v15878_v3  ;;  %v36_v3 = vld [vmem:[%s16014_s3 + $0x78] sm:$0xff] }
 0xe7a   :  { %v12709_v55 = vand.u32 4294901760, %v12708_v26 }
 0xe7b   :  { %12862 = vmatpush.msrb.mxu3 %v15880_v17  ;;  %v12895_v17 = vand.u32 4294901760, %v36_v3 }
 0xe7c   :  { %v12710_v14 = vsub.f32 %v12708_v26, %v12709_v55 }
 0xe7d   :  { %12864 = vmatpush.msrb.mxu3 %v15882_v46  ;;  %v35_v46 = vld [vmem:[%s16014_s3 + $0x58] sm:$0xff] }
 0xe7e   :  { %v12711_v21 = vand.u32 4294901760, %v12710_v14  ;;  %v12897_v19 = vand.u32 4294901760, %v35_v46 }
 0xe7f   :  { %12866 = vmatpush.msrb.mxu3 %v15887_v40  ;;  %v15973_v40 = vsub.f32 %v36_v3, %v12895_v17 }
 0xe80   :  { %12712 = vmatmul.f32.vlgmr.msrb.gmra.mxu2 %v12711_v21  ;;  %12810 = vmatmul.f32.vlgmr.msra.gmra.mxu3 %v12709_v55  ;;  %v15979_v8 = vsub.f32 %v35_v46, %v12897_v19  ;;  %s13133_s18 = spop %13132 }
 0xe81   :  { %12829 = vmatpush.msrb.mxu2 %v12730_v50  ;;  %v12926_v6 = vand.u32 4294901760, %v15973_v40  ;;  %v12899_v50 = vand.u32 4294901760, %v34_v53  ;;  %v12875_v31 = vstv %s13133_s18 }
 0xe83   :  { %12833 = vmatpush.msrb.mxu2 %v12736_v38  ;;  %v33_v38 = vld [vmem:[%s16014_s3 + $0x18] sm:$0xff]  ;;  %v12937_v11 = vsub.f32 %v34_v53, %v12899_v50 }
 0xe84   :  { %v12901_v20 = vand.u32 4294901760, %v33_v38 }
 0xe85   :  { %12837 = vmatpush.msrb.mxu2 %v12742_v44  ;;  %v12927_v44 = vsub.f32 %v15973_v40, %v12926_v6  ;;  %v12938_v12 = vand.u32 4294901760, %v12937_v11 }
 0xe86   :  { %v12943_v28 = vsub.f32 %v33_v38, %v12901_v20 }
 0xe87   :  { %12841 = vmatpush.msrb.mxu2 %v12748_v29  ;;  %v12932_v29 = vand.u32 4294901760, %v15979_v8  ;;  %v12928_v54 = vand.u32 4294901760, %v12927_v44  ;;  %v12939_v2 = vsub.f32 %v12937_v11, %v12938_v12 }
 0xe88   :  { %12783 = vmatmul.f32.vlgmr.msra.gmra.mxu2 %v12708_v26  ;;  %12868 = vmatmul.f32.vlgmr.msrb.gmra.mxu3 %v12707_v57  ;;  %v12944_v42 = vand.u32 4294901760, %v12943_v28 }
 0xe89   :  { %12896 = vmatpush.msra.mxu2 %v12895_v17  ;;  %v12933_v61 = vsub.f32 %v15979_v8, %v12932_v29  ;;  %12929 = vmatpush.msra.mxu3 %v12928_v54  ;;  %v12940_v4 = vand.u32 4294901760, %v12939_v2 }
 0xe8a   :  { %v12945_v18 = vsub.f32 %v12943_v28, %v12944_v42 }
 0xe8b   :  { %12898 = vmatpush.msra.mxu2 %v12897_v19  ;;  %v12934_v16 = vand.u32 4294901760, %v12933_v61 }
 0xe8c   :  { %v12946_v34 = vand.u32 4294901760, %v12945_v18 }
 0xe8d   :  { %12900 = vmatpush.msra.mxu2 %v12899_v50  ;;  %12935 = vmatpush.msra.mxu3 %v12934_v16 }
 0xe8f   :  { %12902 = vmatpush.msra.mxu2 %v12901_v20  ;;  %12941 = vmatpush.msra.mxu3 %v12940_v4 }
 0xe90   :  { %12843 = vmatmul.f32.vlgmr.msrb.gmra.mxu2 %v12707_v57 }
 0xe91   :  { %12967 = vmatpush.msrb.mxu2 %v15973_v40  ;;  %12947 = vmatpush.msra.mxu3 %v12946_v34 }
 0xe93   :  { %12970 = vmatpush.msrb.mxu2 %v15979_v8  ;;  %12996 = vmatpush.msrb.mxu3 %v12895_v17 }
 0xe95   :  { %12973 = vmatpush.msrb.mxu2 %v12937_v11  ;;  %12998 = vmatpush.msrb.mxu3 %v12897_v19 }
 0xe97   :  { %12976 = vmatpush.msrb.mxu2 %v12943_v28  ;;  %13000 = vmatpush.msrb.mxu3 %v12899_v50 }
 0xe99   :  { %13002 = vmatpush.msrb.mxu3 %v12901_v20 }
 0xefb   :  { %v12754_v33 = vpop.f32.mrf.mxu3 }
 0xf03   :  { %v12713_v36 = vpop.f32.mrf.mxu2  ;;  %v12811_v25 = vpop.f32.mrf.mxu3 }
 0xf04   :  { %v12714_v22 = vadd.f32 %v13156_v9, %v12713_v36 }
 0xf06   :  { %v12755_v32 = vadd.f32 %v12754_v33, %v12714_v22 }
 0xf0b   :  { %v12784_v27 = vpop.f32.mrf.mxu2  ;;  %v12869_v5 = vpop.f32.mrf.mxu3 }
 0xf0c   :  { %v12785_v1 = vadd.f32 %v12784_v27, %v12755_v32 }
 0xf0e   :  { %v12812_v24 = vadd.f32 %v12811_v25, %v12785_v1 }
 0xf13   :  { %v12844_v51 = vpop.f32.mrf.mxu2 }
 0xf14   :  { %v12845_v45 = vadd.f32 %v12844_v51, %v12812_v24 }
 0xf16   :  { %v12870_v62 = vadd.f32 %v12869_v5, %v12845_v45 }
 0xf18   :  { %vm12872_vm8 = vcmp.ge.f32.partialorder %v12870_v62, 0.0  ;;  %v12877_v56 = vmul.f32 %v12875_v31, %v12870_v62 }
 0xf1a   :  { %v12878_v10 = vsel %vm12872_vm8, %v12870_v62, %v12877_v56 }
 0xf1b   :  { %v12881_v39 = vsel %vm127_vm0, %v12878_v10, 0  ;;  %vm13069_vm0 = vcmask 130048  }
 0xf1c   :  { %v12903_v41 = vand.u32 4294901760, %v12881_v39 }
 0xf1e   :  { %v12904_v13 = vsub.f32 %v12881_v39, %v12903_v41  ;;  %12949 = vmatmul.f32.vlgmr.msra.gmra.mxu3 %v12903_v41 }
 0xf1f   :  { %13056 = vmatpush.msra.mxu3 %v12895_v17 }
 0xf20   :  { %v12905_v52 = vand.u32 4294901760, %v12904_v13 }
 0xf21   :  { %13058 = vmatpush.msra.mxu3 %v12897_v19 }
 0xf22   :  { %v12906_v43 = vsub.f32 %v12904_v13, %v12905_v52 }
 0xf23   :  { %13060 = vmatpush.msra.mxu3 %v12899_v50 }
 0xf24   :  { %v12907_v15 = vand.u32 4294901760, %v12906_v43 }
 0xf25   :  { %13062 = vmatpush.msra.mxu3 %v12901_v20 }
 0xf26   :  { %12908 = vmatmul.f32.vlgmr.msra.gmra.mxu2 %v12907_v15  ;;  %13006 = vmatmul.f32.vlgmr.msrb.gmra.mxu3 %v12905_v52 }
 0xf27   :  { %13025 = vmatpush.msra.mxu2 %v12926_v6 }
 0xf29   :  { %13029 = vmatpush.msra.mxu2 %v12932_v29 }
 0xf2b   :  { %13033 = vmatpush.msra.mxu2 %v12938_v12 }
 0xf2d   :  { %13037 = vmatpush.msra.mxu2 %v12944_v42 }
 0xf2e   :  { %12979 = vmatmul.f32.vlgmr.msrb.gmra.mxu2 %v12904_v13  ;;  %13064 = vmatmul.f32.vlgmr.msra.gmra.mxu3 %v12903_v41 }
 0xf36   :  { %13039 = vmatmul.f32.vlgmr.msra.gmra.mxu2 %v12903_v41 }
 0xfa1   :  { %v12950_v47 = vpop.f32.mrf.mxu3 }
 0xfa9   :  { %v12909_v48 = vpop.f32.mrf.mxu2  ;;  %v13007_v7 = vpop.f32.mrf.mxu3 }
 0xfaa   :  { %v12910_v63 = vadd.f32 %v13157_v35, %v12909_v48 }
 0xfac   :  { %v12951_v23 = vadd.f32 %v12950_v47, %v12910_v63 }
 0xfb1   :  { %v12980_v30 = vpop.f32.mrf.mxu2  ;;  %v13065_v57 = vpop.f32.mrf.mxu3 }
 0xfb2   :  { %v12981_v0 = vadd.f32 %v12980_v30, %v12951_v23 }
 0xfb4   :  { %v13008_v59 = vadd.f32 %v13007_v7, %v12981_v0 }
 0xfb9   :  { %v13040_v60 = vpop.f32.mrf.mxu2 }
 0xfba   :  { %v13041_v37 = vadd.f32 %v13040_v60, %v13008_v59 }
 0xfbc   :  { %v13066_v26 = vadd.f32 %v13065_v57, %v13041_v37 }
 0xfbe   :  { %v13068_v55 = vmul.f32 %v15535_v58, %v13066_v26 }
 0xfc0   :  { %v13070_v14 = vsel %vm13069_vm0, %v13068_v55, 0.0 }
 0xfc1   :  { %v13071_v21 = vrot.slane %v13070_v14, 4 }
 0xfc3   :  { %v13072_v3 = vadd.f32 %v13071_v21, %v13070_v14 }
 0xfc5   :  { %v13073_v17 = vrot.slane %v13072_v3, 2 }
 0xfc7   :  { %v13074_v46 = vadd.f32 %v13073_v17, %v13072_v3 }
 0xfc9   :  { %v13075_v40 = vrot.slane %v13074_v46, 1 }
 0xfcb   :  { %v13076_v19 = vadd.f32 %v13075_v40, %v13074_v46 }
 0xfcd   :  { %v13077_v53 = vmul.f32 %v13076_v19, %v15810_v49 }
 0xfcf   :  { %v13078_v6 = vsub.f32 %v13066_v26, %v13077_v53 }
 0xfd1   :  { %v13079_v8 = vmul.f32 %v13078_v6, %v13078_v6 }
 0xfd3   :  { %v13080_v50 = vmul.f32 %v15535_v58, %v13079_v8 }
 0xfd5   :  { %v13081_v38 = vsel %vm13069_vm0, %v13080_v50, 0.0 }
 0xfd6   :  { %v13082_v44 = vrot.slane %v13081_v38, 4 }
 0xfd8   :  { %v13083_v29 = vadd.f32 %v13082_v44, %v13081_v38 }
 0xfda   :  { %v13084_v11 = vrot.slane %v13083_v29, 2 }
 0xfdc   :  { %v13085_v20 = vadd.f32 %v13084_v11, %v13083_v29 }
 0xfde   :  { %v13086_v54 = vrot.slane %v13085_v20, 1 }
 0xfe0   :  { %v13087_v61 = vadd.f32 %v13086_v54, %v13085_v20 }
 0xfe2   :  { %v13088_v12 = vmul.f32 %v13087_v61, %v15810_v49 }
 0xfe4   :  { %v13089_v28 = vadd.f32 1e-05, %v13088_v12 }
 0xfe6   :  { %13292 = vrsqrt.f32 %v13089_v28  ;;  %vm13096_vm10 = vweird.f32 %v13089_v28 }
 0xfec   :  { %v13293_v16 = vpop.eup %13292 }
 0xfed   :  { %v13091_v2 = vmul.f32 %v13293_v16, %v13089_v28  ;;  %vm13097_vm9 = vweird.f32 %v13293_v16 }
 0xfee   :  { %vm13098_vm11 = vmor %vm13096_vm10, %vm13097_vm9 }
 0xfef   :  { %v13092_v42 = vmul.f32 %v13293_v16, %v13091_v2 }
 0xff1   :  { %v13093_v4 = vmul.f32 0.5, %v13092_v42 }
 0xff3   :  { %v13094_v18 = vsub.f32 1.5, %v13093_v4 }
 0xff5   :  { %v13095_v34 = vmul.f32 %v13293_v16, %v13094_v18 }
 0xff7   :  { %v13099_v33 = vsel %vm13098_vm11, %v13293_v16, %v13095_v34 }
 0xff8   :  { %v13100_v36 = vmul.f32 %v13099_v33, %v13078_v6 }
 0xffa   :  { %v13101_v49 = vmul.f32 %v15535_v58, %v13100_v36 }
 0xffc   :  { %13102 = vst.msk [vmem:[#allocation2] sm:$0xff] %vm13069_vm0, %v13101_v49 }
 0xffd   :  { %13113 = dma.vmem_to_hbm [thread:$0]  %s13109_s20, 128, %s13111_s23, [#allocation3]  }
 0xffe   :  { %13320 = dma.done.wait [#allocation3], 128  }
 0xfff   :  { %13321 = vsyncadd [#allocation3], 4294967168 }
0x1000   :  { %13118 = vsyncpa [#allocation3], 1 }

</bundles_post_ra>
